<compile_context>
chip_gen: v6e
topology: v6e:2x2x1
jax: 0.10.0
libtpu: 0.0.40
codegen_flags: <defaults>
</compile_context>

<pallas_src>
import functools

import jax
import jax.numpy as jnp
from jax.experimental import pallas as pl
from jax.experimental.pallas import tpu as pltpu


def _round_up(v, m):
    return (v + m - 1) // m * m


def _classifier_kernel(d1, p1, d2, p2, pmax, Ho, Wo, Kp,
                       x_ref, w_ref, b_ref, o_ref, *scratch):
    """One (batch, C-chunk) grid step of  conv0(x) + conv1(x)  (+ folded bias).

    x_ref  : (1, Hpad, Wpad, TC)   shared pmax-padded input, one channel chunk
    w_ref  : (3, 3, TC, 2*Kp)      w1 || w2 packed along lanes, each K zero-padded to Kp
    b_ref  : (1, Kp)               b0 + b1 (float32), zero-padded
    o_ref  : (1, Ho, Wo, Kp)       output block (resident across the C axis)
    scratch: optional (Ho, Wo, Kp) f32 accumulator (only when o_ref is not f32)
    """
    c = pl.program_id(1)
    use_scratch = len(scratch) > 0

    Hpad = x_ref.shape[1]
    Wpad = x_ref.shape[2]
    TC = x_ref.shape[3]

    # One layout-preserving reshape of the whole padded block feeds every tap
    # (Wpad is a multiple of the compute-dtype sublane quantum).
    lhs = x_ref[0].reshape(Hpad * Wpad, TC)

    base1 = pmax - p1
    base2 = pmax - p2

    # Each dilated 3x3 conv = sum over 9 taps of (shifted window) @ (C x Kp tap weight).
    # Both convs share one 2*Kp-wide dot per tap (full MXU width on v6e/v7x); their
    # H/W windows are selected on the f32 result, and the conv split (:Kp / Kp:) is a
    # vreg-aligned lane slice.  Tap contributions accumulate into a single value so the
    # accumulator is only read/written once per grid step.
    psum = None
    for kh in range(3):
        for kw in range(3):
            y = jnp.dot(lhs, w_ref[kh, kw], preferred_element_type=jnp.float32)
            y = y.reshape(Hpad, Wpad, 2 * Kp)
            r1, c1 = base1 + kh * d1, base1 + kw * d1
            r2, c2 = base2 + kh * d2, base2 + kw * d2
            tap = (y[r1:r1 + Ho, c1:c1 + Wo, :Kp]
                   + y[r2:r2 + Ho, c2:c2 + Wo, Kp:])
            psum = tap if psum is None else psum + tap

    bias = b_ref[...]                                   # (1, Kp) f32, broadcasts

    if use_scratch:
        acc_ref = scratch[0]

        @pl.when(c == 0)
        def _init():
            acc_ref[...] = psum + bias

        @pl.when(c > 0)
        def _accum():
            acc_ref[...] = acc_ref[...] + psum

        @pl.when(c == pl.num_programs(1) - 1)
        def _finalize():
            o_ref[...] = acc_ref[...].astype(o_ref.dtype)[None]
    else:
        # float32 output: accumulate directly into the resident output block
        # (saves the Ho*Wo*Kp f32 scratch and the finalize read/cast/store pass).
        @pl.when(c == 0)
        def _init():
            o_ref[...] = (psum + bias)[None].astype(o_ref.dtype)

        @pl.when(c > 0)
        def _accum():
            o_ref[...] = o_ref[...] + psum[None]


def classifier_module_forward(x, weights, biases, dilation_series, padding_series,
                              *, compute_dtype=None, c_chunk=None, lane=128,
                              input_format="NCHW"):
    """Forward of Classifier_Module: conv2d_list[0](x) + conv2d_list[1](x).

    x          : (N, C, H, W) if input_format == "NCHW", else (N, H, W, C)
    weights[i] : (K, C, 3, 3) OIHW;  biases[i]: (K,).  Only the first two convs are
                 used (the PyTorch forward returns inside the first loop iteration).
    compute_dtype : MXU operand dtype (None -> bfloat16 fast path, f32 accumulation).
    """
    assert len(weights) >= 2 and len(biases) >= 2, "forward needs conv0 + conv1"
    if compute_dtype is None:
        compute_dtype = jnp.bfloat16          # fast path on v5e / v6e / v7x MXUs
    compute_dtype = jnp.dtype(compute_dtype)

    if input_format == "NCHW":
        x_nhwc = jnp.transpose(x, (0, 2, 3, 1))
    elif input_format == "NHWC":
        x_nhwc = x                            # lets callers skip the transpose pre-pass
    else:
        raise ValueError(f"unknown input_format {input_format!r}")
    N, H, W, C = x_nhwc.shape
    out_dtype = jnp.dtype(x.dtype)
    use_scratch = out_dtype != jnp.dtype(jnp.float32)

    d1, p1 = int(dilation_series[0]), int(padding_series[0])
    d2, p2 = int(dilation_series[1]), int(padding_series[1])
    Ho, Wo = H + 2 * p1 - 2 * d1, W + 2 * p1 - 2 * d1
    assert (Ho, Wo) == (H + 2 * p2 - 2 * d2, W + 2 * p2 - 2 * d2), \
        "summed conv outputs must have identical spatial size"
    K = weights[0].shape[0]
    Kp = _round_up(max(K, lane), lane)        # lane-dense output channels per conv
    pmax = max(p1, p2)

    # Shared pmax-padded input; W right-padded to the compute-dtype sublane quantum
    # (8 for f32, 16 for bf16) so in-kernel reshapes are layout preserving.
    sublane = 8 * max(1, 4 // compute_dtype.itemsize)
    Hpad = H + 2 * pmax
    Wpad = _round_up(W + 2 * pmax, sublane)

    cd_bytes = compute_dtype.itemsize
    out_bytes = out_dtype.itemsize

    # --- generation-aware VMEM budget & channel-chunk (reduction tile) selection ------
    phys_vmem = 128 * 1024 * 1024
    try:
        phys_vmem = int(getattr(pltpu.get_tpu_info(), "vmem_capacity_bytes", phys_vmem))
    except Exception:
        pass
    budget = min(int(0.45 * phys_vmem), 64 * 1024 * 1024)   # ~28 MiB v7x, ~57 MiB v5e/v6e

    def resident_bytes(tc):
        x_blk = Hpad * Wpad * tc * cd_bytes
        w_blk = 9 * tc * 2 * Kp * cd_bytes
        o_blk = Ho * Wo * Kp * out_bytes
        y_tmp = Hpad * Wpad * 2 * Kp * 4                    # per-tap f32 dot result
        acc_b = Ho * Wo * Kp * 4                            # psum (+ optional scratch)
        return (2 * x_blk + 2 * w_blk + 2 * o_blk + 2 * y_tmp
                + acc_b * (2 if use_scratch else 1) + 2 * Kp * 4)

    if c_chunk is not None and C % int(c_chunk) == 0:
        TC = int(c_chunk)
    else:
        cands = [t for t in (512, 256, 128) if C % t == 0] or [C]
        TC = next((t for t in cands if resident_bytes(t) <= budget), cands[-1])
    nC = C // TC

    resident = resident_bytes(TC)
    vmem_limit = int(min(max(int(1.2 * resident), 32 * 1024 * 1024),
                         int(0.75 * phys_vmem)))

    # --- operands ----------------------------------------------------------------------
    x_pad = jnp.pad(x_nhwc.astype(compute_dtype),
                    ((0, 0), (pmax, pmax), (pmax, Wpad - W - pmax), (0, 0)))

    def prep_w(w):                            # OIHW -> HWIO, K zero-padded to Kp
        w = jnp.transpose(w, (2, 3, 1, 0))
        return jnp.pad(w, ((0, 0), (0, 0), (0, 0), (0, Kp - K)))

    w_packed = jnp.concatenate([prep_w(weights[0]), prep_w(weights[1])],
                               axis=-1).astype(compute_dtype)       # (3, 3, C, 2*Kp)
    b_sum = jnp.pad((biases[0] + biases[1]).astype(jnp.float32),
                    (0, Kp - K)).reshape(1, Kp)

    # --- cost hint (true conv FLOPs / bytes, no padding waste) --------------------------
    flops = 2 * 2 * 9 * N * Ho * Wo * C * K                 # 2 convs x 3x3 taps x madd
    bytes_accessed = (N * H * W * C * cd_bytes + w_packed.size * cd_bytes
                      + b_sum.size * 4 + N * Ho * Wo * K * out_bytes)
    cost = pl.CostEstimate(flops=int(flops), transcendentals=0,
                           bytes_accessed=int(bytes_accessed))

    kernel = functools.partial(_classifier_kernel, d1, p1, d2, p2, pmax, Ho, Wo, Kp)
    scratch_shapes = [pltpu.VMEM((Ho, Wo, Kp), jnp.float32)] if use_scratch else []

    out_nhwc = pl.pallas_call(
        kernel,
        out_shape=jax.ShapeDtypeStruct((N, Ho, Wo, Kp), out_dtype),
        grid=(N, nC),
        in_specs=[
            pl.BlockSpec((1, Hpad, Wpad, TC), lambda b, c: (b, 0, 0, c)),
            pl.BlockSpec((3, 3, TC, 2 * Kp), lambda b, c: (0, 0, c, 0)),
            pl.BlockSpec((1, Kp), lambda b, c: (0, 0)),
        ],
        out_specs=pl.BlockSpec((1, Ho, Wo, Kp), lambda b, c: (b, 0, 0, 0)),
        scratch_shapes=scratch_shapes,
        compiler_params=pltpu.CompilerParams(
            dimension_semantics=("parallel", "arbitrary"),
            vmem_limit_bytes=vmem_limit),
        cost_estimate=cost,
    )(x_pad, w_packed, b_sum)

    out = out_nhwc[..., :K]                                  # drop lane padding
    if input_format == "NCHW":
        out = jnp.transpose(out, (0, 3, 1, 2))
    return out


def _reference_forward(x, weights, biases, dilations, paddings):
    """Pure-JAX reference mirroring the PyTorch forward (conv0(x) + conv1(x))."""
    def conv(w, b, d, p):
        y = jax.lax.conv_general_dilated(
            x, w, window_strides=(1, 1), padding=[(p, p), (p, p)],
            rhs_dilation=(d, d), dimension_numbers=("NCHW", "OIHW", "NCHW"),
            precision=jax.lax.Precision.HIGHEST)
        return y + b[None, :, None, None]
    return (conv(weights[0], biases[0], dilations[0], paddings[0])
            + conv(weights[1], biases[1], dilations[1], paddings[1]))


if __name__ == "__main__":
    dilation_series = [2, 4, 6, 8]
    padding_series = [2, 4, 6, 8]
    num_classes = 4
    N, H, W = 2, 16, 16

    def make_inputs(key, chan):
        ks = jax.random.split(key, 2 * len(dilation_series) + 1)
        x = jax.random.normal(ks[0], (N, chan, H, W), jnp.float32)
        weights, biases = [], []
        for i in range(len(dilation_series)):
            w = 0.01 * jax.random.normal(ks[1 + 2 * i], (num_classes, chan, 3, 3),
                                         jnp.float32)
            b = 0.1 * jax.random.uniform(ks[2 + 2 * i], (num_classes,), jnp.float32,
                                         minval=-1.0, maxval=1.0)
            weights.append(w)
            biases.append(b)
        return x, weights, biases

    k1, k2 = jax.random.split(jax.random.PRNGKey(0))

    # 1) small channel count, f32 operands (single C chunk, accumulate into o_ref)
    x, weights, biases = make_inputs(k1, 8)
    out = classifier_module_forward(x, weights, biases, dilation_series, padding_series,
                                    compute_dtype=jnp.float32)
    out = jax.block_until_ready(out)
    ref = _reference_forward(x, weights, biases, dilation_series, padding_series)
    assert out.shape == ref.shape == (N, num_classes, H, W)
    assert jnp.allclose(out, ref, rtol=1e-4, atol=1e-5), "f32 (chan=8) mismatch"

    # 2) larger channel count, f32, forced 2-chunk C reduction (output-block accumulator)
    x, weights, biases = make_inputs(k2, 256)
    out = classifier_module_forward(x, weights, biases, dilation_series, padding_series,
                                    compute_dtype=jnp.float32, c_chunk=128)
    out = jax.block_until_ready(out)
    ref = _reference_forward(x, weights, biases, dilation_series, padding_series)
    assert out.shape == ref.shape == (N, num_classes, H, W)
    assert jnp.allclose(out, ref, rtol=1e-3, atol=1e-4), "f32 (chan=256, tiled C) mismatch"

    # 3) default compute dtype (bf16 operands, f32 accumulation, Wpad rounded to 16)
    out_bf16 = classifier_module_forward(x, weights, biases, dilation_series,
                                         padding_series, c_chunk=128)
    out_bf16 = jax.block_until_ready(out_bf16)
    assert out_bf16.shape == ref.shape and out_bf16.dtype == jnp.float32
    assert jnp.allclose(out_bf16, ref, rtol=3e-2, atol=3e-2), "bf16-compute mismatch"

    # 4) bf16 input/output -> exercises the f32 VMEM scratch accumulator + final cast
    x_bf16 = x.astype(jnp.bfloat16)
    out_b = classifier_module_forward(x_bf16, weights, biases, dilation_series,
                                      padding_series, c_chunk=128)
    out_b = jax.block_until_ready(out_b)
    ref_b = _reference_forward(x_bf16.astype(jnp.float32), weights, biases,
                               dilation_series, padding_series)
    assert out_b.shape == ref_b.shape and out_b.dtype == jnp.bfloat16
    assert jnp.allclose(out_b.astype(jnp.float32), ref_b, rtol=3e-2, atol=3e-2), \
        "bf16 in/out mismatch"

    print("KERNEL_OK")
</pallas_src>

<mosaic_0001>
module attributes {stable_mosaic.version = 11 : i64} {
  func.func @_classifier_kernel(%arg0: i32, %arg1: i32, %arg2: memref<1x24x24x8xf32, #tpu.memory_space<vmem>>, %arg3: memref<3x3x8x256xf32, #tpu.memory_space<vmem>>, %arg4: memref<1x128xf32, #tpu.memory_space<vmem>>, %arg5: memref<1x16x16x128xf32, #tpu.memory_space<vmem>>) attributes {dimension_semantics = [#tpu.dimension_semantics<parallel>, #tpu.dimension_semantics<arbitrary>], iteration_bounds = array<i64: 2, 1>, scalar_prefetch = 0 : i64, scratch_operands = 0 : i64, tpu.core_type = #tpu.core_type<tc>, window_params = [{transform_indices = @transform_0, window_bounds = array<i64: 1, 24, 24, 8>}, {transform_indices = @transform_1, window_bounds = array<i64: 3, 3, 8, 256>}, {pipeline_mode = #tpu.pipeline_mode<synchronous>, transform_indices = @transform_2, window_bounds = array<i64: 1, 128>}, {transform_indices = @transform_3, window_bounds = array<i64: 1, 16, 16, 128>}]} {
    %c0 = arith.constant 0 : index
    %c0_0 = arith.constant 0 : index
    %c0_1 = arith.constant 0 : index
    %c0_2 = arith.constant 0 : index
    %0 = vector.load %arg2[%c0, %c0_0, %c0_1, %c0_2] : memref<1x24x24x8xf32, #tpu.memory_space<vmem>>, vector<1x24x24x8xf32>
    %1 = vector.shape_cast %0 : vector<1x24x24x8xf32> to vector<24x24x8xf32>
    %2 = vector.shape_cast %1 : vector<24x24x8xf32> to vector<576x8xf32>
    %c0_3 = arith.constant 0 : index
    %c0_4 = arith.constant 0 : index
    %c0_5 = arith.constant 0 : index
    %c0_6 = arith.constant 0 : index
    %3 = vector.load %arg3[%c0_3, %c0_4, %c0_5, %c0_6] : memref<3x3x8x256xf32, #tpu.memory_space<vmem>>, vector<1x1x8x256xf32>
    %4 = vector.shape_cast %3 : vector<1x1x8x256xf32> to vector<8x256xf32>
    %cst = arith.constant dense<0.000000e+00> : vector<576x256xf32>
    %5 = tpu.matmul %2, %4, %cst {dimension_numbers = #tpu.dot_dimension_numbers<[1], [0], [0], [1], [0, 0, 1, 1], [], []>} : vector<576x8xf32>, vector<8x256xf32>, vector<576x256xf32> -> vector<576x256xf32>
    %6 = vector.shape_cast %5 : vector<576x256xf32> to vector<24x24x256xf32>
    %7 = vector.extract_strided_slice %6 {offsets = [2, 2, 0], sizes = [16, 16, 128], strides = [1, 1, 1]} : vector<24x24x256xf32> to vector<16x16x128xf32>
    %8 = vector.extract_strided_slice %6 {offsets = [0, 0, 128], sizes = [16, 16, 128], strides = [1, 1, 1]} : vector<24x24x256xf32> to vector<16x16x128xf32>
    %9 = arith.addf %7, %8 : vector<16x16x128xf32>
    %c0_7 = arith.constant 0 : index
    %c1 = arith.constant 1 : index
    %c0_8 = arith.constant 0 : index
    %c0_9 = arith.constant 0 : index
    %10 = vector.load %arg3[%c0_7, %c1, %c0_8, %c0_9] : memref<3x3x8x256xf32, #tpu.memory_space<vmem>>, vector<1x1x8x256xf32>
    %11 = vector.shape_cast %10 : vector<1x1x8x256xf32> to vector<8x256xf32>
    %cst_10 = arith.constant dense<0.000000e+00> : vector<576x256xf32>
    %12 = tpu.matmul %2, %11, %cst_10 {dimension_numbers = #tpu.dot_dimension_numbers<[1], [0], [0], [1], [0, 0, 1, 1], [], []>} : vector<576x8xf32>, vector<8x256xf32>, vector<576x256xf32> -> vector<576x256xf32>
    %13 = vector.shape_cast %12 : vector<576x256xf32> to vector<24x24x256xf32>
    %14 = vector.extract_strided_slice %13 {offsets = [2, 4, 0], sizes = [16, 16, 128], strides = [1, 1, 1]} : vector<24x24x256xf32> to vector<16x16x128xf32>
    %15 = vector.extract_strided_slice %13 {offsets = [0, 4, 128], sizes = [16, 16, 128], strides = [1, 1, 1]} : vector<24x24x256xf32> to vector<16x16x128xf32>
    %16 = arith.addf %14, %15 : vector<16x16x128xf32>
    %17 = arith.addf %9, %16 : vector<16x16x128xf32>
    %c0_11 = arith.constant 0 : index
    %c2 = arith.constant 2 : index
    %c0_12 = arith.constant 0 : index
    %c0_13 = arith.constant 0 : index
    %18 = vector.load %arg3[%c0_11, %c2, %c0_12, %c0_13] : memref<3x3x8x256xf32, #tpu.memory_space<vmem>>, vector<1x1x8x256xf32>
    %19 = vector.shape_cast %18 : vector<1x1x8x256xf32> to vector<8x256xf32>
    %cst_14 = arith.constant dense<0.000000e+00> : vector<576x256xf32>
    %20 = tpu.matmul %2, %19, %cst_14 {dimension_numbers = #tpu.dot_dimension_numbers<[1], [0], [0], [1], [0, 0, 1, 1], [], []>} : vector<576x8xf32>, vector<8x256xf32>, vector<576x256xf32> -> vector<576x256xf32>
    %21 = vector.shape_cast %20 : vector<576x256xf32> to vector<24x24x256xf32>
    %22 = vector.extract_strided_slice %21 {offsets = [2, 6, 0], sizes = [16, 16, 128], strides = [1, 1, 1]} : vector<24x24x256xf32> to vector<16x16x128xf32>
    %23 = vector.extract_strided_slice %21 {offsets = [0, 8, 128], sizes = [16, 16, 128], strides = [1, 1, 1]} : vector<24x24x256xf32> to vector<16x16x128xf32>
    %24 = arith.addf %22, %23 : vector<16x16x128xf32>
    %25 = arith.addf %17, %24 : vector<16x16x128xf32>
    %c1_15 = arith.constant 1 : index
    %c0_16 = arith.constant 0 : index
    %c0_17 = arith.constant 0 : index
    %c0_18 = arith.constant 0 : index
    %26 = vector.load %arg3[%c1_15, %c0_16, %c0_17, %c0_18] : memref<3x3x8x256xf32, #tpu.memory_space<vmem>>, vector<1x1x8x256xf32>
    %27 = vector.shape_cast %26 : vector<1x1x8x256xf32> to vector<8x256xf32>
    %cst_19 = arith.constant dense<0.000000e+00> : vector<576x256xf32>
    %28 = tpu.matmul %2, %27, %cst_19 {dimension_numbers = #tpu.dot_dimension_numbers<[1], [0], [0], [1], [0, 0, 1, 1], [], []>} : vector<576x8xf32>, vector<8x256xf32>, vector<576x256xf32> -> vector<576x256xf32>
    %29 = vector.shape_cast %28 : vector<576x256xf32> to vector<24x24x256xf32>
    %30 = vector.extract_strided_slice %29 {offsets = [4, 2, 0], sizes = [16, 16, 128], strides = [1, 1, 1]} : vector<24x24x256xf32> to vector<16x16x128xf32>
    %31 = vector.extract_strided_slice %29 {offsets = [4, 0, 128], sizes = [16, 16, 128], strides = [1, 1, 1]} : vector<24x24x256xf32> to vector<16x16x128xf32>
    %32 = arith.addf %30, %31 : vector<16x16x128xf32>
    %33 = arith.addf %25, %32 : vector<16x16x128xf32>
    %c1_20 = arith.constant 1 : index
    %c1_21 = arith.constant 1 : index
    %c0_22 = arith.constant 0 : index
    %c0_23 = arith.constant 0 : index
    %34 = vector.load %arg3[%c1_20, %c1_21, %c0_22, %c0_23] : memref<3x3x8x256xf32, #tpu.memory_space<vmem>>, vector<1x1x8x256xf32>
    %35 = vector.shape_cast %34 : vector<1x1x8x256xf32> to vector<8x256xf32>
    %cst_24 = arith.constant dense<0.000000e+00> : vector<576x256xf32>
    %36 = tpu.matmul %2, %35, %cst_24 {dimension_numbers = #tpu.dot_dimension_numbers<[1], [0], [0], [1], [0, 0, 1, 1], [], []>} : vector<576x8xf32>, vector<8x256xf32>, vector<576x256xf32> -> vector<576x256xf32>
    %37 = vector.shape_cast %36 : vector<576x256xf32> to vector<24x24x256xf32>
    %38 = vector.extract_strided_slice %37 {offsets = [4, 4, 0], sizes = [16, 16, 128], strides = [1, 1, 1]} : vector<24x24x256xf32> to vector<16x16x128xf32>
    %39 = vector.extract_strided_slice %37 {offsets = [4, 4, 128], sizes = [16, 16, 128], strides = [1, 1, 1]} : vector<24x24x256xf32> to vector<16x16x128xf32>
    %40 = arith.addf %38, %39 : vector<16x16x128xf32>
    %41 = arith.addf %33, %40 : vector<16x16x128xf32>
    %c1_25 = arith.constant 1 : index
    %c2_26 = arith.constant 2 : index
    %c0_27 = arith.constant 0 : index
    %c0_28 = arith.constant 0 : index
    %42 = vector.load %arg3[%c1_25, %c2_26, %c0_27, %c0_28] : memref<3x3x8x256xf32, #tpu.memory_space<vmem>>, vector<1x1x8x256xf32>
    %43 = vector.shape_cast %42 : vector<1x1x8x256xf32> to vector<8x256xf32>
    %cst_29 = arith.constant dense<0.000000e+00> : vector<576x256xf32>
    %44 = tpu.matmul %2, %43, %cst_29 {dimension_numbers = #tpu.dot_dimension_numbers<[1], [0], [0], [1], [0, 0, 1, 1], [], []>} : vector<576x8xf32>, vector<8x256xf32>, vector<576x256xf32> -> vector<576x256xf32>
    %45 = vector.shape_cast %44 : vector<576x256xf32> to vector<24x24x256xf32>
    %46 = vector.extract_strided_slice %45 {offsets = [4, 6, 0], sizes = [16, 16, 128], strides = [1, 1, 1]} : vector<24x24x256xf32> to vector<16x16x128xf32>
    %47 = vector.extract_strided_slice %45 {offsets = [4, 8, 128], sizes = [16, 16, 128], strides = [1, 1, 1]} : vector<24x24x256xf32> to vector<16x16x128xf32>
    %48 = arith.addf %46, %47 : vector<16x16x128xf32>
    %49 = arith.addf %41, %48 : vector<16x16x128xf32>
    %c2_30 = arith.constant 2 : index
    %c0_31 = arith.constant 0 : index
    %c0_32 = arith.constant 0 : index
    %c0_33 = arith.constant 0 : index
    %50 = vector.load %arg3[%c2_30, %c0_31, %c0_32, %c0_33] : memref<3x3x8x256xf32, #tpu.memory_space<vmem>>, vector<1x1x8x256xf32>
    %51 = vector.shape_cast %50 : vector<1x1x8x256xf32> to vector<8x256xf32>
    %cst_34 = arith.constant dense<0.000000e+00> : vector<576x256xf32>
    %52 = tpu.matmul %2, %51, %cst_34 {dimension_numbers = #tpu.dot_dimension_numbers<[1], [0], [0], [1], [0, 0, 1, 1], [], []>} : vector<576x8xf32>, vector<8x256xf32>, vector<576x256xf32> -> vector<576x256xf32>
    %53 = vector.shape_cast %52 : vector<576x256xf32> to vector<24x24x256xf32>
    %54 = vector.extract_strided_slice %53 {offsets = [6, 2, 0], sizes = [16, 16, 128], strides = [1, 1, 1]} : vector<24x24x256xf32> to vector<16x16x128xf32>
    %55 = vector.extract_strided_slice %53 {offsets = [8, 0, 128], sizes = [16, 16, 128], strides = [1, 1, 1]} : vector<24x24x256xf32> to vector<16x16x128xf32>
    %56 = arith.addf %54, %55 : vector<16x16x128xf32>
    %57 = arith.addf %49, %56 : vector<16x16x128xf32>
    %c2_35 = arith.constant 2 : index
    %c1_36 = arith.constant 1 : index
    %c0_37 = arith.constant 0 : index
    %c0_38 = arith.constant 0 : index
    %58 = vector.load %arg3[%c2_35, %c1_36, %c0_37, %c0_38] : memref<3x3x8x256xf32, #tpu.memory_space<vmem>>, vector<1x1x8x256xf32>
    %59 = vector.shape_cast %58 : vector<1x1x8x256xf32> to vector<8x256xf32>
    %cst_39 = arith.constant dense<0.000000e+00> : vector<576x256xf32>
    %60 = tpu.matmul %2, %59, %cst_39 {dimension_numbers = #tpu.dot_dimension_numbers<[1], [0], [0], [1], [0, 0, 1, 1], [], []>} : vector<576x8xf32>, vector<8x256xf32>, vector<576x256xf32> -> vector<576x256xf32>
    %61 = vector.shape_cast %60 : vector<576x256xf32> to vector<24x24x256xf32>
    %62 = vector.extract_strided_slice %61 {offsets = [6, 4, 0], sizes = [16, 16, 128], strides = [1, 1, 1]} : vector<24x24x256xf32> to vector<16x16x128xf32>
    %63 = vector.extract_strided_slice %61 {offsets = [8, 4, 128], sizes = [16, 16, 128], strides = [1, 1, 1]} : vector<24x24x256xf32> to vector<16x16x128xf32>
    %64 = arith.addf %62, %63 : vector<16x16x128xf32>
    %65 = arith.addf %57, %64 : vector<16x16x128xf32>
    %c2_40 = arith.constant 2 : index
    %c2_41 = arith.constant 2 : index
    %c0_42 = arith.constant 0 : index
    %c0_43 = arith.constant 0 : index
    %66 = vector.load %arg3[%c2_40, %c2_41, %c0_42, %c0_43] : memref<3x3x8x256xf32, #tpu.memory_space<vmem>>, vector<1x1x8x256xf32>
    %67 = vector.shape_cast %66 : vector<1x1x8x256xf32> to vector<8x256xf32>
    %cst_44 = arith.constant dense<0.000000e+00> : vector<576x256xf32>
    %68 = tpu.matmul %2, %67, %cst_44 {dimension_numbers = #tpu.dot_dimension_numbers<[1], [0], [0], [1], [0, 0, 1, 1], [], []>} : vector<576x8xf32>, vector<8x256xf32>, vector<576x256xf32> -> vector<576x256xf32>
    %69 = vector.shape_cast %68 : vector<576x256xf32> to vector<24x24x256xf32>
    %70 = vector.extract_strided_slice %69 {offsets = [6, 6, 0], sizes = [16, 16, 128], strides = [1, 1, 1]} : vector<24x24x256xf32> to vector<16x16x128xf32>
    %71 = vector.extract_strided_slice %69 {offsets = [8, 8, 128], sizes = [16, 16, 128], strides = [1, 1, 1]} : vector<24x24x256xf32> to vector<16x16x128xf32>
    %72 = arith.addf %70, %71 : vector<16x16x128xf32>
    %73 = arith.addf %65, %72 : vector<16x16x128xf32>
    %c0_45 = arith.constant 0 : index
    %c0_46 = arith.constant 0 : index
    %74 = vector.load %arg4[%c0_45, %c0_46] : memref<1x128xf32, #tpu.memory_space<vmem>>, vector<1x128xf32>
    %c0_i32 = arith.constant 0 : i32
    %75 = arith.cmpi eq, %arg1, %c0_i32 : i32
    %76 = arith.extui %75 : i1 to i32
    %c0_i32_47 = arith.constant 0 : i32
    %77 = arith.cmpi ne, %76, %c0_i32_47 : i32
    scf.if %77 {
      %81 = vector.shape_cast %74 : vector<1x128xf32> to vector<1x1x128xf32>
      %82 = vector.broadcast %81 : vector<1x1x128xf32> to vector<16x16x128xf32>
      %83 = arith.addf %73, %82 : vector<16x16x128xf32>
      %84 = vector.shape_cast %83 : vector<16x16x128xf32> to vector<1x16x16x128xf32>
      %c0_50 = arith.constant 0 : index
      %c0_51 = arith.constant 0 : index
      %c0_52 = arith.constant 0 : index
      %c0_53 = arith.constant 0 : index
      %85 = vector.load %arg5[%c0_50, %c0_51, %c0_52, %c0_53] : memref<1x16x16x128xf32, #tpu.memory_space<vmem>>, vector<1x16x16x128xf32>
      tpu.vector_store %arg5[%c0_50, %c0_51, %c0_52, %c0_53], %84 {strides = array<i32>} : memref<1x16x16x128xf32, #tpu.memory_space<vmem>>, vector<1x16x16x128xf32>,
    } else {
    }
    %c0_i32_48 = arith.constant 0 : i32
    %78 = arith.cmpi sgt, %arg1, %c0_i32_48 : i32
    %79 = arith.extui %78 : i1 to i32
    %c0_i32_49 = arith.constant 0 : i32
    %80 = arith.cmpi ne, %79, %c0_i32_49 : i32
    scf.if %80 {
      %c0_50 = arith.constant 0 : index
      %c0_51 = arith.constant 0 : index
      %c0_52 = arith.constant 0 : index
      %c0_53 = arith.constant 0 : index
      %81 = vector.load %arg5[%c0_50, %c0_51, %c0_52, %c0_53] : memref<1x16x16x128xf32, #tpu.memory_space<vmem>>, vector<1x16x16x128xf32>
      %82 = vector.shape_cast %73 : vector<16x16x128xf32> to vector<1x16x16x128xf32>
      %83 = arith.addf %81, %82 : vector<1x16x16x128xf32>
      %c0_54 = arith.constant 0 : index
      %c0_55 = arith.constant 0 : index
      %c0_56 = arith.constant 0 : index
      %c0_57 = arith.constant 0 : index
      %84 = vector.load %arg5[%c0_54, %c0_55, %c0_56, %c0_57] : memref<1x16x16x128xf32, #tpu.memory_space<vmem>>, vector<1x16x16x128xf32>
      tpu.vector_store %arg5[%c0_54, %c0_55, %c0_56, %c0_57], %83 {strides = array<i32>} : memref<1x16x16x128xf32, #tpu.memory_space<vmem>>, vector<1x16x16x128xf32>,
    } else {
    }
    return
  }
  func.func @transform_0(%arg0: i32, %arg1: i32) -> (i32, i32, i32, i32) {
    %c0_i32 = arith.constant 0 : i32
    %c0_i32_0 = arith.constant 0 : i32
    %c0_i32_1 = arith.constant 0 : i32
    return %arg0, %c0_i32, %c0_i32_0, %arg1 : i32, i32, i32, i32
  }
  func.func @transform_1(%arg0: i32, %arg1: i32) -> (i32, i32, i32, i32) {
    %c0_i32 = arith.constant 0 : i32
    %c0_i32_0 = arith.constant 0 : i32
    %c0_i32_1 = arith.constant 0 : i32
    %c0_i32_2 = arith.constant 0 : i32
    return %c0_i32, %c0_i32_0, %arg1, %c0_i32_1 : i32, i32, i32, i32
  }
  func.func @transform_2(%arg0: i32, %arg1: i32) -> (i32, i32) {
    %c0_i32 = arith.constant 0 : i32
    %c0_i32_0 = arith.constant 0 : i32
    %c0_i32_1 = arith.constant 0 : i32
    return %c0_i32, %c0_i32_0 : i32, i32
  }
  func.func @transform_3(%arg0: i32, %arg1: i32) -> (i32, i32, i32, i32) {
    %c0_i32 = arith.constant 0 : i32
    %c0_i32_0 = arith.constant 0 : i32
    %c0_i32_1 = arith.constant 0 : i32
    %c0_i32_2 = arith.constant 0 : i32
    return %arg0, %c0_i32, %c0_i32_0, %c0_i32_1 : i32, i32, i32, i32
  }
}

</mosaic_0001>

<bundles_post_ra>
// kernel: tpu_custom_call.1
= control target key start
LH: loop header
LB: loop body
LE: loop exit
PB: predicated region body
PF: predicated region fallthrough
CT: control target
= control target key end

     0   :  { %8 = vsyncpa [#allocation3], 0  ;;  %s12708_s0 = inlined_call_operand.vmem [shape: f32[2,24,24,8], index: 0, kind: input, shape index: {}]   ;;  %s12709_s1 = inlined_call_operand.vmem [shape: f32[3,3,8,256], index: 1, kind: input, shape index: {}]   ;;  %s12710_s2 = inlined_call_operand.vmem [shape: f32[1,128], index: 2, kind: input, shape index: {}]   ;;  %s12711_s3 = inlined_call_operand.hbm [shape: f32[2,16,16,128], index: 3, kind: output, shape index: {}]  }
   0x1   :  { %10 = vsyncpa [#allocation3 + $0x1], 0  ;;  %s8682_s12 = smov 0   ;;  %s8684_s13 = smov 0  }
   0x2   :  { %s8686_s14 = smov 0   ;;  %s8688_s15 = smov 0  }
   0x3   :  { %s8690_s16 = smov 0   ;;  %s8692_s17 = smov 0  }
   0x4 LB: > { %s7587_s18 = sadd.s32 4294967295, %s8656_s17   ;;  %s7588_s19 = sadd.s32 4294967294, %s8656_s17   ;;  %s8656_s17 = sphi %s8692_s17, %s16_s17   ;;  %s8652_s16 = sphi %s8690_s16, %s12897_s16   ;;  %s8648_s15 = sphi %s8688_s15, %s12896_s15   ;;  %s8644_s14 = sphi %s8686_s14, %s12895_s14   ;;  %s8640_s13 = sphi %s8684_s13, %s12894_s13   ;;  %s8636_s12 = sphi %s8682_s12, %s12893_s12  }
   0x5   : > { %s28_s20 = sadd.s32 1, %s8652_s16  ;;  %s110_s21 = sadd.s32 1, %s8644_s14 }
   0x6   : > { %p30_p0 = scmp.ge.s32.totalorder %s28_s20, 2  ;;  %p120_p1 = scmp.ne.s32.totalorder %s8644_s14, %s8640_s13 }
   0x7   : > { %p121_p2 = scmp.eq.s32.totalorder %s7587_s18, 1  ;;  %p126_p3 = scmp.ne.s32.totalorder %s8640_s13, %s8636_s12 }
   0x8   : > { %s12899_s20 = smov (%p30_p0, %s28_s20), 0  ;;  %p127_p5 = scmp.eq.s32.totalorder %s7588_s19, 1 }
   0x9   : > { %p8722_p4 = por %p121_p2, %p120_p1  ;;  %s107_s23 = ssub.s32 %s8652_s16, %s12899_s20 }
   0xa   : > { %p7592_p6 = scmp.ge.s32.totalorder %s8656_s17, 1  ;;  %p108_p7 = scmp.eq.s32.totalorder %s107_s23, 0 }
   0xb   : > { %p8729_p8 = por %p127_p5, %p126_p3  ;;  %p167_p9 = scmp.lt.s32.totalorder %s8656_s17, 3 }
   0xc   : > { %s8735_s25 = scalar_select %p108_p7, %s8644_s14, %s110_s21  }
   0xd   : > { %p168_p10 = pnand %p7592_p6, %p167_p9 }
   0xf   : > { %171 = sbr.rel (%p168_p10) target bundleno = 1542 (0x606), region = 32 }
  0x14   : > { %v285_v0 = vld [vmem:[%s12709_s1 + $0x8] sm:$0xff]  ;;  %v284_v1 = vld [vmem:[%s12709_s1] sm:$0xff]  ;;  %p199_p11 = scmp.lt.s32.totalorder %s8648_s15, 1  ;;  %v7668_v3 = vld [vmem:[%s12709_s1 + $0x18] sm:$0xff]  ;;  %v12721_v4 = vmov 0.0   ;;  %vm286_vm0 = vcmask 64512  }
  0x15   : > { %533 = vmatprep.subr.mxu0 %v285_v0  ;;  %8266 = vmatprep.subr.mxu1 %v285_v0  ;;  %v7742_v2 = vld [vmem:[%s12709_s1 + $0x28] sm:$0xff]  ;;  %v7741_v5 = vld [vmem:[%s12709_s1 + $0x20] sm:$0xff]  ;;  %v7667_v6 = vld [vmem:[%s12709_s1 + $0x10] sm:$0xff]  ;;  %vm968_vm1 = vcmask 1041408   ;;  %vm1661_vm2 = vcmask 1045504   ;;  %vm2498_vm3 = vcmask 1043456  }
  0x16   : > { %534 = vmatpush1.msra.mxu0 %v284_v1  ;;  %8267 = vmatpush1.msra.mxu1 %v284_v1  ;;  %s200_s7 = scalar_select %p199_p11, %s8648_s15, 1  ;;  %v7890_v21 = vld [vmem:[%s12709_s1 + $0x48] sm:$0xff]  ;;  %v7816_v22 = vld [vmem:[%s12709_s1 + $0x38] sm:$0xff] }
  0x17   : > { %567 = vmatprep.mubr.f32.mxu0 %v12721_v4  ;;  %765 = vmatprep.mubr.f32.mxu1 %v12721_v4  ;;  %s8265_s21 = sshll.u32 %s8648_s15, 12  ;;  %s8659_s30 = smov [#allocation2]  }
  0x18   : > { %1871 = vmatprep.subr.mxu0 %v7742_v2  ;;  %s8268_s8 = smul.u32 576, %s200_s7  ;;  %1146 = vmatprep.subr.mxu1 %v7668_v3  ;;  %s12652_s28 = scalar_lea.hbm %s12711_s3, %s8265_s21 }
  0x19   : > { %s8584_s4 = sshll.u32 %s8659_s30, 4  ;;  %s8585_s4 = int_to_ptr.vmem [resolvable:$false] %s8584_s4 }
  0x1a   : > { %s8756_s11 = scalar_lea.vmem %s12708_s0, %s8268_s8  ;;  %s8586_s5 = scalar_lea.vmem %s8585_s4, 8192 }
  0x1b   : > { %v8765_v7 = vld [vmem:[%s8756_s11] sm:$0xff]  ;;  %v8772_v9 = vld [vmem:[%s8756_s11 + $0x8] sm:$0xff]  ;;  %v8783_v11 = vld [vmem:[%s8756_s11 + $0x10] sm:$0xff] }
  0x1c   : > { %v248_v8 = vld [vmem:[%s8756_s11 + $0x120] sm:$0xff]  ;;  %7595 = vmatmul.mubr.msk.f32.vlgmr.msra.gmra.mxu0 %vm286_vm0, %v8765_v7  ;;  %v249_v10 = vld [vmem:[%s8756_s11 + $0x128] sm:$0xff]  ;;  %v250_v12 = vld [vmem:[%s8756_s11 + $0x130] sm:$0xff] }
  0x1d   : > { %7631 = vmatmul.mubr.msk.f32.vlgmr.msra.gmra.mxu1 %vm286_vm0, %v248_v8  ;;  %1872 = vmatpush1.msra.mxu0 %v7741_v5  ;;  %v8792_v13 = vld [vmem:[%s8756_s11 + $0x18] sm:$0xff]  ;;  %v8801_v15 = vld [vmem:[%s8756_s11 + $0x20] sm:$0xff]  ;;  %v8810_v17 = vld [vmem:[%s8756_s11 + $0x28] sm:$0xff] }
  0x1e   : > { %1147 = vmatpush1.msra.mxu1 %v7667_v6  ;;  %572 = vmatprep.mubr.f32.mxu0 %v12721_v4  ;;  %v251_v14 = vld [vmem:[%s8756_s11 + $0x138] sm:$0xff]  ;;  %v252_v16 = vld [vmem:[%s8756_s11 + $0x140] sm:$0xff]  ;;  %v253_v18 = vld [vmem:[%s8756_s11 + $0x148] sm:$0xff] }
  0x1f   : > { %771 = vmatprep.mubr.f32.mxu1 %v12721_v4  ;;  %v8819_v19 = vld [vmem:[%s8756_s11 + $0x30] sm:$0xff]  ;;  %v8834_v23 = vld [vmem:[%s8756_s11 + $0x38] sm:$0xff]  ;;  %3368 = vmatprep.subr.mxu0 %v7890_v21  ;;  %v8843_v25 = vld [vmem:[%s8756_s11 + $0x40] sm:$0xff] }
  0x20   : > { %7596 = vmatmul.mubr.msk.f32.gmra.mxu0 %vm286_vm0, %v8772_v9  ;;  %v254_v20 = vld [vmem:[%s8756_s11 + $0x150] sm:$0xff]  ;;  %v255_v24 = vld [vmem:[%s8756_s11 + $0x158] sm:$0xff]  ;;  %2708 = vmatprep.subr.mxu1 %v7816_v22  ;;  %v256_v26 = vld [vmem:[%s8756_s11 + $0x160] sm:$0xff] }
  0x21   : > { %7632 = vmatmul.mubr.msk.f32.gmra.mxu1 %vm286_vm0, %v249_v10  ;;  %577 = vmatprep.mubr.f32.mxu0 %v12721_v4  ;;  %v8852_v27 = vld [vmem:[%s8756_s11 + $0x48] sm:$0xff]  ;;  %v8861_v29 = vld [vmem:[%s8756_s11 + $0x50] sm:$0xff]  ;;  %v8870_v31 = vld [vmem:[%s8756_s11 + $0x58] sm:$0xff] }
  0x22   : > { %777 = vmatprep.mubr.f32.mxu1 %v12721_v4  ;;  %v257_v28 = vld [vmem:[%s8756_s11 + $0x168] sm:$0xff]  ;;  %v258_v30 = vld [vmem:[%s8756_s11 + $0x170] sm:$0xff]  ;;  %v259_v32 = vld [vmem:[%s8756_s11 + $0x178] sm:$0xff] }
  0x23   : > { %v8879_v33 = vld [vmem:[%s8756_s11 + $0x60] sm:$0xff]  ;;  %v8888_v35 = vld [vmem:[%s8756_s11 + $0x68] sm:$0xff]  ;;  %v8897_v37 = vld [vmem:[%s8756_s11 + $0x70] sm:$0xff] }
  0x24   : > { %7597 = vmatmul.mubr.msk.f32.gmra.mxu0 %vm286_vm0, %v8783_v11  ;;  %v260_v34 = vld [vmem:[%s8756_s11 + $0x180] sm:$0xff]  ;;  %v261_v36 = vld [vmem:[%s8756_s11 + $0x188] sm:$0xff]  ;;  %v262_v38 = vld [vmem:[%s8756_s11 + $0x190] sm:$0xff] }
  0x25   : > { %7633 = vmatmul.mubr.msk.f32.gmra.mxu1 %vm286_vm0, %v250_v12  ;;  %581 = vmatprep.mubr.f32.mxu0 %v12721_v4  ;;  %v8906_v39 = vld [vmem:[%s8756_s11 + $0x78] sm:$0xff]  ;;  %v8915_v41 = vld [vmem:[%s8756_s11 + $0x80] sm:$0xff]  ;;  %v8924_v43 = vld [vmem:[%s8756_s11 + $0x88] sm:$0xff] }
  0x26   : > { %782 = vmatprep.mubr.f32.mxu1 %v12721_v4  ;;  %v263_v40 = vld [vmem:[%s8756_s11 + $0x198] sm:$0xff]  ;;  %v264_v42 = vld [vmem:[%s8756_s11 + $0x1a0] sm:$0xff]  ;;  %v265_v44 = vld [vmem:[%s8756_s11 + $0x1a8] sm:$0xff] }
  0x27   : > { %v8933_v45 = vld [vmem:[%s8756_s11 + $0x90] sm:$0xff]  ;;  %v8942_v47 = vld [vmem:[%s8756_s11 + $0x98] sm:$0xff]  ;;  %v8951_v49 = vld [vmem:[%s8756_s11 + $0xa0] sm:$0xff] }
  0x28   : > { %7598 = vmatmul.mubr.msk.f32.gmra.mxu0 %vm286_vm0, %v8792_v13  ;;  %v266_v46 = vld [vmem:[%s8756_s11 + $0x1b0] sm:$0xff]  ;;  %v267_v48 = vld [vmem:[%s8756_s11 + $0x1b8] sm:$0xff]  ;;  %v268_v50 = vld [vmem:[%s8756_s11 + $0x1c0] sm:$0xff] }
  0x29   : > { %7634 = vmatmul.mubr.msk.f32.gmra.mxu1 %vm286_vm0, %v251_v14  ;;  %586 = vmatprep.mubr.f32.mxu0 %v12721_v4  ;;  %v8960_v51 = vld [vmem:[%s8756_s11 + $0xa8] sm:$0xff]  ;;  %v8969_v53 = vld [vmem:[%s8756_s11 + $0xb0] sm:$0xff]  ;;  %v8978_v55 = vld [vmem:[%s8756_s11 + $0xb8] sm:$0xff] }
  0x2a   : > { %788 = vmatprep.mubr.f32.mxu1 %v12721_v4  ;;  %v269_v52 = vld [vmem:[%s8756_s11 + $0x1c8] sm:$0xff]  ;;  %v270_v54 = vld [vmem:[%s8756_s11 + $0x1d0] sm:$0xff]  ;;  %v271_v56 = vld [vmem:[%s8756_s11 + $0x1d8] sm:$0xff] }
  0x2b   : > { %v8987_v57 = vld [vmem:[%s8756_s11 + $0xc0] sm:$0xff]  ;;  %v8996_v59 = vld [vmem:[%s8756_s11 + $0xc8] sm:$0xff]  ;;  %v9005_v61 = vld [vmem:[%s8756_s11 + $0xd0] sm:$0xff] }
  0x2c   : > { %7599 = vmatmul.mubr.msk.f32.gmra.mxu0 %vm286_vm0, %v8801_v15  ;;  %v272_v58 = vld [vmem:[%s8756_s11 + $0x1e0] sm:$0xff]  ;;  %v273_v60 = vld [vmem:[%s8756_s11 + $0x1e8] sm:$0xff]  ;;  %v274_v62 = vld [vmem:[%s8756_s11 + $0x1f0] sm:$0xff] }
  0x2d   : > { %7635 = vmatmul.mubr.msk.f32.gmra.mxu1 %vm286_vm0, %v252_v16  ;;  %591 = vmatprep.mubr.f32.mxu0 %v12721_v4  ;;  %v9014_v63 = vld [vmem:[%s8756_s11 + $0xd8] sm:$0xff]  ;;  %v9023_v1 = vld [vmem:[%s8756_s11 + $0xe0] sm:$0xff]  ;;  %v9032_v3 = vld [vmem:[%s8756_s11 + $0xe8] sm:$0xff] }
  0x2e   : > { %794 = vmatprep.mubr.f32.mxu1 %v12721_v4  ;;  %v275_v0 = vld [vmem:[%s8756_s11 + $0x1f8] sm:$0xff]  ;;  %v276_v2 = vld [vmem:[%s8756_s11 + $0x200] sm:$0xff]  ;;  %v277_v5 = vld [vmem:[%s8756_s11 + $0x208] sm:$0xff] }
  0x2f   : > { %v9041_v6 = vld [vmem:[%s8756_s11 + $0xf0] sm:$0xff]  ;;  %v9050_v10 = vld [vmem:[%s8756_s11 + $0xf8] sm:$0xff]  ;;  %v9059_v14 = vld [vmem:[%s8756_s11 + $0x100] sm:$0xff] }
  0x30   : > { %7600 = vmatmul.mubr.msk.f32.gmra.mxu0 %vm286_vm0, %v8810_v17  ;;  %v278_v8 = vld [vmem:[%s8756_s11 + $0x210] sm:$0xff]  ;;  %v279_v12 = vld [vmem:[%s8756_s11 + $0x218] sm:$0xff]  ;;  %v280_v16 = vld [vmem:[%s8756_s11 + $0x220] sm:$0xff] }
  0x31   : > { %7636 = vmatmul.mubr.msk.f32.gmra.mxu1 %vm286_vm0, %v253_v18  ;;  %595 = vmatprep.mubr.f32.mxu0 %v12721_v4  ;;  %v9068_v18 = vld [vmem:[%s8756_s11 + $0x108] sm:$0xff]  ;;  %v9077_v21 = vld [vmem:[%s8756_s11 + $0x110] sm:$0xff] }
  0x32   : > { %799 = vmatprep.mubr.f32.mxu1 %v12721_v4  ;;  %v282_v22 = vld [vmem:[%s8756_s11 + $0x230] sm:$0xff] }
  0x34   : > { %7601 = vmatmul.mubr.msk.f32.gmra.mxu0 %vm286_vm0, %v8819_v19 }
  0x35   : > { %7637 = vmatmul.mubr.msk.f32.gmra.mxu1 %vm286_vm0, %v254_v20  ;;  %601 = vmatprep.mubr.f32.mxu0 %v12721_v4  ;;  %v281_v20 = vld [vmem:[%s8756_s11 + $0x228] sm:$0xff] }
  0x36   : > { %805 = vmatprep.mubr.f32.mxu1 %v12721_v4 }
  0x38   : > { %7602 = vmatmul.mubr.msk.f32.gmra.mxu0 %vm286_vm0, %v8834_v23 }
  0x39   : > { %7638 = vmatmul.mubr.msk.f32.gmra.mxu1 %vm286_vm0, %v255_v24  ;;  %607 = vmatprep.mubr.f32.mxu0 %v12721_v4  ;;  %v9086_v24 = vld [vmem:[%s8756_s11 + $0x118] sm:$0xff] }
  0x3a   : > { %811 = vmatprep.mubr.f32.mxu1 %v12721_v4 }
  0x3c   : > { %7603 = vmatmul.mubr.msk.f32.gmra.mxu0 %vm286_vm0, %v8843_v25 }
  0x3d   : > { %7639 = vmatmul.mubr.msk.f32.gmra.mxu1 %vm286_vm0, %v256_v26  ;;  %612 = vmatprep.mubr.f32.mxu0 %v12721_v4  ;;  %v283_v26 = vld [vmem:[%s8756_s11 + $0x238] sm:$0xff] }
  0x3e   : > { %816 = vmatprep.mubr.f32.mxu1 %v12721_v4 }
  0x40   : > { %7604 = vmatmul.mubr.msk.f32.gmra.mxu0 %vm286_vm0, %v8852_v27 }
  0x41   : > { %7640 = vmatmul.mubr.msk.f32.gmra.mxu1 %vm286_vm0, %v257_v28  ;;  %618 = vmatprep.mubr.f32.mxu0 %v12721_v4  ;;  %v7889_v28 = vld [vmem:[%s12709_s1 + $0x40] sm:$0xff] }
  0x42   : > { %822 = vmatprep.mubr.f32.mxu1 %v12721_v4 }
  0x44   : > { %7605 = vmatmul.mubr.msk.f32.gmra.mxu0 %vm286_vm0, %v8861_v29 }
  0x45   : > { %7641 = vmatmul.mubr.msk.f32.gmra.mxu1 %vm286_vm0, %v258_v30  ;;  %624 = vmatprep.mubr.f32.mxu0 %v12721_v4  ;;  %v7815_v30 = vld [vmem:[%s12709_s1 + $0x30] sm:$0xff] }
  0x46   : > { %828 = vmatprep.mubr.f32.mxu1 %v12721_v4 }
  0x48   : > { %7606 = vmatmul.mubr.msk.f32.gmra.mxu0 %vm286_vm0, %v8870_v31 }
  0x49   : > { %7642 = vmatmul.mubr.msk.f32.gmra.mxu1 %vm286_vm0, %v259_v32  ;;  %629 = vmatprep.mubr.f32.mxu0 %v12721_v4 }
  0x4a   : > { %833 = vmatprep.mubr.f32.mxu1 %v12721_v4 }
  0x4c   : > { %7607 = vmatmul.mubr.msk.f32.gmra.mxu0 %vm286_vm0, %v8879_v33 }
  0x4d   : > { %7643 = vmatmul.mubr.msk.f32.gmra.mxu1 %vm286_vm0, %v260_v34  ;;  %635 = vmatprep.mubr.f32.mxu0 %v12721_v4 }
  0x4e   : > { %838 = vmatprep.mubr.f32.mxu1 %v12721_v4 }
  0x50   : > { %7608 = vmatmul.mubr.msk.f32.gmra.mxu0 %vm286_vm0, %v8888_v35 }
  0x51   : > { %7644 = vmatmul.mubr.msk.f32.gmra.mxu1 %vm286_vm0, %v261_v36  ;;  %641 = vmatprep.mubr.f32.mxu0 %v12721_v4 }
  0x52   : > { %843 = vmatprep.mubr.f32.mxu1 %v12721_v4 }
  0x54   : > { %7609 = vmatmul.mubr.msk.f32.gmra.mxu0 %vm286_vm0, %v8897_v37 }
  0x55   : > { %7645 = vmatmul.mubr.msk.f32.gmra.mxu1 %vm286_vm0, %v262_v38  ;;  %646 = vmatprep.mubr.f32.mxu0 %v12721_v4 }
  0x56   : > { %848 = vmatprep.mubr.f32.mxu1 %v12721_v4 }
  0x58   : > { %7610 = vmatmul.mubr.msk.f32.gmra.mxu0 %vm286_vm0, %v8906_v39 }
  0x59   : > { %7646 = vmatmul.mubr.msk.f32.gmra.mxu1 %vm286_vm0, %v263_v40  ;;  %652 = vmatprep.mubr.f32.mxu0 %v12721_v4 }
  0x5a   : > { %853 = vmatprep.mubr.f32.mxu1 %v12721_v4 }
  0x5c   : > { %7611 = vmatmul.mubr.msk.f32.gmra.mxu0 %vm286_vm0, %v8915_v41 }
  0x5d   : > { %7647 = vmatmul.mubr.msk.f32.gmra.mxu1 %vm286_vm0, %v264_v42  ;;  %658 = vmatprep.mubr.f32.mxu0 %v12721_v4 }
  0x5e   : > { %858 = vmatprep.mubr.f32.mxu1 %v12721_v4 }
  0x60   : > { %7612 = vmatmul.mubr.msk.f32.gmra.mxu0 %vm286_vm0, %v8924_v43 }
  0x61   : > { %7648 = vmatmul.mubr.msk.f32.gmra.mxu1 %vm286_vm0, %v265_v44  ;;  %663 = vmatprep.mubr.f32.mxu0 %v12721_v4 }
  0x62   : > { %863 = vmatprep.mubr.f32.mxu1 %v12721_v4 }
  0x64   : > { %7613 = vmatmul.mubr.msk.f32.gmra.mxu0 %vm286_vm0, %v8933_v45 }
  0x65   : > { %7649 = vmatmul.mubr.msk.f32.gmra.mxu1 %vm286_vm0, %v266_v46  ;;  %669 = vmatprep.mubr.f32.mxu0 %v12721_v4 }
  0x66   : > { %867 = vmatprep.mubr.f32.mxu1 %v12721_v4 }
  0x68   : > { %7614 = vmatmul.mubr.msk.f32.gmra.mxu0 %vm286_vm0, %v8942_v47 }
  0x69   : > { %7650 = vmatmul.mubr.msk.f32.gmra.mxu1 %vm286_vm0, %v267_v48  ;;  %675 = vmatprep.mubr.f32.mxu0 %v12721_v4 }
  0x6a   : > { %871 = vmatprep.mubr.f32.mxu1 %v12721_v4 }
  0x6c   : > { %7615 = vmatmul.mubr.msk.f32.gmra.mxu0 %vm286_vm0, %v8951_v49 }
  0x6d   : > { %7651 = vmatmul.mubr.msk.f32.gmra.mxu1 %vm286_vm0, %v268_v50  ;;  %680 = vmatprep.mubr.f32.mxu0 %v12721_v4 }
  0x6e   : > { %875 = vmatprep.mubr.f32.mxu1 %v12721_v4 }
  0x70   : > { %7616 = vmatmul.mubr.msk.f32.gmra.mxu0 %vm286_vm0, %v8960_v51 }
  0x71   : > { %7652 = vmatmul.mubr.msk.f32.gmra.mxu1 %vm286_vm0, %v269_v52  ;;  %686 = vmatprep.mubr.f32.mxu0 %v12721_v4 }
  0x72   : > { %879 = vmatprep.mubr.f32.mxu1 %v12721_v4 }
  0x74   : > { %7617 = vmatmul.mubr.msk.f32.gmra.mxu0 %vm286_vm0, %v8969_v53 }
  0x75   : > { %7653 = vmatmul.mubr.msk.f32.gmra.mxu1 %vm286_vm0, %v270_v54  ;;  %692 = vmatprep.mubr.f32.mxu0 %v12721_v4 }
  0x76   : > { %883 = vmatprep.mubr.f32.mxu1 %v12721_v4 }
  0x78   : > { %7618 = vmatmul.mubr.msk.f32.gmra.mxu0 %vm286_vm0, %v8978_v55 }
  0x79   : > { %7654 = vmatmul.mubr.msk.f32.gmra.mxu1 %vm286_vm0, %v271_v56  ;;  %697 = vmatprep.mubr.f32.mxu0 %v12721_v4 }
  0x7a   : > { %887 = vmatprep.mubr.f32.mxu1 %v12721_v4 }
  0x7c   : > { %7619 = vmatmul.mubr.msk.f32.gmra.mxu0 %vm286_vm0, %v8987_v57 }
  0x7d   : > { %7655 = vmatmul.mubr.msk.f32.gmra.mxu1 %vm286_vm0, %v272_v58  ;;  %703 = vmatprep.mubr.f32.mxu0 %v12721_v4 }
  0x7e   : > { %891 = vmatprep.mubr.f32.mxu1 %v12721_v4 }
  0x80   : > { %7620 = vmatmul.mubr.msk.f32.gmra.mxu0 %vm286_vm0, %v8996_v59 }
  0x81   : > { %7656 = vmatmul.mubr.msk.f32.gmra.mxu1 %vm286_vm0, %v273_v60  ;;  %709 = vmatprep.mubr.f32.mxu0 %v12721_v4 }
  0x82   : > { %895 = vmatprep.mubr.f32.mxu1 %v12721_v4 }
  0x84   : > { %7621 = vmatmul.mubr.msk.f32.gmra.mxu0 %vm286_vm0, %v9005_v61 }
  0x85   : > { %7657 = vmatmul.mubr.msk.f32.gmra.mxu1 %vm286_vm0, %v274_v62  ;;  %714 = vmatprep.mubr.f32.mxu0 %v12721_v4 }
  0x86   : > { %899 = vmatprep.mubr.f32.mxu1 %v12721_v4 }
  0x88   : > { %7622 = vmatmul.mubr.msk.f32.gmra.mxu0 %vm286_vm0, %v9014_v63 }
  0x89   : > { %7658 = vmatmul.mubr.msk.f32.gmra.mxu1 %vm286_vm0, %v275_v0  ;;  %720 = vmatprep.mubr.f32.mxu0 %v12721_v4 }
  0x8a   : > { %903 = vmatprep.mubr.f32.mxu1 %v12721_v4 }
  0x8c   : > { %7623 = vmatmul.mubr.msk.f32.gmra.mxu0 %vm286_vm0, %v9023_v1 }
  0x8d   : > { %7659 = vmatmul.mubr.msk.f32.gmra.mxu1 %vm286_vm0, %v276_v2  ;;  %726 = vmatprep.mubr.f32.mxu0 %v12721_v4 }
  0x8e   : > { %907 = vmatprep.mubr.f32.mxu1 %v12721_v4 }
  0x90   : > { %7624 = vmatmul.mubr.msk.f32.gmra.mxu0 %vm286_vm0, %v9032_v3 }
  0x91   : > { %7660 = vmatmul.mubr.msk.f32.gmra.mxu1 %vm286_vm0, %v277_v5  ;;  %731 = vmatprep.mubr.f32.mxu0 %v12721_v4 }
  0x92   : > { %911 = vmatprep.mubr.f32.mxu1 %v12721_v4 }
  0x94   : > { %7625 = vmatmul.mubr.msk.f32.gmra.mxu0 %vm286_vm0, %v9041_v6 }
  0x95   : > { %7661 = vmatmul.mubr.msk.f32.gmra.mxu1 %vm286_vm0, %v278_v8  ;;  %737 = vmatprep.mubr.f32.mxu0 %v12721_v4 }
  0x96   : > { %915 = vmatprep.mubr.f32.mxu1 %v12721_v4 }
  0x98   : > { %7626 = vmatmul.mubr.msk.f32.gmra.mxu0 %vm286_vm0, %v9050_v10 }
  0x99   : > { %7662 = vmatmul.mubr.msk.f32.gmra.mxu1 %vm286_vm0, %v279_v12  ;;  %743 = vmatprep.mubr.f32.mxu0 %v12721_v4 }
  0x9a   : > { %919 = vmatprep.mubr.f32.mxu1 %v12721_v4 }
  0x9c   : > { %7627 = vmatmul.mubr.msk.f32.gmra.mxu0 %vm286_vm0, %v9059_v14 }
  0x9d   : > { %7663 = vmatmul.mubr.msk.f32.gmra.mxu1 %vm286_vm0, %v280_v16  ;;  %748 = vmatprep.mubr.f32.mxu0 %v12721_v4 }
  0x9e   : > { %923 = vmatprep.mubr.f32.mxu1 %v12721_v4 }
  0xa0   : > { %7628 = vmatmul.mubr.msk.f32.gmra.mxu0 %vm286_vm0, %v9068_v18 }
  0xa1   : > { %7664 = vmatmul.mubr.msk.f32.gmra.mxu1 %vm286_vm0, %v281_v20  ;;  %754 = vmatprep.mubr.f32.mxu0 %v12721_v4 }
  0xa2   : > { %927 = vmatprep.mubr.f32.mxu1 %v12721_v4 }
  0xa4   : > { %7629 = vmatmul.mubr.msk.f32.gmra.mxu0 %vm286_vm0, %v9077_v21 }
  0xa5   : > { %7665 = vmatmul.mubr.msk.f32.gmra.mxu1 %vm286_vm0, %v282_v22  ;;  %760 = vmatprep.mubr.f32.mxu0 %v12721_v4 }
  0xa6   : > { %931 = vmatprep.mubr.f32.mxu1 %v12721_v4 }
  0xa8   : > { %7630 = vmatmul.mubr.msk.f32.gmra.mxu0 %vm286_vm0, %v9086_v24 }
  0xa9   : > { %7666 = vmatmul.mubr.msk.f32.gmra.mxu1 %vm286_vm0, %v283_v26  ;;  %1905 = vmatprep.mubr.f32.mxu0 %v12721_v4 }
  0xaa   : > { %1180 = vmatprep.mubr.f32.mxu1 %v12721_v4 }
  0xac   : > { %7743 = vmatmul.mubr.msk.f32.vlgmr.msra.gmra.mxu0 %vm286_vm0, %v8765_v7 }
  0xad   : > { %7669 = vmatmul.mubr.msk.f32.vlgmr.msra.gmra.mxu1 %vm286_vm0, %v8765_v7  ;;  %3369 = vmatpush1.msra.mxu0 %v7889_v28 }
  0xae   : > { %2709 = vmatpush1.msra.mxu1 %v7815_v30  ;;  %1185 = vmatprep.mubr.f32.mxu1 %v12721_v4 }
  0xaf   : > { %1909 = vmatprep.mubr.f32.mxu0 %v12721_v4 }
  0xb0   : > { %7744 = vmatmul.mubr.msk.f32.gmra.mxu0 %vm286_vm0, %v8772_v9 }
  0xb1   : > { %7670 = vmatmul.mubr.msk.f32.gmra.mxu1 %vm286_vm0, %v8772_v9  ;;  %1914 = vmatprep.mubr.f32.mxu0 %v12721_v4 }
  0xb2   : > { %1190 = vmatprep.mubr.f32.mxu1 %v12721_v4 }
  0xb4   : > { %7745 = vmatmul.mubr.msk.f32.gmra.mxu0 %vm286_vm0, %v8783_v11 }
  0xb5   : > { %7671 = vmatmul.mubr.msk.f32.gmra.mxu1 %vm286_vm0, %v8783_v11  ;;  %1919 = vmatprep.mubr.f32.mxu0 %v12721_v4 }
  0xb6   : > { %1195 = vmatprep.mubr.f32.mxu1 %v12721_v4 }
  0xb8   : > { %7746 = vmatmul.mubr.msk.f32.gmra.mxu0 %vm286_vm0, %v8792_v13 }
  0xb9   : > { %7672 = vmatmul.mubr.msk.f32.gmra.mxu1 %vm286_vm0, %v8792_v13  ;;  %1923 = vmatprep.mubr.f32.mxu0 %v12721_v4 }
  0xba   : > { %1200 = vmatprep.mubr.f32.mxu1 %v12721_v4 }
  0xbc   : > { %7747 = vmatmul.mubr.msk.f32.gmra.mxu0 %vm286_vm0, %v8801_v15 }
  0xbd   : > { %7673 = vmatmul.mubr.msk.f32.gmra.mxu1 %vm286_vm0, %v8801_v15  ;;  %1928 = vmatprep.mubr.f32.mxu0 %v12721_v4 }
  0xbe   : > { %1205 = vmatprep.mubr.f32.mxu1 %v12721_v4 }
  0xc0   : > { %7748 = vmatmul.mubr.msk.f32.gmra.mxu0 %vm286_vm0, %v8810_v17 }
  0xc1   : > { %7674 = vmatmul.mubr.msk.f32.gmra.mxu1 %vm286_vm0, %v8810_v17  ;;  %1933 = vmatprep.mubr.f32.mxu0 %v12721_v4 }
  0xc2   : > { %1210 = vmatprep.mubr.f32.mxu1 %v12721_v4 }
  0xc4   : > { %7749 = vmatmul.mubr.msk.f32.gmra.mxu0 %vm286_vm0, %v8819_v19 }
  0xc5   : > { %7675 = vmatmul.mubr.msk.f32.gmra.mxu1 %vm286_vm0, %v8819_v19  ;;  %1938 = vmatprep.mubr.f32.mxu0 %v12721_v4 }
  0xc6   : > { %1216 = vmatprep.mubr.f32.mxu1 %v12721_v4 }
  0xc8   : > { %7750 = vmatmul.mubr.msk.f32.gmra.mxu0 %vm286_vm0, %v8834_v23 }
  0xc9   : > { %7676 = vmatmul.mubr.msk.f32.gmra.mxu1 %vm286_vm0, %v8834_v23  ;;  %1944 = vmatprep.mubr.f32.mxu0 %v12721_v4 }
  0xca   : > { %1222 = vmatprep.mubr.f32.mxu1 %v12721_v4 }
  0xcc   : > { %7751 = vmatmul.mubr.msk.f32.gmra.mxu0 %vm286_vm0, %v8843_v25 }
  0xcd   : > { %7677 = vmatmul.mubr.msk.f32.gmra.mxu1 %vm286_vm0, %v8843_v25  ;;  %1950 = vmatprep.mubr.f32.mxu0 %v12721_v4 }
  0xce   : > { %1228 = vmatprep.mubr.f32.mxu1 %v12721_v4 }
  0xd0   : > { %7752 = vmatmul.mubr.msk.f32.gmra.mxu0 %vm286_vm0, %v8852_v27 }
  0xd1   : > { %7678 = vmatmul.mubr.msk.f32.gmra.mxu1 %vm286_vm0, %v8852_v27  ;;  %1955 = vmatprep.mubr.f32.mxu0 %v12721_v4 }
  0xd2   : > { %1234 = vmatprep.mubr.f32.mxu1 %v12721_v4 }
  0xd4   : > { %7753 = vmatmul.mubr.msk.f32.gmra.mxu0 %vm286_vm0, %v8861_v29 }
  0xd5   : > { %7679 = vmatmul.mubr.msk.f32.gmra.mxu1 %vm286_vm0, %v8861_v29  ;;  %1961 = vmatprep.mubr.f32.mxu0 %v12721_v4 }
  0xd6   : > { %1240 = vmatprep.mubr.f32.mxu1 %v12721_v4 }
  0xd8   : > { %7754 = vmatmul.mubr.msk.f32.gmra.mxu0 %vm286_vm0, %v8870_v31 }
  0xd9   : > { %7680 = vmatmul.mubr.msk.f32.gmra.mxu1 %vm286_vm0, %v8870_v31  ;;  %1967 = vmatprep.mubr.f32.mxu0 %v12721_v4 }
  0xda   : > { %1246 = vmatprep.mubr.f32.mxu1 %v12721_v4 }
  0xdc   : > { %v569_v7 = vpop.f32.mrf.mxu0  ;;  %7755 = vmatmul.mubr.msk.f32.gmra.mxu0 %vm286_vm0, %v8879_v33 }
  0xdd   : > { %v9172_v9 = vpop.f32.mrf.mxu1  ;;  %7681 = vmatmul.mubr.msk.f32.gmra.mxu1 %vm286_vm0, %v8879_v33  ;;  %1972 = vmatprep.mubr.f32.mxu0 %v12721_v4 }
  0xde   : > { %1252 = vmatprep.mubr.f32.mxu1 %v12721_v4  ;;  %v570_v11 = vpop.f32.mrf.mxu0 }
  0xdf   : > { %v769_v13 = vpop.f32.mrf.mxu1  ;;  %v969_v25 = vrot.slane %v570_v11, 6 }
  0xe0   : > { %v574_v15 = vpop.f32.mrf.mxu0  ;;  %7756 = vmatmul.mubr.msk.f32.gmra.mxu0 %vm286_vm0, %v8888_v35  ;;  %v1005_v27 = vrot.slane %v769_v13, 6 }
  0xe1   : > { %v9180_v17 = vpop.f32.mrf.mxu1  ;;  %7682 = vmatmul.mubr.msk.f32.gmra.mxu1 %vm286_vm0, %v8888_v35  ;;  %1978 = vmatprep.mubr.f32.mxu0 %v12721_v4 }
  0xe2   : > { %1258 = vmatprep.mubr.f32.mxu1 %v12721_v4  ;;  %v9188_v19 = vpop.f32.mrf.mxu0 }
  0xe3   : > { %v9190_v23 = vpop.f32.mrf.mxu1  ;;  %v970_v29 = vrot.slane %v9188_v19, 6 }
  0xe4   : > { %v1006_v31 = vrot.slane %v9190_v23, 6  ;;  %v579_v32 = vpop.f32.mrf.mxu0  ;;  %7757 = vmatmul.mubr.msk.f32.gmra.mxu0 %vm286_vm0, %v8897_v37 }
  0xe5   : > { %v9194_v33 = vpop.f32.mrf.mxu1  ;;  %7683 = vmatmul.mubr.msk.f32.gmra.mxu1 %vm286_vm0, %v8897_v37  ;;  %1984 = vmatprep.mubr.f32.mxu0 %v12721_v4  ;;  %v971_v34 = vsel %vm968_vm1, %v969_v25, %v970_v29 }
  0xe6   : > { %1264 = vmatprep.mubr.f32.mxu1 %v12721_v4  ;;  %v1007_v35 = vsel %vm968_vm1, %v1005_v27, %v1006_v31  ;;  %v580_v36 = vpop.f32.mrf.mxu0 }
  0xe7   : > { %v781_v38 = vpop.f32.mrf.mxu1 }
  0xe8   : > { %v583_v40 = vpop.f32.mrf.mxu0  ;;  %7758 = vmatmul.mubr.msk.f32.gmra.mxu0 %vm286_vm0, %v8906_v39 }
  0xe9   : > { %v9208_v42 = vpop.f32.mrf.mxu1  ;;  %7684 = vmatmul.mubr.msk.f32.gmra.mxu1 %vm286_vm0, %v8906_v39  ;;  %1989 = vmatprep.mubr.f32.mxu0 %v12721_v4 }
  0xea   : > { %12731 = vst [vmem:[#allocation5_spill] sm:$0xff] %v9208_v42  ;;  %1270 = vmatprep.mubr.f32.mxu1 %v12721_v4  ;;  %v9216_v37 = vpop.f32.mrf.mxu0 }
  0xeb   : > { %v9218_v44 = vpop.f32.mrf.mxu1  ;;  %v972_v52 = vrot.slane %v9216_v37, 6 }
  0xec   : > { %v588_v46 = vpop.f32.mrf.mxu0  ;;  %7759 = vmatmul.mubr.msk.f32.gmra.mxu0 %vm286_vm0, %v8915_v41  ;;  %v1008_v54 = vrot.slane %v9218_v44, 6 }
  0xed   : > { %v9220_v48 = vpop.f32.mrf.mxu1  ;;  %7685 = vmatmul.mubr.msk.f32.gmra.mxu1 %vm286_vm0, %v8915_v41  ;;  %1995 = vmatprep.mubr.f32.mxu0 %v12721_v4 }
  0xee   : > { %12732 = vst [vmem:[#allocation6_spill] sm:$0xff] %v9220_v48  ;;  %1276 = vmatprep.mubr.f32.mxu1 %v12721_v4  ;;  %v9228_v39 = vpop.f32.mrf.mxu0 }
  0xef   : > { %v9230_v50 = vpop.f32.mrf.mxu1  ;;  %v973_v56 = vrot.slane %v9228_v39, 6 }
  0xf0   : > { %v1009_v58 = vrot.slane %v9230_v50, 6  ;;  %v593_v60 = vpop.f32.mrf.mxu0  ;;  %7760 = vmatmul.mubr.msk.f32.gmra.mxu0 %vm286_vm0, %v8924_v43 }
  0xf1   : > { %v9236_v62 = vpop.f32.mrf.mxu1  ;;  %7686 = vmatmul.mubr.msk.f32.gmra.mxu1 %vm286_vm0, %v8924_v43  ;;  %2001 = vmatprep.mubr.f32.mxu0 %v12721_v4  ;;  %v974_v41 = vsel %vm968_vm1, %v972_v52, %v973_v56 }
  0xf2   : > { %12733 = vst [vmem:[#allocation7_spill] sm:$0xff] %v9236_v62  ;;  %1282 = vmatprep.mubr.f32.mxu1 %v12721_v4  ;;  %v1010_v0 = vsel %vm968_vm1, %v1008_v54, %v1009_v58  ;;  %v594_v2 = vpop.f32.mrf.mxu0 }
  0xf3   : > { %v798_v5 = vpop.f32.mrf.mxu1 }
  0xf4   : > { %v597_v8 = vpop.f32.mrf.mxu0  ;;  %7761 = vmatmul.mubr.msk.f32.gmra.mxu0 %vm286_vm0, %v8933_v45 }
  0xf5   : > { %v801_v12 = vpop.f32.mrf.mxu1  ;;  %7687 = vmatmul.mubr.msk.f32.gmra.mxu1 %vm286_vm0, %v8933_v45  ;;  %v9254_v43 = vadd.f32 %v969_v25, %v597_v8  ;;  %2006 = vmatprep.mubr.f32.mxu0 %v12721_v4 }
  0xf6   : > { %v9256_v16 = vadd.f32 %v1005_v27, %v801_v12  ;;  %1288 = vmatprep.mubr.f32.mxu1 %v12721_v4  ;;  %v9260_v20 = vpop.f32.mrf.mxu0 }
  0xf7   : > { %v9262_v22 = vpop.f32.mrf.mxu1  ;;  %v975_v13 = vrot.slane %v9260_v20, 6 }
  0xf8   : > { %12734 = vst [vmem:[#allocation8_spill] sm:$0xff] %v9256_v16  ;;  %v603_v26 = vpop.f32.mrf.mxu0  ;;  %7762 = vmatmul.mubr.msk.f32.gmra.mxu0 %vm286_vm0, %v8942_v47 }
  0xf9   : > { %v807_v28 = vpop.f32.mrf.mxu1  ;;  %7688 = vmatmul.mubr.msk.f32.gmra.mxu1 %vm286_vm0, %v8942_v47  ;;  %v9268_v45 = vadd.f32 %v971_v34, %v603_v26  ;;  %2012 = vmatprep.mubr.f32.mxu0 %v12721_v4  ;;  %v1011_v47 = vrot.slane %v9262_v22, 6 }
  0xfa   : > { %v9270_v30 = vadd.f32 %v1007_v35, %v807_v28  ;;  %1294 = vmatprep.mubr.f32.mxu1 %v12721_v4  ;;  %v9274_v7 = vpop.f32.mrf.mxu0 }
  0xfb   : > { %v9276_v11 = vpop.f32.mrf.mxu1  ;;  %v976_v15 = vrot.slane %v9274_v7, 6 }
  0xfc   : > { %12735 = vst [vmem:[#allocation9_spill] sm:$0xff] %v9270_v30  ;;  %v1012_v25 = vrot.slane %v9276_v11, 6  ;;  %v609_v27 = vpop.f32.mrf.mxu0  ;;  %7763 = vmatmul.mubr.msk.f32.gmra.mxu0 %vm286_vm0, %v8951_v49 }
  0xfd   : > { %v813_v32 = vpop.f32.mrf.mxu1  ;;  %7689 = vmatmul.mubr.msk.f32.gmra.mxu1 %vm286_vm0, %v8951_v49  ;;  %v9288_v34 = vadd.f32 %v970_v29, %v609_v27  ;;  %2018 = vmatprep.mubr.f32.mxu0 %v12721_v4  ;;  %v977_v36 = vsel %vm968_vm1, %v975_v13, %v976_v15 }
  0xfe   : > { %v9292_v35 = vadd.f32 %v1006_v31, %v813_v32  ;;  %1300 = vmatprep.mubr.f32.mxu1 %v12721_v4  ;;  %v611_v38 = vpop.f32.mrf.mxu0  ;;  %v1013_v49 = vsel %vm968_vm1, %v1011_v47, %v1012_v25 }
  0xff   : > { %v815_v40 = vpop.f32.mrf.mxu1 }
 0x100   : > { %12736 = vst [vmem:[#allocation10_spill] sm:$0xff] %v9292_v35  ;;  %v614_v19 = vpop.f32.mrf.mxu0  ;;  %7764 = vmatmul.mubr.msk.f32.gmra.mxu0 %vm286_vm0, %v8960_v51 }
 0x101   : > { %v818_v29 = vpop.f32.mrf.mxu1  ;;  %7690 = vmatmul.mubr.msk.f32.gmra.mxu1 %vm286_vm0, %v8960_v51  ;;  %v9306_v23 = vadd.f32 %v972_v52, %v614_v19  ;;  %2023 = vmatprep.mubr.f32.mxu0 %v12721_v4 }
 0x102   : > { %v9308_v31 = vadd.f32 %v1008_v54, %v818_v29  ;;  %1306 = vmatprep.mubr.f32.mxu1 %v12721_v4  ;;  %v9312_v37 = vpop.f32.mrf.mxu0 }
 0x103   : > { %v9314_v44 = vpop.f32.mrf.mxu1  ;;  %v978_v5 = vrot.slane %v9312_v37, 6 }
 0x104   : > { %12737 = vst [vmem:[#allocation11_spill] sm:$0xff] %v9308_v31  ;;  %v620_v46 = vpop.f32.mrf.mxu0  ;;  %7765 = vmatmul.mubr.msk.f32.gmra.mxu0 %vm286_vm0, %v8969_v53 }
 0x105   : > { %v824_v60 = vpop.f32.mrf.mxu1  ;;  %7691 = vmatmul.mubr.msk.f32.gmra.mxu1 %vm286_vm0, %v8969_v53  ;;  %v9320_v51 = vadd.f32 %v974_v41, %v620_v46  ;;  %2029 = vmatprep.mubr.f32.mxu0 %v12721_v4  ;;  %v1014_v53 = vrot.slane %v9314_v44, 6 }
 0x106   : > { %v9322_v52 = vadd.f32 %v1010_v0, %v824_v60  ;;  %1312 = vmatprep.mubr.f32.mxu1 %v12721_v4  ;;  %v9326_v54 = vpop.f32.mrf.mxu0 }
 0x107   : > { %v9328_v2 = vpop.f32.mrf.mxu1  ;;  %v979_v8 = vrot.slane %v9326_v54, 6 }
 0x108   : > { %12738 = vst [vmem:[#allocation12_spill] sm:$0xff] %v9322_v52  ;;  %v1015_v12 = vrot.slane %v9328_v2, 6  ;;  %v626_v41 = vpop.f32.mrf.mxu0  ;;  %7766 = vmatmul.mubr.msk.f32.gmra.mxu0 %vm286_vm0, %v8978_v55 }
 0x109   : > { %v830_v20 = vpop.f32.mrf.mxu1  ;;  %7692 = vmatmul.mubr.msk.f32.gmra.mxu1 %vm286_vm0, %v8978_v55  ;;  %v9340_v0 = vadd.f32 %v973_v56, %v626_v41  ;;  %2035 = vmatprep.mubr.f32.mxu0 %v12721_v4  ;;  %v980_v26 = vsel %vm968_vm1, %v978_v5, %v979_v8 }
 0x10a   : > { %v9344_v22 = vadd.f32 %v1009_v58, %v830_v20  ;;  %1318 = vmatprep.mubr.f32.mxu1 %v12721_v4  ;;  %v628_v28 = vpop.f32.mrf.mxu0  ;;  %v1016_v55 = vsel %vm968_vm1, %v1014_v53, %v1015_v12 }
 0x10b   : > { %v832_v27 = vpop.f32.mrf.mxu1 }
 0x10c   : > { %12739 = vst [vmem:[#allocation13_spill] sm:$0xff] %v9344_v22  ;;  %v631_v39 = vpop.f32.mrf.mxu0  ;;  %7767 = vmatmul.mubr.msk.f32.gmra.mxu0 %vm286_vm0, %v8987_v57  ;;  %v8345_v22 = vld [vmem:[%s8756_s11 + $0x1b0] sm:$0xff] }
 0x10d   : > { %v835_v56 = vpop.f32.mrf.mxu1  ;;  %7693 = vmatmul.mubr.msk.f32.gmra.mxu1 %vm286_vm0, %v8987_v57  ;;  %v9358_v50 = vadd.f32 %v975_v13, %v631_v39  ;;  %2040 = vmatprep.mubr.f32.mxu0 %v12721_v4 }
 0x10e   : > { %v9360_v58 = vadd.f32 %v1011_v47, %v835_v56  ;;  %1324 = vmatprep.mubr.f32.mxu1 %v12721_v4  ;;  %v9364_v32 = vpop.f32.mrf.mxu0 }
 0x10f   : > { %v837_v38 = vpop.f32.mrf.mxu1  ;;  %v981_v37 = vrot.slane %v9364_v32, 6 }
 0x110   : > { %12740 = vst [vmem:[#allocation14_spill] sm:$0xff] %v9360_v58  ;;  %v637_v40 = vpop.f32.mrf.mxu0  ;;  %7768 = vmatmul.mubr.msk.f32.gmra.mxu0 %vm286_vm0, %v8996_v59  ;;  %v8344_v58 = vld [vmem:[%s8756_s11 + $0x1a8] sm:$0xff] }
 0x111   : > { %v840_v19 = vpop.f32.mrf.mxu1  ;;  %7694 = vmatmul.mubr.msk.f32.gmra.mxu1 %vm286_vm0, %v8996_v59  ;;  %v9370_v57 = vadd.f32 %v977_v36, %v637_v40  ;;  %2046 = vmatprep.mubr.f32.mxu0 %v12721_v4 }
 0x112   : > { %v9372_v13 = vadd.f32 %v1013_v49, %v840_v19  ;;  %1330 = vmatprep.mubr.f32.mxu1 %v12721_v4  ;;  %v9376_v47 = vpop.f32.mrf.mxu0 }
 0x113   : > { %v842_v29 = vpop.f32.mrf.mxu1  ;;  %v982_v44 = vrot.slane %v9376_v47, 6 }
 0x114   : > { %12741 = vst [vmem:[#allocation15_spill] sm:$0xff] %v9372_v13  ;;  %v643_v46 = vpop.f32.mrf.mxu0  ;;  %7769 = vmatmul.mubr.msk.f32.gmra.mxu0 %vm286_vm0, %v9005_v61 }
 0x115   : > { %v845_v60 = vpop.f32.mrf.mxu1  ;;  %7695 = vmatmul.mubr.msk.f32.gmra.mxu1 %vm286_vm0, %v9005_v61  ;;  %v9386_v59 = vadd.f32 %v976_v15, %v643_v46  ;;  %2052 = vmatprep.mubr.f32.mxu0 %v12721_v4  ;;  %v983_v49 = vsel %vm968_vm1, %v981_v37, %v982_v44 }
 0x116   : > { %v9390_v36 = vadd.f32 %v1012_v25, %v845_v60  ;;  %1336 = vmatprep.mubr.f32.mxu1 %v12721_v4  ;;  %v645_v41 = vpop.f32.mrf.mxu0 }
 0x117   : > { %v847_v20 = vpop.f32.mrf.mxu1 }
 0x118   : > { %12742 = vst [vmem:[#allocation16_spill] sm:$0xff] %v9390_v36  ;;  %v648_v28 = vpop.f32.mrf.mxu0  ;;  %7770 = vmatmul.mubr.msk.f32.gmra.mxu0 %vm286_vm0, %v9014_v63 }
 0x119   : > { %v850_v61 = vpop.f32.mrf.mxu1  ;;  %7696 = vmatmul.mubr.msk.f32.gmra.mxu1 %vm286_vm0, %v9014_v63  ;;  %v9401_v7 = vadd.f32 %v978_v5, %v648_v28  ;;  %2057 = vmatprep.mubr.f32.mxu0 %v12721_v4 }
 0x11a   : > { %v9403_v11 = vadd.f32 %v1014_v53, %v850_v61  ;;  %1342 = vmatprep.mubr.f32.mxu1 %v12721_v4  ;;  %v650_v15 = vpop.f32.mrf.mxu0 }
 0x11b   : > { %v852_v25 = vpop.f32.mrf.mxu1  ;;  %v984_v32 = vrot.slane %v650_v15, 6 }
 0x11c   : > { %12743 = vst [vmem:[#allocation17_spill] sm:$0xff] %v9403_v11  ;;  %v654_v27 = vpop.f32.mrf.mxu0  ;;  %7771 = vmatmul.mubr.msk.f32.gmra.mxu0 %vm286_vm0, %v9023_v1 }
 0x11d   : > { %v855_v39 = vpop.f32.mrf.mxu1  ;;  %7697 = vmatmul.mubr.msk.f32.gmra.mxu1 %vm286_vm0, %v9023_v1  ;;  %v9411_v56 = vadd.f32 %v980_v26, %v654_v27  ;;  %2063 = vmatprep.mubr.f32.mxu0 %v12721_v4 }
 0x11e   : > { %v9413_v63 = vadd.f32 %v1016_v55, %v855_v39  ;;  %1348 = vmatprep.mubr.f32.mxu1 %v12721_v4  ;;  %v9417_v5 = vpop.f32.mrf.mxu0 }
 0x11f   : > { %v857_v53 = vpop.f32.mrf.mxu1  ;;  %v985_v38 = vrot.slane %v9417_v5, 6 }
 0x120   : > { %12744 = vst [vmem:[#allocation18_spill] sm:$0xff] %v9413_v63  ;;  %v660_v40 = vpop.f32.mrf.mxu0  ;;  %7772 = vmatmul.mubr.msk.f32.gmra.mxu0 %vm286_vm0, %v9032_v3 }
 0x121   : > { %v860_v19 = vpop.f32.mrf.mxu1  ;;  %7698 = vmatmul.mubr.msk.f32.gmra.mxu1 %vm286_vm0, %v9032_v3  ;;  %v9426_v1 = vadd.f32 %v979_v8, %v660_v40  ;;  %2069 = vmatprep.mubr.f32.mxu0 %v12721_v4  ;;  %v986_v55 = vsel %vm968_vm1, %v984_v32, %v985_v38 }
 0x122   : > { %v9430_v26 = vadd.f32 %v1015_v12, %v860_v19  ;;  %1354 = vmatprep.mubr.f32.mxu1 %v12721_v4  ;;  %v662_v29 = vpop.f32.mrf.mxu0 }
 0x123   : > { %v862_v46 = vpop.f32.mrf.mxu1 }
 0x124   : > { %12745 = vst [vmem:[#allocation19_spill] sm:$0xff] %v9430_v26  ;;  %v665_v60 = vpop.f32.mrf.mxu0  ;;  %7773 = vmatmul.mubr.msk.f32.gmra.mxu0 %vm286_vm0, %v9041_v6  ;;  %v8342_v26 = vld [vmem:[%s8756_s11 + $0x198] sm:$0xff] }
 0x125   : > { %v865_v3 = vpop.f32.mrf.mxu1  ;;  %7699 = vmatmul.mubr.msk.f32.gmra.mxu1 %vm286_vm0, %v9041_v6  ;;  %v9441_v54 = vadd.f32 %v981_v37, %v665_v60  ;;  %2074 = vmatprep.mubr.f32.mxu0 %v12721_v4 }
 0x126   : > { %1360 = vmatprep.mubr.f32.mxu1 %v12721_v4  ;;  %v667_v2 = vpop.f32.mrf.mxu0 }
 0x127   : > { %v866_v8 = vpop.f32.mrf.mxu1  ;;  %v987_v28 = vrot.slane %v667_v2, 6 }
 0x128   : > { %v671_v12 = vpop.f32.mrf.mxu0  ;;  %7774 = vmatmul.mubr.msk.f32.gmra.mxu0 %vm286_vm0, %v9050_v10 }
 0x129   : > { %v869_v41 = vpop.f32.mrf.mxu1  ;;  %7700 = vmatmul.mubr.msk.f32.gmra.mxu1 %vm286_vm0, %v9050_v10  ;;  %v9449_v20 = vadd.f32 %v983_v49, %v671_v12  ;;  %2080 = vmatprep.mubr.f32.mxu0 %v12721_v4 }
 0x12a   : > { %1366 = vmatprep.mubr.f32.mxu1 %v12721_v4  ;;  %v9453_v6 = vpop.f32.mrf.mxu0 }
 0x12b   : > { %v870_v37 = vpop.f32.mrf.mxu1  ;;  %v988_v61 = vrot.slane %v9453_v6, 6 }
 0x12c   : > { %v677_v15 = vpop.f32.mrf.mxu0  ;;  %7775 = vmatmul.mubr.msk.f32.gmra.mxu0 %vm286_vm0, %v9059_v14 }
 0x12d   : > { %v873_v25 = vpop.f32.mrf.mxu1  ;;  %7701 = vmatmul.mubr.msk.f32.gmra.mxu1 %vm286_vm0, %v9059_v14  ;;  %v9462_v10 = vadd.f32 %v982_v44, %v677_v15  ;;  %2086 = vmatprep.mubr.f32.mxu0 %v12721_v4  ;;  %v989_v49 = vsel %vm968_vm1, %v987_v28, %v988_v61 }
 0x12e   : > { %1372 = vmatprep.mubr.f32.mxu1 %v12721_v4  ;;  %v679_v27 = vpop.f32.mrf.mxu0  ;;  %v8327_v25 = vld [vmem:[%s8756_s11 + $0x120] sm:$0xff] }
 0x12f   : > { %v874_v39 = vpop.f32.mrf.mxu1 }
 0x130   : > { %v682_v53 = vpop.f32.mrf.mxu0  ;;  %7776 = vmatmul.mubr.msk.f32.gmra.mxu0 %vm286_vm0, %v9068_v18 }
 0x131   : > { %v877_v40 = vpop.f32.mrf.mxu1  ;;  %7702 = vmatmul.mubr.msk.f32.gmra.mxu1 %vm286_vm0, %v9068_v18  ;;  %v9473_v14 = vadd.f32 %v984_v32, %v682_v53  ;;  %2091 = vmatprep.mubr.f32.mxu0 %v12721_v4  ;;  %v8328_v53 = vld [vmem:[%s8756_s11 + $0x128] sm:$0xff] }
 0x132   : > { %1378 = vmatprep.mubr.f32.mxu1 %v12721_v4  ;;  %v684_v47 = vpop.f32.mrf.mxu0 }
 0x133   : > { %v878_v44 = vpop.f32.mrf.mxu1  ;;  %v990_v60 = vrot.slane %v684_v47, 6 }
 0x134   : > { %v688_v19 = vpop.f32.mrf.mxu0  ;;  %7777 = vmatmul.mubr.msk.f32.gmra.mxu0 %vm286_vm0, %v9077_v21 }
 0x135   : > { %v881_v29 = vpop.f32.mrf.mxu1  ;;  %7703 = vmatmul.mubr.msk.f32.gmra.mxu1 %vm286_vm0, %v9077_v21  ;;  %v9481_v46 = vadd.f32 %v986_v55, %v688_v19  ;;  %2097 = vmatprep.mubr.f32.mxu0 %v12721_v4 }
 0x136   : > { %1384 = vmatprep.mubr.f32.mxu1 %v12721_v4  ;;  %v9485_v18 = vpop.f32.mrf.mxu0 }
 0x137   : > { %v882_v32 = vpop.f32.mrf.mxu1  ;;  %v991_v3 = vrot.slane %v9485_v18, 6 }
 0x138   : > { %v694_v2 = vpop.f32.mrf.mxu0  ;;  %7778 = vmatmul.mubr.msk.f32.gmra.mxu0 %vm286_vm0, %v9086_v24 }
 0x139   : > { %v885_v8 = vpop.f32.mrf.mxu1  ;;  %7704 = vmatmul.mubr.msk.f32.gmra.mxu1 %vm286_vm0, %v9086_v24  ;;  %v9494_v21 = vadd.f32 %v985_v38, %v694_v2  ;;  %2103 = vmatprep.mubr.f32.mxu0 %v12721_v4  ;;  %v992_v55 = vsel %vm968_vm1, %v990_v60, %v991_v3  ;;  %v8329_v2 = vld [vmem:[%s8756_s11 + $0x130] sm:$0xff] }
 0x13a   : > { %1390 = vmatprep.mubr.f32.mxu1 %v12721_v4  ;;  %v696_v12 = vpop.f32.mrf.mxu0 }
 0x13b   : > { %v886_v41 = vpop.f32.mrf.mxu1 }
 0x13c   : > { %v699_v37 = vpop.f32.mrf.mxu0  ;;  %7779 = vmatmul.mubr.msk.f32.gmra.mxu0 %vm286_vm0, %v8327_v25 }
 0x13d   : > { %v889_v15 = vpop.f32.mrf.mxu1  ;;  %7705 = vmatmul.mubr.msk.f32.gmra.mxu1 %vm286_vm0, %v8327_v25  ;;  %v9504_v24 = vadd.f32 %v987_v28, %v699_v37  ;;  %2108 = vmatprep.mubr.f32.mxu0 %v12721_v4  ;;  %v8330_v25 = vld [vmem:[%s8756_s11 + $0x138] sm:$0xff] }
 0x13e   : > { %1396 = vmatprep.mubr.f32.mxu1 %v12721_v4  ;;  %v9508_v5 = vpop.f32.mrf.mxu0 }
 0x13f   : > { %v890_v38 = vpop.f32.mrf.mxu1  ;;  %v993_v44 = vrot.slane %v9508_v5, 6 }
 0x140   : > { %v705_v27 = vpop.f32.mrf.mxu0  ;;  %7780 = vmatmul.mubr.msk.f32.gmra.mxu0 %vm286_vm0, %v8328_v53 }
 0x141   : > { %v893_v39 = vpop.f32.mrf.mxu1  ;;  %7706 = vmatmul.mubr.msk.f32.gmra.mxu1 %vm286_vm0, %v8328_v53  ;;  %v9513_v40 = vadd.f32 %v989_v49, %v705_v27  ;;  %2114 = vmatprep.mubr.f32.mxu0 %v12721_v4 }
 0x142   : > { %1402 = vmatprep.mubr.f32.mxu1 %v12721_v4  ;;  %v9517_v28 = vpop.f32.mrf.mxu0  ;;  %v8331_v39 = vld [vmem:[%s8756_s11 + $0x140] sm:$0xff] }
 0x143   : > { %v894_v47 = vpop.f32.mrf.mxu1  ;;  %v994_v19 = vrot.slane %v9517_v28, 6 }
 0x144   : > { %v711_v29 = vpop.f32.mrf.mxu0  ;;  %7781 = vmatmul.mubr.msk.f32.gmra.mxu0 %vm286_vm0, %v8329_v2 }
 0x145   : > { %v897_v32 = vpop.f32.mrf.mxu1  ;;  %7707 = vmatmul.mubr.msk.f32.gmra.mxu1 %vm286_vm0, %v8329_v2  ;;  %v9526_v49 = vadd.f32 %v988_v61, %v711_v29  ;;  %2120 = vmatprep.mubr.f32.mxu0 %v12721_v4  ;;  %v995_v8 = vsel %vm968_vm1, %v993_v44, %v994_v19 }
 0x146   : > { %1408 = vmatprep.mubr.f32.mxu1 %v12721_v4  ;;  %v713_v12 = vpop.f32.mrf.mxu0 }
 0x147   : > { %v898_v41 = vpop.f32.mrf.mxu1 }
 0x148   : > { %v716_v37 = vpop.f32.mrf.mxu0  ;;  %7782 = vmatmul.mubr.msk.f32.gmra.mxu0 %vm286_vm0, %v8330_v25  ;;  %v8332_v41 = vld [vmem:[%s8756_s11 + $0x148] sm:$0xff] }
 0x149   : > { %v901_v15 = vpop.f32.mrf.mxu1  ;;  %7708 = vmatmul.mubr.msk.f32.gmra.mxu1 %vm286_vm0, %v8330_v25  ;;  %v9536_v6 = vadd.f32 %v990_v60, %v716_v37  ;;  %2125 = vmatprep.mubr.f32.mxu0 %v12721_v4  ;;  %v7964_v37 = vld [vmem:[%s12709_s1 + $0x58] sm:$0xff] }
 0x14a   : > { %1414 = vmatprep.mubr.f32.mxu1 %v12721_v4  ;;  %v9540_v61 = vpop.f32.mrf.mxu0  ;;  %4092 = vmatprep.subr.mxu1 %v7964_v37 }
 0x14b   : > { %v902_v5 = vpop.f32.mrf.mxu1  ;;  %v996_v29 = vrot.slane %v9540_v61, 6 }
 0x14c   : > { %v722_v38 = vpop.f32.mrf.mxu0  ;;  %7783 = vmatmul.mubr.msk.f32.gmra.mxu0 %vm286_vm0, %v8331_v39 }
 0x14d   : > { %v905_v27 = vpop.f32.mrf.mxu1  ;;  %7709 = vmatmul.mubr.msk.f32.gmra.mxu1 %vm286_vm0, %v8331_v39  ;;  %v9545_v53 = vadd.f32 %v992_v55, %v722_v38  ;;  %2131 = vmatprep.mubr.f32.mxu0 %v12721_v4  ;;  %v8038_v55 = vld [vmem:[%s12709_s1 + $0x68] sm:$0xff]  ;;  %v8333_v39 = vld [vmem:[%s8756_s11 + $0x150] sm:$0xff] }
 0x14e   : > { %1420 = vmatprep.mubr.f32.mxu1 %v12721_v4  ;;  %v9549_v60 = vpop.f32.mrf.mxu0  ;;  %4928 = vmatprep.subr.mxu0 %v8038_v55 }
 0x14f   : > { %v906_v47 = vpop.f32.mrf.mxu1  ;;  %v997_v32 = vrot.slane %v9549_v60, 6 }
 0x150   : > { %v728_v2 = vpop.f32.mrf.mxu0  ;;  %7784 = vmatmul.mubr.msk.f32.gmra.mxu0 %vm286_vm0, %v8332_v41 }
 0x151   : > { %v909_v12 = vpop.f32.mrf.mxu1  ;;  %7710 = vmatmul.mubr.msk.f32.gmra.mxu1 %vm286_vm0, %v8332_v41  ;;  %v9564_v15 = vadd.f32 %v991_v3, %v728_v2  ;;  %2137 = vmatprep.mubr.f32.mxu0 %v12721_v4  ;;  %v998_v25 = vsel %vm968_vm1, %v996_v29, %v997_v32  ;;  %v8334_v41 = vld [vmem:[%s8756_s11 + $0x158] sm:$0xff] }
 0x152   : > { %1426 = vmatprep.mubr.f32.mxu1 %v12721_v4  ;;  %v730_v61 = vpop.f32.mrf.mxu0 }
 0x153   : > { %v910_v5 = vpop.f32.mrf.mxu1 }
 0x154   : > { %v733_v38 = vpop.f32.mrf.mxu0  ;;  %7785 = vmatmul.mubr.msk.f32.gmra.mxu0 %vm286_vm0, %v8333_v39 }
 0x155   : > { %v913_v27 = vpop.f32.mrf.mxu1  ;;  %7711 = vmatmul.mubr.msk.f32.gmra.mxu1 %vm286_vm0, %v8333_v39  ;;  %v9574_v18 = vadd.f32 %v993_v44, %v733_v38  ;;  %2142 = vmatprep.mubr.f32.mxu0 %v12721_v4  ;;  %v8335_v39 = vld [vmem:[%s8756_s11 + $0x160] sm:$0xff] }
 0x156   : > { %1432 = vmatprep.mubr.f32.mxu1 %v12721_v4  ;;  %v9578_v3 = vpop.f32.mrf.mxu0 }
 0x157   : > { %v914_v47 = vpop.f32.mrf.mxu1  ;;  %v12713_v61 = vrot.slane %v9578_v3, 6 }
 0x158   : > { %v739_v2 = vpop.f32.mrf.mxu0  ;;  %7786 = vmatmul.mubr.msk.f32.gmra.mxu0 %vm286_vm0, %v8334_v41 }
 0x159   : > { %v917_v12 = vpop.f32.mrf.mxu1  ;;  %7712 = vmatmul.mubr.msk.f32.gmra.mxu1 %vm286_vm0, %v8334_v41  ;;  %v9583_v55 = vadd.f32 %v995_v8, %v739_v2  ;;  %2148 = vmatprep.mubr.f32.mxu0 %v12721_v4 }
 0x15a   : > { %1438 = vmatprep.mubr.f32.mxu1 %v12721_v4  ;;  %v9587_v44 = vpop.f32.mrf.mxu0 }
 0x15b   : > { %v918_v37 = vpop.f32.mrf.mxu1  ;;  %v12712_v5 = vrot.slane %v9587_v44, 6 }
 0x15c   : > { %v745_v38 = vpop.f32.mrf.mxu0  ;;  %7787 = vmatmul.mubr.msk.f32.gmra.mxu0 %vm286_vm0, %v8335_v39 }
 0x15d   : > { %v921_v27 = vpop.f32.mrf.mxu1  ;;  %7713 = vmatmul.mubr.msk.f32.gmra.mxu1 %vm286_vm0, %v8335_v39  ;;  %v9599_v8 = vsel %vm968_vm1, %v12713_v61, %v12712_v5  ;;  %v9603_v47 = vadd.f32 %v994_v19, %v745_v38  ;;  %2154 = vmatprep.mubr.f32.mxu0 %v12721_v4  ;;  %v8338_v61 = vld [vmem:[%s8756_s11 + $0x178] sm:$0xff] }
 0x15e   : > { %1444 = vmatprep.mubr.f32.mxu1 %v12721_v4  ;;  %v747_v2 = vpop.f32.mrf.mxu0  ;;  %v8336_v27 = vld [vmem:[%s8756_s11 + $0x168] sm:$0xff] }
 0x15f   : > { %v922_v12 = vpop.f32.mrf.mxu1 }
 0x160   : > { %v750_v41 = vpop.f32.mrf.mxu0  ;;  %7788 = vmatmul.mubr.msk.f32.gmra.mxu0 %vm286_vm0, %v8336_v27  ;;  %v8337_v12 = vld [vmem:[%s8756_s11 + $0x170] sm:$0xff] }
 0x161   : > { %v925_v37 = vpop.f32.mrf.mxu1  ;;  %7714 = vmatmul.mubr.msk.f32.gmra.mxu1 %vm286_vm0, %v8336_v27  ;;  %v9610_v39 = vadd.f32 %v996_v29, %v750_v41  ;;  %2159 = vmatprep.mubr.f32.mxu0 %v12721_v4 }
 0x162   : > { %1450 = vmatprep.mubr.f32.mxu1 %v12721_v4  ;;  %v9614_v28 = vpop.f32.mrf.mxu0 }
 0x163   : > { %12746 = vst [vmem:[#allocation20_spill] sm:$0xff] %v9614_v28  ;;  %v926_v19 = vpop.f32.mrf.mxu1  ;;  %v12715_v27 = vrot.slane %v9614_v28, 6  ;;  %v8347_v28 = vld [vmem:[%s8756_s11 + $0x1c0] sm:$0xff] }
 0x164   : > { %v756_v38 = vpop.f32.mrf.mxu0  ;;  %7789 = vmatmul.mubr.msk.f32.gmra.mxu0 %vm286_vm0, %v8337_v12 }
 0x165   : > { %v929_v2 = vpop.f32.mrf.mxu1  ;;  %7715 = vmatmul.mubr.msk.f32.gmra.mxu1 %vm286_vm0, %v8337_v12  ;;  %v9619_v37 = vadd.f32 %v998_v25, %v756_v38  ;;  %2165 = vmatprep.mubr.f32.mxu0 %v12721_v4 }
 0x166   : > { %1456 = vmatprep.mubr.f32.mxu1 %v12721_v4  ;;  %v9623_v29 = vpop.f32.mrf.mxu0 }
 0x167   : > { %12747 = vst [vmem:[#allocation21_spill] sm:$0xff] %v9623_v29  ;;  %v930_v41 = vpop.f32.mrf.mxu1  ;;  %v12714_v19 = vrot.slane %v9623_v29, 6 }
 0x168   : > { %v762_v2 = vpop.f32.mrf.mxu0  ;;  %7790 = vmatmul.mubr.msk.f32.gmra.mxu0 %vm286_vm0, %v8338_v61 }
 0x169   : > { %v933_v5 = vpop.f32.mrf.mxu1  ;;  %7716 = vmatmul.mubr.msk.f32.gmra.mxu1 %vm286_vm0, %v8338_v61  ;;  %v9635_v25 = vsel %vm968_vm1, %v12715_v27, %v12714_v19  ;;  %v9639_v38 = vadd.f32 %v997_v32, %v762_v2  ;;  %2171 = vmatprep.mubr.f32.mxu0 %v12721_v4  ;;  %v8339_v61 = vld [vmem:[%s8756_s11 + $0x180] sm:$0xff]  ;;  %v8340_v19 = vld [vmem:[%s8756_s11 + $0x188] sm:$0xff] }
 0x16a   : > { %12748 = vst [vmem:[#allocation22_spill] sm:$0xff] %v9635_v25  ;;  %1462 = vmatprep.mubr.f32.mxu1 %v12721_v4  ;;  %v764_v5 = vpop.f32.mrf.mxu0  ;;  %v8346_v25 = vld [vmem:[%s8756_s11 + $0x1b8] sm:$0xff] }
 0x16b   : > { %v934_v12 = vpop.f32.mrf.mxu1 }
 0x16c   : > { %v1907_v63 = vpop.f32.mrf.mxu0  ;;  %7791 = vmatmul.mubr.msk.f32.gmra.mxu0 %vm286_vm0, %v8339_v61 }
 0x16d   : > { %v1182_v41 = vpop.f32.mrf.mxu1  ;;  %7717 = vmatmul.mubr.msk.f32.gmra.mxu1 %vm286_vm0, %v8339_v61  ;;  %2176 = vmatprep.mubr.f32.mxu0 %v12721_v4  ;;  %v8341_v61 = vld [vmem:[%s8756_s11 + $0x190] sm:$0xff] }
 0x16e   : > { %1467 = vmatprep.mubr.f32.mxu1 %v12721_v4  ;;  %v1908_v32 = vpop.f32.mrf.mxu0 }
 0x16f   : > { %v1183_v60 = vpop.f32.mrf.mxu1 }
 0x170   : > { %v1911_v5 = vpop.f32.mrf.mxu0  ;;  %7792 = vmatmul.mubr.msk.f32.gmra.mxu0 %vm286_vm0, %v8340_v19 }
 0x171   : > { %v1187_v2 = vpop.f32.mrf.mxu1  ;;  %7718 = vmatmul.mubr.msk.f32.gmra.mxu1 %vm286_vm0, %v8340_v19  ;;  %2181 = vmatprep.mubr.f32.mxu0 %v12721_v4 }
 0x172   : > { %1472 = vmatprep.mubr.f32.mxu1 %v12721_v4  ;;  %v1912_v12 = vpop.f32.mrf.mxu0 }
 0x173   : > { %v1188_v63 = vpop.f32.mrf.mxu1  ;;  %v2306_v2 = vrot.slane %v1912_v12, 2 }
 0x174   : > { %v1916_v27 = vpop.f32.mrf.mxu0  ;;  %7793 = vmatmul.mubr.msk.f32.gmra.mxu0 %vm286_vm0, %v8341_v61 }
 0x175   : > { %v1192_v41 = vpop.f32.mrf.mxu1  ;;  %7719 = vmatmul.mubr.msk.f32.gmra.mxu1 %vm286_vm0, %v8341_v61  ;;  %2186 = vmatprep.mubr.f32.mxu0 %v12721_v4 }
 0x176   : > { %1477 = vmatprep.mubr.f32.mxu1 %v12721_v4  ;;  %v9660_v19 = vpop.f32.mrf.mxu0 }
 0x177   : > { %v9658_v32 = vpop.f32.mrf.mxu1  ;;  %v12716_v5 = vrot.slane %v9660_v19, 2 }
 0x178   : > { %v1921_v27 = vpop.f32.mrf.mxu0  ;;  %7794 = vmatmul.mubr.msk.f32.gmra.mxu0 %vm286_vm0, %v8342_v26 }
 0x179   : > { %v1197_v41 = vpop.f32.mrf.mxu1  ;;  %7720 = vmatmul.mubr.msk.f32.gmra.mxu1 %vm286_vm0, %v8342_v26  ;;  %2191 = vmatprep.mubr.f32.mxu0 %v12721_v4  ;;  %v2308_v61 = vsel %vm1661_vm2, %v2306_v2, %v12716_v5 }
 0x17a   : > { %1482 = vmatprep.mubr.f32.mxu1 %v12721_v4  ;;  %v1922_v12 = vpop.f32.mrf.mxu0  ;;  %v8343_v41 = vld [vmem:[%s8756_s11 + $0x1a0] sm:$0xff] }
 0x17b   : > { %v9671_v11 = vpop.f32.mrf.mxu1 }
 0x17c   : > { %v1925_v36 = vpop.f32.mrf.mxu0  ;;  %7795 = vmatmul.mubr.msk.f32.gmra.mxu0 %vm286_vm0, %v8343_v41 }
 0x17d   : > { %v1202_v13 = vpop.f32.mrf.mxu1  ;;  %7721 = vmatmul.mubr.msk.f32.gmra.mxu1 %vm286_vm0, %v8343_v41  ;;  %2196 = vmatprep.mubr.f32.mxu0 %v12721_v4 }
 0x17e   : > { %1487 = vmatprep.mubr.f32.mxu1 %v12721_v4  ;;  %v9680_v27 = vpop.f32.mrf.mxu0 }
 0x17f   : > { %v9678_v26 = vpop.f32.mrf.mxu1  ;;  %v2309_v41 = vrot.slane %v9680_v27, 2 }
 0x180   : > { %v1930_v13 = vpop.f32.mrf.mxu0  ;;  %7796 = vmatmul.mubr.msk.f32.gmra.mxu0 %vm286_vm0, %v8344_v58 }
 0x181   : > { %v1207_v5 = vpop.f32.mrf.mxu1  ;;  %7722 = vmatmul.mubr.msk.f32.gmra.mxu1 %vm286_vm0, %v8344_v58  ;;  %2201 = vmatprep.mubr.f32.mxu0 %v12721_v4 }
 0x182   : > { %1492 = vmatprep.mubr.f32.mxu1 %v12721_v4  ;;  %v9689_v12 = vpop.f32.mrf.mxu0 }
 0x183   : > { %v9687_v36 = vpop.f32.mrf.mxu1  ;;  %v12717_v52 = vrot.slane %v9689_v12, 2 }
 0x184   : > { %v1935_v13 = vpop.f32.mrf.mxu0  ;;  %7797 = vmatmul.mubr.msk.f32.gmra.mxu0 %vm286_vm0, %v8345_v22 }
 0x185   : > { %v1212_v5 = vpop.f32.mrf.mxu1  ;;  %7723 = vmatmul.mubr.msk.f32.gmra.mxu1 %vm286_vm0, %v8345_v22  ;;  %v2402_v31 = vadd.f32 %v2306_v2, %v1935_v13  ;;  %2205 = vmatprep.mubr.f32.mxu0 %v12721_v4  ;;  %v2311_v30 = vsel %vm1661_vm2, %v2309_v41, %v12717_v52 }
 0x186   : > { %v1565_v58 = vadd.f32 %v1212_v5, %v1183_v60  ;;  %1496 = vmatprep.mubr.f32.mxu1 %v12721_v4  ;;  %v1937_v35 = vpop.f32.mrf.mxu0 }
 0x187   : > { %v9701_v27 = vpop.f32.mrf.mxu1  ;;  %v2499_v13 = vrot.slane %v2402_v31, 4 }
 0x188   : > { %v1940_v48 = vpop.f32.mrf.mxu0  ;;  %7798 = vmatmul.mubr.msk.f32.gmra.mxu0 %vm286_vm0, %v8346_v25  ;;  %v1662_v35 = vrot.slane %v1565_v58, 2 }
 0x189   : > { %v1218_v16 = vpop.f32.mrf.mxu1  ;;  %7724 = vmatmul.mubr.msk.f32.gmra.mxu1 %vm286_vm0, %v8346_v25  ;;  %v2403_v60 = vadd.f32 %v2308_v61, %v1940_v48  ;;  %2209 = vmatprep.mubr.f32.mxu0 %v12721_v4  ;;  %v12749_v61 = vrot.slane %v9660_v19, 2  ;;  %v8348_v19 = vld [vmem:[%s8756_s11 + $0x1c8] sm:$0xff] }
 0x18a   : > { %v1566_v22 = vadd.f32 %v1218_v16, %v1188_v63  ;;  %1500 = vmatprep.mubr.f32.mxu1 %v12721_v4  ;;  %v9710_v5 = vpop.f32.mrf.mxu0 }
 0x18b   : > { %v9708_v2 = vpop.f32.mrf.mxu1  ;;  %v2500_v29 = vrot.slane %v2403_v60, 4 }
 0x18c   : > { %v1663_v52 = vrot.slane %v1566_v22, 2  ;;  %v1946_v25 = vpop.f32.mrf.mxu0  ;;  %7799 = vmatmul.mubr.msk.f32.gmra.mxu0 %vm286_vm0, %v8347_v28 }
 0x18d   : > { %v1224_v62 = vpop.f32.mrf.mxu1  ;;  %7725 = vmatmul.mubr.msk.f32.gmra.mxu1 %vm286_vm0, %v8347_v28  ;;  %v2501_v16 = vsel %vm2498_vm3, %v2499_v13, %v2500_v29  ;;  %v2404_v58 = vadd.f32 %v12749_v61, %v1946_v25  ;;  %2213 = vmatprep.mubr.f32.mxu0 %v12721_v4 }
 0x18e   : > { %v1664_v48 = vsel %vm1661_vm2, %v1662_v35, %v1663_v52  ;;  %v1567_v63 = vadd.f32 %v1224_v62, %v9658_v32  ;;  %1504 = vmatprep.mubr.f32.mxu1 %v12721_v4  ;;  %v9724_v60 = vpop.f32.mrf.mxu0 }
 0x18f   : > { %v1790_v31 = vadd.f32 %v1664_v48, %v9254_v43  ;;  %v9722_v22 = vpop.f32.mrf.mxu1  ;;  %v2502_v42 = vrot.slane %v2404_v58, 4  ;;  %v12720_v35 = vrot.slane %v9724_v60, 2 }
 0x190   : > { %v1665_v28 = vrot.slane %v1567_v63, 2  ;;  %v1952_v25 = vpop.f32.mrf.mxu0  ;;  %7800 = vmatmul.mubr.msk.f32.gmra.mxu0 %vm286_vm0, %v8348_v19 }
 0x191   : > { %v9728_v13 = vadd.f32 %v2501_v16, %v1790_v31  ;;  %v1230_v32 = vpop.f32.mrf.mxu1  ;;  %7726 = vmatmul.mubr.msk.f32.gmra.mxu1 %vm286_vm0, %v8348_v19  ;;  %v2503_v63 = vsel %vm2498_vm3, %v2500_v29, %v2502_v42  ;;  %v2405_v58 = vadd.f32 %v2309_v41, %v1952_v25  ;;  %2217 = vmatprep.mubr.f32.mxu0 %v12721_v4 }
 0x192   : > { %v1666_v43 = vsel %vm1661_vm2, %v1663_v52, %v1665_v28  ;;  %v1792_v48 = vadd.f32 %v1665_v28, %v9288_v34  ;;  %v1568_v61 = vadd.f32 %v1230_v32, %v9671_v11  ;;  %1508 = vmatprep.mubr.f32.mxu1 %v12721_v4  ;;  %v1954_v62 = vpop.f32.mrf.mxu0  ;;  %v12750_v52 = vrot.slane %v9710_v5, 2  ;;  %v8349_v32 = vld [vmem:[%s8756_s11 + $0x1d0] sm:$0xff] }
 0x193   : > { %v1791_v16 = vadd.f32 %v1666_v43, %v9268_v45  ;;  %v9740_v31 = vpop.f32.mrf.mxu1  ;;  %v2504_v43 = vrot.slane %v2405_v58, 4 }
 0x194   : > { %v2314_v34 = vsel %vm1661_vm2, %v12750_v52, %v12720_v35  ;;  %v9748_v28 = vadd.f32 %v2502_v42, %v1792_v48  ;;  %v1957_v45 = vpop.f32.mrf.mxu0  ;;  %7801 = vmatmul.mubr.msk.f32.gmra.mxu0 %vm286_vm0, %v8349_v32  ;;  %v1667_v25 = vrot.slane %v1568_v61, 2  ;;  %v8350_v52 = vld [vmem:[%s8756_s11 + $0x1d8] sm:$0xff] }
 0x195   : > { %v9750_v29 = vadd.f32 %v2503_v63, %v1791_v16  ;;  %v1236_v11 = vpop.f32.mrf.mxu1  ;;  %7727 = vmatmul.mubr.msk.f32.gmra.mxu1 %vm286_vm0, %v8349_v32  ;;  %v2406_v62 = vadd.f32 %v2311_v30, %v1957_v45  ;;  %2221 = vmatprep.mubr.f32.mxu0 %v12721_v4  ;;  %v12751_v45 = vrot.slane %v9689_v12, 2 }
 0x196   : > { %v1569_v41 = vadd.f32 %v1236_v11, %v9678_v26  ;;  %1512 = vmatprep.mubr.f32.mxu1 %v12721_v4  ;;  %v9760_v42 = vpop.f32.mrf.mxu0 }
 0x197   : > { %v9758_v19 = vpop.f32.mrf.mxu1  ;;  %v2505_v63 = vrot.slane %v2406_v62, 4 }
 0x198   : > { %v1668_v48 = vrot.slane %v1569_v41, 2  ;;  %v1963_v32 = vpop.f32.mrf.mxu0  ;;  %7802 = vmatmul.mubr.msk.f32.gmra.mxu0 %vm286_vm0, %v8350_v52 }
 0x199   : > { %v1242_v16 = vpop.f32.mrf.mxu1  ;;  %7728 = vmatmul.mubr.msk.f32.gmra.mxu1 %vm286_vm0, %v8350_v52  ;;  %v2506_v26 = vsel %vm2498_vm3, %v2504_v43, %v2505_v63  ;;  %v2407_v61 = vadd.f32 %v12751_v45, %v1963_v32  ;;  %2225 = vmatprep.mubr.f32.mxu0 %v12721_v4 }
 0x19a   : > { %v1669_v30 = vsel %vm1661_vm2, %v1667_v25, %v1668_v48  ;;  %v1570_v11 = vadd.f32 %v1242_v16, %v9687_v36  ;;  %1516 = vmatprep.mubr.f32.mxu1 %v12721_v4  ;;  %v9774_v62 = vpop.f32.mrf.mxu0  ;;  %v8351_v16 = vld [vmem:[%s8756_s11 + $0x1e0] sm:$0xff] }
 0x19b   : > { %v1793_v58 = vadd.f32 %v1669_v30, %v9306_v23  ;;  %v9772_v41 = vpop.f32.mrf.mxu1  ;;  %v2507_v35 = vrot.slane %v2407_v61, 4  ;;  %v12752_v61 = vrot.slane %v9710_v5, 2 }
 0x19c   : > { %v1670_v52 = vrot.slane %v1570_v11, 2  ;;  %v1969_v32 = vpop.f32.mrf.mxu0  ;;  %7803 = vmatmul.mubr.msk.f32.gmra.mxu0 %vm286_vm0, %v8351_v16 }
 0x19d   : > { %v9778_v43 = vadd.f32 %v2506_v26, %v1793_v58  ;;  %v1248_v12 = vpop.f32.mrf.mxu1  ;;  %7729 = vmatmul.mubr.msk.f32.gmra.mxu1 %vm286_vm0, %v8351_v16  ;;  %v2508_v11 = vsel %vm2498_vm3, %v2505_v63, %v2507_v35  ;;  %v2408_v58 = vadd.f32 %v12752_v61, %v1969_v32  ;;  %2229 = vmatprep.mubr.f32.mxu0 %v12721_v4 }
 0x19e   : > { %v1671_v23 = vsel %vm1661_vm2, %v1668_v48, %v1670_v52  ;;  %v1795_v30 = vadd.f32 %v1670_v52, %v9340_v0  ;;  %v1571_v45 = vadd.f32 %v1248_v12, %v9701_v27  ;;  %1520 = vmatprep.mubr.f32.mxu1 %v12721_v4  ;;  %v1971_v25 = vpop.f32.mrf.mxu0  ;;  %v12753_v48 = vrot.slane %v9774_v62, 2 }
 0x19f   : > { %v1794_v26 = vadd.f32 %v1671_v23, %v9320_v51  ;;  %v9792_v36 = vpop.f32.mrf.mxu1  ;;  %v12754_v0 = vrot.slane %v9760_v42, 2  ;;  %v8352_v51 = vld [vmem:[%s8756_s11 + $0x1e8] sm:$0xff] }
 0x1a0   : > { %v9800_v52 = vadd.f32 %v2507_v35, %v1795_v30  ;;  %v1974_v5 = vpop.f32.mrf.mxu0  ;;  %7804 = vmatmul.mubr.msk.f32.gmra.mxu0 %vm286_vm0, %v8352_v51  ;;  %v1672_v23 = vrot.slane %v1571_v45, 2  ;;  %v2509_v30 = vrot.slane %v2408_v58, 4 }
 0x1a1   : > { %v2317_v63 = vsel %vm1661_vm2, %v12754_v0, %v12753_v48  ;;  %v9802_v27 = vadd.f32 %v2508_v11, %v1794_v26  ;;  %v1254_v12 = vpop.f32.mrf.mxu1  ;;  %7730 = vmatmul.mubr.msk.f32.gmra.mxu1 %vm286_vm0, %v8352_v51  ;;  %v2409_v16 = vadd.f32 %v2314_v34, %v1974_v5  ;;  %2233 = vmatprep.mubr.f32.mxu0 %v12721_v4  ;;  %v8353_v48 = vld [vmem:[%s8756_s11 + $0x1f0] sm:$0xff]  ;;  %v12755_v51 = vrot.slane %v9724_v60, 2 }
 0x1a2   : > { %v1572_v25 = vadd.f32 %v1254_v12, %v9708_v2  ;;  %1524 = vmatprep.mubr.f32.mxu1 %v12721_v4  ;;  %v9812_v35 = vpop.f32.mrf.mxu0 }
 0x1a3   : > { %v9810_v32 = vpop.f32.mrf.mxu1  ;;  %v2510_v26 = vrot.slane %v2409_v16, 4 }
 0x1a4   : > { %v1673_v11 = vrot.slane %v1572_v25, 2  ;;  %v1980_v0 = vpop.f32.mrf.mxu0  ;;  %7805 = vmatmul.mubr.msk.f32.gmra.mxu0 %vm286_vm0, %v8353_v48 }
 0x1a5   : > { %v1260_v61 = vpop.f32.mrf.mxu1  ;;  %7731 = vmatmul.mubr.msk.f32.gmra.mxu1 %vm286_vm0, %v8353_v48  ;;  %v2511_v34 = vsel %vm2498_vm3, %v2509_v30, %v2510_v26  ;;  %v2410_v45 = vadd.f32 %v12755_v51, %v1980_v0  ;;  %2237 = vmatprep.mubr.f32.mxu0 %v12721_v4 }
 0x1a6   : > { %v1674_v2 = vsel %vm1661_vm2, %v1672_v23, %v1673_v11  ;;  %v1573_v12 = vadd.f32 %v1260_v61, %v9722_v22  ;;  %1528 = vmatprep.mubr.f32.mxu1 %v12721_v4  ;;  %v9826_v25 = vpop.f32.mrf.mxu0  ;;  %v8354_v61 = vld [vmem:[%s8756_s11 + $0x1f8] sm:$0xff] }
 0x1a7   : > { %v1796_v58 = vadd.f32 %v1674_v2, %v9358_v50  ;;  %v9824_v5 = vpop.f32.mrf.mxu1  ;;  %v2512_v48 = vrot.slane %v2410_v45, 4  ;;  %v12756_v45 = vrot.slane %v9760_v42, 2 }
 0x1a8   : > { %v1675_v16 = vrot.slane %v1573_v12, 2  ;;  %v1986_v0 = vpop.f32.mrf.mxu0  ;;  %7806 = vmatmul.mubr.msk.f32.gmra.mxu0 %vm286_vm0, %v8354_v61 }
 0x1a9   : > { %v9830_v30 = vadd.f32 %v2511_v34, %v1796_v58  ;;  %v1266_v60 = vpop.f32.mrf.mxu1  ;;  %7732 = vmatmul.mubr.msk.f32.gmra.mxu1 %vm286_vm0, %v8354_v61  ;;  %v2513_v12 = vsel %vm2498_vm3, %v2510_v26, %v2512_v48  ;;  %v2411_v58 = vadd.f32 %v12756_v45, %v1986_v0  ;;  %2241 = vmatprep.mubr.f32.mxu0 %v12721_v4 }
 0x1aa   : > { %v1676_v50 = vsel %vm1661_vm2, %v1673_v11, %v1675_v16  ;;  %v1798_v2 = vadd.f32 %v1675_v16, %v9386_v59  ;;  %v1574_v51 = vadd.f32 %v1266_v60, %v9740_v31  ;;  %1532 = vmatprep.mubr.f32.mxu1 %v12721_v4  ;;  %v1988_v23 = vpop.f32.mrf.mxu0  ;;  %v12757_v11 = vrot.slane %v9826_v25, 2 }
 0x1ab   : > { %v1797_v34 = vadd.f32 %v1676_v50, %v9370_v57  ;;  %v9844_v22 = vpop.f32.mrf.mxu1  ;;  %v12758_v59 = vrot.slane %v9812_v35, 2  ;;  %v8355_v57 = vld [vmem:[%s8756_s11 + $0x200] sm:$0xff] }
 0x1ac   : > { %v9852_v16 = vadd.f32 %v2512_v48, %v1798_v2  ;;  %v1991_v42 = vpop.f32.mrf.mxu0  ;;  %7807 = vmatmul.mubr.msk.f32.gmra.mxu0 %vm286_vm0, %v8355_v57  ;;  %v1677_v50 = vrot.slane %v1574_v51, 2  ;;  %v2514_v2 = vrot.slane %v2411_v58, 4 }
 0x1ad   : > { %v2320_v26 = vsel %vm1661_vm2, %v12758_v59, %v12757_v11  ;;  %v9854_v31 = vadd.f32 %v2513_v12, %v1797_v34  ;;  %v1272_v60 = vpop.f32.mrf.mxu1  ;;  %7733 = vmatmul.mubr.msk.f32.gmra.mxu1 %vm286_vm0, %v8355_v57  ;;  %v2412_v61 = vadd.f32 %v2317_v63, %v1991_v42  ;;  %2245 = vmatprep.mubr.f32.mxu0 %v12721_v4  ;;  %v8356_v11 = vld [vmem:[%s8756_s11 + $0x208] sm:$0xff]  ;;  %v12759_v57 = vrot.slane %v9774_v62, 2 }
 0x1ae   : > { %v1575_v23 = vadd.f32 %v1272_v60, %v9758_v19  ;;  %1536 = vmatprep.mubr.f32.mxu1 %v12721_v4  ;;  %v9864_v48 = vpop.f32.mrf.mxu0 }
 0x1af   : > { %v9862_v0 = vpop.f32.mrf.mxu1  ;;  %v2515_v34 = vrot.slane %v2412_v61, 4 }
 0x1b0   : > { %v1678_v12 = vrot.slane %v1575_v23, 2  ;;  %v1997_v59 = vpop.f32.mrf.mxu0  ;;  %7808 = vmatmul.mubr.msk.f32.gmra.mxu0 %vm286_vm0, %v8356_v11 }
 0x1b1   : > { %v1278_v45 = vpop.f32.mrf.mxu1  ;;  %7734 = vmatmul.mubr.msk.f32.gmra.mxu1 %vm286_vm0, %v8356_v11  ;;  %v2516_v63 = vsel %vm2498_vm3, %v2514_v2, %v2515_v34  ;;  %v2413_v51 = vadd.f32 %v12759_v57, %v1997_v59  ;;  %2249 = vmatprep.mubr.f32.mxu0 %v12721_v4 }
 0x1b2   : > { %v1679_v19 = vsel %vm1661_vm2, %v1677_v50, %v1678_v12  ;;  %v1576_v60 = vadd.f32 %v1278_v45, %v9772_v41  ;;  %1540 = vmatprep.mubr.f32.mxu1 %v12721_v4  ;;  %v9878_v23 = vpop.f32.mrf.mxu0  ;;  %v8357_v45 = vld [vmem:[%s8756_s11 + $0x210] sm:$0xff] }
 0x1b3   : > { %v1799_v58 = vadd.f32 %v1679_v19, %v9401_v7  ;;  %v9876_v42 = vpop.f32.mrf.mxu1  ;;  %v2517_v11 = vrot.slane %v2413_v51, 4  ;;  %v12760_v51 = vrot.slane %v9812_v35, 2 }
 0x1b4   : > { %v1680_v61 = vrot.slane %v1576_v60, 2  ;;  %v2003_v59 = vpop.f32.mrf.mxu0  ;;  %7809 = vmatmul.mubr.msk.f32.gmra.mxu0 %vm286_vm0, %v8357_v45 }
 0x1b5   : > { %v9882_v2 = vadd.f32 %v2516_v63, %v1799_v58  ;;  %v1284_v62 = vpop.f32.mrf.mxu1  ;;  %7735 = vmatmul.mubr.msk.f32.gmra.mxu1 %vm286_vm0, %v8357_v45  ;;  %v2518_v60 = vsel %vm2498_vm3, %v2515_v34, %v2517_v11  ;;  %v2414_v58 = vadd.f32 %v12760_v51, %v2003_v59  ;;  %2253 = vmatprep.mubr.f32.mxu0 %v12721_v4 }
 0x1b6   : > { %v1681_v7 = vsel %vm1661_vm2, %v1678_v12, %v1680_v61  ;;  %v1801_v19 = vadd.f32 %v1680_v61, %v9426_v1  ;;  %v1577_v57 = vadd.f32 %v1284_v62, %v9792_v36  ;;  %1544 = vmatprep.mubr.f32.mxu1 %v12721_v4  ;;  %v2005_v50 = vpop.f32.mrf.mxu0  ;;  %v12761_v12 = vrot.slane %v9878_v23, 2 }
 0x1b7   : > { %v1800_v63 = vadd.f32 %v1681_v7, %v9411_v56  ;;  %v9896_v41 = vpop.f32.mrf.mxu1  ;;  %v12762_v1 = vrot.slane %v9864_v48, 2  ;;  %v8358_v56 = vld [vmem:[%s8756_s11 + $0x218] sm:$0xff] }
 0x1b8   : > { %v9904_v61 = vadd.f32 %v2517_v11, %v1801_v19  ;;  %v2008_v35 = vpop.f32.mrf.mxu0  ;;  %7810 = vmatmul.mubr.msk.f32.gmra.mxu0 %vm286_vm0, %v8358_v56  ;;  %v1682_v7 = vrot.slane %v1577_v57, 2  ;;  %v2519_v19 = vrot.slane %v2414_v58, 4 }
 0x1b9   : > { %v2323_v34 = vsel %vm1661_vm2, %v12762_v1, %v12761_v12  ;;  %v9906_v36 = vadd.f32 %v2518_v60, %v1800_v63  ;;  %v1290_v62 = vpop.f32.mrf.mxu1  ;;  %7736 = vmatmul.mubr.msk.f32.gmra.mxu1 %vm286_vm0, %v8358_v56  ;;  %v2415_v45 = vadd.f32 %v2320_v26, %v2008_v35  ;;  %2257 = vmatprep.mubr.f32.mxu0 %v12721_v4  ;;  %v8359_v12 = vld [vmem:[%s8756_s11 + $0x220] sm:$0xff]  ;;  %v12763_v56 = vrot.slane %v9826_v25, 2 }
 0x1ba   : > { %v1578_v50 = vadd.f32 %v1290_v62, %v9810_v32  ;;  %1548 = vmatprep.mubr.f32.mxu1 %v12721_v4  ;;  %v9916_v11 = vpop.f32.mrf.mxu0 }
 0x1bb   : > { %v9914_v59 = vpop.f32.mrf.mxu1  ;;  %v2520_v63 = vrot.slane %v2415_v45, 4 }
 0x1bc   : > { %v1683_v60 = vrot.slane %v1578_v50, 2  ;;  %v2014_v1 = vpop.f32.mrf.mxu0  ;;  %7811 = vmatmul.mubr.msk.f32.gmra.mxu0 %vm286_vm0, %v8359_v12 }
 0x1bd   : > { %v1296_v51 = vpop.f32.mrf.mxu1  ;;  %7737 = vmatmul.mubr.msk.f32.gmra.mxu1 %vm286_vm0, %v8359_v12  ;;  %v2521_v26 = vsel %vm2498_vm3, %v2519_v19, %v2520_v63  ;;  %v2416_v57 = vadd.f32 %v12763_v56, %v2014_v1  ;;  %2261 = vmatprep.mubr.f32.mxu0 %v12721_v4 }
 0x1be   : > { %v1684_v32 = vsel %vm1661_vm2, %v1682_v7, %v1683_v60  ;;  %v1579_v62 = vadd.f32 %v1296_v51, %v9824_v5  ;;  %1552 = vmatprep.mubr.f32.mxu1 %v12721_v4  ;;  %v9930_v50 = vpop.f32.mrf.mxu0  ;;  %v8360_v51 = vld [vmem:[%s8756_s11 + $0x228] sm:$0xff] }
 0x1bf   : > { %v1802_v58 = vadd.f32 %v1684_v32, %v9441_v54  ;;  %v9928_v35 = vpop.f32.mrf.mxu1  ;;  %v2522_v12 = vrot.slane %v2416_v57, 4  ;;  %v12764_v57 = vrot.slane %v9864_v48, 2  ;;  %v8361_v48 = vld [vmem:[%s8756_s11 + $0x230] sm:$0xff] }
 0x1c0   : > { %v1685_v45 = vrot.slane %v1579_v62, 2  ;;  %v2020_v1 = vpop.f32.mrf.mxu0  ;;  %7812 = vmatmul.mubr.msk.f32.gmra.mxu0 %vm286_vm0, %v8360_v51 }
 0x1c1   : > { %v9934_v19 = vadd.f32 %v2521_v26, %v1802_v58  ;;  %v1302_v25 = vpop.f32.mrf.mxu1  ;;  %7738 = vmatmul.mubr.msk.f32.gmra.mxu1 %vm286_vm0, %v8360_v51  ;;  %v2523_v62 = vsel %vm2498_vm3, %v2520_v63, %v2522_v12  ;;  %v2417_v58 = vadd.f32 %v12764_v57, %v2020_v1  ;;  %2265 = vmatprep.mubr.f32.mxu0 %v12721_v4 }
 0x1c2   : > { %v1686_v54 = vsel %vm1661_vm2, %v1683_v60, %v1685_v45  ;;  %v1804_v32 = vadd.f32 %v1685_v45, %v9462_v10  ;;  %v1580_v56 = vadd.f32 %v1302_v25, %v9844_v22  ;;  %1556 = vmatprep.mubr.f32.mxu1 %v12721_v4  ;;  %v2022_v7 = vpop.f32.mrf.mxu0  ;;  %v12765_v60 = vrot.slane %v9930_v50, 2 }
 0x1c3   : > { %v1803_v26 = vadd.f32 %v1686_v54, %v9449_v20  ;;  %v9948_v5 = vpop.f32.mrf.mxu1  ;;  %v12766_v10 = vrot.slane %v9916_v11, 2 }
 0x1c4   : > { %v9958_v22 = vadd.f32 %v2522_v12, %v1804_v32  ;;  %v2025_v25 = vpop.f32.mrf.mxu0  ;;  %7813 = vmatmul.mubr.msk.f32.gmra.mxu0 %vm286_vm0, %v8361_v48  ;;  %v1687_v54 = vrot.slane %v1580_v56, 2  ;;  %v2524_v32 = vrot.slane %v2417_v58, 4 }
 0x1c5   : > { %v9956_v63 = vsel %vm1661_vm2, %v12766_v10, %v12765_v60  ;;  %v9960_v45 = vadd.f32 %v2523_v62, %v1803_v26  ;;  %v1308_v20 = vpop.f32.mrf.mxu1  ;;  %7739 = vmatmul.mubr.msk.f32.gmra.mxu1 %vm286_vm0, %v8361_v48  ;;  %v2418_v51 = vadd.f32 %v2323_v34, %v2025_v25  ;;  %2269 = vmatprep.mubr.f32.mxu0 %v12721_v4  ;;  %v8362_v60 = vld [vmem:[%s8756_s11 + $0x238] sm:$0xff]  ;;  %v12767_v48 = vrot.slane %v9878_v23, 2 }
 0x1c6   : > { %v1581_v7 = vadd.f32 %v1308_v20, %v9862_v0  ;;  %1560 = vmatprep.mubr.f32.mxu1 %v12721_v4  ;;  %v9970_v12 = vpop.f32.mrf.mxu0 }
 0x1c7   : > { %v9968_v1 = vpop.f32.mrf.mxu1  ;;  %v2525_v26 = vrot.slane %v2418_v51, 4  ;;  %v8037_v51 = vld [vmem:[%s12709_s1 + $0x60] sm:$0xff] }
 0x1c8   : > { %v1688_v62 = vrot.slane %v1581_v7, 2  ;;  %v2031_v10 = vpop.f32.mrf.mxu0  ;;  %7814 = vmatmul.mubr.msk.f32.gmra.mxu0 %vm286_vm0, %v8362_v60 }
 0x1c9   : > { %v1314_v57 = vpop.f32.mrf.mxu1  ;;  %7740 = vmatmul.mubr.msk.f32.gmra.mxu1 %vm286_vm0, %v8362_v60  ;;  %v2526_v34 = vsel %vm2498_vm3, %v2524_v32, %v2525_v26  ;;  %v2419_v56 = vadd.f32 %v12767_v48, %v2031_v10  ;;  %3402 = vmatprep.mubr.f32.mxu0 %v12721_v4  ;;  %v7963_v32 = vld [vmem:[%s12709_s1 + $0x50] sm:$0xff] }
 0x1ca   : > { %v1689_v0 = vsel %vm1661_vm2, %v1687_v54, %v1688_v62  ;;  %v1582_v20 = vadd.f32 %v1314_v57, %v9876_v42  ;;  %2742 = vmatprep.mubr.f32.mxu1 %v12721_v4  ;;  %v9984_v7 = vpop.f32.mrf.mxu0 }
 0x1cb   : > { %v1805_v58 = vadd.f32 %v1689_v0, %v9473_v14  ;;  %v9982_v25 = vpop.f32.mrf.mxu1  ;;  %v2527_v42 = vrot.slane %v2419_v56, 4  ;;  %v8363_v0 = vld [vmem:[%s8756_s11] sm:$0xff] }
 0x1cc   : > { %v1690_v54 = vrot.slane %v1582_v20, 2  ;;  %v2037_v10 = vpop.f32.mrf.mxu0  ;;  %7891 = vmatmul.mubr.msk.f32.vlgmr.msra.gmra.mxu0 %vm286_vm0, %v8363_v0 }
 0x1cd   : > { %v9994_v57 = vadd.f32 %v2526_v34, %v1805_v58  ;;  %v1320_v60 = vpop.f32.mrf.mxu1  ;;  %7817 = vmatmul.mubr.msk.f32.vlgmr.msra.gmra.mxu1 %vm286_vm0, %v8363_v0  ;;  %v2528_v56 = vsel %vm2498_vm3, %v2525_v26, %v2527_v42  ;;  %4929 = vmatpush1.msra.mxu0 %v8037_v51  ;;  %v12769_v58 = vrot.slane %v9916_v11, 2  ;;  %v12770_v0 = vmov 0.0   ;;  %v8364_v51 = vld [vmem:[%s8756_s11 + $0x8] sm:$0xff] }
 0x1ce   : > { %v1691_v20 = vsel %vm1661_vm2, %v1688_v62, %v1690_v54  ;;  %v1807_v48 = vadd.f32 %v1690_v54, %v9494_v21  ;;  %v1583_v23 = vadd.f32 %v1320_v60, %v9896_v41  ;;  %4093 = vmatpush1.msra.mxu1 %v7963_v32  ;;  %2746 = vmatprep.mubr.f32.mxu1 %v12770_v0  ;;  %v12771_v62 = vrot.slane %v9984_v7, 2 }
 0x1cf   : > { %12768 = vst [vmem:[#allocation23_spill] sm:$0xff] %v9994_v57  ;;  %v1806_v34 = vadd.f32 %v1691_v20, %v9481_v46  ;;  %v2420_v14 = vadd.f32 %v12769_v58, %v2037_v10  ;;  %v10007_v4 = vpop.f32.mrf.mxu1  ;;  %v2039_v57 = vpop.f32.mrf.mxu0  ;;  %v12772_v21 = vrot.slane %v9970_v12, 2  ;;  %3406 = vmatprep.mubr.f32.mxu0 %v12770_v0 }
 0x1d0   : > { %v10015_v54 = vadd.f32 %v2527_v42, %v1807_v48  ;;  %7892 = vmatmul.mubr.msk.f32.gmra.mxu0 %vm286_vm0, %v8364_v51  ;;  %v1692_v10 = vrot.slane %v1583_v23, 2 }
 0x1d1   : > { %v2329_v26 = vsel %vm1661_vm2, %v12772_v21, %v12771_v62  ;;  %v10018_v46 = vadd.f32 %v2528_v56, %v1806_v34  ;;  %v1326_v41 = vpop.f32.mrf.mxu1  ;;  %v2042_v11 = vpop.f32.mrf.mxu0  ;;  %7818 = vmatmul.mubr.msk.f32.gmra.mxu1 %vm286_vm0, %v8364_v51  ;;  %3410 = vmatprep.mubr.f32.mxu0 %v12770_v0  ;;  %v2529_v20 = vrot.slane %v2420_v14, 4  ;;  %v8365_v62 = vld [vmem:[%s8756_s11 + $0x10] sm:$0xff] }
 0x1d2   : > { %v1584_v32 = vadd.f32 %v1326_v41, %v9914_v59  ;;  %v2421_v57 = vadd.f32 %v9956_v63, %v2042_v11  ;;  %2750 = vmatprep.mubr.f32.mxu1 %v12770_v0  ;;  %v12773_v41 = vrot.slane %v9930_v50, 2 }
 0x1d3   : > { %v10027_v42 = vpop.f32.mrf.mxu1  ;;  %v10029_v60 = vpop.f32.mrf.mxu0 }
 0x1d4   : > { %v1693_v48 = vrot.slane %v1584_v32, 2  ;;  %v2530_v56 = vrot.slane %v2421_v57, 4  ;;  %7893 = vmatmul.mubr.msk.f32.gmra.mxu0 %vm286_vm0, %v8365_v62 }
 0x1d5   : > { %v1332_v34 = vpop.f32.mrf.mxu1  ;;  %v2048_v58 = vpop.f32.mrf.mxu0  ;;  %7819 = vmatmul.mubr.msk.f32.gmra.mxu1 %vm286_vm0, %v8365_v62  ;;  %3414 = vmatprep.mubr.f32.mxu0 %v12770_v0 }
 0x1d6   : > { %v1694_v59 = vsel %vm1661_vm2, %v1692_v10, %v1693_v48  ;;  %v2531_v63 = vsel %vm2498_vm3, %v2529_v20, %v2530_v56  ;;  %v1585_v21 = vadd.f32 %v1332_v34, %v9928_v35  ;;  %v2422_v23 = vadd.f32 %v12773_v41, %v2048_v58  ;;  %2754 = vmatprep.mubr.f32.mxu1 %v12770_v0  ;;  %v8366_v58 = vld [vmem:[%s8756_s11 + $0x18] sm:$0xff] }
 0x1d7   : > { %v1808_v14 = vadd.f32 %v1694_v59, %v9504_v24  ;;  %v10041_v11 = vpop.f32.mrf.mxu1  ;;  %v10043_v51 = vpop.f32.mrf.mxu0  ;;  %v12774_v41 = vrot.slane %v9970_v12, 2  ;;  %v8367_v12 = vld [vmem:[%s8756_s11 + $0x20] sm:$0xff] }
 0x1d8   : > { %v1695_v32 = vrot.slane %v1585_v21, 2  ;;  %v2532_v57 = vrot.slane %v2422_v23, 4  ;;  %v12723_v10 = vrot.slane %v10043_v51, 2  ;;  %7894 = vmatmul.mubr.msk.f32.gmra.mxu0 %vm286_vm0, %v8366_v58 }
 0x1d9   : > { %v10047_v20 = vadd.f32 %v2531_v63, %v1808_v14  ;;  %v1338_v50 = vpop.f32.mrf.mxu1  ;;  %v2054_v34 = vpop.f32.mrf.mxu0  ;;  %7820 = vmatmul.mubr.msk.f32.gmra.mxu1 %vm286_vm0, %v8366_v58  ;;  %3418 = vmatprep.mubr.f32.mxu0 %v12770_v0 }
 0x1da   : > { %v1696_v24 = vsel %vm1661_vm2, %v1693_v48, %v1695_v32  ;;  %v1810_v62 = vadd.f32 %v1695_v32, %v9526_v49  ;;  %v2533_v59 = vsel %vm2498_vm3, %v2530_v56, %v2532_v57  ;;  %v1586_v21 = vadd.f32 %v1338_v50, %v9948_v5  ;;  %2758 = vmatprep.mubr.f32.mxu1 %v12770_v0 }
 0x1db   : > { %v1809_v63 = vadd.f32 %v1696_v24, %v9513_v40  ;;  %v2423_v23 = vadd.f32 %v12774_v41, %v2054_v34  ;;  %v10061_v14 = vpop.f32.mrf.mxu1  ;;  %v2056_v35 = vpop.f32.mrf.mxu0  ;;  %v12775_v49 = vrot.slane %v10029_v60, 2 }
 0x1dc   : > { %v10069_v56 = vadd.f32 %v2532_v57, %v1810_v62  ;;  %7895 = vmatmul.mubr.msk.f32.gmra.mxu0 %vm286_vm0, %v8367_v12  ;;  %v1697_v58 = vrot.slane %v1586_v21, 2 }
 0x1dd   : > { %v2332_v48 = vsel %vm1661_vm2, %v12775_v49, %v12723_v10  ;;  %v10071_v5 = vadd.f32 %v2533_v59, %v1809_v63  ;;  %v1344_v32 = vpop.f32.mrf.mxu1  ;;  %v2059_v40 = vpop.f32.mrf.mxu0  ;;  %7821 = vmatmul.mubr.msk.f32.gmra.mxu1 %vm286_vm0, %v8367_v12  ;;  %3422 = vmatprep.mubr.f32.mxu0 %v12770_v0  ;;  %v2534_v24 = vrot.slane %v2423_v23, 4  ;;  %v8368_v49 = vld [vmem:[%s8756_s11 + $0x28] sm:$0xff] }
 0x1de   : > { %v1587_v35 = vadd.f32 %v1344_v32, %v9968_v1  ;;  %v2424_v50 = vadd.f32 %v2329_v26, %v2059_v40  ;;  %2762 = vmatprep.mubr.f32.mxu1 %v12770_v0  ;;  %v12776_v40 = vrot.slane %v9984_v7, 2 }
 0x1df   : > { %v10079_v34 = vpop.f32.mrf.mxu1  ;;  %v10081_v57 = vpop.f32.mrf.mxu0 }
 0x1e0   : > { %v1698_v62 = vrot.slane %v1587_v35, 2  ;;  %v2535_v59 = vrot.slane %v2424_v50, 4  ;;  %7896 = vmatmul.mubr.msk.f32.gmra.mxu0 %vm286_vm0, %v8368_v49 }
 0x1e1   : > { %v1350_v63 = vpop.f32.mrf.mxu1  ;;  %v2065_v41 = vpop.f32.mrf.mxu0  ;;  %7822 = vmatmul.mubr.msk.f32.gmra.mxu1 %vm286_vm0, %v8368_v49  ;;  %3426 = vmatprep.mubr.f32.mxu0 %v12770_v0 }
 0x1e2   : > { %v1699_v1 = vsel %vm1661_vm2, %v1697_v58, %v1698_v62  ;;  %v2536_v26 = vsel %vm2498_vm3, %v2534_v24, %v2535_v59  ;;  %v1588_v32 = vadd.f32 %v1350_v63, %v9982_v25  ;;  %v2425_v21 = vadd.f32 %v12776_v40, %v2065_v41  ;;  %2766 = vmatprep.mubr.f32.mxu1 %v12770_v0  ;;  %v8369_v41 = vld [vmem:[%s8756_s11 + $0x30] sm:$0xff] }
 0x1e3   : > { %v1811_v23 = vadd.f32 %v1699_v1, %v9536_v6  ;;  %v10093_v12 = vpop.f32.mrf.mxu1  ;;  %v10095_v35 = vpop.f32.mrf.mxu0 }
 0x1e4   : > { %v1700_v50 = vrot.slane %v1588_v32, 2  ;;  %v2537_v58 = vrot.slane %v2425_v21, 4  ;;  %v12724_v49 = vrot.slane %v10095_v35, 2  ;;  %7897 = vmatmul.mubr.msk.f32.gmra.mxu0 %vm286_vm0, %v8369_v41  ;;  %v12777_v21 = vrot.slane %v10029_v60, 2  ;;  %v8370_v60 = vld [vmem:[%s8756_s11 + $0x38] sm:$0xff] }
 0x1e5   : > { %v10099_v24 = vadd.f32 %v2536_v26, %v1811_v23  ;;  %v1356_v7 = vpop.f32.mrf.mxu1  ;;  %v2071_v63 = vpop.f32.mrf.mxu0  ;;  %7823 = vmatmul.mubr.msk.f32.gmra.mxu1 %vm286_vm0, %v8369_v41  ;;  %3430 = vmatprep.mubr.f32.mxu0 %v12770_v0 }
 0x1e6   : > { %v1701_v6 = vsel %vm1661_vm2, %v1698_v62, %v1700_v50  ;;  %v1813_v1 = vadd.f32 %v1700_v50, %v9564_v15  ;;  %v2538_v32 = vsel %vm2498_vm3, %v2535_v59, %v2537_v58  ;;  %v1589_v40 = vadd.f32 %v1356_v7, %v10007_v4  ;;  %2770 = vmatprep.mubr.f32.mxu1 %v12770_v0 }
 0x1e7   : > { %v1812_v26 = vadd.f32 %v1701_v6, %v9545_v53  ;;  %v2426_v23 = vadd.f32 %v12777_v21, %v2071_v63  ;;  %v10113_v10 = vpop.f32.mrf.mxu1  ;;  %v2073_v25 = vpop.f32.mrf.mxu0  ;;  %v12778_v15 = vrot.slane %v10081_v57, 2 }
 0x1e8   : > { %v10121_v59 = vadd.f32 %v2537_v58, %v1813_v1  ;;  %7898 = vmatmul.mubr.msk.f32.gmra.mxu0 %vm286_vm0, %v8370_v60  ;;  %v1702_v41 = vrot.slane %v1589_v40, 2 }
 0x1e9   : > { %v2335_v62 = vsel %vm1661_vm2, %v12778_v15, %v12724_v49  ;;  %v10123_v4 = vadd.f32 %v2538_v32, %v1812_v26  ;;  %v1362_v50 = vpop.f32.mrf.mxu1  ;;  %v2076_v53 = vpop.f32.mrf.mxu0  ;;  %7824 = vmatmul.mubr.msk.f32.gmra.mxu1 %vm286_vm0, %v8370_v60  ;;  %3434 = vmatprep.mubr.f32.mxu0 %v12770_v0  ;;  %v2539_v6 = vrot.slane %v2426_v23, 4  ;;  %v8371_v15 = vld [vmem:[%s8756_s11 + $0x40] sm:$0xff] }
 0x1ea   : > { %v1590_v25 = vadd.f32 %v1362_v50, %v10027_v42  ;;  %v2427_v7 = vadd.f32 %v2332_v48, %v2076_v53  ;;  %2774 = vmatprep.mubr.f32.mxu1 %v12770_v0  ;;  %v12779_v53 = vrot.slane %v10043_v51, 2 }
 0x1eb   : > { %v10131_v63 = vpop.f32.mrf.mxu1  ;;  %v10133_v58 = vpop.f32.mrf.mxu0 }
 0x1ec   : > { %v1703_v1 = vrot.slane %v1590_v25, 2  ;;  %v2540_v32 = vrot.slane %v2427_v7, 4  ;;  %7899 = vmatmul.mubr.msk.f32.gmra.mxu0 %vm286_vm0, %v8371_v15 }
 0x1ed   : > { %v1368_v26 = vpop.f32.mrf.mxu1  ;;  %v2082_v21 = vpop.f32.mrf.mxu0  ;;  %7825 = vmatmul.mubr.msk.f32.gmra.mxu1 %vm286_vm0, %v8371_v15  ;;  %3438 = vmatprep.mubr.f32.mxu0 %v12770_v0 }
 0x1ee   : > { %v1704_v42 = vsel %vm1661_vm2, %v1702_v41, %v1703_v1  ;;  %v2541_v48 = vsel %vm2498_vm3, %v2539_v6, %v2540_v32  ;;  %v1591_v50 = vadd.f32 %v1368_v26, %v10041_v11  ;;  %v2428_v40 = vadd.f32 %v12779_v53, %v2082_v21  ;;  %2778 = vmatprep.mubr.f32.mxu1 %v12770_v0  ;;  %v8372_v21 = vld [vmem:[%s8756_s11 + $0x48] sm:$0xff] }
 0x1ef   : > { %v1814_v23 = vadd.f32 %v1704_v42, %v9574_v18  ;;  %v10145_v60 = vpop.f32.mrf.mxu1  ;;  %v10147_v25 = vpop.f32.mrf.mxu0 }
 0x1f0   : > { %v1705_v7 = vrot.slane %v1591_v50, 2  ;;  %v2542_v41 = vrot.slane %v2428_v40, 4  ;;  %v12725_v15 = vrot.slane %v10147_v25, 2  ;;  %7900 = vmatmul.mubr.msk.f32.gmra.mxu0 %vm286_vm0, %v8372_v21  ;;  %v12780_v40 = vrot.slane %v10081_v57, 2  ;;  %v8373_v57 = vld [vmem:[%s8756_s11 + $0x50] sm:$0xff] }
 0x1f1   : > { %v10151_v6 = vadd.f32 %v2541_v48, %v1814_v23  ;;  %v1374_v51 = vpop.f32.mrf.mxu1  ;;  %v2088_v26 = vpop.f32.mrf.mxu0  ;;  %7826 = vmatmul.mubr.msk.f32.gmra.mxu1 %vm286_vm0, %v8372_v21  ;;  %3442 = vmatprep.mubr.f32.mxu0 %v12770_v0 }
 0x1f2   : > { %v1706_v18 = vsel %vm1661_vm2, %v1703_v1, %v1705_v7  ;;  %v1816_v42 = vadd.f32 %v1705_v7, %v9603_v47  ;;  %v2543_v50 = vsel %vm2498_vm3, %v2540_v32, %v2542_v41  ;;  %v1592_v53 = vadd.f32 %v1374_v51, %v10061_v14  ;;  %2782 = vmatprep.mubr.f32.mxu1 %v12770_v0 }
 0x1f3   : > { %v1815_v48 = vadd.f32 %v1706_v18, %v9583_v55  ;;  %v2429_v23 = vadd.f32 %v12780_v40, %v2088_v26  ;;  %v10165_v49 = vpop.f32.mrf.mxu1  ;;  %v2090_v11 = vpop.f32.mrf.mxu0  ;;  %v12781_v47 = vrot.slane %v10133_v58, 2 }
 0x1f4   : > { %v10173_v32 = vadd.f32 %v2542_v41, %v1816_v42  ;;  %7901 = vmatmul.mubr.msk.f32.gmra.mxu0 %vm286_vm0, %v8373_v57  ;;  %v1707_v21 = vrot.slane %v1592_v53, 2 }
 0x1f5   : > { %v2338_v1 = vsel %vm1661_vm2, %v12781_v47, %v12725_v15  ;;  %v10175_v14 = vadd.f32 %v2543_v50, %v1815_v48  ;;  %v1380_v7 = vpop.f32.mrf.mxu1  ;;  %v2093_v55 = vpop.f32.mrf.mxu0  ;;  %7827 = vmatmul.mubr.msk.f32.gmra.mxu1 %vm286_vm0, %v8373_v57  ;;  %3446 = vmatprep.mubr.f32.mxu0 %v12770_v0  ;;  %v2544_v18 = vrot.slane %v2429_v23, 4  ;;  %v8374_v47 = vld [vmem:[%s8756_s11 + $0x58] sm:$0xff] }
 0x1f6   : > { %v1593_v11 = vadd.f32 %v1380_v7, %v10079_v34  ;;  %v2430_v51 = vadd.f32 %v2335_v62, %v2093_v55  ;;  %2786 = vmatprep.mubr.f32.mxu1 %v12770_v0  ;;  %v12782_v55 = vrot.slane %v10095_v35, 2 }
 0x1f7   : > { %v10183_v26 = vpop.f32.mrf.mxu1  ;;  %v10185_v41 = vpop.f32.mrf.mxu0 }
 0x1f8   : > { %v1708_v42 = vrot.slane %v1593_v11, 2  ;;  %v2545_v50 = vrot.slane %v2430_v51, 4  ;;  %7902 = vmatmul.mubr.msk.f32.gmra.mxu0 %vm286_vm0, %v8374_v47 }
 0x1f9   : > { %v1386_v48 = vpop.f32.mrf.mxu1  ;;  %v2099_v40 = vpop.f32.mrf.mxu0  ;;  %7828 = vmatmul.mubr.msk.f32.gmra.mxu1 %vm286_vm0, %v8374_v47  ;;  %3450 = vmatprep.mubr.f32.mxu0 %v12770_v0 }
 0x1fa   : > { %v1709_v34 = vsel %vm1661_vm2, %v1707_v21, %v1708_v42  ;;  %v2546_v62 = vsel %vm2498_vm3, %v2544_v18, %v2545_v50  ;;  %v1594_v7 = vadd.f32 %v1386_v48, %v10093_v12  ;;  %v2431_v53 = vadd.f32 %v12782_v55, %v2099_v40  ;;  %2790 = vmatprep.mubr.f32.mxu1 %v12770_v0  ;;  %v8375_v40 = vld [vmem:[%s8756_s11 + $0x60] sm:$0xff] }
 0x1fb   : > { %v1817_v23 = vadd.f32 %v1709_v34, %v9610_v39  ;;  %v10197_v57 = vpop.f32.mrf.mxu1  ;;  %v10199_v11 = vpop.f32.mrf.mxu0 }
 0x1fc   : > { %v1710_v51 = vrot.slane %v1594_v7, 2  ;;  %v2547_v21 = vrot.slane %v2431_v53, 4  ;;  %v2340_v47 = vrot.slane %v10199_v11, 2  ;;  %7903 = vmatmul.mubr.msk.f32.gmra.mxu0 %vm286_vm0, %v8375_v40  ;;  %v12783_v53 = vrot.slane %v10133_v58, 2  ;;  %v8376_v58 = vld [vmem:[%s8756_s11 + $0x68] sm:$0xff] }
 0x1fd   : > { %v10203_v18 = vadd.f32 %v2546_v62, %v1817_v23  ;;  %v1392_v35 = vpop.f32.mrf.mxu1  ;;  %v2105_v48 = vpop.f32.mrf.mxu0  ;;  %7829 = vmatmul.mubr.msk.f32.gmra.mxu1 %vm286_vm0, %v8375_v40  ;;  %3456 = vmatprep.mubr.f32.mxu0 %v12770_v0  ;;  %v12796_v11 = vld [vmem:[#allocation6_spill] sm:$0xff] }
 0x1fe   : > { %v1711_v39 = vsel %vm1661_vm2, %v1708_v42, %v1710_v51  ;;  %v1819_v34 = vadd.f32 %v1710_v51, %v9639_v38  ;;  %v2548_v7 = vsel %vm2498_vm3, %v2545_v50, %v2547_v21  ;;  %v1595_v55 = vadd.f32 %v1392_v35, %v10113_v10  ;;  %2796 = vmatprep.mubr.f32.mxu1 %v12770_v0 }
 0x1ff   : > { %v1818_v62 = vadd.f32 %v1711_v39, %v9619_v37  ;;  %v2432_v23 = vadd.f32 %v12783_v53, %v2105_v48  ;;  %v10217_v15 = vpop.f32.mrf.mxu1  ;;  %v2107_v12 = vpop.f32.mrf.mxu0  ;;  %v12784_v38 = vrot.slane %v10185_v41, 2 }
 0x200   : > { %v10227_v10 = vadd.f32 %v2547_v21, %v1819_v34  ;;  %7904 = vmatmul.mubr.msk.f32.gmra.mxu0 %vm286_vm0, %v8376_v58  ;;  %v1712_v40 = vrot.slane %v1595_v55, 2 }
 0x201   : > { %v10225_v42 = vsel %vm1661_vm2, %v12784_v38, %v2340_v47  ;;  %v10229_v50 = vadd.f32 %v2548_v7, %v1818_v62  ;;  %v1398_v37 = vpop.f32.mrf.mxu1  ;;  %v2110_v51 = vpop.f32.mrf.mxu0  ;;  %7830 = vmatmul.mubr.msk.f32.gmra.mxu1 %vm286_vm0, %v8376_v58  ;;  %3462 = vmatprep.mubr.f32.mxu0 %v12770_v0  ;;  %v2549_v39 = vrot.slane %v2432_v23, 4  ;;  %v12785_v62 = vrot.slane %v9578_v3, 6 }
 0x202   : > { %v1596_v12 = vadd.f32 %v1398_v37, %v10131_v63  ;;  %v2433_v35 = vadd.f32 %v2338_v1, %v2110_v51  ;;  %2802 = vmatprep.mubr.f32.mxu1 %v12770_v0  ;;  %v8377_v63 = vld [vmem:[%s8756_s11 + $0x70] sm:$0xff]  ;;  %v12786_v23 = vrot.slane %v10147_v25, 2  ;;  %v1096_v25 = vadd.f32 %v9599_v8, %v9180_v17 }
 0x203   : > { %v10237_v48 = vpop.f32.mrf.mxu1  ;;  %v10239_v21 = vpop.f32.mrf.mxu0  ;;  %v1095_v53 = vadd.f32 %v12785_v62, %v9172_v9  ;;  %v12788_v8 = vrot.slane %v10185_v41, 2  ;;  %v8379_v41 = vld [vmem:[%s8756_s11 + $0x80] sm:$0xff] }
 0x204   : > { %v1713_v34 = vrot.slane %v1596_v12, 2  ;;  %v2550_v7 = vrot.slane %v2433_v35, 4  ;;  %7905 = vmatmul.mubr.msk.f32.gmra.mxu0 %vm286_vm0, %v8377_v63  ;;  %v12787_v35 = vrot.slane %v9587_v44, 6 }
 0x205   : > { %v1404_v38 = vpop.f32.mrf.mxu1  ;;  %v2116_v58 = vpop.f32.mrf.mxu0  ;;  %7831 = vmatmul.mubr.msk.f32.gmra.mxu1 %vm286_vm0, %v8377_v63  ;;  %3468 = vmatprep.mubr.f32.mxu0 %v12770_v0 }
 0x206   : > { %v1714_v1 = vsel %vm1661_vm2, %v1712_v40, %v1713_v34  ;;  %v2551_v37 = vsel %vm2498_vm3, %v2549_v39, %v2550_v7  ;;  %v1597_v55 = vadd.f32 %v1404_v38, %v10145_v60  ;;  %v2434_v51 = vadd.f32 %v12786_v23, %v2116_v58  ;;  %2807 = vmatprep.mubr.f32.mxu1 %v12770_v0 }
 0x207   : > { %v1820_v9 = vadd.f32 %v1714_v1, %v1095_v53  ;;  %v10253_v3 = vpop.f32.mrf.mxu1  ;;  %v10255_v12 = vpop.f32.mrf.mxu0  ;;  %v1097_v40 = vadd.f32 %v12787_v35, %v9194_v33  ;;  %v12727_v53 = vrot.slane %v10239_v21, 2  ;;  %v8378_v1 = vld [vmem:[%s8756_s11 + $0x78] sm:$0xff] }
 0x208   : > { %v1715_v39 = vrot.slane %v1597_v55, 2  ;;  %v2552_v62 = vrot.slane %v2434_v51, 4  ;;  %v12726_v60 = vrot.slane %v10255_v12, 2  ;;  %7906 = vmatmul.mubr.msk.f32.gmra.mxu0 %vm286_vm0, %v8378_v1 }
 0x209   : > { %v10264_v38 = vadd.f32 %v2551_v37, %v1820_v9  ;;  %v1410_v58 = vpop.f32.mrf.mxu1  ;;  %v2122_v63 = vpop.f32.mrf.mxu0  ;;  %7832 = vmatmul.mubr.msk.f32.gmra.mxu1 %vm286_vm0, %v8378_v1  ;;  %3474 = vmatprep.mubr.f32.mxu0 %v12770_v0 }
 0x20a   : > { %v1716_v33 = vsel %vm1661_vm2, %v1713_v34, %v1715_v39  ;;  %v1822_v44 = vadd.f32 %v1715_v39, %v1097_v40  ;;  %v2553_v55 = vsel %vm2498_vm3, %v2550_v7, %v2552_v62  ;;  %v1598_v23 = vadd.f32 %v1410_v58, %v10165_v49  ;;  %2813 = vmatprep.mubr.f32.mxu1 %v12770_v0 }
 0x20b   : > { %v1821_v17 = vadd.f32 %v1716_v33, %v1096_v25  ;;  %v2435_v37 = vadd.f32 %v12788_v8, %v2122_v63  ;;  %v10276_v51 = vpop.f32.mrf.mxu1  ;;  %v2124_v9 = vpop.f32.mrf.mxu0  ;;  %v10284_v34 = vsel %vm1661_vm2, %v12727_v53, %v12726_v60 }
 0x20c   : > { %v10286_v7 = vadd.f32 %v2552_v62, %v1822_v44  ;;  %7907 = vmatmul.mubr.msk.f32.gmra.mxu0 %vm286_vm0, %v8379_v41  ;;  %v1717_v63 = vrot.slane %v1598_v23, 2 }
 0x20d   : > { %v10288_v49 = vadd.f32 %v2553_v55, %v1821_v17  ;;  %v1416_v35 = vpop.f32.mrf.mxu1  ;;  %v2127_v40 = vpop.f32.mrf.mxu0  ;;  %7833 = vmatmul.mubr.msk.f32.gmra.mxu1 %vm286_vm0, %v8379_v41  ;;  %3480 = vmatprep.mubr.f32.mxu0 %v12770_v0  ;;  %v2554_v1 = vrot.slane %v2435_v37, 4  ;;  %v12790_v55 = vld [vmem:[#allocation5_spill] sm:$0xff]  ;;  %v12791_v17 = vld [vmem:[#allocation20_spill] sm:$0xff] }
 0x20e   : > { %v1599_v39 = vadd.f32 %v1416_v35, %v10183_v26  ;;  %v2436_v25 = vadd.f32 %v10225_v42, %v2127_v40  ;;  %2819 = vmatprep.mubr.f32.mxu1 %v12770_v0  ;;  %v12792_v8 = vrot.slane %v12791_v17, 6  ;;  %v8380_v35 = vld [vmem:[%s8756_s11 + $0x88] sm:$0xff]  ;;  %v12793_v17 = vld [vmem:[#allocation7_spill] sm:$0xff] }
 0x20f   : > { %12789 = vst [vmem:[#allocation24_spill] sm:$0xff] %v10288_v49  ;;  %v10297_v62 = vpop.f32.mrf.mxu1  ;;  %v10299_v58 = vpop.f32.mrf.mxu0  ;;  %v8381_v49 = vld [vmem:[%s8756_s11 + $0x90] sm:$0xff] }
 0x210   : > { %v1718_v33 = vrot.slane %v1599_v39, 2  ;;  %v2555_v44 = vrot.slane %v2436_v25, 4  ;;  %v1098_v9 = vadd.f32 %v12792_v8, %v12790_v55  ;;  %7908 = vmatmul.mubr.msk.f32.gmra.mxu0 %vm286_vm0, %v8380_v35  ;;  %v12794_v8 = vld [vmem:[#allocation21_spill] sm:$0xff] }
 0x211   : > { %v1422_v41 = vpop.f32.mrf.mxu1  ;;  %v2133_v26 = vpop.f32.mrf.mxu0  ;;  %7834 = vmatmul.mubr.msk.f32.gmra.mxu1 %vm286_vm0, %v8380_v35  ;;  %3486 = vmatprep.mubr.f32.mxu0 %v12770_v0 }
 0x212   : > { %v1719_v42 = vsel %vm1661_vm2, %v1717_v63, %v1718_v33  ;;  %v2556_v40 = vsel %vm2498_vm3, %v2554_v1, %v2555_v44  ;;  %v1600_v23 = vadd.f32 %v1422_v41, %v10197_v57  ;;  %v2437_v37 = vadd.f32 %v2340_v47, %v2133_v26  ;;  %2824 = vmatprep.mubr.f32.mxu1 %v12770_v0  ;;  %v12797_v41 = vld [vmem:[#allocation22_spill] sm:$0xff] }
 0x213   : > { %v1823_v39 = vadd.f32 %v1719_v42, %v1098_v9  ;;  %v10313_v25 = vpop.f32.mrf.mxu1  ;;  %v10315_v55 = vpop.f32.mrf.mxu0  ;;  %v12795_v63 = vrot.slane %v12794_v8, 6  ;;  %v1099_v47 = vadd.f32 %v12797_v41, %v12796_v11  ;;  %v2345_v9 = vrot.slane %v10299_v58, 2  ;;  %v8385_v58 = vld [vmem:[%s8756_s11 + $0xb0] sm:$0xff] }
 0x214   : > { %v1720_v1 = vrot.slane %v1600_v23, 2  ;;  %v2557_v60 = vrot.slane %v2437_v37, 4  ;;  %v12728_v57 = vrot.slane %v10315_v55, 2  ;;  %7909 = vmatmul.mubr.msk.f32.gmra.mxu0 %vm286_vm0, %v8381_v49 }
 0x215   : > { %v1100_v35 = vadd.f32 %v12795_v63, %v12793_v17  ;;  %v10324_v26 = vadd.f32 %v2556_v40, %v1823_v39  ;;  %v1428_v42 = vpop.f32.mrf.mxu1  ;;  %v2139_v53 = vpop.f32.mrf.mxu0  ;;  %7835 = vmatmul.mubr.msk.f32.gmra.mxu1 %vm286_vm0, %v8381_v49  ;;  %v12798_v39 = vrot.slane %v10239_v21, 2  ;;  %3492 = vmatprep.mubr.f32.mxu0 %v12770_v0  ;;  %v8382_v21 = vld [vmem:[%s8756_s11 + $0x98] sm:$0xff] }
 0x216   : > { %v1721_v23 = vsel %vm1661_vm2, %v1718_v33, %v1720_v1  ;;  %v2558_v17 = vsel %vm2498_vm3, %v2555_v44, %v2557_v60  ;;  %v1601_v8 = vadd.f32 %v1428_v42, %v10217_v15  ;;  %2830 = vmatprep.mubr.f32.mxu1 %v12770_v0  ;;  %v2347_v49 = vsel %vm1661_vm2, %v2345_v9, %v12728_v57 }
 0x217   : > { %v1825_v37 = vadd.f32 %v1720_v1, %v1100_v35  ;;  %v1824_v40 = vadd.f32 %v1721_v23, %v1099_v47  ;;  %v2438_v63 = vadd.f32 %v12798_v39, %v2139_v53  ;;  %v10336_v11 = vpop.f32.mrf.mxu1  ;;  %v2141_v41 = vpop.f32.mrf.mxu0 }
 0x218   : > { %7910 = vmatmul.mubr.msk.f32.gmra.mxu0 %vm286_vm0, %v8382_v21  ;;  %v1722_v42 = vrot.slane %v1601_v8, 2  ;;  %v8383_v41 = vld [vmem:[%s8756_s11 + $0xa0] sm:$0xff] }
 0x219   : > { %v10344_v33 = vadd.f32 %v2557_v60, %v1825_v37  ;;  %v10346_v15 = vadd.f32 %v2558_v17, %v1824_v40  ;;  %v1434_v44 = vpop.f32.mrf.mxu1  ;;  %v2144_v35 = vpop.f32.mrf.mxu0  ;;  %7836 = vmatmul.mubr.msk.f32.gmra.mxu1 %vm286_vm0, %v8382_v21  ;;  %3498 = vmatprep.mubr.f32.mxu0 %v12770_v0  ;;  %v2559_v23 = vrot.slane %v2438_v63, 4  ;;  %v12800_v63 = vld [vmem:[#allocation8_spill] sm:$0xff] }
 0x21a   : > { %v1602_v53 = vadd.f32 %v1434_v44, %v10237_v48  ;;  %v2439_v1 = vadd.f32 %v10284_v34, %v2144_v35  ;;  %2836 = vmatprep.mubr.f32.mxu1 %v12770_v0  ;;  %v12799_v35 = vrot.slane %v10255_v12, 2 }
 0x21b   : > { %v10355_v60 = vpop.f32.mrf.mxu1  ;;  %v10357_v47 = vpop.f32.mrf.mxu0 }
 0x21c   : > { %v1723_v37 = vrot.slane %v1602_v53, 2  ;;  %v2560_v17 = vrot.slane %v2439_v1, 4  ;;  %7911 = vmatmul.mubr.msk.f32.gmra.mxu0 %vm286_vm0, %v8383_v41 }
 0x21d   : > { %v1440_v40 = vpop.f32.mrf.mxu1  ;;  %v2150_v39 = vpop.f32.mrf.mxu0  ;;  %7837 = vmatmul.mubr.msk.f32.gmra.mxu1 %vm286_vm0, %v8383_v41  ;;  %3504 = vmatprep.mubr.f32.mxu0 %v12770_v0 }
 0x21e   : > { %v1724_v48 = vsel %vm1661_vm2, %v1722_v42, %v1723_v37  ;;  %v2561_v34 = vsel %vm2498_vm3, %v2559_v23, %v2560_v17  ;;  %v1603_v44 = vadd.f32 %v1440_v40, %v10253_v3  ;;  %v2440_v8 = vadd.f32 %v12799_v35, %v2150_v39  ;;  %2841 = vmatprep.mubr.f32.mxu1 %v12770_v0  ;;  %v8384_v39 = vld [vmem:[%s8756_s11 + $0xa8] sm:$0xff] }
 0x21f   : > { %v1826_v21 = vadd.f32 %v1724_v48, %v12800_v63  ;;  %v10369_v53 = vpop.f32.mrf.mxu1  ;;  %v10371_v1 = vpop.f32.mrf.mxu0  ;;  %v12802_v35 = vld [vmem:[#allocation10_spill] sm:$0xff] }
 0x220   : > { %v1725_v41 = vrot.slane %v1603_v44, 2  ;;  %v2562_v42 = vrot.slane %v2440_v8, 4  ;;  %7912 = vmatmul.mubr.msk.f32.gmra.mxu0 %vm286_vm0, %v8384_v39 }
 0x221   : > { %v10375_v23 = vadd.f32 %v2561_v34, %v1826_v21  ;;  %v1446_v12 = vpop.f32.mrf.mxu1  ;;  %v2156_v40 = vpop.f32.mrf.mxu0  ;;  %7838 = vmatmul.mubr.msk.f32.gmra.mxu1 %vm286_vm0, %v8384_v39  ;;  %v12803_v34 = vld [vmem:[#allocation9_spill] sm:$0xff]  ;;  %3510 = vmatprep.mubr.f32.mxu0 %v12770_v0 }
 0x222   : > { %v1726_v48 = vsel %vm1661_vm2, %v1723_v37, %v1725_v41  ;;  %v1828_v63 = vadd.f32 %v1725_v41, %v12802_v35  ;;  %v2563_v44 = vsel %vm2498_vm3, %v2560_v17, %v2562_v42  ;;  %v1604_v8 = vadd.f32 %v1446_v12, %v10276_v51  ;;  %2847 = vmatprep.mubr.f32.mxu1 %v12770_v0 }
 0x223   : > { %12801 = vst [vmem:[#allocation5_spill] sm:$0xff] %v10375_v23  ;;  %v1827_v21 = vadd.f32 %v1726_v48, %v12803_v34  ;;  %v2441_v3 = vadd.f32 %v2345_v9, %v2156_v40  ;;  %v10389_v57 = vpop.f32.mrf.mxu1  ;;  %v2158_v23 = vpop.f32.mrf.mxu0  ;;  %v12804_v37 = vrot.slane %v10371_v1, 2  ;;  %v12805_v41 = vrot.slane %v10357_v47, 2 }
 0x224   : > { %v10397_v39 = vadd.f32 %v2562_v42, %v1828_v63  ;;  %7913 = vmatmul.mubr.msk.f32.gmra.mxu0 %vm286_vm0, %v8385_v58  ;;  %v1727_v35 = vrot.slane %v1604_v8, 2 }
 0x225   : > { %v2350_v17 = vsel %vm1661_vm2, %v12805_v41, %v12804_v37  ;;  %v10399_v51 = vadd.f32 %v2563_v44, %v1827_v21  ;;  %v1452_v12 = vpop.f32.mrf.mxu1  ;;  %v2161_v48 = vpop.f32.mrf.mxu0  ;;  %7839 = vmatmul.mubr.msk.f32.gmra.mxu1 %vm286_vm0, %v8385_v58  ;;  %3516 = vmatprep.mubr.f32.mxu0 %v12770_v0  ;;  %v2564_v63 = vrot.slane %v2441_v3, 4  ;;  %v8386_v41 = vld [vmem:[%s8756_s11 + $0xb8] sm:$0xff]  ;;  %v12809_v3 = vld [vmem:[#allocation11_spill] sm:$0xff] }
 0x226   : > { %12806 = vst [vmem:[#allocation20_spill] sm:$0xff] %v10397_v39  ;;  %v1605_v9 = vadd.f32 %v1452_v12, %v10297_v62  ;;  %v2442_v23 = vadd.f32 %v2347_v49, %v2161_v48  ;;  %2853 = vmatprep.mubr.f32.mxu1 %v12770_v0  ;;  %v12808_v48 = vrot.slane %v10315_v55, 2 }
 0x227   : > { %12807 = vst [vmem:[#allocation7_spill] sm:$0xff] %v10399_v51  ;;  %v10407_v40 = vpop.f32.mrf.mxu1  ;;  %v10409_v42 = vpop.f32.mrf.mxu0 }
 0x228   : > { %v1728_v44 = vrot.slane %v1605_v9, 2  ;;  %v2565_v34 = vrot.slane %v2442_v23, 4  ;;  %7914 = vmatmul.mubr.msk.f32.gmra.mxu0 %vm286_vm0, %v8386_v41 }
 0x229   : > { %v1458_v21 = vpop.f32.mrf.mxu1  ;;  %v2167_v37 = vpop.f32.mrf.mxu0  ;;  %7840 = vmatmul.mubr.msk.f32.gmra.mxu1 %vm286_vm0, %v8386_v41  ;;  %3522 = vmatprep.mubr.f32.mxu0 %v12770_v0 }
 0x22a   : > { %v1729_v62 = vsel %vm1661_vm2, %v1727_v35, %v1728_v44  ;;  %v2566_v49 = vsel %vm2498_vm3, %v2564_v63, %v2565_v34  ;;  %v1606_v12 = vadd.f32 %v1458_v21, %v10313_v25  ;;  %v2443_v8 = vadd.f32 %v12808_v48, %v2167_v37  ;;  %2858 = vmatprep.mubr.f32.mxu1 %v12770_v0  ;;  %v8387_v37 = vld [vmem:[%s8756_s11 + $0xc0] sm:$0xff] }
 0x22b   : > { %v1829_v58 = vadd.f32 %v1729_v62, %v12809_v3  ;;  %v10421_v9 = vpop.f32.mrf.mxu1  ;;  %v10423_v23 = vpop.f32.mrf.mxu0  ;;  %v2351_v25 = vrot.slane %v10409_v42, 2  ;;  %v12811_v48 = vld [vmem:[#allocation13_spill] sm:$0xff] }
 0x22c   : > { %v1730_v41 = vrot.slane %v1606_v12, 2  ;;  %v2567_v35 = vrot.slane %v2443_v8, 4  ;;  %7915 = vmatmul.mubr.msk.f32.gmra.mxu0 %vm286_vm0, %v8387_v37 }
 0x22d   : > { %v10427_v63 = vadd.f32 %v2566_v49, %v1829_v58  ;;  %v1464_v55 = vpop.f32.mrf.mxu1  ;;  %v2173_v21 = vpop.f32.mrf.mxu0  ;;  %7841 = vmatmul.mubr.msk.f32.gmra.mxu1 %vm286_vm0, %v8387_v37  ;;  %v12812_v49 = vld [vmem:[#allocation12_spill] sm:$0xff]  ;;  %v12813_v58 = vrot.slane %v10357_v47, 2  ;;  %3528 = vmatprep.mubr.f32.mxu0 %v12770_v0  ;;  %v12814_v37 = vrot.slane %v10423_v23, 2 }
 0x22e   : > { %v1731_v62 = vsel %vm1661_vm2, %v1728_v44, %v1730_v41  ;;  %v1831_v3 = vadd.f32 %v1730_v41, %v12811_v48  ;;  %v2568_v12 = vsel %vm2498_vm3, %v2565_v34, %v2567_v35  ;;  %v1607_v8 = vadd.f32 %v1464_v55, %v10336_v11  ;;  %2864 = vmatprep.mubr.f32.mxu1 %v12770_v0  ;;  %v8388_v48 = vld [vmem:[%s8756_s11 + $0xc8] sm:$0xff] }
 0x22f   : > { %12810 = vst [vmem:[#allocation21_spill] sm:$0xff] %v10427_v63  ;;  %v1830_v42 = vadd.f32 %v1731_v62, %v12812_v49  ;;  %v2444_v51 = vadd.f32 %v12813_v58, %v2173_v21  ;;  %v1466_v63 = vpop.f32.mrf.mxu1  ;;  %v2175_v39 = vpop.f32.mrf.mxu0  ;;  %v2353_v44 = vsel %vm1661_vm2, %v2351_v25, %v12814_v37  ;;  %v8389_v58 = vld [vmem:[%s8756_s11 + $0xd0] sm:$0xff] }
 0x230   : > { %v10445_v41 = vadd.f32 %v2567_v35, %v1831_v3  ;;  %7916 = vmatmul.mubr.msk.f32.gmra.mxu0 %vm286_vm0, %v8388_v48  ;;  %v1732_v21 = vrot.slane %v1607_v8, 2 }
 0x231   : > { %v10447_v34 = vadd.f32 %v2568_v12, %v1830_v42  ;;  %v1469_v11 = vpop.f32.mrf.mxu1  ;;  %v2178_v55 = vpop.f32.mrf.mxu0  ;;  %7842 = vmatmul.mubr.msk.f32.gmra.mxu1 %vm286_vm0, %v8388_v48  ;;  %3534 = vmatprep.mubr.f32.mxu0 %v12770_v0  ;;  %v2569_v62 = vrot.slane %v2444_v51, 4  ;;  %v12816_v51 = vld [vmem:[#allocation14_spill] sm:$0xff] }
 0x232   : > { %v1608_v47 = vadd.f32 %v1469_v11, %v10355_v60  ;;  %v2445_v39 = vadd.f32 %v2350_v17, %v2178_v55  ;;  %2870 = vmatprep.mubr.f32.mxu1 %v12770_v0  ;;  %v12815_v11 = vrot.slane %v10371_v1, 2  ;;  %v12817_v1 = vld [vmem:[#allocation16_spill] sm:$0xff] }
 0x233   : > { %v1471_v63 = vpop.f32.mrf.mxu1  ;;  %v2180_v35 = vpop.f32.mrf.mxu0 }
 0x234   : > { %v1733_v3 = vrot.slane %v1608_v47, 2  ;;  %v2570_v12 = vrot.slane %v2445_v39, 4  ;;  %7917 = vmatmul.mubr.msk.f32.gmra.mxu0 %vm286_vm0, %v8389_v58 }
 0x235   : > { %v1474_v49 = vpop.f32.mrf.mxu1  ;;  %v2183_v42 = vpop.f32.mrf.mxu0  ;;  %7843 = vmatmul.mubr.msk.f32.gmra.mxu1 %vm286_vm0, %v8389_v58  ;;  %3540 = vmatprep.mubr.f32.mxu0 %v12770_v0 }
 0x236   : > { %v1734_v60 = vsel %vm1661_vm2, %v1732_v21, %v1733_v3  ;;  %v2571_v17 = vsel %vm2498_vm3, %v2569_v62, %v2570_v12  ;;  %v1609_v37 = vadd.f32 %v1474_v49, %v10369_v53  ;;  %v2446_v8 = vadd.f32 %v12815_v11, %v2183_v42  ;;  %2875 = vmatprep.mubr.f32.mxu1 %v12770_v0  ;;  %v8390_v62 = vld [vmem:[%s8756_s11 + $0xd8] sm:$0xff] }
 0x237   : > { %v1832_v55 = vadd.f32 %v1734_v60, %v12816_v51  ;;  %v1476_v48 = vpop.f32.mrf.mxu1  ;;  %v2185_v47 = vpop.f32.mrf.mxu0 }
 0x238   : > { %v1735_v39 = vrot.slane %v1609_v37, 2  ;;  %v2572_v63 = vrot.slane %v2446_v8, 4  ;;  %7918 = vmatmul.mubr.msk.f32.gmra.mxu0 %vm286_vm0, %v8390_v62 }
 0x239   : > { %v10466_v35 = vadd.f32 %v2571_v17, %v1832_v55  ;;  %v1479_v21 = vpop.f32.mrf.mxu1  ;;  %v2188_v58 = vpop.f32.mrf.mxu0  ;;  %7844 = vmatmul.mubr.msk.f32.gmra.mxu1 %vm286_vm0, %v8390_v62  ;;  %v12818_v17 = vld [vmem:[#allocation15_spill] sm:$0xff]  ;;  %3546 = vmatprep.mubr.f32.mxu0 %v12770_v0 }
 0x23a   : > { %v1736_v53 = vsel %vm1661_vm2, %v1733_v3, %v1735_v39  ;;  %v1834_v49 = vadd.f32 %v1735_v39, %v12817_v1  ;;  %v2573_v42 = vsel %vm2498_vm3, %v2570_v12, %v2572_v63  ;;  %v1610_v60 = vadd.f32 %v1479_v21, %v10389_v57  ;;  %2881 = vmatprep.mubr.f32.mxu1 %v12770_v0  ;;  %v8391_v39 = vld [vmem:[%s8756_s11 + $0xe0] sm:$0xff] }
 0x23b   : > { %v1833_v37 = vadd.f32 %v1736_v53, %v12818_v17  ;;  %v2447_v11 = vadd.f32 %v2351_v25, %v2188_v58  ;;  %v1481_v8 = vpop.f32.mrf.mxu1  ;;  %v2190_v51 = vpop.f32.mrf.mxu0 }
 0x23c   : > { %v10478_v55 = vadd.f32 %v2572_v63, %v1834_v49  ;;  %7919 = vmatmul.mubr.msk.f32.gmra.mxu0 %vm286_vm0, %v8391_v39  ;;  %v1737_v21 = vrot.slane %v1610_v60, 2 }
 0x23d   : > { %v10480_v48 = vadd.f32 %v2573_v42, %v1833_v37  ;;  %v1484_v3 = vpop.f32.mrf.mxu1  ;;  %v2193_v47 = vpop.f32.mrf.mxu0  ;;  %7845 = vmatmul.mubr.msk.f32.gmra.mxu1 %vm286_vm0, %v8391_v39  ;;  %3552 = vmatprep.mubr.f32.mxu0 %v12770_v0  ;;  %v2574_v58 = vrot.slane %v2447_v11, 4  ;;  %v8392_v42 = vld [vmem:[%s8756_s11 + $0xe8] sm:$0xff]  ;;  %v12819_v37 = vrot.slane %v10423_v23, 2  ;;  %v12820_v11 = vld [vmem:[#allocation17_spill] sm:$0xff]  ;;  %v12821_v23 = vld [vmem:[#allocation19_spill] sm:$0xff] }
 0x23e   : > { %v1611_v57 = vadd.f32 %v1484_v3, %v10407_v40  ;;  %v2448_v12 = vadd.f32 %v2353_v44, %v2193_v47  ;;  %2887 = vmatprep.mubr.f32.mxu1 %v12770_v0 }
 0x23f   : > { %v1486_v25 = vpop.f32.mrf.mxu1  ;;  %v2195_v63 = vpop.f32.mrf.mxu0 }
 0x240   : > { %v1738_v62 = vrot.slane %v1611_v57, 2  ;;  %v2575_v53 = vrot.slane %v2448_v12, 4  ;;  %7920 = vmatmul.mubr.msk.f32.gmra.mxu0 %vm286_vm0, %v8392_v42  ;;  %v8393_v63 = vld [vmem:[%s8756_s11 + $0xf0] sm:$0xff] }
 0x241   : > { %v1489_v1 = vpop.f32.mrf.mxu1  ;;  %v2198_v49 = vpop.f32.mrf.mxu0  ;;  %7846 = vmatmul.mubr.msk.f32.gmra.mxu1 %vm286_vm0, %v8392_v42  ;;  %3558 = vmatprep.mubr.f32.mxu0 %v12770_v0 }
 0x242   : > { %v1739_v40 = vsel %vm1661_vm2, %v1737_v21, %v1738_v62  ;;  %v2576_v44 = vsel %vm2498_vm3, %v2574_v58, %v2575_v53  ;;  %v1612_v17 = vadd.f32 %v1489_v1, %v10421_v9  ;;  %v2449_v60 = vadd.f32 %v12819_v37, %v2198_v49  ;;  %2892 = vmatprep.mubr.f32.mxu1 %v12770_v0  ;;  %v12822_v1 = vld [vmem:[#allocation18_spill] sm:$0xff] }
 0x243   : > { %v1835_v8 = vadd.f32 %v1739_v40, %v12820_v11  ;;  %v1491_v51 = vpop.f32.mrf.mxu1  ;;  %v2200_v3 = vpop.f32.mrf.mxu0 }
 0x244   : > { %v1740_v47 = vrot.slane %v1612_v17, 2  ;;  %v2577_v39 = vrot.slane %v2449_v60, 4  ;;  %7921 = vmatmul.mubr.msk.f32.gmra.mxu0 %vm286_vm0, %v8393_v63  ;;  %v8395_v3 = vld [vmem:[%s8756_s11 + $0x100] sm:$0xff] }
 0x245   : > { %v10499_v57 = vadd.f32 %v2576_v44, %v1835_v8  ;;  %v1494_v12 = vpop.f32.mrf.mxu1  ;;  %v2203_v25 = vpop.f32.mrf.mxu0  ;;  %7847 = vmatmul.mubr.msk.f32.gmra.mxu1 %vm286_vm0, %v8393_v63  ;;  %3564 = vmatprep.mubr.f32.mxu0 %v12770_v0  ;;  %v8396_v63 = vld [vmem:[%s8756_s11 + $0x108] sm:$0xff] }
 0x246   : > { %v1741_v9 = vsel %vm1661_vm2, %v1738_v62, %v1740_v47  ;;  %v1837_v21 = vadd.f32 %v1740_v47, %v12821_v23  ;;  %v2578_v58 = vsel %vm2498_vm3, %v2575_v53, %v2577_v39  ;;  %2898 = vmatprep.mubr.f32.mxu1 %v12770_v0  ;;  %v8394_v62 = vld [vmem:[%s8756_s11 + $0xf8] sm:$0xff] }
 0x247   : > { %v1836_v49 = vadd.f32 %v1741_v9, %v12822_v1  ;;  %v1495_v42 = vpop.f32.mrf.mxu1  ;;  %v2204_v40 = vpop.f32.mrf.mxu0  ;;  %v8397_v1 = vld [vmem:[%s8756_s11 + $0x110] sm:$0xff] }
 0x248   : > { %v10510_v44 = vadd.f32 %v2577_v39, %v1837_v21  ;;  %7922 = vmatmul.mubr.msk.f32.gmra.mxu0 %vm286_vm0, %v8394_v62 }
 0x249   : > { %v10512_v17 = vadd.f32 %v2578_v58, %v1836_v49  ;;  %v1498_v37 = vpop.f32.mrf.mxu1  ;;  %v2207_v60 = vpop.f32.mrf.mxu0  ;;  %7848 = vmatmul.mubr.msk.f32.gmra.mxu1 %vm286_vm0, %v8394_v62  ;;  %3570 = vmatprep.mubr.f32.mxu0 %v12770_v0 }
 0x24a   : > { %2904 = vmatprep.mubr.f32.mxu1 %v12770_v0  ;;  %v8398_v60 = vld [vmem:[%s8756_s11 + $0x118] sm:$0xff] }
 0x24b   : > { %v1499_v53 = vpop.f32.mrf.mxu1  ;;  %v2208_v11 = vpop.f32.mrf.mxu0 }
 0x24c   : > { %7923 = vmatmul.mubr.msk.f32.gmra.mxu0 %vm286_vm0, %v8395_v3 }
 0x24d   : > { %v1502_v8 = vpop.f32.mrf.mxu1  ;;  %v2211_v51 = vpop.f32.mrf.mxu0  ;;  %7849 = vmatmul.mubr.msk.f32.gmra.mxu1 %vm286_vm0, %v8395_v3  ;;  %3576 = vmatprep.mubr.f32.mxu0 %v12770_v0 }
 0x24e   : > { %2909 = vmatprep.mubr.f32.mxu1 %v12770_v0  ;;  %v8399_v51 = vld [vmem:[%s8756_s11 + $0x120] sm:$0xff] }
 0x24f   : > { %v1503_v47 = vpop.f32.mrf.mxu1  ;;  %v2212_v39 = vpop.f32.mrf.mxu0 }
 0x250   : > { %7924 = vmatmul.mubr.msk.f32.gmra.mxu0 %vm286_vm0, %v8396_v63 }
 0x251   : > { %v1506_v12 = vpop.f32.mrf.mxu1  ;;  %v2215_v25 = vpop.f32.mrf.mxu0  ;;  %7850 = vmatmul.mubr.msk.f32.gmra.mxu1 %vm286_vm0, %v8396_v63  ;;  %3582 = vmatprep.mubr.f32.mxu0 %v12770_v0 }
 0x252   : > { %2915 = vmatprep.mubr.f32.mxu1 %v12770_v0  ;;  %v8400_v25 = vld [vmem:[%s8756_s11 + $0x128] sm:$0xff] }
 0x253   : > { %v1507_v9 = vpop.f32.mrf.mxu1  ;;  %v2216_v23 = vpop.f32.mrf.mxu0 }
 0x254   : > { %7925 = vmatmul.mubr.msk.f32.gmra.mxu0 %vm286_vm0, %v8397_v1 }
 0x255   : > { %v1510_v21 = vpop.f32.mrf.mxu1  ;;  %v2219_v58 = vpop.f32.mrf.mxu0  ;;  %7851 = vmatmul.mubr.msk.f32.gmra.mxu1 %vm286_vm0, %v8397_v1  ;;  %3588 = vmatprep.mubr.f32.mxu0 %v12770_v0 }
 0x256   : > { %2921 = vmatprep.mubr.f32.mxu1 %v12770_v0  ;;  %v8401_v58 = vld [vmem:[%s8756_s11 + $0x130] sm:$0xff] }
 0x257   : > { %v1511_v49 = vpop.f32.mrf.mxu1  ;;  %v2220_v42 = vpop.f32.mrf.mxu0 }
 0x258   : > { %7926 = vmatmul.mubr.msk.f32.gmra.mxu0 %vm286_vm0, %v8398_v60 }
 0x259   : > { %v1514_v40 = vpop.f32.mrf.mxu1  ;;  %v2223_v37 = vpop.f32.mrf.mxu0  ;;  %7852 = vmatmul.mubr.msk.f32.gmra.mxu1 %vm286_vm0, %v8398_v60  ;;  %3594 = vmatprep.mubr.f32.mxu0 %v12770_v0 }
 0x25a   : > { %2926 = vmatprep.mubr.f32.mxu1 %v12770_v0  ;;  %v8402_v37 = vld [vmem:[%s8756_s11 + $0x138] sm:$0xff] }
 0x25b   : > { %v1515_v62 = vpop.f32.mrf.mxu1  ;;  %v2224_v53 = vpop.f32.mrf.mxu0 }
 0x25c   : > { %7927 = vmatmul.mubr.msk.f32.gmra.mxu0 %vm286_vm0, %v8399_v51 }
 0x25d   : > { %v1518_v11 = vpop.f32.mrf.mxu1  ;;  %v2227_v8 = vpop.f32.mrf.mxu0  ;;  %7853 = vmatmul.mubr.msk.f32.gmra.mxu1 %vm286_vm0, %v8399_v51  ;;  %3600 = vmatprep.mubr.f32.mxu0 %v12770_v0 }
 0x25e   : > { %2932 = vmatprep.mubr.f32.mxu1 %v12770_v0  ;;  %v8403_v8 = vld [vmem:[%s8756_s11 + $0x140] sm:$0xff] }
 0x25f   : > { %v1519_v3 = vpop.f32.mrf.mxu1  ;;  %v2228_v47 = vpop.f32.mrf.mxu0 }
 0x260   : > { %7928 = vmatmul.mubr.msk.f32.gmra.mxu0 %vm286_vm0, %v8400_v25 }
 0x261   : > { %v1522_v39 = vpop.f32.mrf.mxu1  ;;  %v2231_v12 = vpop.f32.mrf.mxu0  ;;  %7854 = vmatmul.mubr.msk.f32.gmra.mxu1 %vm286_vm0, %v8400_v25  ;;  %3606 = vmatprep.mubr.f32.mxu0 %v12770_v0  ;;  %v8186_v25 = vld [vmem:[%s12709_s1 + $0x88] sm:$0xff] }
 0x262   : > { %2938 = vmatprep.mubr.f32.mxu1 %v12770_v0  ;;  %v8404_v12 = vld [vmem:[%s8756_s11 + $0x148] sm:$0xff]  ;;  %6312 = vmatprep.subr.mxu0 %v8186_v25 }
 0x263   : > { %v1523_v63 = vpop.f32.mrf.mxu1  ;;  %v2232_v9 = vpop.f32.mrf.mxu0  ;;  %v8408_v25 = vld [vmem:[%s8756_s11 + $0x168] sm:$0xff] }
 0x264   : > { %7929 = vmatmul.mubr.msk.f32.gmra.mxu0 %vm286_vm0, %v8401_v58  ;;  %v8112_v63 = vld [vmem:[%s12709_s1 + $0x78] sm:$0xff] }
 0x265   : > { %v1526_v23 = vpop.f32.mrf.mxu1  ;;  %v2235_v21 = vpop.f32.mrf.mxu0  ;;  %7855 = vmatmul.mubr.msk.f32.gmra.mxu1 %vm286_vm0, %v8401_v58  ;;  %3612 = vmatprep.mubr.f32.mxu0 %v12770_v0 }
 0x266   : > { %2943 = vmatprep.mubr.f32.mxu1 %v12770_v0  ;;  %5588 = vmatprep.subr.mxu1 %v8112_v63 }
 0x267   : > { %v1527_v1 = vpop.f32.mrf.mxu1  ;;  %v2236_v49 = vpop.f32.mrf.mxu0 }
 0x268   : > { %7930 = vmatmul.mubr.msk.f32.gmra.mxu0 %vm286_vm0, %v8402_v37  ;;  %v8405_v1 = vld [vmem:[%s8756_s11 + $0x150] sm:$0xff] }
 0x269   : > { %v1530_v42 = vpop.f32.mrf.mxu1  ;;  %v2239_v40 = vpop.f32.mrf.mxu0  ;;  %7856 = vmatmul.mubr.msk.f32.gmra.mxu1 %vm286_vm0, %v8402_v37  ;;  %3618 = vmatprep.mubr.f32.mxu0 %v12770_v0 }
 0x26a   : > { %2949 = vmatprep.mubr.f32.mxu1 %v12770_v0 }
 0x26b   : > { %v1531_v60 = vpop.f32.mrf.mxu1  ;;  %v2240_v62 = vpop.f32.mrf.mxu0 }
 0x26c   : > { %7931 = vmatmul.mubr.msk.f32.gmra.mxu0 %vm286_vm0, %v8403_v8  ;;  %v8406_v60 = vld [vmem:[%s8756_s11 + $0x158] sm:$0xff] }
 0x26d   : > { %v1534_v53 = vpop.f32.mrf.mxu1  ;;  %v2243_v11 = vpop.f32.mrf.mxu0  ;;  %7857 = vmatmul.mubr.msk.f32.gmra.mxu1 %vm286_vm0, %v8403_v8  ;;  %3624 = vmatprep.mubr.f32.mxu0 %v12770_v0 }
 0x26e   : > { %2955 = vmatprep.mubr.f32.mxu1 %v12770_v0 }
 0x26f   : > { %v1535_v51 = vpop.f32.mrf.mxu1  ;;  %v2244_v3 = vpop.f32.mrf.mxu0 }
 0x270   : > { %7932 = vmatmul.mubr.msk.f32.gmra.mxu0 %vm286_vm0, %v8404_v12  ;;  %v8407_v51 = vld [vmem:[%s8756_s11 + $0x160] sm:$0xff] }
 0x271   : > { %v1538_v47 = vpop.f32.mrf.mxu1  ;;  %v2247_v39 = vpop.f32.mrf.mxu0  ;;  %7858 = vmatmul.mubr.msk.f32.gmra.mxu1 %vm286_vm0, %v8404_v12  ;;  %3630 = vmatprep.mubr.f32.mxu0 %v12770_v0 }
 0x272   : > { %2960 = vmatprep.mubr.f32.mxu1 %v12770_v0 }
 0x273   : > { %v1539_v9 = vpop.f32.mrf.mxu1  ;;  %v2248_v23 = vpop.f32.mrf.mxu0 }
 0x274   : > { %7933 = vmatmul.mubr.msk.f32.gmra.mxu0 %vm286_vm0, %v8405_v1 }
 0x275   : > { %v1542_v21 = vpop.f32.mrf.mxu1  ;;  %v2251_v58 = vpop.f32.mrf.mxu0  ;;  %7859 = vmatmul.mubr.msk.f32.gmra.mxu1 %vm286_vm0, %v8405_v1  ;;  %3636 = vmatprep.mubr.f32.mxu0 %v12770_v0 }
 0x276   : > { %2966 = vmatprep.mubr.f32.mxu1 %v12770_v0  ;;  %v8409_v58 = vld [vmem:[%s8756_s11 + $0x170] sm:$0xff] }
 0x277   : > { %v1543_v49 = vpop.f32.mrf.mxu1  ;;  %v2252_v42 = vpop.f32.mrf.mxu0 }
 0x278   : > { %7934 = vmatmul.mubr.msk.f32.gmra.mxu0 %vm286_vm0, %v8406_v60 }
 0x279   : > { %v1546_v40 = vpop.f32.mrf.mxu1  ;;  %v2255_v37 = vpop.f32.mrf.mxu0  ;;  %7860 = vmatmul.mubr.msk.f32.gmra.mxu1 %vm286_vm0, %v8406_v60  ;;  %3642 = vmatprep.mubr.f32.mxu0 %v12770_v0 }
 0x27a   : > { %2972 = vmatprep.mubr.f32.mxu1 %v12770_v0  ;;  %v8410_v37 = vld [vmem:[%s8756_s11 + $0x178] sm:$0xff] }
 0x27b   : > { %v1547_v62 = vpop.f32.mrf.mxu1  ;;  %v2256_v53 = vpop.f32.mrf.mxu0 }
 0x27c   : > { %7935 = vmatmul.mubr.msk.f32.gmra.mxu0 %vm286_vm0, %v8407_v51 }
 0x27d   : > { %v1550_v11 = vpop.f32.mrf.mxu1  ;;  %v2259_v8 = vpop.f32.mrf.mxu0  ;;  %7861 = vmatmul.mubr.msk.f32.gmra.mxu1 %vm286_vm0, %v8407_v51  ;;  %3648 = vmatprep.mubr.f32.mxu0 %v12770_v0 }
 0x27e   : > { %2977 = vmatprep.mubr.f32.mxu1 %v12770_v0  ;;  %v8411_v11 = vld [vmem:[%s8756_s11 + $0x180] sm:$0xff] }
 0x27f   : > { %v1551_v3 = vpop.f32.mrf.mxu1  ;;  %v2260_v47 = vpop.f32.mrf.mxu0 }
 0x280   : > { %7936 = vmatmul.mubr.msk.f32.gmra.mxu0 %vm286_vm0, %v8408_v25 }
 0x281   : > { %v1554_v39 = vpop.f32.mrf.mxu1  ;;  %v2263_v12 = vpop.f32.mrf.mxu0  ;;  %7862 = vmatmul.mubr.msk.f32.gmra.mxu1 %vm286_vm0, %v8408_v25  ;;  %3654 = vmatprep.mubr.f32.mxu0 %v12770_v0 }
 0x282   : > { %2983 = vmatprep.mubr.f32.mxu1 %v12770_v0  ;;  %v8412_v39 = vld [vmem:[%s8756_s11 + $0x188] sm:$0xff] }
 0x283   : > { %v1555_v63 = vpop.f32.mrf.mxu1  ;;  %v2264_v9 = vpop.f32.mrf.mxu0 }
 0x284   : > { %7937 = vmatmul.mubr.msk.f32.gmra.mxu0 %vm286_vm0, %v8409_v58 }
 0x285   : > { %v1558_v23 = vpop.f32.mrf.mxu1  ;;  %v2267_v21 = vpop.f32.mrf.mxu0  ;;  %7863 = vmatmul.mubr.msk.f32.gmra.mxu1 %vm286_vm0, %v8409_v58  ;;  %3660 = vmatprep.mubr.f32.mxu0 %v12770_v0 }
 0x286   : > { %2989 = vmatprep.mubr.f32.mxu1 %v12770_v0  ;;  %v8413_v23 = vld [vmem:[%s8756_s11 + $0x190] sm:$0xff] }
 0x287   : > { %v1559_v1 = vpop.f32.mrf.mxu1  ;;  %v2268_v49 = vpop.f32.mrf.mxu0 }
 0x288   : > { %7938 = vmatmul.mubr.msk.f32.gmra.mxu0 %vm286_vm0, %v8410_v37 }
 0x289   : > { %v1562_v42 = vpop.f32.mrf.mxu1  ;;  %v2271_v40 = vpop.f32.mrf.mxu0  ;;  %7864 = vmatmul.mubr.msk.f32.gmra.mxu1 %vm286_vm0, %v8410_v37  ;;  %3666 = vmatprep.mubr.f32.mxu0 %v12770_v0 }
 0x28a   : > { %2994 = vmatprep.mubr.f32.mxu1 %v12770_v0  ;;  %v8414_v42 = vld [vmem:[%s8756_s11 + $0x198] sm:$0xff] }
 0x28b   : > { %v1563_v60 = vpop.f32.mrf.mxu1  ;;  %v2272_v62 = vpop.f32.mrf.mxu0 }
 0x28c   : > { %7939 = vmatmul.mubr.msk.f32.gmra.mxu0 %vm286_vm0, %v8411_v11 }
 0x28d   : > { %v2744_v53 = vpop.f32.mrf.mxu1  ;;  %7865 = vmatmul.mubr.msk.f32.gmra.mxu1 %vm286_vm0, %v8411_v11  ;;  %v3404_v8 = vpop.f32.mrf.mxu0  ;;  %3672 = vmatprep.mubr.f32.mxu0 %v12770_v0 }
 0x28e   : > { %3000 = vmatprep.mubr.f32.mxu1 %v12770_v0  ;;  %v8415_v53 = vld [vmem:[%s8756_s11 + $0x1a0] sm:$0xff] }
 0x28f   : > { %v2745_v51 = vpop.f32.mrf.mxu1  ;;  %v3405_v3 = vpop.f32.mrf.mxu0 }
 0x290   : > { %7940 = vmatmul.mubr.msk.f32.gmra.mxu0 %vm286_vm0, %v8412_v39 }
 0x291   : > { %v2748_v47 = vpop.f32.mrf.mxu1  ;;  %7866 = vmatmul.mubr.msk.f32.gmra.mxu1 %vm286_vm0, %v8412_v39  ;;  %v3408_v12 = vpop.f32.mrf.mxu0  ;;  %3678 = vmatprep.mubr.f32.mxu0 %v12770_v0 }
 0x292   : > { %3006 = vmatprep.mubr.f32.mxu1 %v12770_v0  ;;  %v8416_v47 = vld [vmem:[%s8756_s11 + $0x1a8] sm:$0xff] }
 0x293   : > { %v2749_v25 = vpop.f32.mrf.mxu1  ;;  %v3409_v63 = vpop.f32.mrf.mxu0 }
 0x294   : > { %7941 = vmatmul.mubr.msk.f32.gmra.mxu0 %vm286_vm0, %v8413_v23 }
 0x295   : > { %v2752_v9 = vpop.f32.mrf.mxu1  ;;  %7867 = vmatmul.mubr.msk.f32.gmra.mxu1 %vm286_vm0, %v8413_v23  ;;  %v3412_v21 = vpop.f32.mrf.mxu0  ;;  %3684 = vmatprep.mubr.f32.mxu0 %v12770_v0 }
 0x296   : > { %3011 = vmatprep.mubr.f32.mxu1 %v12770_v0  ;;  %v8417_v9 = vld [vmem:[%s8756_s11 + $0x1b0] sm:$0xff] }
 0x297   : > { %v2753_v58 = vpop.f32.mrf.mxu1  ;;  %v3413_v1 = vpop.f32.mrf.mxu0 }
 0x298   : > { %7942 = vmatmul.mubr.msk.f32.gmra.mxu0 %vm286_vm0, %v8414_v42 }
 0x299   : > { %v2756_v49 = vpop.f32.mrf.mxu1  ;;  %7868 = vmatmul.mubr.msk.f32.gmra.mxu1 %vm286_vm0, %v8414_v42  ;;  %v3416_v40 = vpop.f32.mrf.mxu0  ;;  %3690 = vmatprep.mubr.f32.mxu0 %v12770_v0 }
 0x29a   : > { %3017 = vmatprep.mubr.f32.mxu1 %v12770_v0  ;;  %v8418_v49 = vld [vmem:[%s8756_s11 + $0x1b8] sm:$0xff] }
 0x29b   : > { %v2757_v37 = vpop.f32.mrf.mxu1  ;;  %v3417_v60 = vpop.f32.mrf.mxu0 }
 0x29c   : > { %7943 = vmatmul.mubr.msk.f32.gmra.mxu0 %vm286_vm0, %v8415_v53 }
 0x29d   : > { %v2760_v62 = vpop.f32.mrf.mxu1  ;;  %7869 = vmatmul.mubr.msk.f32.gmra.mxu1 %vm286_vm0, %v8415_v53  ;;  %v3420_v11 = vpop.f32.mrf.mxu0  ;;  %3696 = vmatprep.mubr.f32.mxu0 %v12770_v0 }
 0x29e   : > { %3023 = vmatprep.mubr.f32.mxu1 %v12770_v0  ;;  %v8419_v62 = vld [vmem:[%s8756_s11 + $0x1c0] sm:$0xff] }
 0x29f   : > { %v2761_v8 = vpop.f32.mrf.mxu1  ;;  %v3421_v51 = vpop.f32.mrf.mxu0 }
 0x2a0   : > { %7944 = vmatmul.mubr.msk.f32.gmra.mxu0 %vm286_vm0, %v8416_v47 }
 0x2a1   : > { %v2764_v3 = vpop.f32.mrf.mxu1  ;;  %7870 = vmatmul.mubr.msk.f32.gmra.mxu1 %vm286_vm0, %v8416_v47  ;;  %v3424_v39 = vpop.f32.mrf.mxu0  ;;  %3702 = vmatprep.mubr.f32.mxu0 %v12770_v0 }
 0x2a2   : > { %3028 = vmatprep.mubr.f32.mxu1 %v12770_v0  ;;  %v8420_v3 = vld [vmem:[%s8756_s11 + $0x1c8] sm:$0xff] }
 0x2a3   : > { %v2765_v12 = vpop.f32.mrf.mxu1  ;;  %v3425_v25 = vpop.f32.mrf.mxu0 }
 0x2a4   : > { %7945 = vmatmul.mubr.msk.f32.gmra.mxu0 %vm286_vm0, %v8417_v9 }
 0x2a5   : > { %v2768_v63 = vpop.f32.mrf.mxu1  ;;  %7871 = vmatmul.mubr.msk.f32.gmra.mxu1 %vm286_vm0, %v8417_v9  ;;  %v3428_v23 = vpop.f32.mrf.mxu0  ;;  %3708 = vmatprep.mubr.f32.mxu0 %v12770_v0 }
 0x2a6   : > { %3034 = vmatprep.mubr.f32.mxu1 %v12770_v0  ;;  %v8421_v63 = vld [vmem:[%s8756_s11 + $0x1d0] sm:$0xff] }
 0x2a7   : > { %v2769_v21 = vpop.f32.mrf.mxu1  ;;  %v3429_v58 = vpop.f32.mrf.mxu0 }
 0x2a8   : > { %7946 = vmatmul.mubr.msk.f32.gmra.mxu0 %vm286_vm0, %v8418_v49 }
 0x2a9   : > { %v2772_v1 = vpop.f32.mrf.mxu1  ;;  %7872 = vmatmul.mubr.msk.f32.gmra.mxu1 %vm286_vm0, %v8418_v49  ;;  %v3432_v42 = vpop.f32.mrf.mxu0  ;;  %3714 = vmatprep.mubr.f32.mxu0 %v12770_v0 }
 0x2aa   : > { %3040 = vmatprep.mubr.f32.mxu1 %v12770_v0  ;;  %v8422_v1 = vld [vmem:[%s8756_s11 + $0x1d8] sm:$0xff] }
 0x2ab   : > { %v2773_v40 = vpop.f32.mrf.mxu1  ;;  %v3433_v37 = vpop.f32.mrf.mxu0 }
 0x2ac   : > { %7947 = vmatmul.mubr.msk.f32.gmra.mxu0 %vm286_vm0, %v8419_v62 }
 0x2ad   : > { %v2776_v60 = vpop.f32.mrf.mxu1  ;;  %7873 = vmatmul.mubr.msk.f32.gmra.mxu1 %vm286_vm0, %v8419_v62  ;;  %v3436_v53 = vpop.f32.mrf.mxu0  ;;  %3720 = vmatprep.mubr.f32.mxu0 %v12770_v0 }
 0x2ae   : > { %3045 = vmatprep.mubr.f32.mxu1 %v12770_v0  ;;  %v8423_v60 = vld [vmem:[%s8756_s11 + $0x1e0] sm:$0xff] }
 0x2af   : > { %v2777_v11 = vpop.f32.mrf.mxu1  ;;  %v3437_v8 = vpop.f32.mrf.mxu0 }
 0x2b0   : > { %7948 = vmatmul.mubr.msk.f32.gmra.mxu0 %vm286_vm0, %v8420_v3 }
 0x2b1   : > { %v2780_v51 = vpop.f32.mrf.mxu1  ;;  %7874 = vmatmul.mubr.msk.f32.gmra.mxu1 %vm286_vm0, %v8420_v3  ;;  %v3440_v47 = vpop.f32.mrf.mxu0  ;;  %3726 = vmatprep.mubr.f32.mxu0 %v12770_v0 }
 0x2b2   : > { %3051 = vmatprep.mubr.f32.mxu1 %v12770_v0  ;;  %v8424_v47 = vld [vmem:[%s8756_s11 + $0x1e8] sm:$0xff] }
 0x2b3   : > { %v2781_v39 = vpop.f32.mrf.mxu1  ;;  %v3441_v12 = vpop.f32.mrf.mxu0 }
 0x2b4   : > { %7949 = vmatmul.mubr.msk.f32.gmra.mxu0 %vm286_vm0, %v8421_v63 }
 0x2b5   : > { %v2784_v25 = vpop.f32.mrf.mxu1  ;;  %7875 = vmatmul.mubr.msk.f32.gmra.mxu1 %vm286_vm0, %v8421_v63  ;;  %v3444_v9 = vpop.f32.mrf.mxu0  ;;  %3732 = vmatprep.mubr.f32.mxu0 %v12770_v0 }
 0x2b6   : > { %3057 = vmatprep.mubr.f32.mxu1 %v12770_v0 }
 0x2b7   : > { %v2785_v23 = vpop.f32.mrf.mxu1  ;;  %v3445_v21 = vpop.f32.mrf.mxu0 }
 0x2b8   : > { %7950 = vmatmul.mubr.msk.f32.gmra.mxu0 %vm286_vm0, %v8422_v1 }
 0x2b9   : > { %v2788_v58 = vpop.f32.mrf.mxu1  ;;  %7876 = vmatmul.mubr.msk.f32.gmra.mxu1 %vm286_vm0, %v8422_v1  ;;  %v3448_v49 = vpop.f32.mrf.mxu0  ;;  %3738 = vmatprep.mubr.f32.mxu0 %v12770_v0  ;;  %v8425_v1 = vld [vmem:[%s8756_s11 + $0x1f0] sm:$0xff] }
 0x2ba   : > { %3062 = vmatprep.mubr.f32.mxu1 %v12770_v0 }
 0x2bb   : > { %v2789_v42 = vpop.f32.mrf.mxu1  ;;  %v3449_v40 = vpop.f32.mrf.mxu0 }
 0x2bc   : > { %7951 = vmatmul.mubr.msk.f32.gmra.mxu0 %vm286_vm0, %v8423_v60 }
 0x2bd   : > { %v2792_v37 = vpop.f32.mrf.mxu1  ;;  %7877 = vmatmul.mubr.msk.f32.gmra.mxu1 %vm286_vm0, %v8423_v60  ;;  %v3452_v62 = vpop.f32.mrf.mxu0  ;;  %3742 = vmatprep.mubr.f32.mxu0 %v12770_v0 }
 0x2be   : > { %3066 = vmatprep.mubr.f32.mxu1 %v12770_v0 }
 0x2bf   : > { %v2794_v53 = vpop.f32.mrf.mxu1  ;;  %v3454_v11 = vpop.f32.mrf.mxu0 }
 0x2c0   : > { %v3143_v8 = vrot.slane %v2794_v53, 6  ;;  %v3787_v51 = vadd.f32 %v3454_v11, %v3452_v62  ;;  %7952 = vmatmul.mubr.msk.f32.gmra.mxu0 %vm286_vm0, %v8424_v47 }
 0x2c1   : > { %v2798_v3 = vpop.f32.mrf.mxu1  ;;  %7878 = vmatmul.mubr.msk.f32.gmra.mxu1 %vm286_vm0, %v8424_v47  ;;  %v3458_v39 = vpop.f32.mrf.mxu0  ;;  %3746 = vmatprep.mubr.f32.mxu0 %v12770_v0 }
 0x2c2   : > { %v3239_v12 = vadd.f32 %v3143_v8, %v2792_v37  ;;  %3070 = vmatprep.mubr.f32.mxu1 %v12770_v0  ;;  %v3883_v42 = vrot.slane %v3787_v51, 2 }
 0x2c3   : > { %v2800_v25 = vpop.f32.mrf.mxu1  ;;  %v3460_v63 = vpop.f32.mrf.mxu0 }
 0x2c4   : > { %v3287_v9 = vadd.f32 %v3239_v12, %v9728_v13  ;;  %v3144_v23 = vrot.slane %v2800_v25, 6  ;;  %v3788_v21 = vadd.f32 %v3460_v63, %v3458_v39  ;;  %7953 = vmatmul.mubr.msk.f32.gmra.mxu0 %vm286_vm0, %v8425_v1 }
 0x2c5   : > { %v2804_v58 = vpop.f32.mrf.mxu1  ;;  %7879 = vmatmul.mubr.msk.f32.gmra.mxu1 %vm286_vm0, %v8425_v1  ;;  %v3464_v49 = vpop.f32.mrf.mxu0  ;;  %3750 = vmatprep.mubr.f32.mxu0 %v12770_v0 }
 0x2c6   : > { %v3145_v40 = vsel %vm968_vm1, %v3143_v8, %v3144_v23  ;;  %v3884_v37 = vrot.slane %v3788_v21, 2  ;;  %v3241_v60 = vadd.f32 %v3144_v23, %v2804_v58  ;;  %3074 = vmatprep.mubr.f32.mxu1 %v12770_v0  ;;  %v8426_v8 = vld [vmem:[%s8756_s11 + $0x1f8] sm:$0xff] }
 0x2c7   : > { %v3240_v13 = vadd.f32 %v3145_v40, %v2798_v3  ;;  %v2806_v62 = vpop.f32.mrf.mxu1  ;;  %v3466_v53 = vpop.f32.mrf.mxu0 }
 0x2c8   : > { %v3885_v11 = vsel %vm1661_vm2, %v3883_v42, %v3884_v37  ;;  %v3289_v47 = vadd.f32 %v3241_v60, %v9748_v28  ;;  %v3789_v39 = vadd.f32 %v3466_v53, %v3464_v49  ;;  %7954 = vmatmul.mubr.msk.f32.gmra.mxu0 %vm286_vm0, %v8426_v8  ;;  %v8427_v42 = vld [vmem:[%s8756_s11 + $0x200] sm:$0xff] }
 0x2c9   : > { %v3288_v12 = vadd.f32 %v3240_v13, %v9750_v29  ;;  %v10685_v25 = vadd.f32 %v3885_v11, %v3287_v9  ;;  %v2809_v51 = vpop.f32.mrf.mxu1  ;;  %7880 = vmatmul.mubr.msk.f32.gmra.mxu1 %vm286_vm0, %v8426_v8  ;;  %v3470_v63 = vpop.f32.mrf.mxu0  ;;  %3754 = vmatprep.mubr.f32.mxu0 %v12770_v0 }
 0x2ca   : > { %v3886_v3 = vrot.slane %v3789_v39, 2  ;;  %3078 = vmatprep.mubr.f32.mxu1 %v12770_v0  ;;  %v8428_v39 = vld [vmem:[%s8756_s11 + $0x208] sm:$0xff] }
 0x2cb   : > { %v2811_v23 = vpop.f32.mrf.mxu1  ;;  %v3472_v28 = vpop.f32.mrf.mxu0 }
 0x2cc   : > { %v3887_v21 = vsel %vm1661_vm2, %v3884_v37, %v3886_v3  ;;  %v10693_v29 = vadd.f32 %v3886_v3, %v3289_v47  ;;  %v3146_v9 = vrot.slane %v2811_v23, 6  ;;  %v3790_v58 = vadd.f32 %v3472_v28, %v3470_v63  ;;  %7955 = vmatmul.mubr.msk.f32.gmra.mxu0 %vm286_vm0, %v8427_v42 }
 0x2cd   : > { %v10695_v1 = vadd.f32 %v3887_v21, %v3288_v12  ;;  %v2815_v49 = vpop.f32.mrf.mxu1  ;;  %7881 = vmatmul.mubr.msk.f32.gmra.mxu1 %vm286_vm0, %v8427_v42  ;;  %v3476_v40 = vpop.f32.mrf.mxu0  ;;  %3758 = vmatprep.mubr.f32.mxu0 %v12770_v0 }
 0x2ce   : > { %v3242_v60 = vadd.f32 %v3146_v9, %v2809_v51  ;;  %3082 = vmatprep.mubr.f32.mxu1 %v12770_v0  ;;  %v3888_v8 = vrot.slane %v3790_v58, 2 }
 0x2cf   : > { %v2817_v37 = vpop.f32.mrf.mxu1  ;;  %v3478_v13 = vpop.f32.mrf.mxu0 }
 0x2d0   : > { %v3290_v62 = vadd.f32 %v3242_v60, %v9778_v43  ;;  %v3147_v53 = vrot.slane %v2817_v37, 6  ;;  %v3791_v11 = vadd.f32 %v3478_v13, %v3476_v40  ;;  %7956 = vmatmul.mubr.msk.f32.gmra.mxu0 %vm286_vm0, %v8428_v39 }
 0x2d1   : > { %v2821_v47 = vpop.f32.mrf.mxu1  ;;  %7882 = vmatmul.mubr.msk.f32.gmra.mxu1 %vm286_vm0, %v8428_v39  ;;  %v3482_v12 = vpop.f32.mrf.mxu0  ;;  %3762 = vmatprep.mubr.f32.mxu0 %v12770_v0 }
 0x2d2   : > { %v3148_v51 = vsel %vm968_vm1, %v3146_v9, %v3147_v53  ;;  %v3889_v63 = vrot.slane %v3791_v11, 2  ;;  %v3244_v3 = vadd.f32 %v3147_v53, %v2821_v47  ;;  %3086 = vmatprep.mubr.f32.mxu1 %v12770_v0  ;;  %v8429_v9 = vld [vmem:[%s8756_s11 + $0x210] sm:$0xff] }
 0x2d3   : > { %v3243_v43 = vadd.f32 %v3148_v51, %v2815_v49  ;;  %v2823_v23 = vpop.f32.mrf.mxu1  ;;  %v3484_v28 = vpop.f32.mrf.mxu0 }
 0x2d4   : > { %v3890_v21 = vsel %vm1661_vm2, %v3888_v8, %v3889_v63  ;;  %v3292_v42 = vadd.f32 %v3244_v3, %v9800_v52  ;;  %v3792_v40 = vadd.f32 %v3484_v28, %v3482_v12  ;;  %7957 = vmatmul.mubr.msk.f32.gmra.mxu0 %vm286_vm0, %v8429_v9  ;;  %v8430_v8 = vld [vmem:[%s8756_s11 + $0x218] sm:$0xff] }
 0x2d5   : > { %v3291_v60 = vadd.f32 %v3243_v43, %v9802_v27  ;;  %v10712_v37 = vadd.f32 %v3890_v21, %v3290_v62  ;;  %v2826_v58 = vpop.f32.mrf.mxu1  ;;  %7883 = vmatmul.mubr.msk.f32.gmra.mxu1 %vm286_vm0, %v8429_v9  ;;  %v3488_v13 = vpop.f32.mrf.mxu0  ;;  %3766 = vmatprep.mubr.f32.mxu0 %v12770_v0 }
 0x2d6   : > { %v3891_v49 = vrot.slane %v3792_v40, 2  ;;  %3090 = vmatprep.mubr.f32.mxu1 %v12770_v0  ;;  %v8431_v40 = vld [vmem:[%s8756_s11 + $0x220] sm:$0xff] }
 0x2d7   : > { %v2828_v53 = vpop.f32.mrf.mxu1  ;;  %v3490_v52 = vpop.f32.mrf.mxu0 }
 0x2d8   : > { %v3892_v11 = vsel %vm1661_vm2, %v3889_v63, %v3891_v49  ;;  %v10720_v27 = vadd.f32 %v3891_v49, %v3292_v42  ;;  %v3149_v62 = vrot.slane %v2828_v53, 6  ;;  %v3793_v47 = vadd.f32 %v3490_v52, %v3488_v13  ;;  %7958 = vmatmul.mubr.msk.f32.gmra.mxu0 %vm286_vm0, %v8430_v8 }
 0x2d9   : > { %v10722_v39 = vadd.f32 %v3892_v11, %v3291_v60  ;;  %v2832_v12 = vpop.f32.mrf.mxu1  ;;  %7884 = vmatmul.mubr.msk.f32.gmra.mxu1 %vm286_vm0, %v8430_v8  ;;  %v3494_v51 = vpop.f32.mrf.mxu0  ;;  %3770 = vmatprep.mubr.f32.mxu0 %v12770_v0 }
 0x2da   : > { %v3245_v3 = vadd.f32 %v3149_v62, %v2826_v58  ;;  %3094 = vmatprep.mubr.f32.mxu1 %v12770_v0  ;;  %v3893_v9 = vrot.slane %v3793_v47, 2 }
 0x2db   : > { %v2834_v63 = vpop.f32.mrf.mxu1  ;;  %v3496_v43 = vpop.f32.mrf.mxu0 }
 0x2dc   : > { %v3293_v23 = vadd.f32 %v3245_v3, %v9830_v30  ;;  %v3150_v28 = vrot.slane %v2834_v63, 6  ;;  %v3794_v21 = vadd.f32 %v3496_v43, %v3494_v51  ;;  %7959 = vmatmul.mubr.msk.f32.gmra.mxu0 %vm286_vm0, %v8431_v40 }
 0x2dd   : > { %v2838_v42 = vpop.f32.mrf.mxu1  ;;  %7885 = vmatmul.mubr.msk.f32.gmra.mxu1 %vm286_vm0, %v8431_v40  ;;  %v3500_v60 = vpop.f32.mrf.mxu0  ;;  %3774 = vmatprep.mubr.f32.mxu0 %v12770_v0 }
 0x2de   : > { %v3151_v58 = vsel %vm968_vm1, %v3149_v62, %v3150_v28  ;;  %v3894_v13 = vrot.slane %v3794_v21, 2  ;;  %v3247_v49 = vadd.f32 %v3150_v28, %v2838_v42  ;;  %3098 = vmatprep.mubr.f32.mxu1 %v12770_v0  ;;  %v8432_v62 = vld [vmem:[%s8756_s11 + $0x228] sm:$0xff] }
 0x2df   : > { %v3246_v30 = vadd.f32 %v3151_v58, %v2832_v12  ;;  %v2840_v53 = vpop.f32.mrf.mxu1  ;;  %v3502_v52 = vpop.f32.mrf.mxu0 }
 0x2e0   : > { %v3895_v11 = vsel %vm1661_vm2, %v3893_v9, %v3894_v13  ;;  %v3295_v8 = vadd.f32 %v3247_v49, %v9852_v16  ;;  %v3795_v51 = vadd.f32 %v3502_v52, %v3500_v60  ;;  %7960 = vmatmul.mubr.msk.f32.gmra.mxu0 %vm286_vm0, %v8432_v62  ;;  %v8433_v9 = vld [vmem:[%s8756_s11 + $0x230] sm:$0xff] }
 0x2e1   : > { %v3294_v3 = vadd.f32 %v3246_v30, %v9854_v31  ;;  %v10739_v63 = vadd.f32 %v3895_v11, %v3293_v23  ;;  %v2843_v47 = vpop.f32.mrf.mxu1  ;;  %7886 = vmatmul.mubr.msk.f32.gmra.mxu1 %vm286_vm0, %v8432_v62  ;;  %v3506_v43 = vpop.f32.mrf.mxu0  ;;  %3778 = vmatprep.mubr.f32.mxu0 %v12770_v0 }
 0x2e2   : > { %v3896_v12 = vrot.slane %v3795_v51, 2  ;;  %3102 = vmatprep.mubr.f32.mxu1 %v12770_v0  ;;  %v8434_v51 = vld [vmem:[%s8756_s11 + $0x238] sm:$0xff] }
 0x2e3   : > { %v2845_v28 = vpop.f32.mrf.mxu1  ;;  %v3508_v16 = vpop.f32.mrf.mxu0 }
 0x2e4   : > { %v3897_v21 = vsel %vm1661_vm2, %v3894_v13, %v3896_v12  ;;  %v10747_v31 = vadd.f32 %v3896_v12, %v3295_v8  ;;  %v3152_v23 = vrot.slane %v2845_v28, 6  ;;  %v3796_v42 = vadd.f32 %v3508_v16, %v3506_v43  ;;  %7961 = vmatmul.mubr.msk.f32.gmra.mxu0 %vm286_vm0, %v8433_v9 }
 0x2e5   : > { %v10749_v40 = vadd.f32 %v3897_v21, %v3294_v3  ;;  %v2849_v60 = vpop.f32.mrf.mxu1  ;;  %7887 = vmatmul.mubr.msk.f32.gmra.mxu1 %vm286_vm0, %v8433_v9  ;;  %v3512_v58 = vpop.f32.mrf.mxu0  ;;  %3782 = vmatprep.mubr.f32.mxu0 %v12770_v0  ;;  %v8185_v21 = vld [vmem:[%s12709_s1 + $0x80] sm:$0xff] }
 0x2e6   : > { %v3248_v49 = vadd.f32 %v3152_v23, %v2843_v47  ;;  %3106 = vmatprep.mubr.f32.mxu1 %v12770_v0  ;;  %v3898_v62 = vrot.slane %v3796_v42, 2  ;;  %v8111_v42 = vld [vmem:[%s12709_s1 + $0x70] sm:$0xff] }
 0x2e7   : > { %v2851_v13 = vpop.f32.mrf.mxu1  ;;  %v3514_v30 = vpop.f32.mrf.mxu0 }
 0x2e8   : > { %v3296_v53 = vadd.f32 %v3248_v49, %v9882_v2  ;;  %v3153_v52 = vrot.slane %v2851_v13, 6  ;;  %v3797_v11 = vadd.f32 %v3514_v30, %v3512_v58  ;;  %7962 = vmatmul.mubr.msk.f32.gmra.mxu0 %vm286_vm0, %v8434_v51 }
 0x2e9   : > { %v2855_v8 = vpop.f32.mrf.mxu1  ;;  %7888 = vmatmul.mubr.msk.f32.gmra.mxu1 %vm286_vm0, %v8434_v51  ;;  %v3518_v3 = vpop.f32.mrf.mxu0  ;;  %4962 = vmatprep.mubr.f32.mxu0 %v12770_v0 }
 0x2ea   : > { %v3154_v47 = vsel %vm968_vm1, %v3152_v23, %v3153_v52  ;;  %v3899_v43 = vrot.slane %v3797_v11, 2  ;;  %v3250_v12 = vadd.f32 %v3153_v52, %v2855_v8  ;;  %4126 = vmatprep.mubr.f32.mxu1 %v12770_v0  ;;  %v8435_v52 = vld [vmem:[%s8756_s11] sm:$0xff] }
 0x2eb   : > { %v3249_v2 = vadd.f32 %v3154_v47, %v2849_v60  ;;  %v2857_v28 = vpop.f32.mrf.mxu1  ;;  %v3520_v16 = vpop.f32.mrf.mxu0 }
 0x2ec   : > { %v3900_v23 = vsel %vm1661_vm2, %v3898_v62, %v3899_v43  ;;  %v3298_v9 = vadd.f32 %v3250_v12, %v9904_v61  ;;  %v3798_v58 = vadd.f32 %v3520_v16, %v3518_v3  ;;  %8039 = vmatmul.mubr.msk.f32.vlgmr.msra.gmra.mxu0 %vm286_vm0, %v8435_v52 }
 0x2ed   : > { %v3297_v49 = vadd.f32 %v3249_v2, %v9906_v36  ;;  %v10772_v13 = vadd.f32 %v3900_v23, %v3296_v53  ;;  %v2860_v60 = vpop.f32.mrf.mxu1  ;;  %v3524_v30 = vpop.f32.mrf.mxu0  ;;  %7965 = vmatmul.mubr.msk.f32.vlgmr.msra.gmra.mxu1 %vm286_vm0, %v8435_v52  ;;  %6313 = vmatpush1.msra.mxu0 %v8185_v21  ;;  %v8436_v2 = vld [vmem:[%s8756_s11 + $0x8] sm:$0xff] }
 0x2ee   : > { %v3901_v11 = vrot.slane %v3798_v58, 2  ;;  %5589 = vmatpush1.msra.mxu1 %v8111_v42  ;;  %4130 = vmatprep.mubr.f32.mxu1 %v12770_v0 }
 0x2ef   : > { %v2862_v8 = vpop.f32.mrf.mxu1  ;;  %v3526_v51 = vpop.f32.mrf.mxu0  ;;  %4966 = vmatprep.mubr.f32.mxu0 %v12770_v0 }
 0x2f0   : > { %v3902_v61 = vsel %vm1661_vm2, %v3899_v43, %v3901_v11  ;;  %v10780_v36 = vadd.f32 %v3901_v11, %v3298_v9  ;;  %v3155_v53 = vrot.slane %v2862_v8, 6  ;;  %v3799_v3 = vadd.f32 %v3526_v51, %v3524_v30  ;;  %8040 = vmatmul.mubr.msk.f32.gmra.mxu0 %vm286_vm0, %v8436_v2 }
 0x2f1   : > { %v10782_v62 = vadd.f32 %v3902_v61, %v3297_v49  ;;  %v2866_v47 = vpop.f32.mrf.mxu1  ;;  %v3530_v12 = vpop.f32.mrf.mxu0  ;;  %7966 = vmatmul.mubr.msk.f32.gmra.mxu1 %vm286_vm0, %v8436_v2  ;;  %4970 = vmatprep.mubr.f32.mxu0 %v12770_v0  ;;  %v8437_v49 = vld [vmem:[%s8756_s11 + $0x10] sm:$0xff] }
 0x2f2   : > { %v3251_v28 = vadd.f32 %v3155_v53, %v2860_v60  ;;  %4134 = vmatprep.mubr.f32.mxu1 %v12770_v0  ;;  %v3903_v30 = vrot.slane %v3799_v3, 2 }
 0x2f3   : > { %v2868_v43 = vpop.f32.mrf.mxu1  ;;  %v3532_v16 = vpop.f32.mrf.mxu0 }
 0x2f4   : > { %v3299_v21 = vadd.f32 %v3251_v28, %v9934_v19  ;;  %v3156_v42 = vrot.slane %v2868_v43, 6  ;;  %v3800_v23 = vadd.f32 %v3532_v16, %v3530_v12  ;;  %8041 = vmatmul.mubr.msk.f32.gmra.mxu0 %vm286_vm0, %v8437_v49  ;;  %v8438_v16 = vld [vmem:[%s8756_s11 + $0x18] sm:$0xff] }
 0x2f5   : > { %v2872_v9 = vpop.f32.mrf.mxu1  ;;  %v3536_v58 = vpop.f32.mrf.mxu0  ;;  %7967 = vmatmul.mubr.msk.f32.gmra.mxu1 %vm286_vm0, %v8437_v49  ;;  %4974 = vmatprep.mubr.f32.mxu0 %v12770_v0 }
 0x2f6   : > { %v3157_v60 = vsel %vm968_vm1, %v3155_v53, %v3156_v42  ;;  %v3904_v52 = vrot.slane %v3800_v23, 2  ;;  %v3253_v11 = vadd.f32 %v3156_v42, %v2872_v9  ;;  %4138 = vmatprep.mubr.f32.mxu1 %v12770_v0 }
 0x2f7   : > { %v3252_v19 = vadd.f32 %v3157_v60, %v2866_v47  ;;  %v2874_v8 = vpop.f32.mrf.mxu1  ;;  %v3538_v51 = vpop.f32.mrf.mxu0  ;;  %v8439_v60 = vld [vmem:[%s8756_s11 + $0x20] sm:$0xff] }
 0x2f8   : > { %v3905_v61 = vsel %vm1661_vm2, %v3903_v30, %v3904_v52  ;;  %v3301_v12 = vadd.f32 %v3253_v11, %v9958_v22  ;;  %v3801_v2 = vadd.f32 %v3538_v51, %v3536_v58  ;;  %8042 = vmatmul.mubr.msk.f32.gmra.mxu0 %vm286_vm0, %v8438_v16  ;;  %v12823_v8 = vld [vmem:[#allocation23_spill] sm:$0xff] }
 0x2f9   : > { %v3300_v28 = vadd.f32 %v3252_v19, %v9960_v45  ;;  %v10799_v3 = vadd.f32 %v3905_v61, %v3299_v21  ;;  %v2877_v43 = vpop.f32.mrf.mxu1  ;;  %v3542_v53 = vpop.f32.mrf.mxu0  ;;  %7968 = vmatmul.mubr.msk.f32.gmra.mxu1 %vm286_vm0, %v8438_v16  ;;  %4978 = vmatprep.mubr.f32.mxu0 %v12770_v0 }
 0x2fa   : > { %v3906_v47 = vrot.slane %v3801_v2, 2  ;;  %4142 = vmatprep.mubr.f32.mxu1 %v12770_v0 }
 0x2fb   : > { %v2879_v42 = vpop.f32.mrf.mxu1  ;;  %v3544_v22 = vpop.f32.mrf.mxu0 }
 0x2fc   : > { %v3907_v23 = vsel %vm1661_vm2, %v3904_v52, %v3906_v47  ;;  %v10807_v45 = vadd.f32 %v3906_v47, %v3301_v12  ;;  %v3158_v21 = vrot.slane %v2879_v42, 6  ;;  %v3802_v9 = vadd.f32 %v3544_v22, %v3542_v53  ;;  %8043 = vmatmul.mubr.msk.f32.gmra.mxu0 %vm286_vm0, %v8439_v60  ;;  %v8440_v53 = vld [vmem:[%s8756_s11 + $0x28] sm:$0xff] }
 0x2fd   : > { %v10809_v58 = vadd.f32 %v3907_v23, %v3300_v28  ;;  %v2883_v49 = vpop.f32.mrf.mxu1  ;;  %v3548_v30 = vpop.f32.mrf.mxu0  ;;  %7969 = vmatmul.mubr.msk.f32.gmra.mxu1 %vm286_vm0, %v8439_v60  ;;  %4982 = vmatprep.mubr.f32.mxu0 %v12770_v0 }
 0x2fe   : > { %v3254_v11 = vadd.f32 %v3158_v21, %v2877_v43  ;;  %4146 = vmatprep.mubr.f32.mxu1 %v12770_v0  ;;  %v3908_v16 = vrot.slane %v3802_v9, 2 }
 0x2ff   : > { %v2885_v52 = vpop.f32.mrf.mxu1  ;;  %v3550_v19 = vpop.f32.mrf.mxu0 }
 0x300   : > { %v3302_v51 = vadd.f32 %v3254_v11, %v12823_v8  ;;  %v3159_v61 = vrot.slane %v2885_v52, 6  ;;  %v3803_v12 = vadd.f32 %v3550_v19, %v3548_v30  ;;  %8044 = vmatmul.mubr.msk.f32.gmra.mxu0 %vm286_vm0, %v8440_v53 }
 0x301   : > { %v2889_v2 = vpop.f32.mrf.mxu1  ;;  %v3554_v28 = vpop.f32.mrf.mxu0  ;;  %7970 = vmatmul.mubr.msk.f32.gmra.mxu1 %vm286_vm0, %v8440_v53  ;;  %4986 = vmatprep.mubr.f32.mxu0 %v12770_v0 }
 0x302   : > { %v3160_v43 = vsel %vm968_vm1, %v3158_v21, %v3159_v61  ;;  %v3909_v47 = vrot.slane %v3803_v12, 2  ;;  %v3256_v42 = vadd.f32 %v3159_v61, %v2889_v2  ;;  %4150 = vmatprep.mubr.f32.mxu1 %v12770_v0  ;;  %v8441_v61 = vld [vmem:[%s8756_s11 + $0x30] sm:$0xff] }
 0x303   : > { %v3255_v22 = vadd.f32 %v3160_v43, %v2883_v49  ;;  %v2891_v23 = vpop.f32.mrf.mxu1  ;;  %v3556_v30 = vpop.f32.mrf.mxu0 }
 0x304   : > { %v3910_v60 = vsel %vm1661_vm2, %v3908_v16, %v3909_v47  ;;  %v3304_v11 = vadd.f32 %v3256_v42, %v10015_v54  ;;  %v3804_v52 = vadd.f32 %v3556_v30, %v3554_v28  ;;  %8045 = vmatmul.mubr.msk.f32.gmra.mxu0 %vm286_vm0, %v8441_v61  ;;  %v8442_v42 = vld [vmem:[%s8756_s11 + $0x38] sm:$0xff] }
 0x305   : > { %v3303_v19 = vadd.f32 %v3255_v22, %v10018_v46  ;;  %v10826_v9 = vadd.f32 %v3910_v60, %v3302_v51  ;;  %v2894_v8 = vpop.f32.mrf.mxu1  ;;  %v3560_v21 = vpop.f32.mrf.mxu0  ;;  %7971 = vmatmul.mubr.msk.f32.gmra.mxu1 %vm286_vm0, %v8441_v61  ;;  %4990 = vmatprep.mubr.f32.mxu0 %v12770_v0 }
 0x306   : > { %v3911_v49 = vrot.slane %v3804_v52, 2  ;;  %4154 = vmatprep.mubr.f32.mxu1 %v12770_v0 }
 0x307   : > { %v2896_v12 = vpop.f32.mrf.mxu1  ;;  %v3562_v54 = vpop.f32.mrf.mxu0 }
 0x308   : > { %v3912_v2 = vsel %vm1661_vm2, %v3909_v47, %v3911_v49  ;;  %v10834_v46 = vadd.f32 %v3911_v49, %v3304_v11  ;;  %v3161_v51 = vrot.slane %v2896_v12, 6  ;;  %v3805_v28 = vadd.f32 %v3562_v54, %v3560_v21  ;;  %8046 = vmatmul.mubr.msk.f32.gmra.mxu0 %vm286_vm0, %v8442_v42  ;;  %v8443_v21 = vld [vmem:[%s8756_s11 + $0x40] sm:$0xff] }
 0x309   : > { %v10836_v53 = vadd.f32 %v3912_v2, %v3303_v19  ;;  %v2900_v16 = vpop.f32.mrf.mxu1  ;;  %v3566_v43 = vpop.f32.mrf.mxu0  ;;  %7972 = vmatmul.mubr.msk.f32.gmra.mxu1 %vm286_vm0, %v8442_v42  ;;  %4994 = vmatprep.mubr.f32.mxu0 %v12770_v0 }
 0x30a   : > { %v3257_v22 = vadd.f32 %v3161_v51, %v2894_v8  ;;  %4158 = vmatprep.mubr.f32.mxu1 %v12770_v0  ;;  %v3913_v61 = vrot.slane %v3805_v28, 2 }
 0x30b   : > { %v2902_v47 = vpop.f32.mrf.mxu1  ;;  %v3568_v23 = vpop.f32.mrf.mxu0 }
 0x30c   : > { %v3305_v30 = vadd.f32 %v3257_v22, %v10047_v20  ;;  %v3162_v60 = vrot.slane %v2902_v47, 6  ;;  %v3806_v11 = vadd.f32 %v3568_v23, %v3566_v43  ;;  %8047 = vmatmul.mubr.msk.f32.gmra.mxu0 %vm286_vm0, %v8443_v21 }
 0x30d   : > { %v2906_v52 = vpop.f32.mrf.mxu1  ;;  %v3572_v19 = vpop.f32.mrf.mxu0  ;;  %7973 = vmatmul.mubr.msk.f32.gmra.mxu1 %vm286_vm0, %v8443_v21  ;;  %4998 = vmatprep.mubr.f32.mxu0 %v12770_v0 }
 0x30e   : > { %v3163_v8 = vsel %vm968_vm1, %v3161_v51, %v3162_v60  ;;  %v3914_v49 = vrot.slane %v3806_v11, 2  ;;  %v3259_v12 = vadd.f32 %v3162_v60, %v2906_v52  ;;  %4162 = vmatprep.mubr.f32.mxu1 %v12770_v0  ;;  %v8444_v60 = vld [vmem:[%s8756_s11 + $0x48] sm:$0xff] }
 0x30f   : > { %v3258_v20 = vadd.f32 %v3163_v8, %v2900_v16  ;;  %v2908_v54 = vpop.f32.mrf.mxu1  ;;  %v3574_v2 = vpop.f32.mrf.mxu0 }
 0x310   : > { %v3915_v43 = vsel %vm1661_vm2, %v3913_v61, %v3914_v49  ;;  %v3307_v42 = vadd.f32 %v3259_v12, %v10069_v56  ;;  %v3807_v22 = vadd.f32 %v3574_v2, %v3572_v19  ;;  %8048 = vmatmul.mubr.msk.f32.gmra.mxu0 %vm286_vm0, %v8444_v60  ;;  %v8445_v12 = vld [vmem:[%s8756_s11 + $0x50] sm:$0xff] }
 0x311   : > { %v3306_v47 = vadd.f32 %v3258_v20, %v10071_v5  ;;  %v10853_v28 = vadd.f32 %v3915_v43, %v3305_v30  ;;  %v2911_v23 = vpop.f32.mrf.mxu1  ;;  %v3578_v51 = vpop.f32.mrf.mxu0  ;;  %7974 = vmatmul.mubr.msk.f32.gmra.mxu1 %vm286_vm0, %v8444_v60  ;;  %5002 = vmatprep.mubr.f32.mxu0 %v12770_v0 }
 0x312   : > { %v3916_v16 = vrot.slane %v3807_v22, 2  ;;  %4166 = vmatprep.mubr.f32.mxu1 %v12770_v0 }
 0x313   : > { %v2913_v11 = vpop.f32.mrf.mxu1  ;;  %v3580_v56 = vpop.f32.mrf.mxu0 }
 0x314   : > { %v3917_v52 = vsel %vm1661_vm2, %v3914_v49, %v3916_v16  ;;  %v10861_v5 = vadd.f32 %v3916_v16, %v3307_v42  ;;  %v3164_v30 = vrot.slane %v2913_v11, 6  ;;  %v3808_v19 = vadd.f32 %v3580_v56, %v3578_v51  ;;  %8049 = vmatmul.mubr.msk.f32.gmra.mxu0 %vm286_vm0, %v8445_v12  ;;  %v8446_v51 = vld [vmem:[%s8756_s11 + $0x58] sm:$0xff] }
 0x315   : > { %v10863_v21 = vadd.f32 %v3917_v52, %v3306_v47  ;;  %v2917_v61 = vpop.f32.mrf.mxu1  ;;  %v3584_v8 = vpop.f32.mrf.mxu0  ;;  %7975 = vmatmul.mubr.msk.f32.gmra.mxu1 %vm286_vm0, %v8445_v12  ;;  %5006 = vmatprep.mubr.f32.mxu0 %v12770_v0 }
 0x316   : > { %v3260_v20 = vadd.f32 %v3164_v30, %v2911_v23  ;;  %4170 = vmatprep.mubr.f32.mxu1 %v12770_v0  ;;  %v3918_v60 = vrot.slane %v3808_v19, 2 }
 0x317   : > { %v2919_v49 = vpop.f32.mrf.mxu1  ;;  %v3586_v54 = vpop.f32.mrf.mxu0 }
 0x318   : > { %v3308_v2 = vadd.f32 %v3260_v20, %v10099_v24  ;;  %v3165_v43 = vrot.slane %v2919_v49, 6  ;;  %v3809_v42 = vadd.f32 %v3586_v54, %v3584_v8  ;;  %8050 = vmatmul.mubr.msk.f32.gmra.mxu0 %vm286_vm0, %v8446_v51 }
 0x319   : > { %v2923_v22 = vpop.f32.mrf.mxu1  ;;  %v3590_v47 = vpop.f32.mrf.mxu0  ;;  %7976 = vmatmul.mubr.msk.f32.gmra.mxu1 %vm286_vm0, %v8446_v51  ;;  %5010 = vmatprep.mubr.f32.mxu0 %v12770_v0 }
 0x31a   : > { %v3166_v23 = vsel %vm968_vm1, %v3164_v30, %v3165_v43  ;;  %v3919_v16 = vrot.slane %v3809_v42, 2  ;;  %v3262_v11 = vadd.f32 %v3165_v43, %v2923_v22  ;;  %4174 = vmatprep.mubr.f32.mxu1 %v12770_v0  ;;  %v8447_v43 = vld [vmem:[%s8756_s11 + $0x60] sm:$0xff] }
 0x31b   : > { %v3261_v24 = vadd.f32 %v3166_v23, %v2917_v61  ;;  %v2925_v56 = vpop.f32.mrf.mxu1  ;;  %v3592_v52 = vpop.f32.mrf.mxu0 }
 0x31c   : > { %v3920_v8 = vsel %vm1661_vm2, %v3918_v60, %v3919_v16  ;;  %v3310_v12 = vadd.f32 %v3262_v11, %v10121_v59  ;;  %v3810_v20 = vadd.f32 %v3592_v52, %v3590_v47  ;;  %8051 = vmatmul.mubr.msk.f32.gmra.mxu0 %vm286_vm0, %v8447_v43  ;;  %v8448_v11 = vld [vmem:[%s8756_s11 + $0x68] sm:$0xff] }
 0x31d   : > { %v3309_v49 = vadd.f32 %v3261_v24, %v10123_v4  ;;  %v10880_v19 = vadd.f32 %v3920_v8, %v3308_v2  ;;  %v2928_v54 = vpop.f32.mrf.mxu1  ;;  %v3596_v30 = vpop.f32.mrf.mxu0  ;;  %7977 = vmatmul.mubr.msk.f32.gmra.mxu1 %vm286_vm0, %v8447_v43  ;;  %5014 = vmatprep.mubr.f32.mxu0 %v12770_v0 }
 0x31e   : > { %v3921_v61 = vrot.slane %v3810_v20, 2  ;;  %4179 = vmatprep.mubr.f32.mxu1 %v12770_v0 }
 0x31f   : > { %v2930_v42 = vpop.f32.mrf.mxu1  ;;  %v3598_v59 = vpop.f32.mrf.mxu0 }
 0x320   : > { %v3922_v22 = vsel %vm1661_vm2, %v3919_v16, %v3921_v61  ;;  %v10888_v4 = vadd.f32 %v3921_v61, %v3310_v12  ;;  %v3167_v2 = vrot.slane %v2930_v42, 6  ;;  %v3811_v47 = vadd.f32 %v3598_v59, %v3596_v30  ;;  %8052 = vmatmul.mubr.msk.f32.gmra.mxu0 %vm286_vm0, %v8448_v11  ;;  %v8449_v30 = vld [vmem:[%s8756_s11 + $0x70] sm:$0xff] }
 0x321   : > { %v10890_v51 = vadd.f32 %v3922_v22, %v3309_v49  ;;  %v2934_v60 = vpop.f32.mrf.mxu1  ;;  %v3602_v23 = vpop.f32.mrf.mxu0  ;;  %7978 = vmatmul.mubr.msk.f32.gmra.mxu1 %vm286_vm0, %v8448_v11  ;;  %5018 = vmatprep.mubr.f32.mxu0 %v12770_v0 }
 0x322   : > { %v3263_v24 = vadd.f32 %v3167_v2, %v2928_v54  ;;  %4185 = vmatprep.mubr.f32.mxu1 %v12770_v0  ;;  %v3923_v43 = vrot.slane %v3811_v47, 2 }
 0x323   : > { %v2936_v16 = vpop.f32.mrf.mxu1  ;;  %v3604_v56 = vpop.f32.mrf.mxu0 }
 0x324   : > { %v3311_v52 = vadd.f32 %v3263_v24, %v10151_v6  ;;  %v3168_v8 = vrot.slane %v2936_v16, 6  ;;  %v3812_v12 = vadd.f32 %v3604_v56, %v3602_v23  ;;  %8053 = vmatmul.mubr.msk.f32.gmra.mxu0 %vm286_vm0, %v8449_v30 }
 0x325   : > { %v2940_v20 = vpop.f32.mrf.mxu1  ;;  %v3608_v49 = vpop.f32.mrf.mxu0  ;;  %7979 = vmatmul.mubr.msk.f32.gmra.mxu1 %vm286_vm0, %v8449_v30  ;;  %5022 = vmatprep.mubr.f32.mxu0 %v12770_v0 }
 0x326   : > { %v3169_v54 = vsel %vm968_vm1, %v3167_v2, %v3168_v8  ;;  %v3924_v61 = vrot.slane %v3812_v12, 2  ;;  %v3265_v42 = vadd.f32 %v3168_v8, %v2940_v20  ;;  %4191 = vmatprep.mubr.f32.mxu1 %v12770_v0  ;;  %v8450_v8 = vld [vmem:[%s8756_s11 + $0x78] sm:$0xff] }
 0x327   : > { %v3264_v6 = vadd.f32 %v3169_v54, %v2934_v60  ;;  %v2942_v59 = vpop.f32.mrf.mxu1  ;;  %v3610_v22 = vpop.f32.mrf.mxu0 }
 0x328   : > { %v3925_v23 = vsel %vm1661_vm2, %v3923_v43, %v3924_v61  ;;  %v3313_v11 = vadd.f32 %v3265_v42, %v10173_v32  ;;  %v3813_v24 = vadd.f32 %v3610_v22, %v3608_v49  ;;  %8054 = vmatmul.mubr.msk.f32.gmra.mxu0 %vm286_vm0, %v8450_v8  ;;  %v8451_v42 = vld [vmem:[%s8756_s11 + $0x80] sm:$0xff] }
 0x329   : > { %v3312_v16 = vadd.f32 %v3264_v6, %v10175_v14  ;;  %v10907_v47 = vadd.f32 %v3925_v23, %v3311_v52  ;;  %v2945_v56 = vpop.f32.mrf.mxu1  ;;  %v3614_v2 = vpop.f32.mrf.mxu0  ;;  %7980 = vmatmul.mubr.msk.f32.gmra.mxu1 %vm286_vm0, %v8450_v8  ;;  %5026 = vmatprep.mubr.f32.mxu0 %v12770_v0 }
 0x32a   : > { %v3926_v60 = vrot.slane %v3813_v24, 2  ;;  %4196 = vmatprep.mubr.f32.mxu1 %v12770_v0 }
 0x32b   : > { %v2947_v12 = vpop.f32.mrf.mxu1  ;;  %v3616_v32 = vpop.f32.mrf.mxu0 }
 0x32c   : > { %v3927_v20 = vsel %vm1661_vm2, %v3924_v61, %v3926_v60  ;;  %v10915_v14 = vadd.f32 %v3926_v60, %v3313_v11  ;;  %v3170_v52 = vrot.slane %v2947_v12, 6  ;;  %v3814_v49 = vadd.f32 %v3616_v32, %v3614_v2  ;;  %8055 = vmatmul.mubr.msk.f32.gmra.mxu0 %vm286_vm0, %v8451_v42  ;;  %v8452_v2 = vld [vmem:[%s8756_s11 + $0x88] sm:$0xff] }
 0x32d   : > { %v10917_v30 = vadd.f32 %v3927_v20, %v3312_v16  ;;  %v2951_v43 = vpop.f32.mrf.mxu1  ;;  %v3620_v54 = vpop.f32.mrf.mxu0  ;;  %7981 = vmatmul.mubr.msk.f32.gmra.mxu1 %vm286_vm0, %v8451_v42  ;;  %5030 = vmatprep.mubr.f32.mxu0 %v12770_v0 }
 0x32e   : > { %v3266_v6 = vadd.f32 %v3170_v52, %v2945_v56  ;;  %4202 = vmatprep.mubr.f32.mxu1 %v12770_v0  ;;  %v3928_v8 = vrot.slane %v3814_v49, 2 }
 0x32f   : > { %v2953_v61 = vpop.f32.mrf.mxu1  ;;  %v3622_v59 = vpop.f32.mrf.mxu0 }
 0x330   : > { %v3314_v22 = vadd.f32 %v3266_v6, %v10203_v18  ;;  %v3171_v23 = vrot.slane %v2953_v61, 6  ;;  %v3815_v11 = vadd.f32 %v3622_v59, %v3620_v54  ;;  %8056 = vmatmul.mubr.msk.f32.gmra.mxu0 %vm286_vm0, %v8452_v2 }
 0x331   : > { %v2957_v24 = vpop.f32.mrf.mxu1  ;;  %v3626_v16 = vpop.f32.mrf.mxu0  ;;  %7982 = vmatmul.mubr.msk.f32.gmra.mxu1 %vm286_vm0, %v8452_v2  ;;  %5034 = vmatprep.mubr.f32.mxu0 %v12770_v0 }
 0x332   : > { %v3172_v56 = vsel %vm968_vm1, %v3170_v52, %v3171_v23  ;;  %v3929_v60 = vrot.slane %v3815_v11, 2  ;;  %v3268_v12 = vadd.f32 %v3171_v23, %v2957_v24  ;;  %4208 = vmatprep.mubr.f32.mxu1 %v12770_v0  ;;  %v8453_v23 = vld [vmem:[%s8756_s11 + $0x90] sm:$0xff] }
 0x333   : > { %v3267_v18 = vadd.f32 %v3172_v56, %v2951_v43  ;;  %v2959_v32 = vpop.f32.mrf.mxu1  ;;  %v3628_v20 = vpop.f32.mrf.mxu0 }
 0x334   : > { %v3930_v54 = vsel %vm1661_vm2, %v3928_v8, %v3929_v60  ;;  %v3316_v42 = vadd.f32 %v3268_v12, %v10227_v10  ;;  %v3816_v6 = vadd.f32 %v3628_v20, %v3626_v16  ;;  %8057 = vmatmul.mubr.msk.f32.gmra.mxu0 %vm286_vm0, %v8453_v23  ;;  %v8454_v12 = vld [vmem:[%s8756_s11 + $0x98] sm:$0xff] }
 0x335   : > { %v3315_v61 = vadd.f32 %v3267_v18, %v10229_v50  ;;  %v10934_v49 = vadd.f32 %v3930_v54, %v3314_v22  ;;  %v2962_v59 = vpop.f32.mrf.mxu1  ;;  %v3632_v52 = vpop.f32.mrf.mxu0  ;;  %7983 = vmatmul.mubr.msk.f32.gmra.mxu1 %vm286_vm0, %v8453_v23  ;;  %5039 = vmatprep.mubr.f32.mxu0 %v12770_v0 }
 0x336   : > { %v3931_v43 = vrot.slane %v3816_v6, 2  ;;  %4213 = vmatprep.mubr.f32.mxu1 %v12770_v0 }
 0x337   : > { %v2964_v11 = vpop.f32.mrf.mxu1  ;;  %v3634_v10 = vpop.f32.mrf.mxu0 }
 0x338   : > { %v3932_v24 = vsel %vm1661_vm2, %v3929_v60, %v3931_v43  ;;  %v10942_v50 = vadd.f32 %v3931_v43, %v3316_v42  ;;  %v3173_v22 = vrot.slane %v2964_v11, 6  ;;  %v3817_v16 = vadd.f32 %v3634_v10, %v3632_v52  ;;  %8058 = vmatmul.mubr.msk.f32.gmra.mxu0 %vm286_vm0, %v8454_v12  ;;  %v8455_v52 = vld [vmem:[%s8756_s11 + $0xa0] sm:$0xff] }
 0x339   : > { %v10944_v2 = vadd.f32 %v3932_v24, %v3315_v61  ;;  %v2968_v8 = vpop.f32.mrf.mxu1  ;;  %v3638_v56 = vpop.f32.mrf.mxu0  ;;  %7984 = vmatmul.mubr.msk.f32.gmra.mxu1 %vm286_vm0, %v8454_v12  ;;  %5044 = vmatprep.mubr.f32.mxu0 %v12770_v0 }
 0x33a   : > { %v3269_v18 = vadd.f32 %v3173_v22, %v2962_v59  ;;  %4219 = vmatprep.mubr.f32.mxu1 %v12770_v0  ;;  %v3933_v23 = vrot.slane %v3817_v16, 2 }
 0x33b   : > { %v2970_v60 = vpop.f32.mrf.mxu1  ;;  %v3640_v32 = vpop.f32.mrf.mxu0 }
 0x33c   : > { %v3317_v20 = vadd.f32 %v3269_v18, %v10264_v38  ;;  %v3174_v54 = vrot.slane %v2970_v60, 6  ;;  %v3818_v42 = vadd.f32 %v3640_v32, %v3638_v56  ;;  %8059 = vmatmul.mubr.msk.f32.gmra.mxu0 %vm286_vm0, %v8455_v52  ;;  %v12824_v60 = vld [vmem:[#allocation24_spill] sm:$0xff] }
 0x33d   : > { %v2974_v6 = vpop.f32.mrf.mxu1  ;;  %v3644_v61 = vpop.f32.mrf.mxu0  ;;  %7985 = vmatmul.mubr.msk.f32.gmra.mxu1 %vm286_vm0, %v8455_v52  ;;  %5049 = vmatprep.mubr.f32.mxu0 %v12770_v0 }
 0x33e   : > { %v3175_v59 = vsel %vm968_vm1, %v3173_v22, %v3174_v54  ;;  %v3934_v43 = vrot.slane %v3818_v42, 2  ;;  %v3271_v11 = vadd.f32 %v3174_v54, %v2974_v6  ;;  %4225 = vmatprep.mubr.f32.mxu1 %v12770_v0  ;;  %v8456_v54 = vld [vmem:[%s8756_s11 + $0xa8] sm:$0xff] }
 0x33f   : > { %v3270_v38 = vadd.f32 %v3175_v59, %v2968_v8  ;;  %v2976_v10 = vpop.f32.mrf.mxu1  ;;  %v3646_v24 = vpop.f32.mrf.mxu0 }
 0x340   : > { %v3935_v56 = vsel %vm1661_vm2, %v3933_v23, %v3934_v43  ;;  %v3319_v12 = vadd.f32 %v3271_v11, %v10286_v7  ;;  %v3819_v18 = vadd.f32 %v3646_v24, %v3644_v61  ;;  %8060 = vmatmul.mubr.msk.f32.gmra.mxu0 %vm286_vm0, %v8456_v54  ;;  %v8457_v10 = vld [vmem:[%s8756_s11 + $0xb0] sm:$0xff] }
 0x341   : > { %v3318_v32 = vadd.f32 %v3270_v38, %v12824_v60  ;;  %v10961_v16 = vadd.f32 %v3935_v56, %v3317_v20  ;;  %v2979_v52 = vpop.f32.mrf.mxu1  ;;  %v3650_v22 = vpop.f32.mrf.mxu0  ;;  %7986 = vmatmul.mubr.msk.f32.gmra.mxu1 %vm286_vm0, %v8456_v54  ;;  %5054 = vmatprep.mubr.f32.mxu0 %v12770_v0  ;;  %v8458_v54 = vld [vmem:[%s8756_s11 + $0xb8] sm:$0xff] }
 0x342   : > { %v3936_v8 = vrot.slane %v3819_v18, 2  ;;  %4230 = vmatprep.mubr.f32.mxu1 %v12770_v0 }
 0x343   : > { %v2981_v42 = vpop.f32.mrf.mxu1  ;;  %v3652_v7 = vpop.f32.mrf.mxu0 }
 0x344   : > { %v3937_v6 = vsel %vm1661_vm2, %v3934_v43, %v3936_v8  ;;  %v10969_v61 = vadd.f32 %v3936_v8, %v3319_v12  ;;  %v3176_v20 = vrot.slane %v2981_v42, 6  ;;  %v3820_v23 = vadd.f32 %v3652_v7, %v3650_v22  ;;  %8061 = vmatmul.mubr.msk.f32.gmra.mxu0 %vm286_vm0, %v8457_v10 }
 0x345   : > { %v10971_v59 = vadd.f32 %v3937_v6, %v3318_v32  ;;  %v2985_v11 = vpop.f32.mrf.mxu1  ;;  %v3656_v38 = vpop.f32.mrf.mxu0  ;;  %7987 = vmatmul.mubr.msk.f32.gmra.mxu1 %vm286_vm0, %v8457_v10  ;;  %5059 = vmatprep.mubr.f32.mxu0 %v12770_v0 }
 0x346   : > { %v3272_v24 = vadd.f32 %v3176_v20, %v2979_v52  ;;  %4236 = vmatprep.mubr.f32.mxu1 %v12770_v0  ;;  %v3938_v8 = vrot.slane %v3820_v23, 2 }
 0x347   : > { %v2987_v43 = vpop.f32.mrf.mxu1  ;;  %v3658_v56 = vpop.f32.mrf.mxu0 }
 0x348   : > { %v3320_v12 = vadd.f32 %v3272_v24, %v10324_v26  ;;  %v3177_v18 = vrot.slane %v2987_v43, 6  ;;  %v3821_v60 = vadd.f32 %v3658_v56, %v3656_v38  ;;  %8062 = vmatmul.mubr.msk.f32.gmra.mxu0 %vm286_vm0, %v8458_v54 }
 0x349   : > { %v2991_v32 = vpop.f32.mrf.mxu1  ;;  %v3662_v22 = vpop.f32.mrf.mxu0  ;;  %7988 = vmatmul.mubr.msk.f32.gmra.mxu1 %vm286_vm0, %v8458_v54  ;;  %5064 = vmatprep.mubr.f32.mxu0 %v12770_v0 }
 0x34a   : > { %v3178_v52 = vsel %vm968_vm1, %v3176_v20, %v3177_v18  ;;  %v3939_v42 = vrot.slane %v3821_v60, 2  ;;  %v3274_v7 = vadd.f32 %v3177_v18, %v2991_v32  ;;  %4242 = vmatprep.mubr.f32.mxu1 %v12770_v0  ;;  %v8459_v18 = vld [vmem:[%s8756_s11 + $0xc0] sm:$0xff] }
 0x34b   : > { %v3273_v26 = vadd.f32 %v3178_v52, %v2985_v11  ;;  %v2993_v6 = vpop.f32.mrf.mxu1  ;;  %v3664_v38 = vpop.f32.mrf.mxu0 }
 0x34c   : > { %v3940_v10 = vsel %vm1661_vm2, %v3938_v8, %v3939_v42  ;;  %v3322_v24 = vadd.f32 %v3274_v7, %v10344_v33  ;;  %v3822_v43 = vadd.f32 %v3664_v38, %v3662_v22  ;;  %8063 = vmatmul.mubr.msk.f32.gmra.mxu0 %vm286_vm0, %v8459_v18 }
 0x34d   : > { %v3321_v56 = vadd.f32 %v3273_v26, %v10346_v15  ;;  %v10988_v23 = vadd.f32 %v3940_v10, %v3320_v12  ;;  %v2996_v54 = vpop.f32.mrf.mxu1  ;;  %v3668_v20 = vpop.f32.mrf.mxu0  ;;  %7989 = vmatmul.mubr.msk.f32.gmra.mxu1 %vm286_vm0, %v8459_v18  ;;  %5070 = vmatprep.mubr.f32.mxu0 %v12770_v0  ;;  %v8460_v26 = vld [vmem:[%s8756_s11 + $0xc8] sm:$0xff]  ;;  %v12828_v10 = vld [vmem:[#allocation5_spill] sm:$0xff] }
 0x34e   : > { %v3941_v11 = vrot.slane %v3822_v43, 2  ;;  %4247 = vmatprep.mubr.f32.mxu1 %v12770_v0 }
 0x34f   : > { %12825 = vst [vmem:[#allocation6_spill] sm:$0xff] %v10988_v23  ;;  %v2998_v60 = vpop.f32.mrf.mxu1  ;;  %v3670_v33 = vpop.f32.mrf.mxu0 }
 0x350   : > { %v3942_v32 = vsel %vm1661_vm2, %v3939_v42, %v3941_v11  ;;  %v10996_v15 = vadd.f32 %v3941_v11, %v3322_v24  ;;  %v3179_v12 = vrot.slane %v2998_v60, 6  ;;  %v3823_v22 = vadd.f32 %v3670_v33, %v3668_v20  ;;  %8064 = vmatmul.mubr.msk.f32.gmra.mxu0 %vm286_vm0, %v8460_v26  ;;  %v8461_v11 = vld [vmem:[%s8756_s11 + $0xd0] sm:$0xff] }
 0x351   : > { %v10998_v8 = vadd.f32 %v3942_v32, %v3321_v56  ;;  %v3002_v52 = vpop.f32.mrf.mxu1  ;;  %v3674_v7 = vpop.f32.mrf.mxu0  ;;  %7990 = vmatmul.mubr.msk.f32.gmra.mxu1 %vm286_vm0, %v8460_v26  ;;  %5076 = vmatprep.mubr.f32.mxu0 %v12770_v0 }
 0x352   : > { %12826 = vst [vmem:[#allocation22_spill] sm:$0xff] %v10996_v15  ;;  %v3275_v6 = vadd.f32 %v3179_v12, %v2996_v54  ;;  %4253 = vmatprep.mubr.f32.mxu1 %v12770_v0  ;;  %v3943_v60 = vrot.slane %v3823_v22, 2 }
 0x353   : > { %12827 = vst [vmem:[#allocation8_spill] sm:$0xff] %v10998_v8  ;;  %v3004_v42 = vpop.f32.mrf.mxu1  ;;  %v3676_v38 = vpop.f32.mrf.mxu0  ;;  %v12830_v8 = vld [vmem:[#allocation7_spill] sm:$0xff] }
 0x354   : > { %v3323_v24 = vadd.f32 %v3275_v6, %v12828_v10  ;;  %v3180_v43 = vrot.slane %v3004_v42, 6  ;;  %v3824_v56 = vadd.f32 %v3676_v38, %v3674_v7  ;;  %8065 = vmatmul.mubr.msk.f32.gmra.mxu0 %vm286_vm0, %v8461_v11  ;;  %v12829_v38 = vld [vmem:[#allocation20_spill] sm:$0xff] }
 0x355   : > { %v3008_v20 = vpop.f32.mrf.mxu1  ;;  %v3680_v18 = vpop.f32.mrf.mxu0  ;;  %7991 = vmatmul.mubr.msk.f32.gmra.mxu1 %vm286_vm0, %v8461_v11  ;;  %5081 = vmatprep.mubr.f32.mxu0 %v12770_v0 }
 0x356   : > { %v3181_v54 = vsel %vm968_vm1, %v3179_v12, %v3180_v43  ;;  %v3944_v33 = vrot.slane %v3824_v56, 2  ;;  %v3277_v32 = vadd.f32 %v3180_v43, %v3008_v20  ;;  %4259 = vmatprep.mubr.f32.mxu1 %v12770_v0  ;;  %v8462_v43 = vld [vmem:[%s8756_s11 + $0xd8] sm:$0xff] }
 0x357   : > { %v3276_v26 = vadd.f32 %v3181_v54, %v3002_v52  ;;  %v3010_v6 = vpop.f32.mrf.mxu1  ;;  %v3682_v7 = vpop.f32.mrf.mxu0 }
 0x358   : > { %v3945_v42 = vsel %vm1661_vm2, %v3943_v60, %v3944_v33  ;;  %v3325_v10 = vadd.f32 %v3277_v32, %v12829_v38  ;;  %v3825_v23 = vadd.f32 %v3682_v7, %v3680_v18  ;;  %8066 = vmatmul.mubr.msk.f32.gmra.mxu0 %vm286_vm0, %v8462_v43  ;;  %v8463_v6 = vld [vmem:[%s8756_s11 + $0xe0] sm:$0xff] }
 0x359   : > { %v3324_v11 = vadd.f32 %v3276_v26, %v12830_v8  ;;  %v11015_v22 = vadd.f32 %v3945_v42, %v3323_v24  ;;  %v3013_v15 = vpop.f32.mrf.mxu1  ;;  %v3686_v12 = vpop.f32.mrf.mxu0  ;;  %7992 = vmatmul.mubr.msk.f32.gmra.mxu1 %vm286_vm0, %v8462_v43  ;;  %5087 = vmatprep.mubr.f32.mxu0 %v12770_v0  ;;  %v12832_v42 = vld [vmem:[#allocation21_spill] sm:$0xff] }
 0x35a   : > { %v3946_v52 = vrot.slane %v3825_v23, 2  ;;  %4264 = vmatprep.mubr.f32.mxu1 %v12770_v0 }
 0x35b   : > { %12831 = vst [vmem:[#allocation10_spill] sm:$0xff] %v11015_v22  ;;  %v3015_v56 = vpop.f32.mrf.mxu1  ;;  %v3688_v20 = vpop.f32.mrf.mxu0 }
 0x35c   : > { %v3947_v18 = vsel %vm1661_vm2, %v3944_v33, %v3946_v52  ;;  %v11023_v8 = vadd.f32 %v3946_v52, %v3325_v10  ;;  %v3182_v24 = vrot.slane %v3015_v56, 6  ;;  %v3826_v60 = vadd.f32 %v3688_v20, %v3686_v12  ;;  %8067 = vmatmul.mubr.msk.f32.gmra.mxu0 %vm286_vm0, %v8463_v6  ;;  %v8464_v52 = vld [vmem:[%s8756_s11 + $0xe8] sm:$0xff] }
 0x35d   : > { %v11025_v54 = vadd.f32 %v3947_v18, %v3324_v11  ;;  %v3019_v32 = vpop.f32.mrf.mxu1  ;;  %v3692_v26 = vpop.f32.mrf.mxu0  ;;  %7993 = vmatmul.mubr.msk.f32.gmra.mxu1 %vm286_vm0, %v8463_v6  ;;  %5093 = vmatprep.mubr.f32.mxu0 %v12770_v0 }
 0x35e   : > { %v3278_v23 = vadd.f32 %v3182_v24, %v3013_v15  ;;  %4270 = vmatprep.mubr.f32.mxu1 %v12770_v0  ;;  %v3948_v56 = vrot.slane %v3826_v60, 2 }
 0x35f   : > { %v3021_v33 = vpop.f32.mrf.mxu1  ;;  %v3694_v7 = vpop.f32.mrf.mxu0 }
 0x360   : > { %v3326_v38 = vadd.f32 %v3278_v23, %v12832_v42  ;;  %v3183_v10 = vrot.slane %v3021_v33, 6  ;;  %v3827_v11 = vadd.f32 %v3694_v7, %v3692_v26  ;;  %8068 = vmatmul.mubr.msk.f32.gmra.mxu0 %vm286_vm0, %v8464_v52 }
 0x361   : > { %v3025_v12 = vpop.f32.mrf.mxu1  ;;  %v3698_v43 = vpop.f32.mrf.mxu0  ;;  %7994 = vmatmul.mubr.msk.f32.gmra.mxu1 %vm286_vm0, %v8464_v52  ;;  %5098 = vmatprep.mubr.f32.mxu0 %v12770_v0 }
 0x362   : > { %v3184_v15 = vsel %vm968_vm1, %v3182_v24, %v3183_v10  ;;  %v3949_v20 = vrot.slane %v3827_v11, 2  ;;  %v3280_v18 = vadd.f32 %v3183_v10, %v3025_v12  ;;  %4276 = vmatprep.mubr.f32.mxu1 %v12770_v0  ;;  %v8465_v10 = vld [vmem:[%s8756_s11 + $0xf0] sm:$0xff] }
 0x363   : > { %v3279_v6 = vadd.f32 %v3184_v15, %v3019_v32  ;;  %v3027_v23 = vpop.f32.mrf.mxu1  ;;  %v3700_v26 = vpop.f32.mrf.mxu0 }
 0x364   : > { %v3950_v33 = vsel %vm1661_vm2, %v3948_v56, %v3949_v20  ;;  %v3328_v7 = vadd.f32 %v3280_v18, %v10445_v41  ;;  %v3828_v42 = vadd.f32 %v3700_v26, %v3698_v43  ;;  %8069 = vmatmul.mubr.msk.f32.gmra.mxu0 %vm286_vm0, %v8465_v10 }
 0x365   : > { %v3327_v52 = vadd.f32 %v3279_v6, %v10447_v34  ;;  %v11042_v60 = vadd.f32 %v3950_v33, %v3326_v38  ;;  %v3030_v22 = vpop.f32.mrf.mxu1  ;;  %v3704_v24 = vpop.f32.mrf.mxu0  ;;  %7995 = vmatmul.mubr.msk.f32.gmra.mxu1 %vm286_vm0, %v8465_v10  ;;  %5104 = vmatprep.mubr.f32.mxu0 %v12770_v0  ;;  %v8466_v6 = vld [vmem:[%s8756_s11 + $0xf8] sm:$0xff]  ;;  %v8467_v10 = vld [vmem:[%s8756_s11 + $0x100] sm:$0xff] }
 0x366   : > { %v3951_v32 = vrot.slane %v3828_v42, 2  ;;  %4281 = vmatprep.mubr.f32.mxu1 %v12770_v0 }
 0x367   : > { %12833 = vst [vmem:[#allocation9_spill] sm:$0xff] %v11042_v60  ;;  %v3032_v11 = vpop.f32.mrf.mxu1  ;;  %v3706_v41 = vpop.f32.mrf.mxu0  ;;  %v8508_v60 = vld [vmem:[%s8756_s11 + $0x8] sm:$0xff] }
 0x368   : > { %v3952_v12 = vsel %vm1661_vm2, %v3949_v20, %v3951_v32  ;;  %v11050_v34 = vadd.f32 %v3951_v32, %v3328_v7  ;;  %v3185_v38 = vrot.slane %v3032_v11, 6  ;;  %v3829_v43 = vadd.f32 %v3706_v41, %v3704_v24  ;;  %8070 = vmatmul.mubr.msk.f32.gmra.mxu0 %vm286_vm0, %v8466_v6 }
 0x369   : > { %v11052_v56 = vadd.f32 %v3952_v12, %v3327_v52  ;;  %v3036_v15 = vpop.f32.mrf.mxu1  ;;  %v3710_v18 = vpop.f32.mrf.mxu0  ;;  %7996 = vmatmul.mubr.msk.f32.gmra.mxu1 %vm286_vm0, %v8466_v6  ;;  %5110 = vmatprep.mubr.f32.mxu0 %v12770_v0 }
 0x36a   : > { %v3281_v23 = vadd.f32 %v3185_v38, %v3030_v22  ;;  %4287 = vmatprep.mubr.f32.mxu1 %v12770_v0  ;;  %v3953_v32 = vrot.slane %v3829_v43, 2 }
 0x36b   : > { %v3038_v20 = vpop.f32.mrf.mxu1  ;;  %v3712_v26 = vpop.f32.mrf.mxu0 }
 0x36c   : > { %v3329_v33 = vadd.f32 %v3281_v23, %v10466_v35  ;;  %v3186_v7 = vrot.slane %v3038_v20, 6  ;;  %v3830_v42 = vadd.f32 %v3712_v26, %v3710_v18  ;;  %8071 = vmatmul.mubr.msk.f32.gmra.mxu0 %vm286_vm0, %v8467_v10 }
 0x36d   : > { %v3042_v52 = vpop.f32.mrf.mxu1  ;;  %v3716_v24 = vpop.f32.mrf.mxu0  ;;  %7997 = vmatmul.mubr.msk.f32.gmra.mxu1 %vm286_vm0, %v8467_v10  ;;  %5115 = vmatprep.mubr.f32.mxu0 %v12770_v0 }
 0x36e   : > { %v3187_v22 = vsel %vm968_vm1, %v3185_v38, %v3186_v7  ;;  %v3954_v11 = vrot.slane %v3830_v42, 2  ;;  %v3283_v41 = vadd.f32 %v3186_v7, %v3042_v52  ;;  %4293 = vmatprep.mubr.f32.mxu1 %v12770_v0  ;;  %v8468_v7 = vld [vmem:[%s8756_s11 + $0x108] sm:$0xff] }
 0x36f   : > { %v3282_v35 = vadd.f32 %v3187_v22, %v3036_v15  ;;  %v3044_v12 = vpop.f32.mrf.mxu1  ;;  %v3718_v18 = vpop.f32.mrf.mxu0 }
 0x370   : > { %v3955_v6 = vsel %vm1661_vm2, %v3953_v32, %v3954_v11  ;;  %v3331_v23 = vadd.f32 %v3283_v41, %v10478_v55  ;;  %v3831_v20 = vadd.f32 %v3718_v18, %v3716_v24  ;;  %8072 = vmatmul.mubr.msk.f32.gmra.mxu0 %vm286_vm0, %v8468_v7 }
 0x371   : > { %v3330_v26 = vadd.f32 %v3282_v35, %v10480_v48  ;;  %v11069_v43 = vadd.f32 %v3955_v6, %v3329_v33  ;;  %v3047_v10 = vpop.f32.mrf.mxu1  ;;  %v3722_v38 = vpop.f32.mrf.mxu0  ;;  %7998 = vmatmul.mubr.msk.f32.gmra.mxu1 %vm286_vm0, %v8468_v7  ;;  %5121 = vmatprep.mubr.f32.mxu0 %v12770_v0  ;;  %v8469_v35 = vld [vmem:[%s8756_s11 + $0x110] sm:$0xff]  ;;  %v8470_v7 = vld [vmem:[%s8756_s11 + $0x118] sm:$0xff] }
 0x372   : > { %v3956_v15 = vrot.slane %v3831_v20, 2  ;;  %4298 = vmatprep.mubr.f32.mxu1 %v12770_v0 }
 0x373   : > { %12834 = vst [vmem:[#allocation11_spill] sm:$0xff] %v11069_v43  ;;  %v3049_v42 = vpop.f32.mrf.mxu1  ;;  %v3724_v55 = vpop.f32.mrf.mxu0 }
 0x374   : > { %v3957_v52 = vsel %vm1661_vm2, %v3954_v11, %v3956_v15  ;;  %v11077_v48 = vadd.f32 %v3956_v15, %v3331_v23  ;;  %v3188_v33 = vrot.slane %v3049_v42, 6  ;;  %v3832_v24 = vadd.f32 %v3724_v55, %v3722_v38  ;;  %8073 = vmatmul.mubr.msk.f32.gmra.mxu0 %vm286_vm0, %v8469_v35 }
 0x375   : > { %v11079_v32 = vadd.f32 %v3957_v52, %v3330_v26  ;;  %v3053_v22 = vpop.f32.mrf.mxu1  ;;  %v3728_v41 = vpop.f32.mrf.mxu0  ;;  %7999 = vmatmul.mubr.msk.f32.gmra.mxu1 %vm286_vm0, %v8469_v35  ;;  %5127 = vmatprep.mubr.f32.mxu0 %v12770_v0 }
 0x376   : > { %12835 = vst [vmem:[#allocation13_spill] sm:$0xff] %v11077_v48  ;;  %v3284_v12 = vadd.f32 %v3188_v33, %v3047_v10  ;;  %4304 = vmatprep.mubr.f32.mxu1 %v12770_v0  ;;  %v3958_v15 = vrot.slane %v3832_v24, 2 }
 0x377   : > { %12836 = vst [vmem:[#allocation12_spill] sm:$0xff] %v11079_v32  ;;  %v3055_v11 = vpop.f32.mrf.mxu1  ;;  %v3730_v18 = vpop.f32.mrf.mxu0 }
 0x378   : > { %v3332_v6 = vadd.f32 %v3284_v12, %v10499_v57  ;;  %v3189_v23 = vrot.slane %v3055_v11, 6  ;;  %v3833_v20 = vadd.f32 %v3730_v18, %v3728_v41  ;;  %8074 = vmatmul.mubr.msk.f32.gmra.mxu0 %vm286_vm0, %v8470_v7 }
 0x379   : > { %v3059_v26 = vpop.f32.mrf.mxu1  ;;  %v3734_v38 = vpop.f32.mrf.mxu0  ;;  %8000 = vmatmul.mubr.msk.f32.gmra.mxu1 %vm286_vm0, %v8470_v7  ;;  %5132 = vmatprep.mubr.f32.mxu0 %v12770_v0 }
 0x37a   : > { %v3190_v10 = vsel %vm968_vm1, %v3188_v33, %v3189_v23  ;;  %v3959_v42 = vrot.slane %v3833_v20, 2  ;;  %v3286_v55 = vadd.f32 %v3189_v23, %v3059_v26  ;;  %4310 = vmatprep.mubr.f32.mxu1 %v12770_v0  ;;  %v8471_v23 = vld [vmem:[%s8756_s11 + $0x120] sm:$0xff] }
 0x37b   : > { %v3285_v57 = vadd.f32 %v3190_v10, %v3053_v22  ;;  %v3061_v52 = vpop.f32.mrf.mxu1  ;;  %v3736_v41 = vpop.f32.mrf.mxu0  ;;  %v8472_v10 = vld [vmem:[%s8756_s11 + $0x128] sm:$0xff] }
 0x37c   : > { %v3960_v35 = vsel %vm1661_vm2, %v3958_v15, %v3959_v42  ;;  %v3334_v12 = vadd.f32 %v3286_v55, %v10510_v44  ;;  %v3834_v11 = vadd.f32 %v3736_v41, %v3734_v38  ;;  %8075 = vmatmul.mubr.msk.f32.gmra.mxu0 %vm286_vm0, %v8471_v23  ;;  %v8473_v41 = vld [vmem:[%s8756_s11 + $0x130] sm:$0xff] }
 0x37d   : > { %v3333_v18 = vadd.f32 %v3285_v57, %v10512_v17  ;;  %v11096_v24 = vadd.f32 %v3960_v35, %v3332_v6  ;;  %v3064_v33 = vpop.f32.mrf.mxu1  ;;  %v3740_v20 = vpop.f32.mrf.mxu0  ;;  %8001 = vmatmul.mubr.msk.f32.gmra.mxu1 %vm286_vm0, %v8471_v23  ;;  %5138 = vmatprep.mubr.f32.mxu0 %v12770_v0 }
 0x37e   : > { %v3961_v22 = vrot.slane %v3834_v11, 2  ;;  %4315 = vmatprep.mubr.f32.mxu1 %v12770_v0  ;;  %v8474_v33 = vld [vmem:[%s8756_s11 + $0x138] sm:$0xff] }
 0x37f   : > { %12837 = vst [vmem:[#allocation14_spill] sm:$0xff] %v11096_v24  ;;  %v3065_v26 = vpop.f32.mrf.mxu1  ;;  %v3741_v44 = vpop.f32.mrf.mxu0 }
 0x380   : > { %v3962_v17 = vsel %vm1661_vm2, %v3959_v42, %v3961_v22  ;;  %v11104_v6 = vadd.f32 %v3961_v22, %v3334_v12  ;;  %8076 = vmatmul.mubr.msk.f32.gmra.mxu0 %vm286_vm0, %v8472_v10  ;;  %v8475_v44 = vld [vmem:[%s8756_s11 + $0x140] sm:$0xff] }
 0x381   : > { %v11106_v38 = vadd.f32 %v3962_v17, %v3333_v18  ;;  %v3068_v7 = vpop.f32.mrf.mxu1  ;;  %v3744_v15 = vpop.f32.mrf.mxu0  ;;  %8002 = vmatmul.mubr.msk.f32.gmra.mxu1 %vm286_vm0, %v8472_v10  ;;  %5144 = vmatprep.mubr.f32.mxu0 %v12770_v0 }
 0x382   : > { %12838 = vst [vmem:[#allocation16_spill] sm:$0xff] %v11104_v6  ;;  %4321 = vmatprep.mubr.f32.mxu1 %v12770_v0 }
 0x383   : > { %12839 = vst [vmem:[#allocation15_spill] sm:$0xff] %v11106_v38  ;;  %v3069_v55 = vpop.f32.mrf.mxu1  ;;  %v3745_v57 = vpop.f32.mrf.mxu0  ;;  %v8505_v38 = vld [vmem:[%s8756_s11 + $0x230] sm:$0xff] }
 0x384   : > { %8077 = vmatmul.mubr.msk.f32.gmra.mxu0 %vm286_vm0, %v8473_v41  ;;  %v8476_v55 = vld [vmem:[%s8756_s11 + $0x148] sm:$0xff] }
 0x385   : > { %v3072_v52 = vpop.f32.mrf.mxu1  ;;  %v3748_v42 = vpop.f32.mrf.mxu0  ;;  %8003 = vmatmul.mubr.msk.f32.gmra.mxu1 %vm286_vm0, %v8473_v41  ;;  %5149 = vmatprep.mubr.f32.mxu0 %v12770_v0 }
 0x386   : > { %4327 = vmatprep.mubr.f32.mxu1 %v12770_v0 }
 0x387   : > { %v3073_v35 = vpop.f32.mrf.mxu1  ;;  %v3749_v12 = vpop.f32.mrf.mxu0 }
 0x388   : > { %8078 = vmatmul.mubr.msk.f32.gmra.mxu0 %vm286_vm0, %v8474_v33  ;;  %v8477_v35 = vld [vmem:[%s8756_s11 + $0x150] sm:$0xff] }
 0x389   : > { %v3076_v11 = vpop.f32.mrf.mxu1  ;;  %v3752_v18 = vpop.f32.mrf.mxu0  ;;  %8004 = vmatmul.mubr.msk.f32.gmra.mxu1 %vm286_vm0, %v8474_v33  ;;  %5155 = vmatprep.mubr.f32.mxu0 %v12770_v0 }
 0x38a   : > { %4332 = vmatprep.mubr.f32.mxu1 %v12770_v0 }
 0x38b   : > { %v3077_v20 = vpop.f32.mrf.mxu1  ;;  %v3753_v23 = vpop.f32.mrf.mxu0 }
 0x38c   : > { %8079 = vmatmul.mubr.msk.f32.gmra.mxu0 %vm286_vm0, %v8475_v44  ;;  %v8478_v20 = vld [vmem:[%s8756_s11 + $0x158] sm:$0xff] }
 0x38d   : > { %v3080_v22 = vpop.f32.mrf.mxu1  ;;  %v3756_v26 = vpop.f32.mrf.mxu0  ;;  %8005 = vmatmul.mubr.msk.f32.gmra.mxu1 %vm286_vm0, %v8475_v44  ;;  %5161 = vmatprep.mubr.f32.mxu0 %v12770_v0 }
 0x38e   : > { %4338 = vmatprep.mubr.f32.mxu1 %v12770_v0 }
 0x38f   : > { %v3081_v17 = vpop.f32.mrf.mxu1  ;;  %v3757_v7 = vpop.f32.mrf.mxu0 }
 0x390   : > { %8080 = vmatmul.mubr.msk.f32.gmra.mxu0 %vm286_vm0, %v8476_v55  ;;  %v8479_v17 = vld [vmem:[%s8756_s11 + $0x160] sm:$0xff] }
 0x391   : > { %v3084_v15 = vpop.f32.mrf.mxu1  ;;  %v3760_v10 = vpop.f32.mrf.mxu0  ;;  %8006 = vmatmul.mubr.msk.f32.gmra.mxu1 %vm286_vm0, %v8476_v55  ;;  %5166 = vmatprep.mubr.f32.mxu0 %v12770_v0 }
 0x392   : > { %4344 = vmatprep.mubr.f32.mxu1 %v12770_v0 }
 0x393   : > { %v3085_v57 = vpop.f32.mrf.mxu1  ;;  %v3761_v52 = vpop.f32.mrf.mxu0 }
 0x394   : > { %8081 = vmatmul.mubr.msk.f32.gmra.mxu0 %vm286_vm0, %v8477_v35  ;;  %v8480_v57 = vld [vmem:[%s8756_s11 + $0x168] sm:$0xff] }
 0x395   : > { %v3088_v42 = vpop.f32.mrf.mxu1  ;;  %v3764_v41 = vpop.f32.mrf.mxu0  ;;  %8007 = vmatmul.mubr.msk.f32.gmra.mxu1 %vm286_vm0, %v8477_v35  ;;  %5172 = vmatprep.mubr.f32.mxu0 %v12770_v0 }
 0x396   : > { %4349 = vmatprep.mubr.f32.mxu1 %v12770_v0 }
 0x397   : > { %v3089_v12 = vpop.f32.mrf.mxu1  ;;  %v3765_v11 = vpop.f32.mrf.mxu0 }
 0x398   : > { %8082 = vmatmul.mubr.msk.f32.gmra.mxu0 %vm286_vm0, %v8478_v20  ;;  %v8481_v12 = vld [vmem:[%s8756_s11 + $0x170] sm:$0xff] }
 0x399   : > { %v3092_v18 = vpop.f32.mrf.mxu1  ;;  %v3768_v33 = vpop.f32.mrf.mxu0  ;;  %8008 = vmatmul.mubr.msk.f32.gmra.mxu1 %vm286_vm0, %v8478_v20  ;;  %5178 = vmatprep.mubr.f32.mxu0 %v12770_v0 }
 0x39a   : > { %4355 = vmatprep.mubr.f32.mxu1 %v12770_v0 }
 0x39b   : > { %v3093_v23 = vpop.f32.mrf.mxu1  ;;  %v3769_v22 = vpop.f32.mrf.mxu0 }
 0x39c   : > { %8083 = vmatmul.mubr.msk.f32.gmra.mxu0 %vm286_vm0, %v8479_v17  ;;  %v8482_v23 = vld [vmem:[%s8756_s11 + $0x178] sm:$0xff] }
 0x39d   : > { %v3096_v26 = vpop.f32.mrf.mxu1  ;;  %v3772_v44 = vpop.f32.mrf.mxu0  ;;  %8009 = vmatmul.mubr.msk.f32.gmra.mxu1 %vm286_vm0, %v8479_v17  ;;  %5183 = vmatprep.mubr.f32.mxu0 %v12770_v0  ;;  %v8483_v17 = vld [vmem:[%s8756_s11 + $0x180] sm:$0xff] }
 0x39e   : > { %4361 = vmatprep.mubr.f32.mxu1 %v12770_v0 }
 0x39f   : > { %v3097_v7 = vpop.f32.mrf.mxu1  ;;  %v3773_v15 = vpop.f32.mrf.mxu0 }
 0x3a0   : > { %8084 = vmatmul.mubr.msk.f32.gmra.mxu0 %vm286_vm0, %v8480_v57 }
 0x3a1   : > { %v3100_v10 = vpop.f32.mrf.mxu1  ;;  %v3776_v55 = vpop.f32.mrf.mxu0  ;;  %8010 = vmatmul.mubr.msk.f32.gmra.mxu1 %vm286_vm0, %v8480_v57  ;;  %5189 = vmatprep.mubr.f32.mxu0 %v12770_v0  ;;  %v8484_v57 = vld [vmem:[%s8756_s11 + $0x188] sm:$0xff] }
 0x3a2   : > { %4366 = vmatprep.mubr.f32.mxu1 %v12770_v0 }
 0x3a3   : > { %v3101_v52 = vpop.f32.mrf.mxu1  ;;  %v3777_v42 = vpop.f32.mrf.mxu0 }
 0x3a4   : > { %8085 = vmatmul.mubr.msk.f32.gmra.mxu0 %vm286_vm0, %v8481_v12 }
 0x3a5   : > { %v3104_v41 = vpop.f32.mrf.mxu1  ;;  %v3780_v35 = vpop.f32.mrf.mxu0  ;;  %8011 = vmatmul.mubr.msk.f32.gmra.mxu1 %vm286_vm0, %v8481_v12  ;;  %5195 = vmatprep.mubr.f32.mxu0 %v12770_v0  ;;  %v8485_v12 = vld [vmem:[%s8756_s11 + $0x190] sm:$0xff] }
 0x3a6   : > { %4372 = vmatprep.mubr.f32.mxu1 %v12770_v0 }
 0x3a7   : > { %v3105_v11 = vpop.f32.mrf.mxu1  ;;  %v3781_v18 = vpop.f32.mrf.mxu0 }
 0x3a8   : > { %8086 = vmatmul.mubr.msk.f32.gmra.mxu0 %vm286_vm0, %v8482_v23 }
 0x3a9   : > { %v3108_v33 = vpop.f32.mrf.mxu1  ;;  %v3784_v20 = vpop.f32.mrf.mxu0  ;;  %8012 = vmatmul.mubr.msk.f32.gmra.mxu1 %vm286_vm0, %v8482_v23  ;;  %5200 = vmatprep.mubr.f32.mxu0 %v12770_v0  ;;  %v8486_v23 = vld [vmem:[%s8756_s11 + $0x198] sm:$0xff] }
 0x3aa   : > { %4378 = vmatprep.mubr.f32.mxu1 %v12770_v0 }
 0x3ab   : > { %v3109_v22 = vpop.f32.mrf.mxu1  ;;  %v3785_v26 = vpop.f32.mrf.mxu0 }
 0x3ac   : > { %8087 = vmatmul.mubr.msk.f32.gmra.mxu0 %vm286_vm0, %v8483_v17 }
 0x3ad   : > { %v4128_v44 = vpop.f32.mrf.mxu1  ;;  %8013 = vmatmul.mubr.msk.f32.gmra.mxu1 %vm286_vm0, %v8483_v17  ;;  %v4964_v7 = vpop.f32.mrf.mxu0  ;;  %5206 = vmatprep.mubr.f32.mxu0 %v12770_v0 }
 0x3ae   : > { %4383 = vmatprep.mubr.f32.mxu1 %v12770_v0  ;;  %v8487_v7 = vld [vmem:[%s8756_s11 + $0x1a0] sm:$0xff] }
 0x3af   : > { %v4129_v15 = vpop.f32.mrf.mxu1  ;;  %v4965_v10 = vpop.f32.mrf.mxu0 }
 0x3b0   : > { %8088 = vmatmul.mubr.msk.f32.gmra.mxu0 %vm286_vm0, %v8484_v57 }
 0x3b1   : > { %v4132_v55 = vpop.f32.mrf.mxu1  ;;  %8014 = vmatmul.mubr.msk.f32.gmra.mxu1 %vm286_vm0, %v8484_v57  ;;  %v4968_v52 = vpop.f32.mrf.mxu0  ;;  %5212 = vmatprep.mubr.f32.mxu0 %v12770_v0 }
 0x3b2   : > { %4389 = vmatprep.mubr.f32.mxu1 %v12770_v0  ;;  %v8488_v52 = vld [vmem:[%s8756_s11 + $0x1a8] sm:$0xff] }
 0x3b3   : > { %v4133_v42 = vpop.f32.mrf.mxu1  ;;  %v4969_v41 = vpop.f32.mrf.mxu0 }
 0x3b4   : > { %8089 = vmatmul.mubr.msk.f32.gmra.mxu0 %vm286_vm0, %v8485_v12 }
 0x3b5   : > { %v4136_v35 = vpop.f32.mrf.mxu1  ;;  %8015 = vmatmul.mubr.msk.f32.gmra.mxu1 %vm286_vm0, %v8485_v12  ;;  %v4972_v11 = vpop.f32.mrf.mxu0  ;;  %5217 = vmatprep.mubr.f32.mxu0 %v12770_v0 }
 0x3b6   : > { %4395 = vmatprep.mubr.f32.mxu1 %v12770_v0  ;;  %v8489_v11 = vld [vmem:[%s8756_s11 + $0x1b0] sm:$0xff] }
 0x3b7   : > { %v4137_v18 = vpop.f32.mrf.mxu1  ;;  %v4973_v33 = vpop.f32.mrf.mxu0 }
 0x3b8   : > { %8090 = vmatmul.mubr.msk.f32.gmra.mxu0 %vm286_vm0, %v8486_v23 }
 0x3b9   : > { %v4140_v20 = vpop.f32.mrf.mxu1  ;;  %8016 = vmatmul.mubr.msk.f32.gmra.mxu1 %vm286_vm0, %v8486_v23  ;;  %v4976_v22 = vpop.f32.mrf.mxu0  ;;  %5223 = vmatprep.mubr.f32.mxu0 %v12770_v0 }
 0x3ba   : > { %4400 = vmatprep.mubr.f32.mxu1 %v12770_v0  ;;  %v8490_v22 = vld [vmem:[%s8756_s11 + $0x1b8] sm:$0xff] }
 0x3bb   : > { %v4141_v26 = vpop.f32.mrf.mxu1  ;;  %v4977_v44 = vpop.f32.mrf.mxu0 }
 0x3bc   : > { %8091 = vmatmul.mubr.msk.f32.gmra.mxu0 %vm286_vm0, %v8487_v7 }
 0x3bd   : > { %v4144_v17 = vpop.f32.mrf.mxu1  ;;  %8017 = vmatmul.mubr.msk.f32.gmra.mxu1 %vm286_vm0, %v8487_v7  ;;  %v4980_v15 = vpop.f32.mrf.mxu0  ;;  %5229 = vmatprep.mubr.f32.mxu0 %v12770_v0 }
 0x3be   : > { %4406 = vmatprep.mubr.f32.mxu1 %v12770_v0  ;;  %v8491_v15 = vld [vmem:[%s8756_s11 + $0x1c0] sm:$0xff] }
 0x3bf   : > { %v4145_v10 = vpop.f32.mrf.mxu1  ;;  %v4981_v55 = vpop.f32.mrf.mxu0 }
 0x3c0   : > { %8092 = vmatmul.mubr.msk.f32.gmra.mxu0 %vm286_vm0, %v8488_v52 }
 0x3c1   : > { %v4148_v57 = vpop.f32.mrf.mxu1  ;;  %8018 = vmatmul.mubr.msk.f32.gmra.mxu1 %vm286_vm0, %v8488_v52  ;;  %v4984_v42 = vpop.f32.mrf.mxu0  ;;  %5234 = vmatprep.mubr.f32.mxu0 %v12770_v0 }
 0x3c2   : > { %4412 = vmatprep.mubr.f32.mxu1 %v12770_v0  ;;  %v8492_v42 = vld [vmem:[%s8756_s11 + $0x1c8] sm:$0xff] }
 0x3c3   : > { %v4149_v41 = vpop.f32.mrf.mxu1  ;;  %v4985_v35 = vpop.f32.mrf.mxu0 }
 0x3c4   : > { %8093 = vmatmul.mubr.msk.f32.gmra.mxu0 %vm286_vm0, %v8489_v11 }
 0x3c5   : > { %v4152_v12 = vpop.f32.mrf.mxu1  ;;  %8019 = vmatmul.mubr.msk.f32.gmra.mxu1 %vm286_vm0, %v8489_v11  ;;  %v4988_v18 = vpop.f32.mrf.mxu0  ;;  %5240 = vmatprep.mubr.f32.mxu0 %v12770_v0 }
 0x3c6   : > { %4417 = vmatprep.mubr.f32.mxu1 %v12770_v0  ;;  %v8493_v18 = vld [vmem:[%s8756_s11 + $0x1d0] sm:$0xff] }
 0x3c7   : > { %v4153_v33 = vpop.f32.mrf.mxu1  ;;  %v4989_v20 = vpop.f32.mrf.mxu0 }
 0x3c8   : > { %8094 = vmatmul.mubr.msk.f32.gmra.mxu0 %vm286_vm0, %v8490_v22 }
 0x3c9   : > { %v4156_v23 = vpop.f32.mrf.mxu1  ;;  %8020 = vmatmul.mubr.msk.f32.gmra.mxu1 %vm286_vm0, %v8490_v22  ;;  %v4992_v26 = vpop.f32.mrf.mxu0  ;;  %5246 = vmatprep.mubr.f32.mxu0 %v12770_v0 }
 0x3ca   : > { %4423 = vmatprep.mubr.f32.mxu1 %v12770_v0  ;;  %v8494_v26 = vld [vmem:[%s8756_s11 + $0x1d8] sm:$0xff] }
 0x3cb   : > { %v4157_v44 = vpop.f32.mrf.mxu1  ;;  %v4993_v17 = vpop.f32.mrf.mxu0 }
 0x3cc   : > { %8095 = vmatmul.mubr.msk.f32.gmra.mxu0 %vm286_vm0, %v8491_v15 }
 0x3cd   : > { %v4160_v7 = vpop.f32.mrf.mxu1  ;;  %8021 = vmatmul.mubr.msk.f32.gmra.mxu1 %vm286_vm0, %v8491_v15  ;;  %v4996_v10 = vpop.f32.mrf.mxu0  ;;  %5251 = vmatprep.mubr.f32.mxu0 %v12770_v0 }
 0x3ce   : > { %4429 = vmatprep.mubr.f32.mxu1 %v12770_v0  ;;  %v8495_v10 = vld [vmem:[%s8756_s11 + $0x1e0] sm:$0xff] }
 0x3cf   : > { %v4161_v55 = vpop.f32.mrf.mxu1  ;;  %v4997_v57 = vpop.f32.mrf.mxu0 }
 0x3d0   : > { %8096 = vmatmul.mubr.msk.f32.gmra.mxu0 %vm286_vm0, %v8492_v42 }
 0x3d1   : > { %v4164_v52 = vpop.f32.mrf.mxu1  ;;  %8022 = vmatmul.mubr.msk.f32.gmra.mxu1 %vm286_vm0, %v8492_v42  ;;  %v5000_v41 = vpop.f32.mrf.mxu0  ;;  %5257 = vmatprep.mubr.f32.mxu0 %v12770_v0 }
 0x3d2   : > { %4434 = vmatprep.mubr.f32.mxu1 %v12770_v0  ;;  %v8496_v41 = vld [vmem:[%s8756_s11 + $0x1e8] sm:$0xff] }
 0x3d3   : > { %v4165_v35 = vpop.f32.mrf.mxu1  ;;  %v5001_v12 = vpop.f32.mrf.mxu0 }
 0x3d4   : > { %8097 = vmatmul.mubr.msk.f32.gmra.mxu0 %vm286_vm0, %v8493_v18 }
 0x3d5   : > { %v4168_v11 = vpop.f32.mrf.mxu1  ;;  %8023 = vmatmul.mubr.msk.f32.gmra.mxu1 %vm286_vm0, %v8493_v18  ;;  %v5004_v33 = vpop.f32.mrf.mxu0  ;;  %5263 = vmatprep.mubr.f32.mxu0 %v12770_v0 }
 0x3d6   : > { %4440 = vmatprep.mubr.f32.mxu1 %v12770_v0 }
 0x3d7   : > { %v4169_v20 = vpop.f32.mrf.mxu1  ;;  %v5005_v23 = vpop.f32.mrf.mxu0 }
 0x3d8   : > { %8098 = vmatmul.mubr.msk.f32.gmra.mxu0 %vm286_vm0, %v8494_v26  ;;  %v8497_v20 = vld [vmem:[%s8756_s11 + $0x1f0] sm:$0xff] }
 0x3d9   : > { %v4172_v22 = vpop.f32.mrf.mxu1  ;;  %8024 = vmatmul.mubr.msk.f32.gmra.mxu1 %vm286_vm0, %v8494_v26  ;;  %v5008_v44 = vpop.f32.mrf.mxu0  ;;  %5268 = vmatprep.mubr.f32.mxu0 %v12770_v0 }
 0x3da   : > { %4446 = vmatprep.mubr.f32.mxu1 %v12770_v0 }
 0x3db   : > { %v4173_v17 = vpop.f32.mrf.mxu1  ;;  %v5009_v7 = vpop.f32.mrf.mxu0 }
 0x3dc   : > { %8099 = vmatmul.mubr.msk.f32.gmra.mxu0 %vm286_vm0, %v8495_v10 }
 0x3dd   : > { %v4176_v15 = vpop.f32.mrf.mxu1  ;;  %8025 = vmatmul.mubr.msk.f32.gmra.mxu1 %vm286_vm0, %v8495_v10  ;;  %v5012_v55 = vpop.f32.mrf.mxu0  ;;  %5274 = vmatprep.mubr.f32.mxu0 %v12770_v0  ;;  %v8498_v10 = vld [vmem:[%s8756_s11 + $0x1f8] sm:$0xff] }
 0x3de   : > { %4450 = vmatprep.mubr.f32.mxu1 %v12770_v0 }
 0x3df   : > { %v4178_v57 = vpop.f32.mrf.mxu1  ;;  %v5013_v52 = vpop.f32.mrf.mxu0 }
 0x3e0   : > { %8100 = vmatmul.mubr.msk.f32.gmra.mxu0 %vm286_vm0, %v8496_v41 }
 0x3e1   : > { %v4181_v42 = vpop.f32.mrf.mxu1  ;;  %8026 = vmatmul.mubr.msk.f32.gmra.mxu1 %vm286_vm0, %v8496_v41  ;;  %v5016_v35 = vpop.f32.mrf.mxu0  ;;  %5280 = vmatprep.mubr.f32.mxu0 %v12770_v0 }
 0x3e2   : > { %4454 = vmatprep.mubr.f32.mxu1 %v12770_v0 }
 0x3e3   : > { %v4183_v12 = vpop.f32.mrf.mxu1  ;;  %v5017_v11 = vpop.f32.mrf.mxu0 }
 0x3e4   : > { %v4527_v18 = vrot.slane %v4183_v12, 2  ;;  %8101 = vmatmul.mubr.msk.f32.gmra.mxu0 %vm286_vm0, %v8497_v20 }
 0x3e5   : > { %v4187_v33 = vpop.f32.mrf.mxu1  ;;  %8027 = vmatmul.mubr.msk.f32.gmra.mxu1 %vm286_vm0, %v8497_v20  ;;  %v5020_v23 = vpop.f32.mrf.mxu0  ;;  %5285 = vmatprep.mubr.f32.mxu0 %v12770_v0 }
 0x3e6   : > { %v4623_v22 = vadd.f32 %v4527_v18, %v4176_v15  ;;  %4458 = vmatprep.mubr.f32.mxu1 %v12770_v0 }
 0x3e7   : > { %v4189_v26 = vpop.f32.mrf.mxu1  ;;  %v5021_v44 = vpop.f32.mrf.mxu0 }
 0x3e8   : > { %v4528_v17 = vrot.slane %v4189_v26, 2  ;;  %8102 = vmatmul.mubr.msk.f32.gmra.mxu0 %vm286_vm0, %v8498_v10  ;;  %v4719_v11 = vrot.slane %v4623_v22, 4  ;;  %v8499_v26 = vld [vmem:[%s8756_s11 + $0x200] sm:$0xff] }
 0x3e9   : > { %v4193_v7 = vpop.f32.mrf.mxu1  ;;  %8028 = vmatmul.mubr.msk.f32.gmra.mxu1 %vm286_vm0, %v8498_v10  ;;  %v5024_v55 = vpop.f32.mrf.mxu0  ;;  %5291 = vmatprep.mubr.f32.mxu0 %v12770_v0 }
 0x3ea   : > { %v4529_v57 = vsel %vm1661_vm2, %v4527_v18, %v4528_v17  ;;  %v4625_v52 = vadd.f32 %v4528_v17, %v4187_v33  ;;  %4462 = vmatprep.mubr.f32.mxu1 %v12770_v0 }
 0x3eb   : > { %v4624_v15 = vadd.f32 %v4529_v57, %v4181_v42  ;;  %v4195_v41 = vpop.f32.mrf.mxu1  ;;  %v5025_v35 = vpop.f32.mrf.mxu0 }
 0x3ec   : > { %v4722_v12 = vrot.slane %v4625_v52, 4  ;;  %8103 = vmatmul.mubr.msk.f32.gmra.mxu0 %vm286_vm0, %v8499_v26  ;;  %v8500_v52 = vld [vmem:[%s8756_s11 + $0x208] sm:$0xff] }
 0x3ed   : > { %v4720_v20 = vrot.slane %v4624_v15, 4  ;;  %v4198_v23 = vpop.f32.mrf.mxu1  ;;  %8029 = vmatmul.mubr.msk.f32.gmra.mxu1 %vm286_vm0, %v8499_v26  ;;  %v5028_v44 = vpop.f32.mrf.mxu0  ;;  %5297 = vmatprep.mubr.f32.mxu0 %v12770_v0 }
 0x3ee   : > { %v11248_v18 = vadd.f32 %v4722_v12, %v10693_v29  ;;  %4466 = vmatprep.mubr.f32.mxu1 %v12770_v0 }
 0x3ef   : > { %v4723_v42 = vsel %vm2498_vm3, %v4720_v20, %v4722_v12  ;;  %v4200_v33 = vpop.f32.mrf.mxu1  ;;  %v5029_v22 = vpop.f32.mrf.mxu0  ;;  %v4721_v17 = vsel %vm2498_vm3, %v4719_v11, %v4720_v20  ;;  %v8501_v20 = vld [vmem:[%s8756_s11 + $0x210] sm:$0xff] }
 0x3f0   : > { %v11255_v10 = vadd.f32 %v4723_v42, %v10695_v1  ;;  %v4530_v55 = vrot.slane %v4200_v33, 2  ;;  %v11258_v57 = vadd.f32 %v4721_v17, %v10685_v25  ;;  %8104 = vmatmul.mubr.msk.f32.gmra.mxu0 %vm286_vm0, %v8500_v52 }
 0x3f1   : > { %v4204_v29 = vpop.f32.mrf.mxu1  ;;  %8030 = vmatmul.mubr.msk.f32.gmra.mxu1 %vm286_vm0, %v8500_v52  ;;  %v5032_v15 = vpop.f32.mrf.mxu0  ;;  %5302 = vmatprep.mubr.f32.mxu0 %v12770_v0 }
 0x3f2   : > { %v4626_v41 = vadd.f32 %v4530_v55, %v4193_v7  ;;  %4470 = vmatprep.mubr.f32.mxu1 %v12770_v0 }
 0x3f3   : > { %v4206_v35 = vpop.f32.mrf.mxu1  ;;  %v5033_v12 = vpop.f32.mrf.mxu0 }
 0x3f4   : > { %v4531_v1 = vrot.slane %v4206_v35, 2  ;;  %8105 = vmatmul.mubr.msk.f32.gmra.mxu0 %vm286_vm0, %v8501_v20  ;;  %v4724_v17 = vrot.slane %v4626_v41, 4  ;;  %v8502_v35 = vld [vmem:[%s8756_s11 + $0x218] sm:$0xff] }
 0x3f5   : > { %v4210_v11 = vpop.f32.mrf.mxu1  ;;  %8031 = vmatmul.mubr.msk.f32.gmra.mxu1 %vm286_vm0, %v8501_v20  ;;  %v11267_v25 = vpop.f32.mrf.mxu0  ;;  %5307 = vmatprep.mubr.f32.mxu0 %v12770_v0 }
 0x3f6   : > { %v4532_v26 = vsel %vm1661_vm2, %v4530_v55, %v4531_v1  ;;  %v4628_v44 = vadd.f32 %v4531_v1, %v4204_v29  ;;  %4474 = vmatprep.mubr.f32.mxu1 %v12770_v0 }
 0x3f7   : > { %v4627_v7 = vadd.f32 %v4532_v26, %v4198_v23  ;;  %v4212_v42 = vpop.f32.mrf.mxu1  ;;  %v5038_v33 = vpop.f32.mrf.mxu0 }
 0x3f8   : > { %v4727_v22 = vrot.slane %v4628_v44, 4  ;;  %8106 = vmatmul.mubr.msk.f32.gmra.mxu0 %vm286_vm0, %v8502_v35 }
 0x3f9   : > { %v4725_v52 = vrot.slane %v4627_v7, 4  ;;  %v4215_v15 = vpop.f32.mrf.mxu1  ;;  %8032 = vmatmul.mubr.msk.f32.gmra.mxu1 %vm286_vm0, %v8502_v35  ;;  %v11275_v12 = vpop.f32.mrf.mxu0  ;;  %5312 = vmatprep.mubr.f32.mxu0 %v12770_v0  ;;  %v8503_v7 = vld [vmem:[%s8756_s11 + $0x220] sm:$0xff] }
 0x3fa   : > { %v11279_v55 = vadd.f32 %v4727_v22, %v10720_v27  ;;  %4478 = vmatprep.mubr.f32.mxu1 %v12770_v0 }
 0x3fb   : > { %v4728_v23 = vsel %vm2498_vm3, %v4725_v52, %v4727_v22  ;;  %v4217_v29 = vpop.f32.mrf.mxu1  ;;  %v5043_v41 = vpop.f32.mrf.mxu0  ;;  %v4726_v1 = vsel %vm2498_vm3, %v4724_v17, %v4725_v52 }
 0x3fc   : > { %v11286_v20 = vadd.f32 %v4728_v23, %v10722_v39  ;;  %v4533_v26 = vrot.slane %v4217_v29, 2  ;;  %v11289_v44 = vadd.f32 %v4726_v1, %v10712_v37  ;;  %8107 = vmatmul.mubr.msk.f32.gmra.mxu0 %vm286_vm0, %v8503_v7  ;;  %v8504_v37 = vld [vmem:[%s8756_s11 + $0x228] sm:$0xff] }
 0x3fd   : > { %v4221_v27 = vpop.f32.mrf.mxu1  ;;  %8033 = vmatmul.mubr.msk.f32.gmra.mxu1 %vm286_vm0, %v8503_v7  ;;  %v11293_v42 = vpop.f32.mrf.mxu0  ;;  %5316 = vmatprep.mubr.f32.mxu0 %v12770_v0 }
 0x3fe   : > { %v4629_v33 = vadd.f32 %v4533_v26, %v4210_v11  ;;  %4482 = vmatprep.mubr.f32.mxu1 %v12770_v0 }
 0x3ff   : > { %v4223_v22 = vpop.f32.mrf.mxu1  ;;  %v5048_v39 = vpop.f32.mrf.mxu0 }
 0x400   : > { %v4534_v17 = vrot.slane %v4223_v22, 2  ;;  %8108 = vmatmul.mubr.msk.f32.gmra.mxu0 %vm286_vm0, %v8504_v37  ;;  %v4729_v22 = vrot.slane %v4629_v33, 4 }
 0x401   : > { %v4227_v52 = vpop.f32.mrf.mxu1  ;;  %8034 = vmatmul.mubr.msk.f32.gmra.mxu1 %vm286_vm0, %v8504_v37  ;;  %v11300_v35 = vpop.f32.mrf.mxu0  ;;  %5321 = vmatprep.mubr.f32.mxu0 %v12770_v0 }
 0x402   : > { %v4535_v23 = vsel %vm1661_vm2, %v4533_v26, %v4534_v17  ;;  %v4631_v29 = vadd.f32 %v4534_v17, %v4221_v27  ;;  %4486 = vmatprep.mubr.f32.mxu1 %v12770_v0 }
 0x403   : > { %v4630_v11 = vadd.f32 %v4535_v23, %v4215_v15  ;;  %v4229_v41 = vpop.f32.mrf.mxu1  ;;  %v5053_v1 = vpop.f32.mrf.mxu0 }
 0x404   : > { %v4732_v7 = vrot.slane %v4631_v29, 4  ;;  %8109 = vmatmul.mubr.msk.f32.gmra.mxu0 %vm286_vm0, %v8505_v38  ;;  %v8506_v29 = vld [vmem:[%s8756_s11 + $0x238] sm:$0xff] }
 0x405   : > { %v4730_v39 = vrot.slane %v4630_v11, 4  ;;  %v4232_v24 = vpop.f32.mrf.mxu1  ;;  %8035 = vmatmul.mubr.msk.f32.gmra.mxu1 %vm286_vm0, %v8505_v38  ;;  %v11308_v6 = vpop.f32.mrf.mxu0  ;;  %5326 = vmatprep.mubr.f32.mxu0 %v12770_v0 }
 0x406   : > { %v11312_v26 = vadd.f32 %v4732_v7, %v10747_v31  ;;  %4490 = vmatprep.mubr.f32.mxu1 %v12770_v0 }
 0x407   : > { %v4733_v15 = vsel %vm2498_vm3, %v4730_v39, %v4732_v7  ;;  %v4234_v27 = vpop.f32.mrf.mxu1  ;;  %v5058_v33 = vpop.f32.mrf.mxu0  ;;  %v4731_v17 = vsel %vm2498_vm3, %v4729_v22, %v4730_v39 }
 0x408   : > { %v11319_v37 = vadd.f32 %v4733_v15, %v10749_v40  ;;  %v4536_v23 = vrot.slane %v4234_v27, 2  ;;  %v11322_v38 = vadd.f32 %v4731_v17, %v10739_v63  ;;  %8110 = vmatmul.mubr.msk.f32.gmra.mxu0 %vm286_vm0, %v8506_v29  ;;  %v8507_v63 = vld [vmem:[%s8756_s11] sm:$0xff] }
 0x409   : > { %v4238_v31 = vpop.f32.mrf.mxu1  ;;  %8036 = vmatmul.mubr.msk.f32.gmra.mxu1 %vm286_vm0, %v8506_v29  ;;  %v11326_v11 = vpop.f32.mrf.mxu0  ;;  %6346 = vmatprep.mubr.f32.mxu0 %v12770_v0 }
 0x40a   : > { %v4632_v41 = vadd.f32 %v4536_v23, %v4227_v52  ;;  %5622 = vmatprep.mubr.f32.mxu1 %v12770_v0 }
 0x40b   : > { %v4240_v40 = vpop.f32.mrf.mxu1  ;;  %v5063_v1 = vpop.f32.mrf.mxu0 }
 0x40c   : > { %v4537_v7 = vrot.slane %v4240_v40, 2  ;;  %8187 = vmatmul.mubr.msk.f32.vlgmr.msra.gmra.mxu0 %vm286_vm0, %v8507_v63  ;;  %v4734_v1 = vrot.slane %v4632_v41, 4 }
 0x40d   : > { %v4244_v22 = vpop.f32.mrf.mxu1  ;;  %v11331_v39 = vpop.f32.mrf.mxu0  ;;  %8113 = vmatmul.mubr.msk.f32.vlgmr.msra.gmra.mxu1 %vm286_vm0, %v8507_v63  ;;  %6350 = vmatprep.mubr.f32.mxu0 %v12770_v0 }
 0x40e   : > { %v4538_v15 = vsel %vm1661_vm2, %v4536_v23, %v4537_v7  ;;  %v4634_v27 = vadd.f32 %v4537_v7, %v4238_v31  ;;  %5626 = vmatprep.mubr.f32.mxu1 %v12770_v0 }
 0x40f   : > { %v4633_v52 = vadd.f32 %v4538_v15, %v4232_v24  ;;  %v4246_v33 = vpop.f32.mrf.mxu1  ;;  %v5068_v17 = vpop.f32.mrf.mxu0 }
 0x410   : > { %v4737_v29 = vrot.slane %v4634_v27, 4  ;;  %v5363_v40 = vrot.slane %v5068_v17, 6  ;;  %8188 = vmatmul.mubr.msk.f32.gmra.mxu0 %vm286_vm0, %v8508_v60  ;;  %v8509_v33 = vld [vmem:[%s8756_s11 + $0x10] sm:$0xff] }
 0x411   : > { %v4735_v43 = vrot.slane %v4633_v52, 4  ;;  %v4249_v32 = vpop.f32.mrf.mxu1  ;;  %v11339_v48 = vpop.f32.mrf.mxu0  ;;  %8114 = vmatmul.mubr.msk.f32.gmra.mxu1 %vm286_vm0, %v8508_v60  ;;  %6354 = vmatprep.mubr.f32.mxu0 %v12770_v0 }
 0x412   : > { %v11345_v23 = vadd.f32 %v4737_v29, %v10780_v36  ;;  %v5459_v24 = vadd.f32 %v5363_v40, %v11267_v25  ;;  %5630 = vmatprep.mubr.f32.mxu1 %v12770_v0 }
 0x413   : > { %v4738_v31 = vsel %vm2498_vm3, %v4735_v43, %v4737_v29  ;;  %v4251_v41 = vpop.f32.mrf.mxu1  ;;  %v5074_v7 = vpop.f32.mrf.mxu0  ;;  %v4736_v63 = vsel %vm2498_vm3, %v4734_v1, %v4735_v43 }
 0x414   : > { %v11353_v15 = vadd.f32 %v4738_v31, %v10782_v62  ;;  %v11356_v60 = vadd.f32 %v5459_v24, %v11258_v57  ;;  %v4539_v36 = vrot.slane %v4251_v41, 2  ;;  %v5364_v27 = vrot.slane %v5074_v7, 6  ;;  %8189 = vmatmul.mubr.msk.f32.gmra.mxu0 %vm286_vm0, %v8509_v33 }
 0x415   : > { %v4255_v52 = vpop.f32.mrf.mxu1  ;;  %v11358_v25 = vpop.f32.mrf.mxu0  ;;  %8115 = vmatmul.mubr.msk.f32.gmra.mxu1 %vm286_vm0, %v8509_v33  ;;  %v11364_v17 = vadd.f32 %v4736_v63, %v10772_v13  ;;  %6358 = vmatprep.mubr.f32.mxu0 %v12770_v0 }
 0x416   : > { %12840 = vst [vmem:[#allocation17_spill] sm:$0xff] %v11356_v60  ;;  %v4635_v43 = vadd.f32 %v4539_v36, %v4244_v22  ;;  %v5365_v62 = vsel %vm968_vm1, %v5363_v40, %v5364_v27  ;;  %v5461_v57 = vadd.f32 %v5364_v27, %v11293_v42  ;;  %5634 = vmatprep.mubr.f32.mxu1 %v12770_v0  ;;  %v8510_v22 = vld [vmem:[%s8756_s11 + $0x18] sm:$0xff] }
 0x417   : > { %v5460_v29 = vadd.f32 %v5365_v62, %v11275_v12  ;;  %v4257_v1 = vpop.f32.mrf.mxu1  ;;  %v5080_v24 = vpop.f32.mrf.mxu0 }
 0x418   : > { %v4540_v31 = vrot.slane %v4257_v1, 2  ;;  %v11372_v41 = vadd.f32 %v5461_v57, %v11248_v18  ;;  %8190 = vmatmul.mubr.msk.f32.gmra.mxu0 %vm286_vm0, %v8510_v22  ;;  %v4739_v57 = vrot.slane %v4635_v43, 4 }
 0x419   : > { %v4261_v7 = vpop.f32.mrf.mxu1  ;;  %v11374_v13 = vpop.f32.mrf.mxu0  ;;  %8116 = vmatmul.mubr.msk.f32.gmra.mxu1 %vm286_vm0, %v8510_v22  ;;  %v11380_v42 = vadd.f32 %v5460_v29, %v11255_v10  ;;  %6362 = vmatprep.mubr.f32.mxu0 %v12770_v0  ;;  %v8511_v22 = vld [vmem:[%s8756_s11 + $0x20] sm:$0xff] }
 0x41a   : > { %v4541_v12 = vsel %vm1661_vm2, %v4539_v36, %v4540_v31  ;;  %v4637_v40 = vadd.f32 %v4540_v31, %v4255_v52  ;;  %5638 = vmatprep.mubr.f32.mxu1 %v12770_v0 }
 0x41b   : > { %v4636_v18 = vadd.f32 %v4541_v12, %v4249_v32  ;;  %v4263_v63 = vpop.f32.mrf.mxu1  ;;  %v5085_v27 = vpop.f32.mrf.mxu0 }
 0x41c   : > { %v4742_v33 = vrot.slane %v4637_v40, 4  ;;  %v5366_v62 = vrot.slane %v5085_v27, 6  ;;  %8191 = vmatmul.mubr.msk.f32.gmra.mxu0 %vm286_vm0, %v8511_v22  ;;  %v8512_v63 = vld [vmem:[%s8756_s11 + $0x28] sm:$0xff] }
 0x41d   : > { %v4740_v1 = vrot.slane %v4636_v18, 4  ;;  %v4266_v24 = vpop.f32.mrf.mxu1  ;;  %v11385_v60 = vpop.f32.mrf.mxu0  ;;  %8117 = vmatmul.mubr.msk.f32.gmra.mxu1 %vm286_vm0, %v8511_v22  ;;  %6366 = vmatprep.mubr.f32.mxu0 %v12770_v0 }
 0x41e   : > { %v11391_v10 = vadd.f32 %v4742_v33, %v10807_v45  ;;  %v5462_v32 = vadd.f32 %v5366_v62, %v11300_v35  ;;  %5642 = vmatprep.mubr.f32.mxu1 %v12770_v0 }
 0x41f   : > { %v4743_v36 = vsel %vm2498_vm3, %v4740_v1, %v4742_v33  ;;  %v4268_v52 = vpop.f32.mrf.mxu1  ;;  %v5091_v43 = vpop.f32.mrf.mxu0  ;;  %v4741_v29 = vsel %vm2498_vm3, %v4739_v57, %v4740_v1 }
 0x420   : > { %v11399_v31 = vadd.f32 %v4743_v36, %v10809_v58  ;;  %v11402_v12 = vadd.f32 %v5462_v32, %v11289_v44  ;;  %v4542_v45 = vrot.slane %v4268_v52, 2  ;;  %v5367_v40 = vrot.slane %v5091_v43, 6  ;;  %8192 = vmatmul.mubr.msk.f32.gmra.mxu0 %vm286_vm0, %v8512_v63 }
 0x421   : > { %v4272_v18 = vpop.f32.mrf.mxu1  ;;  %v11404_v35 = vpop.f32.mrf.mxu0  ;;  %8118 = vmatmul.mubr.msk.f32.gmra.mxu1 %vm286_vm0, %v8512_v63  ;;  %v11410_v27 = vadd.f32 %v4741_v29, %v10799_v3  ;;  %6370 = vmatprep.mubr.f32.mxu0 %v12770_v0 }
 0x422   : > { %v4638_v33 = vadd.f32 %v4542_v45, %v4261_v7  ;;  %v5368_v58 = vsel %vm968_vm1, %v5366_v62, %v5367_v40  ;;  %v5464_v44 = vadd.f32 %v5367_v40, %v11326_v11  ;;  %5646 = vmatprep.mubr.f32.mxu1 %v12770_v0  ;;  %v8513_v7 = vld [vmem:[%s8756_s11 + $0x30] sm:$0xff] }
 0x423   : > { %v5463_v57 = vadd.f32 %v5368_v58, %v11308_v6  ;;  %v4274_v1 = vpop.f32.mrf.mxu1  ;;  %v5097_v22 = vpop.f32.mrf.mxu0 }
 0x424   : > { %v4543_v32 = vrot.slane %v4274_v1, 2  ;;  %v11418_v36 = vadd.f32 %v5464_v44, %v11279_v55  ;;  %8193 = vmatmul.mubr.msk.f32.gmra.mxu0 %vm286_vm0, %v8513_v7  ;;  %v4744_v58 = vrot.slane %v4638_v33, 4 }
 0x425   : > { %v4278_v52 = vpop.f32.mrf.mxu1  ;;  %v11420_v3 = vpop.f32.mrf.mxu0  ;;  %8119 = vmatmul.mubr.msk.f32.gmra.mxu1 %vm286_vm0, %v8513_v7  ;;  %v11426_v11 = vadd.f32 %v5463_v57, %v11286_v20  ;;  %6374 = vmatprep.mubr.f32.mxu0 %v12770_v0  ;;  %v8514_v7 = vld [vmem:[%s8756_s11 + $0x38] sm:$0xff] }
 0x426   : > { %v4544_v6 = vsel %vm1661_vm2, %v4542_v45, %v4543_v32  ;;  %v4640_v62 = vadd.f32 %v4543_v32, %v4272_v18  ;;  %5650 = vmatprep.mubr.f32.mxu1 %v12770_v0 }
 0x427   : > { %v4639_v55 = vadd.f32 %v4544_v6, %v4266_v24  ;;  %v4280_v43 = vpop.f32.mrf.mxu1  ;;  %v5102_v29 = vpop.f32.mrf.mxu0 }
 0x428   : > { %v4747_v40 = vrot.slane %v4640_v62, 4  ;;  %v5369_v63 = vrot.slane %v5102_v29, 6  ;;  %8194 = vmatmul.mubr.msk.f32.gmra.mxu0 %vm286_vm0, %v8514_v7  ;;  %v8515_v43 = vld [vmem:[%s8756_s11 + $0x40] sm:$0xff] }
 0x429   : > { %v4745_v44 = vrot.slane %v4639_v55, 4  ;;  %v4283_v1 = vpop.f32.mrf.mxu1  ;;  %v11431_v22 = vpop.f32.mrf.mxu0  ;;  %8120 = vmatmul.mubr.msk.f32.gmra.mxu1 %vm286_vm0, %v8514_v7  ;;  %6378 = vmatprep.mubr.f32.mxu0 %v12770_v0 }
 0x42a   : > { %v11437_v20 = vadd.f32 %v4747_v40, %v10834_v46  ;;  %v5465_v24 = vadd.f32 %v5369_v63, %v11331_v39  ;;  %5654 = vmatprep.mubr.f32.mxu1 %v12770_v0 }
 0x42b   : > { %v4748_v45 = vsel %vm2498_vm3, %v4745_v44, %v4747_v40  ;;  %v4285_v18 = vpop.f32.mrf.mxu1  ;;  %v5108_v33 = vpop.f32.mrf.mxu0  ;;  %v4746_v57 = vsel %vm2498_vm3, %v4744_v58, %v4745_v44 }
 0x42c   : > { %v11445_v32 = vadd.f32 %v4748_v45, %v10836_v53  ;;  %v11448_v6 = vadd.f32 %v5465_v24, %v11322_v38  ;;  %v4545_v46 = vrot.slane %v4285_v18, 2  ;;  %v5370_v62 = vrot.slane %v5108_v33, 6  ;;  %8195 = vmatmul.mubr.msk.f32.gmra.mxu0 %vm286_vm0, %v8515_v43 }
 0x42d   : > { %v4289_v55 = vpop.f32.mrf.mxu1  ;;  %v11450_v39 = vpop.f32.mrf.mxu0  ;;  %8121 = vmatmul.mubr.msk.f32.gmra.mxu1 %vm286_vm0, %v8515_v43  ;;  %v11456_v29 = vadd.f32 %v4746_v57, %v10826_v9  ;;  %6382 = vmatprep.mubr.f32.mxu0 %v12770_v0 }
 0x42e   : > { %v4641_v40 = vadd.f32 %v4545_v46, %v4278_v52  ;;  %v5371_v53 = vsel %vm968_vm1, %v5369_v63, %v5370_v62  ;;  %v5467_v38 = vadd.f32 %v5370_v62, %v11358_v25  ;;  %5658 = vmatprep.mubr.f32.mxu1 %v12770_v0  ;;  %v8516_v52 = vld [vmem:[%s8756_s11 + $0x48] sm:$0xff] }
 0x42f   : > { %v5466_v58 = vadd.f32 %v5371_v53, %v11339_v48  ;;  %v4291_v44 = vpop.f32.mrf.mxu1  ;;  %v5114_v7 = vpop.f32.mrf.mxu0 }
 0x430   : > { %v4546_v24 = vrot.slane %v4291_v44, 2  ;;  %v11464_v45 = vadd.f32 %v5467_v38, %v11312_v26  ;;  %8196 = vmatmul.mubr.msk.f32.gmra.mxu0 %vm286_vm0, %v8516_v52  ;;  %v4749_v53 = vrot.slane %v4641_v40, 4 }
 0x431   : > { %v4295_v18 = vpop.f32.mrf.mxu1  ;;  %v11466_v9 = vpop.f32.mrf.mxu0  ;;  %8122 = vmatmul.mubr.msk.f32.gmra.mxu1 %vm286_vm0, %v8516_v52  ;;  %v11472_v25 = vadd.f32 %v5466_v58, %v11319_v37  ;;  %6386 = vmatprep.mubr.f32.mxu0 %v12770_v0  ;;  %v8517_v52 = vld [vmem:[%s8756_s11 + $0x50] sm:$0xff] }
 0x432   : > { %v4547_v48 = vsel %vm1661_vm2, %v4545_v46, %v4546_v24  ;;  %v4643_v63 = vadd.f32 %v4546_v24, %v4289_v55  ;;  %5662 = vmatprep.mubr.f32.mxu1 %v12770_v0 }
 0x433   : > { %v4642_v26 = vadd.f32 %v4547_v48, %v4283_v1  ;;  %v4297_v33 = vpop.f32.mrf.mxu1  ;;  %v5119_v57 = vpop.f32.mrf.mxu0 }
 0x434   : > { %v4752_v62 = vrot.slane %v4643_v63, 4  ;;  %v5372_v43 = vrot.slane %v5119_v57, 6  ;;  %8197 = vmatmul.mubr.msk.f32.gmra.mxu0 %vm286_vm0, %v8517_v52  ;;  %v8518_v33 = vld [vmem:[%s8756_s11 + $0x58] sm:$0xff] }
 0x435   : > { %v4750_v38 = vrot.slane %v4642_v26, 4  ;;  %v4300_v44 = vpop.f32.mrf.mxu1  ;;  %v11477_v7 = vpop.f32.mrf.mxu0  ;;  %8123 = vmatmul.mubr.msk.f32.gmra.mxu1 %vm286_vm0, %v8517_v52  ;;  %6390 = vmatprep.mubr.f32.mxu0 %v12770_v0 }
 0x436   : > { %v11483_v37 = vadd.f32 %v4752_v62, %v10861_v5  ;;  %v5468_v1 = vadd.f32 %v5372_v43, %v11374_v13  ;;  %5666 = vmatprep.mubr.f32.mxu1 %v12770_v0 }
 0x437   : > { %v4753_v46 = vsel %vm2498_vm3, %v4750_v38, %v4752_v62  ;;  %v4302_v55 = vpop.f32.mrf.mxu1  ;;  %v5125_v40 = vpop.f32.mrf.mxu0  ;;  %v4751_v58 = vsel %vm2498_vm3, %v4749_v53, %v4750_v38 }
 0x438   : > { %v11491_v24 = vadd.f32 %v4753_v46, %v10863_v21  ;;  %v11494_v48 = vadd.f32 %v5468_v1, %v11364_v17  ;;  %v4548_v5 = vrot.slane %v4302_v55, 2  ;;  %v5373_v63 = vrot.slane %v5125_v40, 6  ;;  %8198 = vmatmul.mubr.msk.f32.gmra.mxu0 %vm286_vm0, %v8518_v33 }
 0x439   : > { %v4306_v26 = vpop.f32.mrf.mxu1  ;;  %v11496_v13 = vpop.f32.mrf.mxu0  ;;  %8124 = vmatmul.mubr.msk.f32.gmra.mxu1 %vm286_vm0, %v8518_v33  ;;  %v11502_v57 = vadd.f32 %v4751_v58, %v10853_v28  ;;  %6394 = vmatprep.mubr.f32.mxu0 %v12770_v0 }
 0x43a   : > { %v4644_v62 = vadd.f32 %v4548_v5, %v4295_v18  ;;  %v5374_v21 = vsel %vm968_vm1, %v5372_v43, %v5373_v63  ;;  %v5470_v17 = vadd.f32 %v5373_v63, %v11404_v35  ;;  %5670 = vmatprep.mubr.f32.mxu1 %v12770_v0  ;;  %v8519_v18 = vld [vmem:[%s8756_s11 + $0x60] sm:$0xff] }
 0x43b   : > { %v5469_v53 = vadd.f32 %v5374_v21, %v11385_v60  ;;  %v4308_v38 = vpop.f32.mrf.mxu1  ;;  %v5131_v52 = vpop.f32.mrf.mxu0 }
 0x43c   : > { %v4549_v1 = vrot.slane %v4308_v38, 2  ;;  %v11510_v46 = vadd.f32 %v5470_v17, %v11345_v23  ;;  %8199 = vmatmul.mubr.msk.f32.gmra.mxu0 %vm286_vm0, %v8519_v18  ;;  %v4754_v21 = vrot.slane %v4644_v62, 4 }
 0x43d   : > { %v4312_v55 = vpop.f32.mrf.mxu1  ;;  %v11512_v28 = vpop.f32.mrf.mxu0  ;;  %8125 = vmatmul.mubr.msk.f32.gmra.mxu1 %vm286_vm0, %v8519_v18  ;;  %v11518_v35 = vadd.f32 %v5469_v53, %v11353_v15  ;;  %6398 = vmatprep.mubr.f32.mxu0 %v12770_v0  ;;  %v8520_v18 = vld [vmem:[%s8756_s11 + $0x68] sm:$0xff] }
 0x43e   : > { %v4550_v60 = vsel %vm1661_vm2, %v4548_v5, %v4549_v1  ;;  %v4646_v43 = vadd.f32 %v4549_v1, %v4306_v26  ;;  %5674 = vmatprep.mubr.f32.mxu1 %v12770_v0 }
 0x43f   : > { %v4645_v23 = vadd.f32 %v4550_v60, %v4300_v44  ;;  %v4314_v40 = vpop.f32.mrf.mxu1  ;;  %v5136_v58 = vpop.f32.mrf.mxu0 }
 0x440   : > { %v4757_v63 = vrot.slane %v4646_v43, 4  ;;  %v5375_v33 = vrot.slane %v5136_v58, 6  ;;  %8200 = vmatmul.mubr.msk.f32.gmra.mxu0 %vm286_vm0, %v8520_v18  ;;  %v8521_v40 = vld [vmem:[%s8756_s11 + $0x70] sm:$0xff] }
 0x441   : > { %v4755_v17 = vrot.slane %v4645_v23, 4  ;;  %v4317_v38 = vpop.f32.mrf.mxu1  ;;  %v11523_v52 = vpop.f32.mrf.mxu0  ;;  %8126 = vmatmul.mubr.msk.f32.gmra.mxu1 %vm286_vm0, %v8520_v18  ;;  %6402 = vmatprep.mubr.f32.mxu0 %v12770_v0 }
 0x442   : > { %v11529_v15 = vadd.f32 %v4757_v63, %v10888_v4  ;;  %v5471_v44 = vadd.f32 %v5375_v33, %v11420_v3  ;;  %5678 = vmatprep.mubr.f32.mxu1 %v12770_v0 }
 0x443   : > { %v4758_v5 = vsel %vm2498_vm3, %v4755_v17, %v4757_v63  ;;  %v4319_v26 = vpop.f32.mrf.mxu1  ;;  %v5142_v62 = vpop.f32.mrf.mxu0  ;;  %v4756_v53 = vsel %vm2498_vm3, %v4754_v21, %v4755_v17 }
 0x444   : > { %v11537_v1 = vadd.f32 %v4758_v5, %v10890_v51  ;;  %v11540_v60 = vadd.f32 %v5471_v44, %v11410_v27  ;;  %v4551_v4 = vrot.slane %v4319_v26, 2  ;;  %v5376_v43 = vrot.slane %v5142_v62, 6  ;;  %8201 = vmatmul.mubr.msk.f32.gmra.mxu0 %vm286_vm0, %v8521_v40 }
 0x445   : > { %v4323_v23 = vpop.f32.mrf.mxu1  ;;  %v11542_v3 = vpop.f32.mrf.mxu0  ;;  %8127 = vmatmul.mubr.msk.f32.gmra.mxu1 %vm286_vm0, %v8521_v40  ;;  %v11548_v58 = vadd.f32 %v4756_v53, %v10880_v19  ;;  %6406 = vmatprep.mubr.f32.mxu0 %v12770_v0 }
 0x446   : > { %v4647_v63 = vadd.f32 %v4551_v4, %v4312_v55  ;;  %v5377_v51 = vsel %vm968_vm1, %v5375_v33, %v5376_v43  ;;  %v5473_v27 = vadd.f32 %v5376_v43, %v11450_v39  ;;  %5682 = vmatprep.mubr.f32.mxu1 %v12770_v0  ;;  %v8522_v55 = vld [vmem:[%s8756_s11 + $0x78] sm:$0xff] }
 0x447   : > { %v5472_v21 = vadd.f32 %v5377_v51, %v11431_v22  ;;  %v4325_v17 = vpop.f32.mrf.mxu1  ;;  %v5148_v18 = vpop.f32.mrf.mxu0 }
 0x448   : > { %v4552_v44 = vrot.slane %v4325_v17, 2  ;;  %v11556_v5 = vadd.f32 %v5473_v27, %v11391_v10  ;;  %8202 = vmatmul.mubr.msk.f32.gmra.mxu0 %vm286_vm0, %v8522_v55  ;;  %v4759_v51 = vrot.slane %v4647_v63, 4 }
 0x449   : > { %v4329_v26 = vpop.f32.mrf.mxu1  ;;  %v11558_v19 = vpop.f32.mrf.mxu0  ;;  %8128 = vmatmul.mubr.msk.f32.gmra.mxu1 %vm286_vm0, %v8522_v55  ;;  %v11564_v39 = vadd.f32 %v5472_v21, %v11399_v31  ;;  %6410 = vmatprep.mubr.f32.mxu0 %v12770_v0  ;;  %v8523_v55 = vld [vmem:[%s8756_s11 + $0x80] sm:$0xff] }
 0x44a   : > { %v4553_v22 = vsel %vm1661_vm2, %v4551_v4, %v4552_v44  ;;  %v4649_v33 = vadd.f32 %v4552_v44, %v4323_v23  ;;  %5686 = vmatprep.mubr.f32.mxu1 %v12770_v0 }
 0x44b   : > { %v4648_v10 = vadd.f32 %v4553_v22, %v4317_v38  ;;  %v4331_v62 = vpop.f32.mrf.mxu1  ;;  %v5153_v53 = vpop.f32.mrf.mxu0 }
 0x44c   : > { %v4762_v43 = vrot.slane %v4649_v33, 4  ;;  %v5378_v40 = vrot.slane %v5153_v53, 6  ;;  %8203 = vmatmul.mubr.msk.f32.gmra.mxu0 %vm286_vm0, %v8523_v55  ;;  %v8524_v62 = vld [vmem:[%s8756_s11 + $0x88] sm:$0xff] }
 0x44d   : > { %v4760_v27 = vrot.slane %v4648_v10, 4  ;;  %v4334_v17 = vpop.f32.mrf.mxu1  ;;  %v11569_v18 = vpop.f32.mrf.mxu0  ;;  %8129 = vmatmul.mubr.msk.f32.gmra.mxu1 %vm286_vm0, %v8523_v55  ;;  %6414 = vmatprep.mubr.f32.mxu0 %v12770_v0 }
 0x44e   : > { %v11575_v31 = vadd.f32 %v4762_v43, %v10915_v14  ;;  %v5474_v38 = vadd.f32 %v5378_v40, %v11466_v9  ;;  %5690 = vmatprep.mubr.f32.mxu1 %v12770_v0 }
 0x44f   : > { %v4763_v4 = vsel %vm2498_vm3, %v4760_v27, %v4762_v43  ;;  %v4336_v23 = vpop.f32.mrf.mxu1  ;;  %v5159_v63 = vpop.f32.mrf.mxu0  ;;  %v4761_v21 = vsel %vm2498_vm3, %v4759_v51, %v4760_v27 }
 0x450   : > { %v11583_v44 = vadd.f32 %v4763_v4, %v10917_v30  ;;  %v11586_v22 = vadd.f32 %v5474_v38, %v11456_v29  ;;  %v4554_v14 = vrot.slane %v4336_v23, 2  ;;  %v5379_v33 = vrot.slane %v5159_v63, 6  ;;  %8204 = vmatmul.mubr.msk.f32.gmra.mxu0 %vm286_vm0, %v8524_v62 }
 0x451   : > { %v4340_v10 = vpop.f32.mrf.mxu1  ;;  %v11588_v9 = vpop.f32.mrf.mxu0  ;;  %8130 = vmatmul.mubr.msk.f32.gmra.mxu1 %vm286_vm0, %v8524_v62  ;;  %v11594_v53 = vadd.f32 %v4761_v21, %v10907_v47  ;;  %6418 = vmatprep.mubr.f32.mxu0 %v12770_v0 }
 0x452   : > { %v4650_v43 = vadd.f32 %v4554_v14, %v4329_v26  ;;  %v5380_v30 = vsel %vm968_vm1, %v5378_v40, %v5379_v33  ;;  %v5476_v29 = vadd.f32 %v5379_v33, %v11496_v13  ;;  %5694 = vmatprep.mubr.f32.mxu1 %v12770_v0  ;;  %v8525_v26 = vld [vmem:[%s8756_s11 + $0x90] sm:$0xff] }
 0x453   : > { %v5475_v51 = vadd.f32 %v5380_v30, %v11477_v7  ;;  %v4342_v27 = vpop.f32.mrf.mxu1  ;;  %v5165_v55 = vpop.f32.mrf.mxu0 }
 0x454   : > { %v4555_v38 = vrot.slane %v4342_v27, 2  ;;  %v11602_v4 = vadd.f32 %v5476_v29, %v11437_v20  ;;  %8205 = vmatmul.mubr.msk.f32.gmra.mxu0 %vm286_vm0, %v8525_v26  ;;  %v4764_v30 = vrot.slane %v4650_v43, 4 }
 0x455   : > { %v4346_v23 = vpop.f32.mrf.mxu1  ;;  %v11604_v47 = vpop.f32.mrf.mxu0  ;;  %8131 = vmatmul.mubr.msk.f32.gmra.mxu1 %vm286_vm0, %v8525_v26  ;;  %v11610_v13 = vadd.f32 %v5475_v51, %v11445_v32  ;;  %6423 = vmatprep.mubr.f32.mxu0 %v12770_v0  ;;  %v8526_v26 = vld [vmem:[%s8756_s11 + $0x98] sm:$0xff] }
 0x456   : > { %v4556_v7 = vsel %vm1661_vm2, %v4554_v14, %v4555_v38  ;;  %v4652_v40 = vadd.f32 %v4555_v38, %v4340_v10  ;;  %5699 = vmatprep.mubr.f32.mxu1 %v12770_v0 }
 0x457   : > { %v4651_v20 = vadd.f32 %v4556_v7, %v4334_v17  ;;  %v4348_v63 = vpop.f32.mrf.mxu1  ;;  %v5170_v21 = vpop.f32.mrf.mxu0 }
 0x458   : > { %v4767_v33 = vrot.slane %v4652_v40, 4  ;;  %v5381_v62 = vrot.slane %v5170_v21, 6  ;;  %8206 = vmatmul.mubr.msk.f32.gmra.mxu0 %vm286_vm0, %v8526_v26  ;;  %v8527_v63 = vld [vmem:[%s8756_s11 + $0xa0] sm:$0xff] }
 0x459   : > { %v4765_v29 = vrot.slane %v4651_v20, 4  ;;  %v4351_v27 = vpop.f32.mrf.mxu1  ;;  %v11615_v55 = vpop.f32.mrf.mxu0  ;;  %8132 = vmatmul.mubr.msk.f32.gmra.mxu1 %vm286_vm0, %v8526_v26  ;;  %6428 = vmatprep.mubr.f32.mxu0 %v12770_v0 }
 0x45a   : > { %v11621_v32 = vadd.f32 %v4767_v33, %v10942_v50  ;;  %v5477_v17 = vadd.f32 %v5381_v62, %v11512_v28  ;;  %5704 = vmatprep.mubr.f32.mxu1 %v12770_v0 }
 0x45b   : > { %v4768_v14 = vsel %vm2498_vm3, %v4765_v29, %v4767_v33  ;;  %v4353_v10 = vpop.f32.mrf.mxu1  ;;  %v5176_v43 = vpop.f32.mrf.mxu0  ;;  %v4766_v51 = vsel %vm2498_vm3, %v4764_v30, %v4765_v29 }
 0x45c   : > { %v11629_v38 = vadd.f32 %v4768_v14, %v10944_v2  ;;  %v11632_v7 = vadd.f32 %v5477_v17, %v11502_v57  ;;  %v4557_v50 = vrot.slane %v4353_v10, 2  ;;  %v5382_v40 = vrot.slane %v5176_v43, 6  ;;  %8207 = vmatmul.mubr.msk.f32.gmra.mxu0 %vm286_vm0, %v8527_v63 }
 0x45d   : > { %v4357_v20 = vpop.f32.mrf.mxu1  ;;  %v11634_v28 = vpop.f32.mrf.mxu0  ;;  %8133 = vmatmul.mubr.msk.f32.gmra.mxu1 %vm286_vm0, %v8527_v63  ;;  %v11640_v21 = vadd.f32 %v4766_v51, %v10934_v49  ;;  %6433 = vmatprep.mubr.f32.mxu0 %v12770_v0 }
 0x45e   : > { %v4653_v33 = vadd.f32 %v4557_v50, %v4346_v23  ;;  %v5383_v2 = vsel %vm968_vm1, %v5381_v62, %v5382_v40  ;;  %v5479_v57 = vadd.f32 %v5382_v40, %v11542_v3  ;;  %5709 = vmatprep.mubr.f32.mxu1 %v12770_v0  ;;  %v8528_v23 = vld [vmem:[%s8756_s11 + $0xa8] sm:$0xff] }
 0x45f   : > { %v5478_v30 = vadd.f32 %v5383_v2, %v11523_v52  ;;  %v4359_v29 = vpop.f32.mrf.mxu1  ;;  %v5182_v26 = vpop.f32.mrf.mxu0 }
 0x460   : > { %v4558_v17 = vrot.slane %v4359_v29, 2  ;;  %v11648_v14 = vadd.f32 %v5479_v57, %v11483_v37  ;;  %8208 = vmatmul.mubr.msk.f32.gmra.mxu0 %vm286_vm0, %v8528_v23  ;;  %v4769_v2 = vrot.slane %v4653_v33, 4 }
 0x461   : > { %v4363_v10 = vpop.f32.mrf.mxu1  ;;  %v11650_v49 = vpop.f32.mrf.mxu0  ;;  %8134 = vmatmul.mubr.msk.f32.gmra.mxu1 %vm286_vm0, %v8528_v23  ;;  %v11656_v3 = vadd.f32 %v5478_v30, %v11491_v24  ;;  %6438 = vmatprep.mubr.f32.mxu0 %v12770_v0  ;;  %v8529_v23 = vld [vmem:[%s8756_s11 + $0xb0] sm:$0xff] }
 0x462   : > { %v4559_v52 = vsel %vm1661_vm2, %v4557_v50, %v4558_v17  ;;  %v4655_v62 = vadd.f32 %v4558_v17, %v4357_v20  ;;  %5714 = vmatprep.mubr.f32.mxu1 %v12770_v0 }
 0x463   : > { %v4654_v37 = vadd.f32 %v4559_v52, %v4351_v27  ;;  %v4365_v43 = vpop.f32.mrf.mxu1  ;;  %v5187_v51 = vpop.f32.mrf.mxu0 }
 0x464   : > { %v4772_v40 = vrot.slane %v4655_v62, 4  ;;  %v5384_v63 = vrot.slane %v5187_v51, 6  ;;  %8209 = vmatmul.mubr.msk.f32.gmra.mxu0 %vm286_vm0, %v8529_v23  ;;  %v8530_v43 = vld [vmem:[%s8756_s11 + $0xb8] sm:$0xff] }
 0x465   : > { %v4770_v57 = vrot.slane %v4654_v37, 4  ;;  %v4368_v29 = vpop.f32.mrf.mxu1  ;;  %v11661_v26 = vpop.f32.mrf.mxu0  ;;  %8135 = vmatmul.mubr.msk.f32.gmra.mxu1 %vm286_vm0, %v8529_v23  ;;  %6443 = vmatprep.mubr.f32.mxu0 %v12770_v0 }
 0x466   : > { %v11667_v24 = vadd.f32 %v4772_v40, %v10969_v61  ;;  %v5480_v27 = vadd.f32 %v5384_v63, %v11558_v19  ;;  %5719 = vmatprep.mubr.f32.mxu1 %v12770_v0 }
 0x467   : > { %v4773_v50 = vsel %vm2498_vm3, %v4770_v57, %v4772_v40  ;;  %v4370_v20 = vpop.f32.mrf.mxu1  ;;  %v5193_v33 = vpop.f32.mrf.mxu0  ;;  %v4771_v30 = vsel %vm2498_vm3, %v4769_v2, %v4770_v57 }
 0x468   : > { %v11675_v17 = vadd.f32 %v4773_v50, %v10971_v59  ;;  %v11678_v52 = vadd.f32 %v5480_v27, %v11548_v58  ;;  %v4560_v61 = vrot.slane %v4370_v20, 2  ;;  %v5385_v62 = vrot.slane %v5193_v33, 6  ;;  %8210 = vmatmul.mubr.msk.f32.gmra.mxu0 %vm286_vm0, %v8530_v43 }
 0x469   : > { %v4374_v37 = vpop.f32.mrf.mxu1  ;;  %v11680_v19 = vpop.f32.mrf.mxu0  ;;  %8136 = vmatmul.mubr.msk.f32.gmra.mxu1 %vm286_vm0, %v8530_v43  ;;  %v11686_v51 = vadd.f32 %v4771_v30, %v10961_v16  ;;  %6448 = vmatprep.mubr.f32.mxu0 %v12770_v0 }
 0x46a   : > { %12841 = vst [vmem:[#allocation19_spill] sm:$0xff] %v11678_v52  ;;  %v4656_v40 = vadd.f32 %v4560_v61, %v4363_v10  ;;  %v5386_v59 = vsel %vm968_vm1, %v5384_v63, %v5385_v62  ;;  %v5482_v58 = vadd.f32 %v5385_v62, %v11588_v9  ;;  %5724 = vmatprep.mubr.f32.mxu1 %v12770_v0  ;;  %v8531_v10 = vld [vmem:[%s8756_s11 + $0xc0] sm:$0xff] }
 0x46b   : > { %v5481_v2 = vadd.f32 %v5386_v59, %v11569_v18  ;;  %v4376_v57 = vpop.f32.mrf.mxu1  ;;  %v5199_v23 = vpop.f32.mrf.mxu0 }
 0x46c   : > { %v4561_v27 = vrot.slane %v4376_v57, 2  ;;  %v11694_v50 = vadd.f32 %v5482_v58, %v11529_v15  ;;  %8211 = vmatmul.mubr.msk.f32.gmra.mxu0 %vm286_vm0, %v8531_v10  ;;  %v4774_v59 = vrot.slane %v4656_v40, 4 }
 0x46d   : > { %v4380_v20 = vpop.f32.mrf.mxu1  ;;  %v11696_v16 = vpop.f32.mrf.mxu0  ;;  %8137 = vmatmul.mubr.msk.f32.gmra.mxu1 %vm286_vm0, %v8531_v10  ;;  %v11702_v9 = vadd.f32 %v5481_v2, %v11537_v1  ;;  %6453 = vmatprep.mubr.f32.mxu0 %v12770_v0  ;;  %v8532_v10 = vld [vmem:[%s8756_s11 + $0xc8] sm:$0xff] }
 0x46e   : > { %v4562_v18 = vsel %vm1661_vm2, %v4560_v61, %v4561_v27  ;;  %v4658_v63 = vadd.f32 %v4561_v27, %v4374_v37  ;;  %5730 = vmatprep.mubr.f32.mxu1 %v12770_v0  ;;  %v12842_v1 = vld [vmem:[#allocation22_spill] sm:$0xff] }
 0x46f   : > { %v4657_v15 = vadd.f32 %v4562_v18, %v4368_v29  ;;  %v4382_v33 = vpop.f32.mrf.mxu1  ;;  %v5204_v30 = vpop.f32.mrf.mxu0  ;;  %v12843_v18 = vld [vmem:[#allocation8_spill] sm:$0xff] }
 0x470   : > { %v4777_v62 = vrot.slane %v4658_v63, 4  ;;  %v5387_v43 = vrot.slane %v5204_v30, 6  ;;  %8212 = vmatmul.mubr.msk.f32.gmra.mxu0 %vm286_vm0, %v8532_v10 }
 0x471   : > { %v4775_v58 = vrot.slane %v4657_v15, 4  ;;  %v4385_v57 = vpop.f32.mrf.mxu1  ;;  %v11707_v23 = vpop.f32.mrf.mxu0  ;;  %8138 = vmatmul.mubr.msk.f32.gmra.mxu1 %vm286_vm0, %v8532_v10  ;;  %6459 = vmatprep.mubr.f32.mxu0 %v12770_v0 }
 0x472   : > { %v11713_v61 = vadd.f32 %v4777_v62, %v12842_v1  ;;  %v5483_v29 = vadd.f32 %v5387_v43, %v11604_v47  ;;  %5736 = vmatprep.mubr.f32.mxu1 %v12770_v0  ;;  %v8533_v1 = vld [vmem:[%s8756_s11 + $0xd0] sm:$0xff] }
 0x473   : > { %v4778_v37 = vsel %vm2498_vm3, %v4775_v58, %v4777_v62  ;;  %v4387_v40 = vpop.f32.mrf.mxu1  ;;  %v5210_v2 = vpop.f32.mrf.mxu0  ;;  %v4776_v27 = vsel %vm2498_vm3, %v4774_v59, %v4775_v58  ;;  %v12845_v62 = vld [vmem:[#allocation6_spill] sm:$0xff] }
 0x474   : > { %v11721_v63 = vadd.f32 %v4778_v37, %v12843_v18  ;;  %v11724_v15 = vadd.f32 %v5483_v29, %v11594_v53  ;;  %v4563_v33 = vrot.slane %v4387_v40, 2  ;;  %v5388_v30 = vrot.slane %v5210_v2, 6  ;;  %8213 = vmatmul.mubr.msk.f32.gmra.mxu0 %vm286_vm0, %v8533_v1 }
 0x475   : > { %v4391_v10 = vpop.f32.mrf.mxu1  ;;  %v11726_v47 = vpop.f32.mrf.mxu0  ;;  %8139 = vmatmul.mubr.msk.f32.gmra.mxu1 %vm286_vm0, %v8533_v1  ;;  %v11732_v52 = vadd.f32 %v4776_v27, %v12845_v62  ;;  %6465 = vmatprep.mubr.f32.mxu0 %v12770_v0 }
 0x476   : > { %12844 = vst [vmem:[#allocation18_spill] sm:$0xff] %v11724_v15  ;;  %v4659_v59 = vadd.f32 %v4563_v33, %v4380_v20  ;;  %v5389_v58 = vsel %vm968_vm1, %v5387_v43, %v5388_v30  ;;  %v5485_v53 = vadd.f32 %v5388_v30, %v11634_v28  ;;  %5742 = vmatprep.mubr.f32.mxu1 %v12770_v0  ;;  %v8534_v20 = vld [vmem:[%s8756_s11 + $0xd8] sm:$0xff] }
 0x477   : > { %v5484_v29 = vadd.f32 %v5389_v58, %v11615_v55  ;;  %v4393_v37 = vpop.f32.mrf.mxu1  ;;  %v5216_v40 = vpop.f32.mrf.mxu0 }
 0x478   : > { %v4564_v2 = vrot.slane %v4393_v37, 2  ;;  %v11740_v18 = vadd.f32 %v5485_v53, %v11575_v31  ;;  %8214 = vmatmul.mubr.msk.f32.gmra.mxu0 %vm286_vm0, %v8534_v20  ;;  %v4779_v37 = vrot.slane %v4659_v59, 4 }
 0x479   : > { %v4397_v1 = vpop.f32.mrf.mxu1  ;;  %v11742_v27 = vpop.f32.mrf.mxu0  ;;  %8140 = vmatmul.mubr.msk.f32.gmra.mxu1 %vm286_vm0, %v8534_v20  ;;  %v11748_v28 = vadd.f32 %v5484_v29, %v11583_v44  ;;  %6470 = vmatprep.mubr.f32.mxu0 %v12770_v0  ;;  %v8535_v20 = vld [vmem:[%s8756_s11 + $0xe0] sm:$0xff] }
 0x47a   : > { %12846 = vst [vmem:[#allocation23_spill] sm:$0xff] %v11740_v18  ;;  %v4565_v55 = vsel %vm1661_vm2, %v4563_v33, %v4564_v2  ;;  %v4661_v43 = vadd.f32 %v4564_v2, %v4391_v10  ;;  %5748 = vmatprep.mubr.f32.mxu1 %v12770_v0 }
 0x47b   : > { %v4660_v31 = vadd.f32 %v4565_v55, %v4385_v57  ;;  %v4399_v30 = vpop.f32.mrf.mxu1  ;;  %v5221_v62 = vpop.f32.mrf.mxu0 }
 0x47c   : > { %v4782_v58 = vrot.slane %v4661_v43, 4  ;;  %v5390_v53 = vrot.slane %v5221_v62, 6  ;;  %8215 = vmatmul.mubr.msk.f32.gmra.mxu0 %vm286_vm0, %v8535_v20  ;;  %v8536_v30 = vld [vmem:[%s8756_s11 + $0xe8] sm:$0xff] }
 0x47d   : > { %v4780_v40 = vrot.slane %v4660_v31, 4  ;;  %v4402_v15 = vpop.f32.mrf.mxu1  ;;  %v11753_v18 = vpop.f32.mrf.mxu0  ;;  %8141 = vmatmul.mubr.msk.f32.gmra.mxu1 %vm286_vm0, %v8535_v20  ;;  %6476 = vmatprep.mubr.f32.mxu0 %v12770_v0  ;;  %v12848_v62 = vld [vmem:[#allocation10_spill] sm:$0xff] }
 0x47e   : > { %v11759_v44 = vadd.f32 %v4782_v58, %v11023_v8  ;;  %v5486_v57 = vadd.f32 %v5390_v53, %v11650_v49  ;;  %5754 = vmatprep.mubr.f32.mxu1 %v12770_v0 }
 0x47f   : > { %v4783_v33 = vsel %vm2498_vm3, %v4780_v40, %v4782_v58  ;;  %v4404_v10 = vpop.f32.mrf.mxu1  ;;  %v5227_v59 = vpop.f32.mrf.mxu0  ;;  %v4781_v29 = vsel %vm2498_vm3, %v4779_v37, %v4780_v40 }
 0x480   : > { %v11767_v2 = vadd.f32 %v4783_v33, %v11025_v54  ;;  %v11770_v55 = vadd.f32 %v5486_v57, %v11640_v21  ;;  %v4566_v8 = vrot.slane %v4404_v10, 2  ;;  %v5391_v43 = vrot.slane %v5227_v59, 6  ;;  %8216 = vmatmul.mubr.msk.f32.gmra.mxu0 %vm286_vm0, %v8536_v30 }
 0x481   : > { %v4408_v31 = vpop.f32.mrf.mxu1  ;;  %v11772_v49 = vpop.f32.mrf.mxu0  ;;  %8142 = vmatmul.mubr.msk.f32.gmra.mxu1 %vm286_vm0, %v8536_v30  ;;  %v11778_v58 = vadd.f32 %v4781_v29, %v12848_v62  ;;  %6482 = vmatprep.mubr.f32.mxu0 %v12770_v0 }
 0x482   : > { %12847 = vst [vmem:[#allocation24_spill] sm:$0xff] %v11770_v55  ;;  %v4662_v37 = vadd.f32 %v4566_v8, %v4397_v1  ;;  %v5392_v54 = vsel %vm968_vm1, %v5390_v53, %v5391_v43  ;;  %v5488_v21 = vadd.f32 %v5391_v43, %v11680_v19  ;;  %5760 = vmatprep.mubr.f32.mxu1 %v12770_v0  ;;  %v8537_v1 = vld [vmem:[%s8756_s11 + $0xf0] sm:$0xff] }
 0x483   : > { %v5487_v40 = vadd.f32 %v5392_v54, %v11661_v26  ;;  %v4410_v20 = vpop.f32.mrf.mxu1  ;;  %v5233_v57 = vpop.f32.mrf.mxu0 }
 0x484   : > { %v4567_v33 = vrot.slane %v4410_v20, 2  ;;  %v11786_v10 = vadd.f32 %v5488_v21, %v11621_v32  ;;  %8217 = vmatmul.mubr.msk.f32.gmra.mxu0 %vm286_vm0, %v8537_v1  ;;  %v4784_v21 = vrot.slane %v4662_v37, 4 }
 0x485   : > { %v4414_v59 = vpop.f32.mrf.mxu1  ;;  %v11788_v29 = vpop.f32.mrf.mxu0  ;;  %8143 = vmatmul.mubr.msk.f32.gmra.mxu1 %vm286_vm0, %v8537_v1  ;;  %v11794_v19 = vadd.f32 %v5487_v40, %v11629_v38  ;;  %6487 = vmatprep.mubr.f32.mxu0 %v12770_v0  ;;  %v8538_v1 = vld [vmem:[%s8756_s11 + $0xf8] sm:$0xff] }
 0x486   : > { %v4568_v26 = vsel %vm1661_vm2, %v4566_v8, %v4567_v33  ;;  %v4664_v53 = vadd.f32 %v4567_v33, %v4408_v31  ;;  %5766 = vmatprep.mubr.f32.mxu1 %v12770_v0 }
 0x487   : > { %v4663_v32 = vadd.f32 %v4568_v26, %v4402_v15  ;;  %v4416_v43 = vpop.f32.mrf.mxu1  ;;  %v5238_v30 = vpop.f32.mrf.mxu0 }
 0x488   : > { %v4787_v62 = vrot.slane %v4664_v53, 4  ;;  %v5393_v54 = vrot.slane %v5238_v30, 6  ;;  %8218 = vmatmul.mubr.msk.f32.gmra.mxu0 %vm286_vm0, %v8538_v1  ;;  %v8539_v43 = vld [vmem:[%s8756_s11 + $0x100] sm:$0xff] }
 0x489   : > { %v4785_v20 = vrot.slane %v4663_v32, 4  ;;  %v4419_v57 = vpop.f32.mrf.mxu1  ;;  %v11799_v55 = vpop.f32.mrf.mxu0  ;;  %8144 = vmatmul.mubr.msk.f32.gmra.mxu1 %vm286_vm0, %v8538_v1  ;;  %6493 = vmatprep.mubr.f32.mxu0 %v12770_v0  ;;  %v12850_v30 = vld [vmem:[#allocation9_spill] sm:$0xff] }
 0x48a   : > { %v11805_v38 = vadd.f32 %v4787_v62, %v11050_v34  ;;  %v5489_v15 = vadd.f32 %v5393_v54, %v11696_v16  ;;  %5772 = vmatprep.mubr.f32.mxu1 %v12770_v0 }
 0x48b   : > { %v4788_v8 = vsel %vm2498_vm3, %v4785_v20, %v4787_v62  ;;  %v4421_v31 = vpop.f32.mrf.mxu1  ;;  %v5244_v37 = vpop.f32.mrf.mxu0  ;;  %v4786_v40 = vsel %vm2498_vm3, %v4784_v21, %v4785_v20 }
 0x48c   : > { %v11813_v33 = vadd.f32 %v4788_v8, %v11052_v56  ;;  %v11816_v26 = vadd.f32 %v5489_v15, %v11686_v51  ;;  %v4569_v34 = vrot.slane %v4421_v31, 2  ;;  %v5394_v53 = vrot.slane %v5244_v37, 6  ;;  %8219 = vmatmul.mubr.msk.f32.gmra.mxu0 %vm286_vm0, %v8539_v43 }
 0x48d   : > { %v4425_v32 = vpop.f32.mrf.mxu1  ;;  %v11818_v16 = vpop.f32.mrf.mxu0  ;;  %8145 = vmatmul.mubr.msk.f32.gmra.mxu1 %vm286_vm0, %v8539_v43  ;;  %v11824_v62 = vadd.f32 %v4786_v40, %v12850_v30  ;;  %6499 = vmatprep.mubr.f32.mxu0 %v12770_v0 }
 0x48e   : > { %12849 = vst [vmem:[#allocation5_spill] sm:$0xff] %v11816_v26  ;;  %v4665_v21 = vadd.f32 %v4569_v34, %v4414_v59  ;;  %v5395_v56 = vsel %vm968_vm1, %v5393_v54, %v5394_v53  ;;  %v5491_v51 = vadd.f32 %v5394_v53, %v11726_v47  ;;  %5778 = vmatprep.mubr.f32.mxu1 %v12770_v0  ;;  %v8540_v59 = vld [vmem:[%s8756_s11 + $0x108] sm:$0xff] }
 0x48f   : > { %v5490_v20 = vadd.f32 %v5395_v56, %v11707_v23  ;;  %v4427_v1 = vpop.f32.mrf.mxu1  ;;  %v5250_v15 = vpop.f32.mrf.mxu0 }
 0x490   : > { %v4570_v8 = vrot.slane %v4427_v1, 2  ;;  %v11832_v31 = vadd.f32 %v5491_v51, %v11667_v24  ;;  %8220 = vmatmul.mubr.msk.f32.gmra.mxu0 %vm286_vm0, %v8540_v59  ;;  %v4789_v51 = vrot.slane %v4665_v21, 4 }
 0x491   : > { %v4431_v37 = vpop.f32.mrf.mxu1  ;;  %v11834_v40 = vpop.f32.mrf.mxu0  ;;  %8146 = vmatmul.mubr.msk.f32.gmra.mxu1 %vm286_vm0, %v8540_v59  ;;  %v11840_v47 = vadd.f32 %v5490_v20, %v11675_v17  ;;  %6504 = vmatprep.mubr.f32.mxu0 %v12770_v0  ;;  %v8541_v59 = vld [vmem:[%s8756_s11 + $0x110] sm:$0xff]  ;;  %v12852_v17 = vld [vmem:[#allocation13_spill] sm:$0xff] }
 0x492   : > { %v4571_v23 = vsel %vm1661_vm2, %v4569_v34, %v4570_v8  ;;  %v4667_v54 = vadd.f32 %v4570_v8, %v4425_v32  ;;  %5784 = vmatprep.mubr.f32.mxu1 %v12770_v0 }
 0x493   : > { %12851 = vst [vmem:[#allocation20_spill] sm:$0xff] %v11840_v47  ;;  %v4666_v24 = vadd.f32 %v4571_v23, %v4419_v57  ;;  %v4433_v53 = vpop.f32.mrf.mxu1  ;;  %v5255_v43 = vpop.f32.mrf.mxu0  ;;  %v12853_v23 = vld [vmem:[#allocation12_spill] sm:$0xff] }
 0x494   : > { %v4792_v30 = vrot.slane %v4667_v54, 4  ;;  %v5396_v56 = vrot.slane %v5255_v43, 6  ;;  %8221 = vmatmul.mubr.msk.f32.gmra.mxu0 %vm286_vm0, %v8541_v59 }
 0x495   : > { %v4790_v1 = vrot.slane %v4666_v24, 4  ;;  %v4436_v15 = vpop.f32.mrf.mxu1  ;;  %v11845_v26 = vpop.f32.mrf.mxu0  ;;  %8147 = vmatmul.mubr.msk.f32.gmra.mxu1 %vm286_vm0, %v8541_v59  ;;  %6510 = vmatprep.mubr.f32.mxu0 %v12770_v0 }
 0x496   : > { %v11851_v34 = vadd.f32 %v4792_v30, %v12852_v17  ;;  %v5492_v57 = vadd.f32 %v5396_v56, %v11742_v27  ;;  %5790 = vmatprep.mubr.f32.mxu1 %v12770_v0  ;;  %v8542_v17 = vld [vmem:[%s8756_s11 + $0x118] sm:$0xff] }
 0x497   : > { %v4793_v32 = vsel %vm2498_vm3, %v4790_v1, %v4792_v30  ;;  %v4438_v21 = vpop.f32.mrf.mxu1  ;;  %v5261_v20 = vpop.f32.mrf.mxu0  ;;  %v4791_v8 = vsel %vm2498_vm3, %v4789_v51, %v4790_v1  ;;  %v12855_v30 = vld [vmem:[#allocation11_spill] sm:$0xff] }
 0x498   : > { %v11859_v54 = vadd.f32 %v4793_v32, %v12853_v23  ;;  %v11862_v24 = vadd.f32 %v5492_v57, %v11732_v52  ;;  %v4572_v53 = vrot.slane %v4438_v21, 2  ;;  %v5397_v43 = vrot.slane %v5261_v20, 6  ;;  %8222 = vmatmul.mubr.msk.f32.gmra.mxu0 %vm286_vm0, %v8542_v17 }
 0x499   : > { %v4442_v59 = vpop.f32.mrf.mxu1  ;;  %v11864_v27 = vpop.f32.mrf.mxu0  ;;  %8148 = vmatmul.mubr.msk.f32.gmra.mxu1 %vm286_vm0, %v8542_v17  ;;  %v11870_v47 = vadd.f32 %v4791_v8, %v12855_v30  ;;  %6516 = vmatprep.mubr.f32.mxu0 %v12770_v0 }
 0x49a   : > { %12854 = vst [vmem:[#allocation7_spill] sm:$0xff] %v11862_v24  ;;  %v4668_v51 = vadd.f32 %v4572_v53, %v4431_v37  ;;  %v5398_v1 = vsel %vm968_vm1, %v5396_v56, %v5397_v43  ;;  %v5494_v52 = vadd.f32 %v5397_v43, %v11772_v49  ;;  %5796 = vmatprep.mubr.f32.mxu1 %v12770_v0  ;;  %v8543_v37 = vld [vmem:[%s8756_s11 + $0x120] sm:$0xff] }
 0x49b   : > { %v5493_v57 = vadd.f32 %v5398_v1, %v11753_v18  ;;  %v4444_v32 = vpop.f32.mrf.mxu1  ;;  %v5267_v21 = vpop.f32.mrf.mxu0 }
 0x49c   : > { %v4573_v20 = vrot.slane %v4444_v32, 2  ;;  %v11878_v23 = vadd.f32 %v5494_v52, %v11713_v61  ;;  %8223 = vmatmul.mubr.msk.f32.gmra.mxu0 %vm286_vm0, %v8543_v37  ;;  %v4794_v32 = vrot.slane %v4668_v51, 4 }
 0x49d   : > { %v4448_v17 = vpop.f32.mrf.mxu1  ;;  %v11880_v8 = vpop.f32.mrf.mxu0  ;;  %8149 = vmatmul.mubr.msk.f32.gmra.mxu1 %vm286_vm0, %v8543_v37  ;;  %v11886_v49 = vadd.f32 %v5493_v57, %v11721_v63  ;;  %6521 = vmatprep.mubr.f32.mxu0 %v12770_v0  ;;  %v8544_v37 = vld [vmem:[%s8756_s11 + $0x128] sm:$0xff]  ;;  %v12857_v63 = vld [vmem:[#allocation16_spill] sm:$0xff] }
 0x49e   : > { %v4574_v18 = vsel %vm1661_vm2, %v4572_v53, %v4573_v20  ;;  %v4670_v56 = vadd.f32 %v4573_v20, %v4442_v59  ;;  %5802 = vmatprep.mubr.f32.mxu1 %v12770_v0 }
 0x49f   : > { %12856 = vst [vmem:[#allocation21_spill] sm:$0xff] %v11886_v49  ;;  %v4669_v61 = vadd.f32 %v4574_v18, %v4436_v15  ;;  %v4449_v43 = vpop.f32.mrf.mxu1  ;;  %v5272_v30 = vpop.f32.mrf.mxu0  ;;  %v12858_v18 = vld [vmem:[#allocation15_spill] sm:$0xff] }
 0x4a0   : > { %v4797_v1 = vrot.slane %v4670_v56, 4  ;;  %v5399_v52 = vrot.slane %v5272_v30, 6  ;;  %8224 = vmatmul.mubr.msk.f32.gmra.mxu0 %vm286_vm0, %v8544_v37  ;;  %v12860_v30 = vld [vmem:[#allocation14_spill] sm:$0xff] }
 0x4a1   : > { %v4795_v21 = vrot.slane %v4669_v61, 4  ;;  %v4452_v17 = vpop.f32.mrf.mxu1  ;;  %v11891_v24 = vpop.f32.mrf.mxu0  ;;  %8150 = vmatmul.mubr.msk.f32.gmra.mxu1 %vm286_vm0, %v8544_v37  ;;  %6527 = vmatprep.mubr.f32.mxu0 %v12770_v0 }
 0x4a2   : > { %v11897_v53 = vadd.f32 %v4797_v1, %v12857_v63  ;;  %v5495_v15 = vadd.f32 %v5399_v52, %v11788_v29  ;;  %5808 = vmatprep.mubr.f32.mxu1 %v12770_v0  ;;  %v8545_v63 = vld [vmem:[%s8756_s11 + $0x130] sm:$0xff] }
 0x4a3   : > { %v4798_v59 = vsel %vm2498_vm3, %v4795_v21, %v4797_v1  ;;  %v4453_v51 = vpop.f32.mrf.mxu1  ;;  %v5278_v57 = vpop.f32.mrf.mxu0  ;;  %v4796_v20 = vsel %vm2498_vm3, %v4794_v32, %v4795_v21 }
 0x4a4   : > { %v11905_v56 = vadd.f32 %v4798_v59, %v12858_v18  ;;  %v11908_v61 = vadd.f32 %v5495_v15, %v11778_v58  ;;  %v5400_v43 = vrot.slane %v5278_v57, 6  ;;  %v11911_v17 = vadd.f32 %v4796_v20, %v12860_v30  ;;  %8225 = vmatmul.mubr.msk.f32.gmra.mxu0 %vm286_vm0, %v8545_v63  ;;  %v8546_v20 = vld [vmem:[%s8756_s11 + $0x138] sm:$0xff]  ;;  %v8547_v30 = vld [vmem:[%s8756_s11 + $0x140] sm:$0xff] }
 0x4a5   : > { %v4456_v29 = vpop.f32.mrf.mxu1  ;;  %v11913_v37 = vpop.f32.mrf.mxu0  ;;  %8151 = vmatmul.mubr.msk.f32.gmra.mxu1 %vm286_vm0, %v8545_v63  ;;  %6533 = vmatprep.mubr.f32.mxu0 %v12770_v0 }
 0x4a6   : > { %12859 = vst [vmem:[#allocation22_spill] sm:$0xff] %v11908_v61  ;;  %v5401_v1 = vsel %vm968_vm1, %v5399_v52, %v5400_v43  ;;  %v5497_v32 = vadd.f32 %v5400_v43, %v11818_v16  ;;  %5814 = vmatprep.mubr.f32.mxu1 %v12770_v0 }
 0x4a7   : > { %v5496_v58 = vadd.f32 %v5401_v1, %v11799_v55  ;;  %v4457_v21 = vpop.f32.mrf.mxu1  ;;  %v5284_v15 = vpop.f32.mrf.mxu0 }
 0x4a8   : > { %v11924_v59 = vadd.f32 %v5497_v32, %v11759_v44  ;;  %8226 = vmatmul.mubr.msk.f32.gmra.mxu0 %vm286_vm0, %v8546_v20  ;;  %v8548_v15 = vld [vmem:[%s8756_s11 + $0x148] sm:$0xff] }
 0x4a9   : > { %v4460_v51 = vpop.f32.mrf.mxu1  ;;  %v11926_v57 = vpop.f32.mrf.mxu0  ;;  %8152 = vmatmul.mubr.msk.f32.gmra.mxu1 %vm286_vm0, %v8546_v20  ;;  %v11932_v16 = vadd.f32 %v5496_v58, %v11767_v2  ;;  %6538 = vmatprep.mubr.f32.mxu0 %v12770_v0 }
 0x4aa   : > { %12861 = vst [vmem:[#allocation8_spill] sm:$0xff] %v11924_v59  ;;  %5820 = vmatprep.mubr.f32.mxu1 %v12770_v0 }
 0x4ab   : > { %12862 = vst [vmem:[#allocation6_spill] sm:$0xff] %v11932_v16  ;;  %v4461_v55 = vpop.f32.mrf.mxu1  ;;  %v5289_v52 = vpop.f32.mrf.mxu0 }
 0x4ac   : > { %v5402_v44 = vrot.slane %v5289_v52, 6  ;;  %8227 = vmatmul.mubr.msk.f32.gmra.mxu0 %vm286_vm0, %v8547_v30 }
 0x4ad   : > { %v4464_v18 = vpop.f32.mrf.mxu1  ;;  %v11936_v43 = vpop.f32.mrf.mxu0  ;;  %8153 = vmatmul.mubr.msk.f32.gmra.mxu1 %vm286_vm0, %v8547_v30  ;;  %6544 = vmatprep.mubr.f32.mxu0 %v12770_v0 }
 0x4ae   : > { %v5498_v29 = vadd.f32 %v5402_v44, %v11834_v40  ;;  %5826 = vmatprep.mubr.f32.mxu1 %v12770_v0 }
 0x4af   : > { %v4465_v2 = vpop.f32.mrf.mxu1  ;;  %v5295_v63 = vpop.f32.mrf.mxu0 }
 0x4b0   : > { %v11945_v1 = vadd.f32 %v5498_v29, %v11824_v62  ;;  %v5403_v32 = vrot.slane %v5295_v63, 6  ;;  %8228 = vmatmul.mubr.msk.f32.gmra.mxu0 %vm286_vm0, %v8548_v15  ;;  %v8549_v29 = vld [vmem:[%s8756_s11 + $0x150] sm:$0xff] }
 0x4b1   : > { %v4468_v58 = vpop.f32.mrf.mxu1  ;;  %v11947_v21 = vpop.f32.mrf.mxu0  ;;  %8154 = vmatmul.mubr.msk.f32.gmra.mxu1 %vm286_vm0, %v8548_v15  ;;  %6550 = vmatprep.mubr.f32.mxu0 %v12770_v0 }
 0x4b2   : > { %12863 = vst [vmem:[#allocation10_spill] sm:$0xff] %v11945_v1  ;;  %v5404_v40 = vsel %vm968_vm1, %v5402_v44, %v5403_v32  ;;  %v5500_v51 = vadd.f32 %v5403_v32, %v11864_v27  ;;  %5832 = vmatprep.mubr.f32.mxu1 %v12770_v0  ;;  %v8550_v32 = vld [vmem:[%s8756_s11 + $0x158] sm:$0xff] }
 0x4b3   : > { %v5499_v62 = vadd.f32 %v5404_v40, %v11845_v26  ;;  %v4469_v20 = vpop.f32.mrf.mxu1  ;;  %v5301_v55 = vpop.f32.mrf.mxu0 }
 0x4b4   : > { %v11958_v52 = vadd.f32 %v5500_v51, %v11805_v38  ;;  %8229 = vmatmul.mubr.msk.f32.gmra.mxu0 %vm286_vm0, %v8549_v29  ;;  %v8551_v55 = vld [vmem:[%s8756_s11 + $0x160] sm:$0xff] }
 0x4b5   : > { %v4472_v18 = vpop.f32.mrf.mxu1  ;;  %v5304_v30 = vpop.f32.mrf.mxu0  ;;  %8155 = vmatmul.mubr.msk.f32.gmra.mxu1 %vm286_vm0, %v8549_v29  ;;  %v11964_v27 = vadd.f32 %v5499_v62, %v11813_v33  ;;  %6555 = vmatprep.mubr.f32.mxu0 %v12770_v0 }
 0x4b6   : > { %12864 = vst [vmem:[#allocation9_spill] sm:$0xff] %v11958_v52  ;;  %5838 = vmatprep.mubr.f32.mxu1 %v12770_v0 }
 0x4b7   : > { %12865 = vst [vmem:[#allocation13_spill] sm:$0xff] %v11964_v27  ;;  %v4473_v26 = vpop.f32.mrf.mxu1  ;;  %v5305_v44 = vpop.f32.mrf.mxu0 }
 0x4b8   : > { %v5405_v2 = vrot.slane %v5305_v44, 6  ;;  %8230 = vmatmul.mubr.msk.f32.gmra.mxu0 %vm286_vm0, %v8550_v32 }
 0x4b9   : > { %v4476_v38 = vpop.f32.mrf.mxu1  ;;  %v5309_v63 = vpop.f32.mrf.mxu0  ;;  %8156 = vmatmul.mubr.msk.f32.gmra.mxu1 %vm286_vm0, %v8550_v32  ;;  %6561 = vmatprep.mubr.f32.mxu0 %v12770_v0 }
 0x4ba   : > { %v5501_v58 = vadd.f32 %v5405_v2, %v11880_v8  ;;  %5844 = vmatprep.mubr.f32.mxu1 %v12770_v0  ;;  %v8552_v63 = vld [vmem:[%s8756_s11 + $0x168] sm:$0xff] }
 0x4bb   : > { %v4477_v33 = vpop.f32.mrf.mxu1  ;;  %v5310_v15 = vpop.f32.mrf.mxu0 }
 0x4bc   : > { %v11975_v40 = vadd.f32 %v5501_v58, %v11870_v47  ;;  %v5406_v51 = vrot.slane %v5310_v15, 6  ;;  %8231 = vmatmul.mubr.msk.f32.gmra.mxu0 %vm286_vm0, %v8551_v55  ;;  %v8553_v33 = vld [vmem:[%s8756_s11 + $0x170] sm:$0xff] }
 0x4bd   : > { %v4480_v62 = vpop.f32.mrf.mxu1  ;;  %v5314_v20 = vpop.f32.mrf.mxu0  ;;  %8157 = vmatmul.mubr.msk.f32.gmra.mxu1 %vm286_vm0, %v8551_v55  ;;  %6567 = vmatprep.mubr.f32.mxu0 %v12770_v0 }
 0x4be   : > { %12866 = vst [vmem:[#allocation12_spill] sm:$0xff] %v11975_v40  ;;  %v5407_v8 = vsel %vm968_vm1, %v5405_v2, %v5406_v51  ;;  %v5503_v18 = vadd.f32 %v5406_v51, %v11913_v37  ;;  %5850 = vmatprep.mubr.f32.mxu1 %v12770_v0 }
 0x4bf   : > { %v5502_v47 = vadd.f32 %v5407_v8, %v11891_v24  ;;  %v4481_v30 = vpop.f32.mrf.mxu1  ;;  %v5315_v29 = vpop.f32.mrf.mxu0 }
 0x4c0   : > { %v11986_v26 = vadd.f32 %v5503_v18, %v11851_v34  ;;  %8232 = vmatmul.mubr.msk.f32.gmra.mxu0 %vm286_vm0, %v8552_v63  ;;  %v8554_v18 = vld [vmem:[%s8756_s11 + $0x178] sm:$0xff] }
 0x4c1   : > { %v4484_v44 = vpop.f32.mrf.mxu1  ;;  %v5318_v38 = vpop.f32.mrf.mxu0  ;;  %8158 = vmatmul.mubr.msk.f32.gmra.mxu1 %vm286_vm0, %v8552_v63  ;;  %v11992_v37 = vadd.f32 %v5502_v47, %v11859_v54  ;;  %6572 = vmatprep.mubr.f32.mxu0 %v12770_v0  ;;  %v8555_v63 = vld [vmem:[%s8756_s11 + $0x180] sm:$0xff] }
 0x4c2   : > { %12867 = vst [vmem:[#allocation11_spill] sm:$0xff] %v11986_v26  ;;  %5856 = vmatprep.mubr.f32.mxu1 %v12770_v0 }
 0x4c3   : > { %12868 = vst [vmem:[#allocation16_spill] sm:$0xff] %v11992_v37  ;;  %v4485_v24 = vpop.f32.mrf.mxu1  ;;  %v5319_v2 = vpop.f32.mrf.mxu0 }
 0x4c4   : > { %v5408_v32 = vrot.slane %v5319_v2, 6  ;;  %8233 = vmatmul.mubr.msk.f32.gmra.mxu0 %vm286_vm0, %v8553_v33 }
 0x4c5   : > { %v4488_v34 = vpop.f32.mrf.mxu1  ;;  %v5323_v58 = vpop.f32.mrf.mxu0  ;;  %8159 = vmatmul.mubr.msk.f32.gmra.mxu1 %vm286_vm0, %v8553_v33  ;;  %6578 = vmatprep.mubr.f32.mxu0 %v12770_v0 }
 0x4c6   : > { %v5504_v15 = vadd.f32 %v5408_v32, %v11926_v57  ;;  %5862 = vmatprep.mubr.f32.mxu1 %v12770_v0 }
 0x4c7   : > { %v4489_v54 = vpop.f32.mrf.mxu1  ;;  %v5324_v51 = vpop.f32.mrf.mxu0 }
 0x4c8   : > { %v12003_v62 = vadd.f32 %v5504_v15, %v11911_v17  ;;  %v5409_v20 = vrot.slane %v5324_v51, 6  ;;  %8234 = vmatmul.mubr.msk.f32.gmra.mxu0 %vm286_vm0, %v8554_v18  ;;  %v8557_v15 = vld [vmem:[%s8756_s11 + $0x190] sm:$0xff] }
 0x4c9   : > { %v4492_v55 = vpop.f32.mrf.mxu1  ;;  %v5328_v8 = vpop.f32.mrf.mxu0  ;;  %8160 = vmatmul.mubr.msk.f32.gmra.mxu1 %vm286_vm0, %v8554_v18  ;;  %6584 = vmatprep.mubr.f32.mxu0 %v12770_v0 }
 0x4ca   : > { %12869 = vst [vmem:[#allocation15_spill] sm:$0xff] %v12003_v62  ;;  %v5410_v57 = vsel %vm968_vm1, %v5408_v32, %v5409_v20  ;;  %v5506_v47 = vadd.f32 %v5409_v20, %v11947_v21  ;;  %5868 = vmatprep.mubr.f32.mxu1 %v12770_v0  ;;  %v8558_v8 = vld [vmem:[%s8756_s11 + $0x198] sm:$0xff] }
 0x4cb   : > { %v5505_v17 = vadd.f32 %v5410_v57, %v11936_v43  ;;  %v4493_v30 = vpop.f32.mrf.mxu1  ;;  %v5329_v29 = vpop.f32.mrf.mxu0 }
 0x4cc   : > { %v12014_v44 = vadd.f32 %v5506_v47, %v11897_v53  ;;  %8235 = vmatmul.mubr.msk.f32.gmra.mxu0 %vm286_vm0, %v8555_v63  ;;  %v8556_v53 = vld [vmem:[%s8756_s11 + $0x188] sm:$0xff]  ;;  %v8559_v30 = vld [vmem:[%s8756_s11 + $0x1a0] sm:$0xff] }
 0x4cd   : > { %v5624_v38 = vpop.f32.mrf.mxu1  ;;  %8161 = vmatmul.mubr.msk.f32.gmra.mxu1 %vm286_vm0, %v8555_v63  ;;  %v6348_v24 = vpop.f32.mrf.mxu0  ;;  %v12020_v21 = vadd.f32 %v5505_v17, %v11905_v56  ;;  %6589 = vmatprep.mubr.f32.mxu0 %v12770_v0 }
 0x4ce   : > { %12870 = vst [vmem:[#allocation14_spill] sm:$0xff] %v12014_v44  ;;  %5874 = vmatprep.mubr.f32.mxu1 %v12770_v0 }
 0x4cf   : > { %12871 = vst [vmem:[#allocation25_spill] sm:$0xff] %v12020_v21  ;;  %v5625_v43 = vpop.f32.mrf.mxu1  ;;  %v6349_v2 = vpop.f32.mrf.mxu0 }
 0x4d0   : > { %8236 = vmatmul.mubr.msk.f32.gmra.mxu0 %vm286_vm0, %v8556_v53  ;;  %v8560_v43 = vld [vmem:[%s8756_s11 + $0x1a8] sm:$0xff] }
 0x4d1   : > { %v5628_v32 = vpop.f32.mrf.mxu1  ;;  %8162 = vmatmul.mubr.msk.f32.gmra.mxu1 %vm286_vm0, %v8556_v53  ;;  %v6352_v34 = vpop.f32.mrf.mxu0  ;;  %6595 = vmatprep.mubr.f32.mxu0 %v12770_v0 }
 0x4d2   : > { %5880 = vmatprep.mubr.f32.mxu1 %v12770_v0 }
 0x4d3   : > { %v5629_v56 = vpop.f32.mrf.mxu1  ;;  %v6353_v58 = vpop.f32.mrf.mxu0 }
 0x4d4   : > { %8237 = vmatmul.mubr.msk.f32.gmra.mxu0 %vm286_vm0, %v8557_v15  ;;  %v8561_v56 = vld [vmem:[%s8756_s11 + $0x1b0] sm:$0xff] }
 0x4d5   : > { %v5632_v33 = vpop.f32.mrf.mxu1  ;;  %8163 = vmatmul.mubr.msk.f32.gmra.mxu1 %vm286_vm0, %v8557_v15  ;;  %v6356_v54 = vpop.f32.mrf.mxu0  ;;  %6601 = vmatprep.mubr.f32.mxu0 %v12770_v0 }
 0x4d6   : > { %5886 = vmatprep.mubr.f32.mxu1 %v12770_v0 }
 0x4d7   : > { %v5633_v51 = vpop.f32.mrf.mxu1  ;;  %v6357_v20 = vpop.f32.mrf.mxu0 }
 0x4d8   : > { %8238 = vmatmul.mubr.msk.f32.gmra.mxu0 %vm286_vm0, %v8558_v8  ;;  %v8562_v51 = vld [vmem:[%s8756_s11 + $0x1b8] sm:$0xff] }
 0x4d9   : > { %v5636_v55 = vpop.f32.mrf.mxu1  ;;  %8164 = vmatmul.mubr.msk.f32.gmra.mxu1 %vm286_vm0, %v8558_v8  ;;  %v6360_v18 = vpop.f32.mrf.mxu0  ;;  %6606 = vmatprep.mubr.f32.mxu0 %v12770_v0 }
 0x4da   : > { %5892 = vmatprep.mubr.f32.mxu1 %v12770_v0 }
 0x4db   : > { %v5637_v57 = vpop.f32.mrf.mxu1  ;;  %v6361_v47 = vpop.f32.mrf.mxu0 }
 0x4dc   : > { %8239 = vmatmul.mubr.msk.f32.gmra.mxu0 %vm286_vm0, %v8559_v30  ;;  %v8563_v57 = vld [vmem:[%s8756_s11 + $0x1c0] sm:$0xff] }
 0x4dd   : > { %v5640_v17 = vpop.f32.mrf.mxu1  ;;  %8165 = vmatmul.mubr.msk.f32.gmra.mxu1 %vm286_vm0, %v8559_v30  ;;  %v6364_v29 = vpop.f32.mrf.mxu0  ;;  %6612 = vmatprep.mubr.f32.mxu0 %v12770_v0 }
 0x4de   : > { %5898 = vmatprep.mubr.f32.mxu1 %v12770_v0 }
 0x4df   : > { %v5641_v38 = vpop.f32.mrf.mxu1  ;;  %v6365_v63 = vpop.f32.mrf.mxu0 }
 0x4e0   : > { %8240 = vmatmul.mubr.msk.f32.gmra.mxu0 %vm286_vm0, %v8560_v43  ;;  %v8564_v38 = vld [vmem:[%s8756_s11 + $0x1c8] sm:$0xff] }
 0x4e1   : > { %v5644_v24 = vpop.f32.mrf.mxu1  ;;  %8166 = vmatmul.mubr.msk.f32.gmra.mxu1 %vm286_vm0, %v8560_v43  ;;  %v6368_v2 = vpop.f32.mrf.mxu0  ;;  %6618 = vmatprep.mubr.f32.mxu0 %v12770_v0 }
 0x4e2   : > { %5904 = vmatprep.mubr.f32.mxu1 %v12770_v0 }
 0x4e3   : > { %v5645_v32 = vpop.f32.mrf.mxu1  ;;  %v6369_v53 = vpop.f32.mrf.mxu0 }
 0x4e4   : > { %8241 = vmatmul.mubr.msk.f32.gmra.mxu0 %vm286_vm0, %v8561_v56  ;;  %v8565_v32 = vld [vmem:[%s8756_s11 + $0x1d0] sm:$0xff] }
 0x4e5   : > { %v5648_v34 = vpop.f32.mrf.mxu1  ;;  %8167 = vmatmul.mubr.msk.f32.gmra.mxu1 %vm286_vm0, %v8561_v56  ;;  %v6372_v58 = vpop.f32.mrf.mxu0  ;;  %6623 = vmatprep.mubr.f32.mxu0 %v12770_v0 }
 0x4e6   : > { %5910 = vmatprep.mubr.f32.mxu1 %v12770_v0 }
 0x4e7   : > { %v5649_v33 = vpop.f32.mrf.mxu1  ;;  %v6373_v15 = vpop.f32.mrf.mxu0 }
 0x4e8   : > { %8242 = vmatmul.mubr.msk.f32.gmra.mxu0 %vm286_vm0, %v8562_v51  ;;  %v8566_v33 = vld [vmem:[%s8756_s11 + $0x1d8] sm:$0xff] }
 0x4e9   : > { %v5652_v54 = vpop.f32.mrf.mxu1  ;;  %8168 = vmatmul.mubr.msk.f32.gmra.mxu1 %vm286_vm0, %v8562_v51  ;;  %v6376_v20 = vpop.f32.mrf.mxu0  ;;  %6629 = vmatprep.mubr.f32.mxu0 %v12770_v0 }
 0x4ea   : > { %5916 = vmatprep.mubr.f32.mxu1 %v12770_v0 }
 0x4eb   : > { %v5653_v55 = vpop.f32.mrf.mxu1  ;;  %v6377_v8 = vpop.f32.mrf.mxu0 }
 0x4ec   : > { %8243 = vmatmul.mubr.msk.f32.gmra.mxu0 %vm286_vm0, %v8563_v57  ;;  %v8567_v55 = vld [vmem:[%s8756_s11 + $0x1e0] sm:$0xff] }
 0x4ed   : > { %v5656_v18 = vpop.f32.mrf.mxu1  ;;  %8169 = vmatmul.mubr.msk.f32.gmra.mxu1 %vm286_vm0, %v8563_v57  ;;  %v6380_v47 = vpop.f32.mrf.mxu0  ;;  %6635 = vmatprep.mubr.f32.mxu0 %v12770_v0 }
 0x4ee   : > { %5922 = vmatprep.mubr.f32.mxu1 %v12770_v0 }
 0x4ef   : > { %v5657_v17 = vpop.f32.mrf.mxu1  ;;  %v6381_v30 = vpop.f32.mrf.mxu0 }
 0x4f0   : > { %8244 = vmatmul.mubr.msk.f32.gmra.mxu0 %vm286_vm0, %v8564_v38  ;;  %v8568_v17 = vld [vmem:[%s8756_s11 + $0x1e8] sm:$0xff] }
 0x4f1   : > { %v5660_v29 = vpop.f32.mrf.mxu1  ;;  %8170 = vmatmul.mubr.msk.f32.gmra.mxu1 %vm286_vm0, %v8564_v38  ;;  %v6384_v63 = vpop.f32.mrf.mxu0  ;;  %6640 = vmatprep.mubr.f32.mxu0 %v12770_v0 }
 0x4f2   : > { %5928 = vmatprep.mubr.f32.mxu1 %v12770_v0 }
 0x4f3   : > { %v5661_v24 = vpop.f32.mrf.mxu1  ;;  %v6385_v43 = vpop.f32.mrf.mxu0 }
 0x4f4   : > { %8245 = vmatmul.mubr.msk.f32.gmra.mxu0 %vm286_vm0, %v8565_v32  ;;  %v8569_v24 = vld [vmem:[%s8756_s11 + $0x1f0] sm:$0xff] }
 0x4f5   : > { %v5664_v2 = vpop.f32.mrf.mxu1  ;;  %8171 = vmatmul.mubr.msk.f32.gmra.mxu1 %vm286_vm0, %v8565_v32  ;;  %v6388_v53 = vpop.f32.mrf.mxu0  ;;  %6646 = vmatprep.mubr.f32.mxu0 %v12770_v0 }
 0x4f6   : > { %5934 = vmatprep.mubr.f32.mxu1 %v12770_v0 }
 0x4f7   : > { %v5665_v34 = vpop.f32.mrf.mxu1  ;;  %v6389_v56 = vpop.f32.mrf.mxu0 }
 0x4f8   : > { %8246 = vmatmul.mubr.msk.f32.gmra.mxu0 %vm286_vm0, %v8566_v33  ;;  %v8570_v34 = vld [vmem:[%s8756_s11 + $0x1f8] sm:$0xff] }
 0x4f9   : > { %v5668_v58 = vpop.f32.mrf.mxu1  ;;  %8172 = vmatmul.mubr.msk.f32.gmra.mxu1 %vm286_vm0, %v8566_v33  ;;  %v6392_v15 = vpop.f32.mrf.mxu0  ;;  %6652 = vmatprep.mubr.f32.mxu0 %v12770_v0 }
 0x4fa   : > { %5940 = vmatprep.mubr.f32.mxu1 %v12770_v0 }
 0x4fb   : > { %v5669_v54 = vpop.f32.mrf.mxu1  ;;  %v6393_v51 = vpop.f32.mrf.mxu0 }
 0x4fc   : > { %8247 = vmatmul.mubr.msk.f32.gmra.mxu0 %vm286_vm0, %v8567_v55  ;;  %v8571_v54 = vld [vmem:[%s8756_s11 + $0x200] sm:$0xff] }
 0x4fd   : > { %v5672_v20 = vpop.f32.mrf.mxu1  ;;  %8173 = vmatmul.mubr.msk.f32.gmra.mxu1 %vm286_vm0, %v8567_v55  ;;  %v6396_v8 = vpop.f32.mrf.mxu0  ;;  %6657 = vmatprep.mubr.f32.mxu0 %v12770_v0 }
 0x4fe   : > { %5946 = vmatprep.mubr.f32.mxu1 %v12770_v0 }
 0x4ff   : > { %v5673_v18 = vpop.f32.mrf.mxu1  ;;  %v6397_v57 = vpop.f32.mrf.mxu0 }
 0x500   : > { %8248 = vmatmul.mubr.msk.f32.gmra.mxu0 %vm286_vm0, %v8568_v17  ;;  %v8572_v18 = vld [vmem:[%s8756_s11 + $0x208] sm:$0xff] }
 0x501   : > { %v5676_v47 = vpop.f32.mrf.mxu1  ;;  %8174 = vmatmul.mubr.msk.f32.gmra.mxu1 %vm286_vm0, %v8568_v17  ;;  %v6400_v30 = vpop.f32.mrf.mxu0  ;;  %6663 = vmatprep.mubr.f32.mxu0 %v12770_v0 }
 0x502   : > { %5952 = vmatprep.mubr.f32.mxu1 %v12770_v0 }
 0x503   : > { %v5677_v29 = vpop.f32.mrf.mxu1  ;;  %v6401_v38 = vpop.f32.mrf.mxu0 }
 0x504   : > { %8249 = vmatmul.mubr.msk.f32.gmra.mxu0 %vm286_vm0, %v8569_v24  ;;  %v8573_v29 = vld [vmem:[%s8756_s11 + $0x210] sm:$0xff] }
 0x505   : > { %v5680_v63 = vpop.f32.mrf.mxu1  ;;  %8175 = vmatmul.mubr.msk.f32.gmra.mxu1 %vm286_vm0, %v8569_v24  ;;  %v6404_v43 = vpop.f32.mrf.mxu0  ;;  %6669 = vmatprep.mubr.f32.mxu0 %v12770_v0 }
 0x506   : > { %5958 = vmatprep.mubr.f32.mxu1 %v12770_v0 }
 0x507   : > { %v5681_v2 = vpop.f32.mrf.mxu1  ;;  %v6405_v32 = vpop.f32.mrf.mxu0 }
 0x508   : > { %8250 = vmatmul.mubr.msk.f32.gmra.mxu0 %vm286_vm0, %v8570_v34  ;;  %v8574_v2 = vld [vmem:[%s8756_s11 + $0x218] sm:$0xff] }
 0x509   : > { %v5684_v53 = vpop.f32.mrf.mxu1  ;;  %8176 = vmatmul.mubr.msk.f32.gmra.mxu1 %vm286_vm0, %v8570_v34  ;;  %v6408_v56 = vpop.f32.mrf.mxu0  ;;  %6674 = vmatprep.mubr.f32.mxu0 %v12770_v0 }
 0x50a   : > { %5964 = vmatprep.mubr.f32.mxu1 %v12770_v0 }
 0x50b   : > { %v5685_v58 = vpop.f32.mrf.mxu1  ;;  %v6409_v33 = vpop.f32.mrf.mxu0 }
 0x50c   : > { %8251 = vmatmul.mubr.msk.f32.gmra.mxu0 %vm286_vm0, %v8571_v54  ;;  %v8575_v58 = vld [vmem:[%s8756_s11 + $0x220] sm:$0xff] }
 0x50d   : > { %v5688_v15 = vpop.f32.mrf.mxu1  ;;  %8177 = vmatmul.mubr.msk.f32.gmra.mxu1 %vm286_vm0, %v8571_v54  ;;  %v6412_v51 = vpop.f32.mrf.mxu0  ;;  %6680 = vmatprep.mubr.f32.mxu0 %v12770_v0 }
 0x50e   : > { %5970 = vmatprep.mubr.f32.mxu1 %v12770_v0 }
 0x50f   : > { %v5689_v20 = vpop.f32.mrf.mxu1  ;;  %v6413_v55 = vpop.f32.mrf.mxu0 }
 0x510   : > { %8252 = vmatmul.mubr.msk.f32.gmra.mxu0 %vm286_vm0, %v8572_v18  ;;  %v8576_v20 = vld [vmem:[%s8756_s11 + $0x228] sm:$0xff] }
 0x511   : > { %v5692_v8 = vpop.f32.mrf.mxu1  ;;  %8178 = vmatmul.mubr.msk.f32.gmra.mxu1 %vm286_vm0, %v8572_v18  ;;  %v6416_v57 = vpop.f32.mrf.mxu0  ;;  %6686 = vmatprep.mubr.f32.mxu0 %v12770_v0 }
 0x512   : > { %5976 = vmatprep.mubr.f32.mxu1 %v12770_v0 }
 0x513   : > { %v5693_v47 = vpop.f32.mrf.mxu1  ;;  %v6417_v17 = vpop.f32.mrf.mxu0 }
 0x514   : > { %8253 = vmatmul.mubr.msk.f32.gmra.mxu0 %vm286_vm0, %v8573_v29  ;;  %v8577_v47 = vld [vmem:[%s8756_s11 + $0x230] sm:$0xff] }
 0x515   : > { %v5696_v30 = vpop.f32.mrf.mxu1  ;;  %8179 = vmatmul.mubr.msk.f32.gmra.mxu1 %vm286_vm0, %v8573_v29  ;;  %v12111_v38 = vpop.f32.mrf.mxu0  ;;  %6690 = vmatprep.mubr.f32.mxu0 %v12770_v0 }
 0x516   : > { %5981 = vmatprep.mubr.f32.mxu1 %v12770_v0 }
 0x517   : > { %v5698_v63 = vpop.f32.mrf.mxu1  ;;  %v6422_v24 = vpop.f32.mrf.mxu0 }
 0x518   : > { %8254 = vmatmul.mubr.msk.f32.gmra.mxu0 %vm286_vm0, %v8574_v2 }
 0x519   : > { %v5701_v43 = vpop.f32.mrf.mxu1  ;;  %8180 = vmatmul.mubr.msk.f32.gmra.mxu1 %vm286_vm0, %v8574_v2  ;;  %v12118_v32 = vpop.f32.mrf.mxu0  ;;  %6695 = vmatprep.mubr.f32.mxu0 %v12770_v0  ;;  %v8578_v2 = vld [vmem:[%s8756_s11 + $0x238] sm:$0xff]  ;;  %s196_s11 = sand.u32 1, %s8640_s13  }
 0x51a   : > { %5986 = vmatprep.mubr.f32.mxu1 %v12770_v0  ;;  %s7593_s7 = sshll.u32 %s196_s11, 8  ;;  %s12663_s15 = scalar_lea.sflag [#allocation3], %s196_s11 }
 0x51b   : > { %v5703_v53 = vpop.f32.mrf.mxu1  ;;  %v6427_v34 = vpop.f32.mrf.mxu0  ;;  %s12200_s10 = scalar_lea.vmem [#allocation2], %s7593_s7 }
 0x51c   : > { %8255 = vmatmul.mubr.msk.f32.gmra.mxu0 %vm286_vm0, %v8575_v58  ;;  %s7496_s23 = sshll.u32 %s12200_s10, 4  ;;  %s12654_s23 = int_to_ptr.vmem [resolvable:$true] %s7496_s23 }
 0x51d   : > { %v5706_v56 = vpop.f32.mrf.mxu1  ;;  %8181 = vmatmul.mubr.msk.f32.gmra.mxu1 %vm286_vm0, %v8575_v58  ;;  %v6430_v33 = vpop.f32.mrf.mxu0  ;;  %6700 = vmatprep.mubr.f32.mxu0 %v12770_v0  ;;  %s8580_s29 = scalar_lea.vmem %s12654_s23, 4096  ;;  %p8587_p1 = scmp.lt.s32.totalorder %s12654_s23, %s8585_s4 }
 0x51e   : > { %5991 = vmatprep.mubr.f32.mxu1 %v12770_v0  ;;  %p8581_p12 = scmp.ne.s32.totalorder %s12654_s23, %s8580_s29  ;;  %p8588_p2 = scmp.lt.s32.totalorder %s8586_s5, %s8580_s29 }
 0x51f   : > { %v5708_v15 = vpop.f32.mrf.mxu1  ;;  %v6432_v54 = vpop.f32.mrf.mxu0 }
 0x520   : > { %8256 = vmatmul.mubr.msk.f32.gmra.mxu0 %vm286_vm0, %v8576_v20  ;;  %p8582_p13 = pnand %p8581_p12, %p8722_p4  ;;  %p8589_p3 = por %p8588_p2, %p8587_p1 }
 0x521   : > { %v12128_v51 = vpop.f32.mrf.mxu1  ;;  %8182 = vmatmul.mubr.msk.f32.gmra.mxu1 %vm286_vm0, %v8576_v20  ;;  %v12132_v55 = vpop.f32.mrf.mxu0  ;;  %6704 = vmatprep.mubr.f32.mxu0 %v12770_v0 }
 0x522   : > { %5996 = vmatprep.mubr.f32.mxu1 %v12770_v0  ;;  %p8583_p0 = pneg %p8582_p13 }
 0x523   : > { %v5713_v8 = vpop.f32.mrf.mxu1  ;;  %v6437_v18 = vpop.f32.mrf.mxu0 }
 0x524   : > { %8257 = vmatmul.mubr.msk.f32.gmra.mxu0 %vm286_vm0, %v8577_v47  ;;  %p8590_p5 = pnand %p8589_p3, %p8583_p0 }
 0x525   : > { %v12137_v57 = vpop.f32.mrf.mxu1  ;;  %8183 = vmatmul.mubr.msk.f32.gmra.mxu1 %vm286_vm0, %v8577_v47  ;;  %v12141_v17 = vpop.f32.mrf.mxu0  ;;  %6709 = vmatprep.mubr.f32.mxu0 %v12770_v0 }
 0x526   : > { %6001 = vmatprep.mubr.f32.mxu1 %v12770_v0 }
 0x527   : > { %v5718_v29 = vpop.f32.mrf.mxu1  ;;  %v6442_v63 = vpop.f32.mrf.mxu0 }
 0x528   : > { %8258 = vmatmul.mubr.msk.f32.gmra.mxu0 %vm286_vm0, %v8578_v2 }
 0x529   : > { %v12146_v24 = vpop.f32.mrf.mxu1  ;;  %8184 = vmatmul.mubr.msk.f32.gmra.mxu1 %vm286_vm0, %v8578_v2  ;;  %v12150_v53 = vpop.f32.mrf.mxu0 }
 0x52b   : > { %v5723_v34 = vpop.f32.mrf.mxu1  ;;  %v6447_v58 = vpop.f32.mrf.mxu0 }
 0x52d   : > { %v12153_v15 = vpop.f32.mrf.mxu1  ;;  %v12155_v54 = vpop.f32.mrf.mxu0 }
 0x52f   : > { %v5728_v20 = vpop.f32.mrf.mxu1  ;;  %v6452_v8 = vpop.f32.mrf.mxu0 }
 0x530   : > { %v6007_v62 = vadd.f32 %v5728_v20, %v5696_v30 }
 0x531   : > { %v12157_v0 = vpop.f32.mrf.mxu1  ;;  %v12159_v18 = vpop.f32.mrf.mxu0 }
 0x532   : > { %v6103_v26 = vrot.slane %v6007_v62, 2 }
 0x533   : > { %v5734_v47 = vpop.f32.mrf.mxu1  ;;  %v6457_v29 = vpop.f32.mrf.mxu0 }
 0x534   : > { %v6008_v63 = vadd.f32 %v5734_v47, %v5701_v43  ;;  %v6747_v21 = vrot.slane %v6457_v29, 2 }
 0x535   : > { %v12161_v44 = vpop.f32.mrf.mxu1  ;;  %v12163_v2 = vpop.f32.mrf.mxu0 }
 0x536   : > { %v6104_v34 = vrot.slane %v6008_v63, 2  ;;  %v6843_v1 = vadd.f32 %v6747_v21, %v12111_v38 }
 0x537   : > { %v5740_v58 = vpop.f32.mrf.mxu1  ;;  %v6463_v40 = vpop.f32.mrf.mxu0 }
 0x538   : > { %v6009_v37 = vadd.f32 %v5740_v58, %v5706_v56  ;;  %v6748_v8 = vrot.slane %v6463_v40, 2  ;;  %v6105_v47 = vsel %vm1661_vm2, %v6103_v26, %v6104_v34  ;;  %v6939_v58 = vrot.slane %v6843_v1, 4 }
 0x539   : > { %v12167_v27 = vpop.f32.mrf.mxu1  ;;  %v12169_v52 = vpop.f32.mrf.mxu0 }
 0x53a   : > { %v6106_v30 = vrot.slane %v6009_v37, 2  ;;  %v6749_v43 = vsel %vm1661_vm2, %v6747_v21, %v6748_v8  ;;  %v6845_v20 = vadd.f32 %v6748_v8, %v6430_v33  ;;  %v12182_v21 = vld [vmem:[%s12710_s2] ss:$0 sm:$0xff] }
 0x53b   : > { %v6844_v29 = vadd.f32 %v6749_v43, %v12118_v32  ;;  %v5746_v63 = vpop.f32.mrf.mxu1  ;;  %v6469_v56 = vpop.f32.mrf.mxu0  ;;  %v12872_v33 = vld [vmem:[#allocation17_spill] sm:$0xff] }
 0x53c   : > { %v6107_v40 = vsel %vm1661_vm2, %v6104_v34, %v6106_v30  ;;  %v6233_v62 = vadd.f32 %v6106_v30, %v11372_v41  ;;  %v6942_v38 = vrot.slane %v6845_v20, 4  ;;  %v6231_v34 = vadd.f32 %v6105_v47, %v12872_v33 }
 0x53d   : > { %v6232_v61 = vadd.f32 %v6107_v40, %v11380_v42  ;;  %v6940_v37 = vrot.slane %v6844_v29, 4  ;;  %v12184_v26 = vpop.f32.mrf.mxu1  ;;  %v12186_v32 = vpop.f32.mrf.mxu0  ;;  %v6010_v40 = vadd.f32 %v5746_v63, %v12128_v51 }
 0x53e   : > { %v7069_v8 = vadd.f32 %v6942_v38, %v6233_v62 }
 0x53f   : > { %v6941_v41 = vsel %vm2498_vm3, %v6939_v58, %v6940_v37  ;;  %v6943_v30 = vsel %vm2498_vm3, %v6940_v37, %v6942_v38  ;;  %v5752_v1 = vpop.f32.mrf.mxu1  ;;  %v6474_v43 = vpop.f32.mrf.mxu0  ;;  %v6108_v58 = vrot.slane %v6010_v40, 2 }
 0x540   : > { %v7067_v42 = vadd.f32 %v6941_v41, %v6231_v34  ;;  %v7068_v20 = vadd.f32 %v6943_v30, %v6232_v61  ;;  %v7128_v29 = vadd.f32 %v12182_v21, %v7069_v8  ;;  %v6011_v56 = vadd.f32 %v5752_v1, %v12137_v57 }
 0x541   : > { %v6750_v16 = vrot.slane %v6474_v43, 2  ;;  %v12194_v59 = vpop.f32.mrf.mxu1  ;;  %v12196_v49 = vpop.f32.mrf.mxu0 }
 0x542   : > { %v7126_v47 = vadd.f32 %v12182_v21, %v7067_v42  ;;  %v7127_v62 = vadd.f32 %v12182_v21, %v7068_v20  ;;  %7176 = vst [vmem:[%s12200_s10 + $0xe] sm:$0x3] %v7128_v29  ;;  %v6109_v61 = vrot.slane %v6011_v56, 2 }
 0x543   : > { %v5758_v38 = vpop.f32.mrf.mxu1  ;;  %v6480_v57 = vpop.f32.mrf.mxu0  ;;  %v6846_v37 = vadd.f32 %v6750_v16, %v12132_v55 }
 0x544   : > { %7174 = vst [vmem:[%s12200_s10 - $0x2] sm:$0xfc] %v7126_v47  ;;  %7175 = vst [vmem:[%s12200_s10 + $0x6] sm:$0xff] %v7127_v62  ;;  %v6012_v51 = vadd.f32 %v5758_v38, %v12146_v24  ;;  %v6751_v63 = vrot.slane %v6480_v57, 2  ;;  %v6110_v1 = vsel %vm1661_vm2, %v6108_v58, %v6109_v61 }
 0x545   : > { %v12207_v33 = vpop.f32.mrf.mxu1  ;;  %v12209_v34 = vpop.f32.mrf.mxu0  ;;  %v6944_v56 = vrot.slane %v6846_v37, 4 }
 0x546   : > { %v6111_v8 = vrot.slane %v6012_v51, 2  ;;  %v6752_v41 = vsel %vm1661_vm2, %v6750_v16, %v6751_v63  ;;  %v6848_v30 = vadd.f32 %v6751_v63, %v12150_v53  ;;  %v6234_v53 = vadd.f32 %v6110_v1, %v11402_v12 }
 0x547   : > { %v6847_v43 = vadd.f32 %v6752_v41, %v12141_v17  ;;  %v5764_v42 = vpop.f32.mrf.mxu1  ;;  %v6486_v20 = vpop.f32.mrf.mxu0 }
 0x548   : > { %v6112_v24 = vsel %vm1661_vm2, %v6109_v61, %v6111_v8  ;;  %v6236_v29 = vadd.f32 %v6111_v8, %v11418_v36  ;;  %v6947_v55 = vrot.slane %v6848_v30, 4  ;;  %v6013_v37 = vadd.f32 %v5764_v42, %v12153_v15 }
 0x549   : > { %v6235_v40 = vadd.f32 %v6112_v24, %v11426_v11  ;;  %v6945_v47 = vrot.slane %v6847_v43, 4  ;;  %v12218_v62 = vpop.f32.mrf.mxu1  ;;  %v12220_v16 = vpop.f32.mrf.mxu0 }
 0x54a   : > { %v7072_v38 = vadd.f32 %v6947_v55, %v6236_v29 }
 0x54b   : > { %v6946_v17 = vsel %vm2498_vm3, %v6944_v56, %v6945_v47  ;;  %v6948_v57 = vsel %vm2498_vm3, %v6945_v47, %v6947_v55  ;;  %v5770_v61 = vpop.f32.mrf.mxu1  ;;  %v6491_v36 = vpop.f32.mrf.mxu0  ;;  %v6113_v55 = vrot.slane %v6013_v37, 2 }
 0x54c   : > { %v7070_v51 = vadd.f32 %v6946_v17, %v6234_v53  ;;  %v7071_v63 = vadd.f32 %v6948_v57, %v6235_v40  ;;  %v7131_v11 = vadd.f32 %v12182_v21, %v7072_v38  ;;  %v6014_v58 = vadd.f32 %v5770_v61, %v12157_v0 }
 0x54d   : > { %v6753_v8 = vrot.slane %v6491_v36, 2  ;;  %v12228_v12 = vpop.f32.mrf.mxu1  ;;  %v12230_v41 = vpop.f32.mrf.mxu0 }
 0x54e   : > { %v7129_v30 = vadd.f32 %v12182_v21, %v7070_v51  ;;  %v7130_v1 = vadd.f32 %v12182_v21, %v7071_v63  ;;  %7179 = vst [vmem:[%s12200_s10 + $0x1e] sm:$0x3] %v7131_v11  ;;  %v6114_v43 = vrot.slane %v6014_v58, 2 }
 0x54f   : > { %v5776_v20 = vpop.f32.mrf.mxu1  ;;  %v6497_v24 = vpop.f32.mrf.mxu0  ;;  %v6849_v15 = vadd.f32 %v6753_v8, %v12155_v54 }
 0x550   : > { %7177 = vst [vmem:[%s12200_s10 + $0xe] sm:$0xfc] %v7129_v30  ;;  %7178 = vst [vmem:[%s12200_s10 + $0x16] sm:$0xff] %v7130_v1  ;;  %v6015_v29 = vadd.f32 %v5776_v20, %v12161_v44  ;;  %v6754_v0 = vrot.slane %v6497_v24, 2  ;;  %v6115_v38 = vsel %vm1661_vm2, %v6113_v55, %v6114_v43 }
 0x551   : > { %v12239_v42 = vpop.f32.mrf.mxu1  ;;  %v12241_v56 = vpop.f32.mrf.mxu0  ;;  %v6949_v51 = vrot.slane %v6849_v15, 4 }
 0x552   : > { %v6116_v40 = vrot.slane %v6015_v29, 2  ;;  %v6755_v47 = vsel %vm1661_vm2, %v6753_v8, %v6754_v0  ;;  %v6851_v53 = vadd.f32 %v6754_v0, %v12163_v2  ;;  %v6237_v2 = vadd.f32 %v6115_v38, %v11448_v6 }
 0x553   : > { %v6850_v17 = vadd.f32 %v6755_v47, %v12159_v18  ;;  %v5782_v57 = vpop.f32.mrf.mxu1  ;;  %v6503_v61 = vpop.f32.mrf.mxu0 }
 0x554   : > { %v6117_v44 = vsel %vm1661_vm2, %v6114_v43, %v6116_v40  ;;  %v6239_v36 = vadd.f32 %v6116_v40, %v11464_v45  ;;  %v6952_v54 = vrot.slane %v6851_v53, 4  ;;  %v6016_v29 = vadd.f32 %v5782_v57, %v12167_v27 }
 0x555   : > { %v6238_v63 = vadd.f32 %v6117_v44, %v11472_v25  ;;  %v6950_v11 = vrot.slane %v6850_v17, 4  ;;  %v12250_v58 = vpop.f32.mrf.mxu1  ;;  %v12252_v37 = vpop.f32.mrf.mxu0 }
 0x556   : > { %v7075_v8 = vadd.f32 %v6952_v54, %v6239_v36  ;;  %v6118_v61 = vrot.slane %v6016_v29, 2 }
 0x557   : > { %v6951_v18 = vsel %vm2498_vm3, %v6949_v51, %v6950_v11  ;;  %v6953_v30 = vsel %vm2498_vm3, %v6950_v11, %v6952_v54  ;;  %v5788_v1 = vpop.f32.mrf.mxu1  ;;  %v6508_v45 = vpop.f32.mrf.mxu0 }
 0x558   : > { %v7073_v43 = vadd.f32 %v6951_v18, %v6237_v2  ;;  %v7074_v20 = vadd.f32 %v6953_v30, %v6238_v63  ;;  %v7134_v25 = vadd.f32 %v12182_v21, %v7075_v8  ;;  %v6017_v24 = vadd.f32 %v5788_v1, %v12184_v26 }
 0x559   : > { %v6756_v0 = vrot.slane %v6508_v45, 2  ;;  %v12260_v6 = vpop.f32.mrf.mxu1  ;;  %v12262_v55 = vpop.f32.mrf.mxu0 }
 0x55a   : > { %v7132_v15 = vadd.f32 %v12182_v21, %v7073_v43  ;;  %v7133_v40 = vadd.f32 %v12182_v21, %v7074_v20  ;;  %7182 = vst [vmem:[%s12200_s10 + $0x2e] sm:$0x3] %v7134_v25  ;;  %v6119_v47 = vrot.slane %v6017_v24, 2 }
 0x55b   : > { %v5794_v53 = vpop.f32.mrf.mxu1  ;;  %v6514_v38 = vpop.f32.mrf.mxu0  ;;  %v6852_v27 = vadd.f32 %v6756_v0, %v12169_v52 }
 0x55c   : > { %7180 = vst [vmem:[%s12200_s10 + $0x1e] sm:$0xfc] %v7132_v15  ;;  %7181 = vst [vmem:[%s12200_s10 + $0x26] sm:$0xff] %v7133_v40  ;;  %v6018_v17 = vadd.f32 %v5794_v53, %v12194_v59  ;;  %v6757_v26 = vrot.slane %v6514_v38, 2  ;;  %v6120_v63 = vsel %vm1661_vm2, %v6118_v61, %v6119_v47 }
 0x55d   : > { %v12271_v57 = vpop.f32.mrf.mxu1  ;;  %v12273_v44 = vpop.f32.mrf.mxu0  ;;  %v6954_v30 = vrot.slane %v6852_v27, 4 }
 0x55e   : > { %v6121_v36 = vrot.slane %v6018_v17, 2  ;;  %v6758_v54 = vsel %vm1661_vm2, %v6756_v0, %v6757_v26  ;;  %v6854_v51 = vadd.f32 %v6757_v26, %v12196_v49  ;;  %v6240_v49 = vadd.f32 %v6120_v63, %v11494_v48 }
 0x55f   : > { %v6853_v11 = vadd.f32 %v6758_v54, %v12186_v32  ;;  %v5800_v2 = vpop.f32.mrf.mxu1  ;;  %v6520_v8 = vpop.f32.mrf.mxu0 }
 0x560   : > { %v6122_v59 = vsel %vm1661_vm2, %v6119_v47, %v6121_v36  ;;  %v6242_v18 = vadd.f32 %v6121_v36, %v11510_v46  ;;  %v6957_v52 = vrot.slane %v6854_v51, 4  ;;  %v6019_v47 = vadd.f32 %v5800_v2, %v12207_v33 }
 0x561   : > { %v6241_v1 = vadd.f32 %v6122_v59, %v11518_v35  ;;  %v6955_v45 = vrot.slane %v6853_v11, 4  ;;  %v12282_v43 = vpop.f32.mrf.mxu1  ;;  %v12284_v20 = vpop.f32.mrf.mxu0 }
 0x562   : > { %v7078_v25 = vadd.f32 %v6957_v52, %v6242_v18  ;;  %v6123_v51 = vrot.slane %v6019_v47, 2 }
 0x563   : > { %v6956_v32 = vsel %vm2498_vm3, %v6954_v30, %v6955_v45  ;;  %v6958_v24 = vsel %vm2498_vm3, %v6955_v45, %v6957_v52  ;;  %v5806_v29 = vpop.f32.mrf.mxu1  ;;  %v6525_v46 = vpop.f32.mrf.mxu0 }
 0x564   : > { %v7076_v0 = vadd.f32 %v6956_v32, %v6240_v49  ;;  %v7077_v15 = vadd.f32 %v6958_v24, %v6241_v1  ;;  %v7137_v35 = vadd.f32 %v12182_v21, %v7078_v25  ;;  %v6020_v40 = vadd.f32 %v5806_v29, %v12218_v62 }
 0x565   : > { %v6759_v53 = vrot.slane %v6525_v46, 2  ;;  %v12292_v48 = vpop.f32.mrf.mxu1  ;;  %v12294_v38 = vpop.f32.mrf.mxu0 }
 0x566   : > { %v7135_v17 = vadd.f32 %v12182_v21, %v7076_v0  ;;  %v7136_v26 = vadd.f32 %v12182_v21, %v7077_v15  ;;  %7185 = vst [vmem:[%s12200_s10 + $0x3e] sm:$0x3] %v7137_v35  ;;  %v6124_v61 = vrot.slane %v6020_v40, 2 }
 0x567   : > { %v5812_v27 = vpop.f32.mrf.mxu1  ;;  %v6531_v36 = vpop.f32.mrf.mxu0  ;;  %v6855_v33 = vadd.f32 %v6759_v53, %v12209_v34 }
 0x568   : > { %7183 = vst [vmem:[%s12200_s10 + $0x2e] sm:$0xfc] %v7135_v17  ;;  %7184 = vst [vmem:[%s12200_s10 + $0x36] sm:$0xff] %v7136_v26  ;;  %v6021_v54 = vadd.f32 %v5812_v27, %v12228_v12  ;;  %v6760_v62 = vrot.slane %v6531_v36, 2  ;;  %v6125_v18 = vsel %vm1661_vm2, %v6123_v51, %v6124_v61 }
 0x569   : > { %v12303_v63 = vpop.f32.mrf.mxu1  ;;  %v12305_v11 = vpop.f32.mrf.mxu0  ;;  %v6959_v49 = vrot.slane %v6855_v33, 4 }
 0x56a   : > { %v6126_v2 = vrot.slane %v6021_v54, 2  ;;  %v6761_v8 = vsel %vm1661_vm2, %v6759_v53, %v6760_v62  ;;  %v6857_v59 = vadd.f32 %v6760_v62, %v12230_v41  ;;  %v6243_v41 = vadd.f32 %v6125_v18, %v11540_v60 }
 0x56b   : > { %v6856_v52 = vadd.f32 %v6761_v8, %v12220_v16  ;;  %v5818_v30 = vpop.f32.mrf.mxu1  ;;  %v6537_v1 = vpop.f32.mrf.mxu0 }
 0x56c   : > { %v6127_v12 = vsel %vm1661_vm2, %v6124_v61, %v6126_v2  ;;  %v6245_v45 = vadd.f32 %v6126_v2, %v11556_v5  ;;  %v6962_v34 = vrot.slane %v6857_v59, 4  ;;  %v6022_v53 = vadd.f32 %v5818_v30, %v12239_v42 }
 0x56d   : > { %v6244_v25 = vadd.f32 %v6127_v12, %v11564_v39  ;;  %v6960_v32 = vrot.slane %v6856_v52, 4  ;;  %v12314_v24 = vpop.f32.mrf.mxu1  ;;  %v12316_v29 = vpop.f32.mrf.mxu0 }
 0x56e   : > { %v7081_v46 = vadd.f32 %v6962_v34, %v6245_v45  ;;  %v6128_v33 = vrot.slane %v6022_v53, 2 }
 0x56f   : > { %v6961_v16 = vsel %vm2498_vm3, %v6959_v49, %v6960_v32  ;;  %v6963_v0 = vsel %vm2498_vm3, %v6960_v32, %v6962_v34  ;;  %v5824_v15 = vpop.f32.mrf.mxu1  ;;  %v6542_v5 = vpop.f32.mrf.mxu0 }
 0x570   : > { %v7079_v35 = vadd.f32 %v6961_v16, %v6243_v41  ;;  %v7080_v40 = vadd.f32 %v6963_v0, %v6244_v25  ;;  %v7140_v39 = vadd.f32 %v12182_v21, %v7081_v46  ;;  %v6023_v47 = vadd.f32 %v5824_v15, %v12250_v58 }
 0x571   : > { %v6762_v17 = vrot.slane %v6542_v5, 2  ;;  %v12324_v60 = vpop.f32.mrf.mxu1  ;;  %v12326_v26 = vpop.f32.mrf.mxu0 }
 0x572   : > { %v7138_v61 = vadd.f32 %v12182_v21, %v7079_v35  ;;  %v7139_v27 = vadd.f32 %v12182_v21, %v7080_v40  ;;  %7188 = vst [vmem:[%s12200_s10 + $0x4e] sm:$0x3] %v7140_v39  ;;  %v6129_v36 = vrot.slane %v6023_v47, 2 }
 0x573   : > { %v5830_v54 = vpop.f32.mrf.mxu1  ;;  %v6548_v62 = vpop.f32.mrf.mxu0  ;;  %v6858_v42 = vadd.f32 %v6762_v17, %v12241_v56 }
 0x574   : > { %7186 = vst [vmem:[%s12200_s10 + $0x3e] sm:$0xfc] %v7138_v61  ;;  %7187 = vst [vmem:[%s12200_s10 + $0x46] sm:$0xff] %v7139_v27  ;;  %v6024_v51 = vadd.f32 %v5830_v54, %v12260_v6  ;;  %v6763_v58 = vrot.slane %v6548_v62, 2  ;;  %v6130_v30 = vsel %vm1661_vm2, %v6128_v33, %v6129_v36 }
 0x575   : > { %v12335_v2 = vpop.f32.mrf.mxu1  ;;  %v12337_v8 = vpop.f32.mrf.mxu0  ;;  %v6964_v49 = vrot.slane %v6858_v42, 4 }
 0x576   : > { %v6131_v59 = vrot.slane %v6024_v51, 2  ;;  %v6764_v18 = vsel %vm1661_vm2, %v6762_v17, %v6763_v58  ;;  %v6860_v52 = vadd.f32 %v6763_v58, %v12262_v55  ;;  %v6246_v55 = vadd.f32 %v6130_v30, %v11586_v22 }
 0x577   : > { %v6859_v1 = vadd.f32 %v6764_v18, %v12252_v37  ;;  %v5836_v12 = vpop.f32.mrf.mxu1  ;;  %v6554_v45 = vpop.f32.mrf.mxu0 }
 0x578   : > { %v6132_v6 = vsel %vm1661_vm2, %v6129_v36, %v6131_v59  ;;  %v6248_v34 = vadd.f32 %v6131_v59, %v11602_v4  ;;  %v6967_v56 = vrot.slane %v6860_v52, 4  ;;  %v6025_v39 = vadd.f32 %v5836_v12, %v12271_v57 }
 0x579   : > { %v6247_v25 = vadd.f32 %v6132_v6, %v11610_v13  ;;  %v6965_v32 = vrot.slane %v6859_v1, 4  ;;  %v12346_v41 = vpop.f32.mrf.mxu1  ;;  %v12348_v46 = vpop.f32.mrf.mxu0 }
 0x57a   : > { %v7084_v16 = vadd.f32 %v6967_v56, %v6248_v34  ;;  %v6133_v51 = vrot.slane %v6025_v39, 2 }
 0x57b   : > { %v6966_v37 = vsel %vm2498_vm3, %v6964_v49, %v6965_v32  ;;  %v6968_v0 = vsel %vm2498_vm3, %v6965_v32, %v6967_v56  ;;  %v5842_v15 = vpop.f32.mrf.mxu1  ;;  %v6559_v4 = vpop.f32.mrf.mxu0 }
 0x57c   : > { %v7082_v5 = vadd.f32 %v6966_v37, %v6246_v55  ;;  %v7083_v35 = vadd.f32 %v6968_v0, %v6247_v25  ;;  %v7143_v13 = vadd.f32 %v12182_v21, %v7084_v16  ;;  %v6026_v40 = vadd.f32 %v5842_v15, %v12282_v43 }
 0x57d   : > { %v6765_v47 = vrot.slane %v6559_v4, 2  ;;  %v12356_v22 = vpop.f32.mrf.mxu1  ;;  %v12358_v53 = vpop.f32.mrf.mxu0 }
 0x57e   : > { %v7141_v17 = vadd.f32 %v12182_v21, %v7082_v5  ;;  %v7142_v61 = vadd.f32 %v12182_v21, %v7083_v35  ;;  %7191 = vst [vmem:[%s12200_s10 + $0x5e] sm:$0x3] %v7143_v13  ;;  %v6134_v27 = vrot.slane %v6026_v40, 2 }
 0x57f   : > { %v5848_v36 = vpop.f32.mrf.mxu1  ;;  %v6565_v54 = vpop.f32.mrf.mxu0  ;;  %v6861_v57 = vadd.f32 %v6765_v47, %v12273_v44 }
 0x580   : > { %7189 = vst [vmem:[%s12200_s10 + $0x4e] sm:$0xfc] %v7141_v17  ;;  %7190 = vst [vmem:[%s12200_s10 + $0x56] sm:$0xff] %v7142_v61  ;;  %v6027_v62 = vadd.f32 %v5848_v36, %v12292_v48  ;;  %v6766_v43 = vrot.slane %v6565_v54, 2  ;;  %v6135_v52 = vsel %vm1661_vm2, %v6133_v51, %v6134_v27 }
 0x581   : > { %v12367_v58 = vpop.f32.mrf.mxu1  ;;  %v12369_v33 = vpop.f32.mrf.mxu0  ;;  %v6969_v6 = vrot.slane %v6861_v57, 4 }
 0x582   : > { %v6136_v42 = vrot.slane %v6027_v62, 2  ;;  %v6767_v59 = vsel %vm1661_vm2, %v6765_v47, %v6766_v43  ;;  %v6863_v18 = vadd.f32 %v6766_v43, %v12294_v38  ;;  %v6249_v38 = vadd.f32 %v6135_v52, %v11632_v7 }
 0x583   : > { %v6862_v30 = vadd.f32 %v6767_v59, %v12284_v20  ;;  %v5854_v1 = vpop.f32.mrf.mxu1  ;;  %v6571_v12 = vpop.f32.mrf.mxu0 }
 0x584   : > { %v6137_v48 = vsel %vm1661_vm2, %v6134_v27, %v6136_v42  ;;  %v6251_v45 = vadd.f32 %v6136_v42, %v11648_v14  ;;  %v6972_v44 = vrot.slane %v6863_v18, 4  ;;  %v6028_v4 = vadd.f32 %v5854_v1, %v12303_v63 }
 0x585   : > { %v6250_v34 = vadd.f32 %v6137_v48, %v11656_v3  ;;  %v6970_v56 = vrot.slane %v6862_v30, 4  ;;  %v12378_v49 = vpop.f32.mrf.mxu1  ;;  %v12380_v25 = vpop.f32.mrf.mxu0 }
 0x586   : > { %v7087_v32 = vadd.f32 %v6972_v44, %v6251_v45  ;;  %v6138_v27 = vrot.slane %v6028_v4, 2 }
 0x587   : > { %v6971_v20 = vsel %vm2498_vm3, %v6969_v6, %v6970_v56  ;;  %v6973_v55 = vsel %vm2498_vm3, %v6970_v56, %v6972_v44  ;;  %v5860_v16 = vpop.f32.mrf.mxu1  ;;  %v6576_v14 = vpop.f32.mrf.mxu0 }
 0x588   : > { %v7085_v37 = vadd.f32 %v6971_v20, %v6249_v38  ;;  %v7086_v0 = vadd.f32 %v6973_v55, %v6250_v34  ;;  %v7146_v3 = vadd.f32 %v12182_v21, %v7087_v32  ;;  %v6029_v15 = vadd.f32 %v5860_v16, %v12314_v24 }
 0x589   : > { %v6768_v5 = vrot.slane %v6576_v14, 2  ;;  %v12388_v7 = vpop.f32.mrf.mxu1  ;;  %v12390_v35 = vpop.f32.mrf.mxu0 }
 0x58a   : > { %v7144_v13 = vadd.f32 %v12182_v21, %v7085_v37  ;;  %v7145_v40 = vadd.f32 %v12182_v21, %v7086_v0  ;;  %7194 = vst [vmem:[%s12200_s10 + $0x6e] sm:$0x3] %v7146_v3  ;;  %v6139_v39 = vrot.slane %v6029_v15, 2 }
 0x58b   : > { %v5866_v47 = vpop.f32.mrf.mxu1  ;;  %v6582_v17 = vpop.f32.mrf.mxu0  ;;  %v6864_v63 = vadd.f32 %v6768_v5, %v12305_v11 }
 0x58c   : > { %7192 = vst [vmem:[%s12200_s10 + $0x5e] sm:$0xfc] %v7144_v13  ;;  %7193 = vst [vmem:[%s12200_s10 + $0x66] sm:$0xff] %v7145_v40  ;;  %v6030_v61 = vadd.f32 %v5866_v47, %v12324_v60  ;;  %v6769_v24 = vrot.slane %v6582_v17, 2  ;;  %v6140_v57 = vsel %vm1661_vm2, %v6138_v27, %v6139_v39 }
 0x58d   : > { %v12399_v36 = vpop.f32.mrf.mxu1  ;;  %v12401_v54 = vpop.f32.mrf.mxu0  ;;  %v6974_v30 = vrot.slane %v6864_v63, 4 }
 0x58e   : > { %v6141_v62 = vrot.slane %v6030_v61, 2  ;;  %v6770_v43 = vsel %vm1661_vm2, %v6768_v5, %v6769_v24  ;;  %v6866_v51 = vadd.f32 %v6769_v24, %v12326_v26  ;;  %v12873_v26 = vld [vmem:[#allocation19_spill] sm:$0xff] }
 0x58f   : > { %v6865_v42 = vadd.f32 %v6770_v43, %v12316_v29  ;;  %v5872_v59 = vpop.f32.mrf.mxu1  ;;  %v6588_v18 = vpop.f32.mrf.mxu0  ;;  %v6252_v44 = vadd.f32 %v6140_v57, %v12873_v26 }
 0x590   : > { %v6142_v60 = vsel %vm1661_vm2, %v6139_v39, %v6141_v62  ;;  %v6254_v52 = vadd.f32 %v6141_v62, %v11694_v50  ;;  %v6977_v11 = vrot.slane %v6866_v51, 4  ;;  %v6031_v55 = vadd.f32 %v5872_v59, %v12335_v2  ;;  %v12874_v51 = vld [vmem:[#allocation23_spill] sm:$0xff] }
 0x591   : > { %v6253_v1 = vadd.f32 %v6142_v60, %v11702_v9  ;;  %v6975_v12 = vrot.slane %v6865_v42, 4  ;;  %v12410_v48 = vpop.f32.mrf.mxu1  ;;  %v12412_v45 = vpop.f32.mrf.mxu0 }
 0x592   : > { %v7090_v6 = vadd.f32 %v6977_v11, %v6254_v52  ;;  %v6143_v40 = vrot.slane %v6031_v55, 2 }
 0x593   : > { %v6976_v29 = vsel %vm2498_vm3, %v6974_v30, %v6975_v12  ;;  %v6978_v34 = vsel %vm2498_vm3, %v6975_v12, %v6977_v11  ;;  %v5878_v56 = vpop.f32.mrf.mxu1  ;;  %v6593_v50 = vpop.f32.mrf.mxu0 }
 0x594   : > { %v7088_v38 = vadd.f32 %v6976_v29, %v6252_v44  ;;  %v7089_v32 = vadd.f32 %v6978_v34, %v6253_v1  ;;  %v7149_v9 = vadd.f32 %v12182_v21, %v7090_v6  ;;  %v6032_v20 = vadd.f32 %v5878_v56, %v12346_v41 }
 0x595   : > { %v6771_v16 = vrot.slane %v6593_v50, 2  ;;  %v12420_v14 = vpop.f32.mrf.mxu1  ;;  %v12422_v37 = vpop.f32.mrf.mxu0 }
 0x596   : > { %v7147_v0 = vadd.f32 %v12182_v21, %v7088_v38  ;;  %v7148_v3 = vadd.f32 %v12182_v21, %v7089_v32  ;;  %7197 = vst [vmem:[%s12200_s10 + $0x7e] sm:$0x3] %v7149_v9  ;;  %v6144_v15 = vrot.slane %v6032_v20, 2 }
 0x597   : > { %v5884_v4 = vpop.f32.mrf.mxu1  ;;  %v6599_v5 = vpop.f32.mrf.mxu0  ;;  %v6867_v2 = vadd.f32 %v6771_v16, %v12337_v8 }
 0x598   : > { %7195 = vst [vmem:[%s12200_s10 + $0x6e] sm:$0xfc] %v7147_v0  ;;  %7196 = vst [vmem:[%s12200_s10 + $0x76] sm:$0xff] %v7148_v3  ;;  %v6033_v13 = vadd.f32 %v5884_v4, %v12356_v22  ;;  %v6772_v41 = vrot.slane %v6599_v5, 2  ;;  %v6145_v27 = vsel %vm1661_vm2, %v6143_v40, %v6144_v15 }
 0x599   : > { %v12431_v39 = vpop.f32.mrf.mxu1  ;;  %v12433_v47 = vpop.f32.mrf.mxu0  ;;  %v6979_v42 = vrot.slane %v6867_v2, 4 }
 0x59a   : > { %v6146_v17 = vrot.slane %v6033_v13, 2  ;;  %v6773_v61 = vsel %vm1661_vm2, %v6771_v16, %v6772_v41  ;;  %v6869_v24 = vadd.f32 %v6772_v41, %v12358_v53  ;;  %v12875_v53 = vld [vmem:[#allocation18_spill] sm:$0xff] }
 0x59b   : > { %v6868_v63 = vadd.f32 %v6773_v61, %v12348_v46  ;;  %v5890_v62 = vpop.f32.mrf.mxu1  ;;  %v6605_v43 = vpop.f32.mrf.mxu0  ;;  %v6255_v11 = vadd.f32 %v6145_v27, %v12875_v53 }
 0x59c   : > { %v6147_v22 = vsel %vm1661_vm2, %v6144_v15, %v6146_v17  ;;  %v6257_v57 = vadd.f32 %v6146_v17, %v12874_v51  ;;  %v6982_v8 = vrot.slane %v6869_v24, 4  ;;  %v6034_v34 = vadd.f32 %v5890_v62, %v12367_v58 }
 0x59d   : > { %v6256_v59 = vadd.f32 %v6147_v22, %v11748_v28  ;;  %v6980_v18 = vrot.slane %v6868_v63, 4  ;;  %v12442_v60 = vpop.f32.mrf.mxu1  ;;  %v12444_v52 = vpop.f32.mrf.mxu0 }
 0x59e   : > { %v7093_v30 = vadd.f32 %v6982_v8, %v6257_v57  ;;  %v6148_v3 = vrot.slane %v6034_v34, 2 }
 0x59f   : > { %v6981_v46 = vsel %vm2498_vm3, %v6979_v42, %v6980_v18  ;;  %v6983_v1 = vsel %vm2498_vm3, %v6980_v18, %v6982_v8  ;;  %v5896_v12 = vpop.f32.mrf.mxu1  ;;  %v6610_v26 = vpop.f32.mrf.mxu0 }
 0x5a0   : > { %v7091_v44 = vadd.f32 %v6981_v46, %v6255_v11  ;;  %v7092_v6 = vadd.f32 %v6983_v1, %v6256_v59  ;;  %v7152_v28 = vadd.f32 %v12182_v21, %v7093_v30  ;;  %v6035_v29 = vadd.f32 %v5896_v12, %v12378_v49 }
 0x5a1   : > { %v6774_v56 = vrot.slane %v6610_v26, 2  ;;  %v12452_v50 = vpop.f32.mrf.mxu1  ;;  %v12454_v38 = vpop.f32.mrf.mxu0 }
 0x5a2   : > { %v7150_v32 = vadd.f32 %v12182_v21, %v7091_v44  ;;  %v7151_v9 = vadd.f32 %v12182_v21, %v7092_v6  ;;  %7200 = vst [vmem:[%s12200_s10 + $0x8e] sm:$0x3] %v7152_v28  ;;  %v6149_v20 = vrot.slane %v6035_v29, 2 }
 0x5a3   : > { %v5902_v55 = vpop.f32.mrf.mxu1  ;;  %v6616_v16 = vpop.f32.mrf.mxu0  ;;  %v6870_v58 = vadd.f32 %v6774_v56, %v12369_v33 }
 0x5a4   : > { %7198 = vst [vmem:[%s12200_s10 + $0x7e] sm:$0xfc] %v7150_v32  ;;  %7199 = vst [vmem:[%s12200_s10 + $0x86] sm:$0xff] %v7151_v9  ;;  %v6036_v0 = vadd.f32 %v5902_v55, %v12388_v7  ;;  %v6775_v49 = vrot.slane %v6616_v16, 2  ;;  %v6150_v40 = vsel %vm1661_vm2, %v6148_v3, %v6149_v20 }
 0x5a5   : > { %v12463_v15 = vpop.f32.mrf.mxu1  ;;  %v12465_v4 = vpop.f32.mrf.mxu0  ;;  %v6984_v27 = vrot.slane %v6870_v58, 4 }
 0x5a6   : > { %v6151_v5 = vrot.slane %v6036_v0, 2  ;;  %v6776_v13 = vsel %vm1661_vm2, %v6774_v56, %v6775_v49  ;;  %v6872_v41 = vadd.f32 %v6775_v49, %v12390_v35  ;;  %v12876_v35 = vld [vmem:[#allocation24_spill] sm:$0xff] }
 0x5a7   : > { %v6871_v2 = vadd.f32 %v6776_v13, %v12380_v25  ;;  %v5908_v17 = vpop.f32.mrf.mxu1  ;;  %v6622_v61 = vpop.f32.mrf.mxu0  ;;  %v6258_v51 = vadd.f32 %v6150_v40, %v12876_v35  ;;  %v12877_v13 = vld [vmem:[#allocation20_spill] sm:$0xff] }
 0x5a8   : > { %v6152_v7 = vsel %vm1661_vm2, %v6149_v20, %v6151_v5  ;;  %v6260_v24 = vadd.f32 %v6151_v5, %v11786_v10  ;;  %v6987_v33 = vrot.slane %v6872_v41, 4  ;;  %v6037_v11 = vadd.f32 %v5908_v17, %v12399_v36 }
 0x5a9   : > { %v6259_v63 = vadd.f32 %v6152_v7, %v11794_v19  ;;  %v6985_v62 = vrot.slane %v6871_v2, 4  ;;  %v12474_v43 = vpop.f32.mrf.mxu1  ;;  %v12476_v22 = vpop.f32.mrf.mxu0 }
 0x5aa   : > { %v7096_v57 = vadd.f32 %v6987_v33, %v6260_v24  ;;  %v6153_v34 = vrot.slane %v6037_v11, 2 }
 0x5ab   : > { %v6986_v25 = vsel %vm2498_vm3, %v6984_v27, %v6985_v62  ;;  %v6988_v8 = vsel %vm2498_vm3, %v6985_v62, %v6987_v33  ;;  %v5914_v42 = vpop.f32.mrf.mxu1  ;;  %v6627_v10 = vpop.f32.mrf.mxu0 }
 0x5ac   : > { %v7094_v59 = vadd.f32 %v6986_v25, %v6258_v51  ;;  %v7095_v18 = vadd.f32 %v6988_v8, %v6259_v63  ;;  %v7155_v19 = vadd.f32 %v12182_v21, %v7096_v57  ;;  %v6038_v53 = vadd.f32 %v5914_v42, %v12410_v48 }
 0x5ad   : > { %v6777_v30 = vrot.slane %v6627_v10, 2  ;;  %v12484_v46 = vpop.f32.mrf.mxu1  ;;  %v12486_v1 = vpop.f32.mrf.mxu0 }
 0x5ae   : > { %v7153_v12 = vadd.f32 %v12182_v21, %v7094_v59  ;;  %v7154_v26 = vadd.f32 %v12182_v21, %v7095_v18  ;;  %7203 = vst [vmem:[%s12200_s10 + $0x9e] sm:$0x3] %v7155_v19  ;;  %v6154_v44 = vrot.slane %v6038_v53, 2 }
 0x5af   : > { %v5920_v6 = vpop.f32.mrf.mxu1  ;;  %v6633_v28 = vpop.f32.mrf.mxu0  ;;  %v6873_v36 = vadd.f32 %v6777_v30, %v12401_v54 }
 0x5b0   : > { %7201 = vst [vmem:[%s12200_s10 + $0x8e] sm:$0xfc] %v7153_v12  ;;  %7202 = vst [vmem:[%s12200_s10 + $0x96] sm:$0xff] %v7154_v26  ;;  %v6039_v29 = vadd.f32 %v5920_v6, %v12420_v14  ;;  %v6778_v48 = vrot.slane %v6633_v28, 2  ;;  %v6155_v16 = vsel %vm1661_vm2, %v6153_v34, %v6154_v44 }
 0x5b1   : > { %v12495_v56 = vpop.f32.mrf.mxu1  ;;  %v12497_v32 = vpop.f32.mrf.mxu0  ;;  %v6989_v5 = vrot.slane %v6873_v36, 4 }
 0x5b2   : > { %v6156_v9 = vrot.slane %v6039_v29, 2  ;;  %v6779_v20 = vsel %vm1661_vm2, %v6777_v30, %v6778_v48  ;;  %v6875_v55 = vadd.f32 %v6778_v48, %v12422_v37  ;;  %v12878_v37 = vld [vmem:[#allocation5_spill] sm:$0xff] }
 0x5b3   : > { %v6874_v0 = vadd.f32 %v6779_v20, %v12412_v45  ;;  %v5926_v49 = vpop.f32.mrf.mxu1  ;;  %v6639_v3 = vpop.f32.mrf.mxu0  ;;  %v6261_v61 = vadd.f32 %v6155_v16, %v12878_v37  ;;  %v12879_v20 = vld [vmem:[#allocation21_spill] sm:$0xff] }
 0x5b4   : > { %v6157_v14 = vsel %vm1661_vm2, %v6154_v44, %v6156_v9  ;;  %v6263_v58 = vadd.f32 %v6156_v9, %v11832_v31  ;;  %v6992_v54 = vrot.slane %v6875_v55, 4  ;;  %v6040_v51 = vadd.f32 %v5926_v49, %v12431_v39 }
 0x5b5   : > { %v6262_v41 = vadd.f32 %v6157_v14, %v12877_v13  ;;  %v6990_v40 = vrot.slane %v6874_v0, 4  ;;  %v12506_v2 = vpop.f32.mrf.mxu1  ;;  %v12508_v17 = vpop.f32.mrf.mxu0 }
 0x5b6   : > { %v7099_v7 = vadd.f32 %v6992_v54, %v6263_v58  ;;  %v6158_v11 = vrot.slane %v6040_v51, 2 }
 0x5b7   : > { %v6991_v45 = vsel %vm2498_vm3, %v6989_v5, %v6990_v40  ;;  %v6993_v24 = vsel %vm2498_vm3, %v6990_v40, %v6992_v54  ;;  %v5932_v33 = vpop.f32.mrf.mxu1  ;;  %v6644_v31 = vpop.f32.mrf.mxu0 }
 0x5b8   : > { %v7097_v27 = vadd.f32 %v6991_v45, %v6261_v61  ;;  %v7098_v63 = vadd.f32 %v6993_v24, %v6262_v41  ;;  %v7158_v62 = vadd.f32 %v12182_v21, %v7099_v7  ;;  %v6041_v35 = vadd.f32 %v5932_v33, %v12442_v60 }
 0x5b9   : > { %v6780_v57 = vrot.slane %v6644_v31, 2  ;;  %v12516_v25 = vpop.f32.mrf.mxu1  ;;  %v12518_v8 = vpop.f32.mrf.mxu0 }
 0x5ba   : > { %v7156_v42 = vadd.f32 %v12182_v21, %v7097_v27  ;;  %v7157_v10 = vadd.f32 %v12182_v21, %v7098_v63  ;;  %7206 = vst [vmem:[%s12200_s10 + $0xae] sm:$0x3] %v7158_v62  ;;  %v6159_v59 = vrot.slane %v6041_v35, 2 }
 0x5bb   : > { %v5938_v18 = vpop.f32.mrf.mxu1  ;;  %v6650_v19 = vpop.f32.mrf.mxu0  ;;  %v6876_v39 = vadd.f32 %v6780_v57, %v12433_v47 }
 0x5bc   : > { %7204 = vst [vmem:[%s12200_s10 + $0x9e] sm:$0xfc] %v7156_v42  ;;  %7205 = vst [vmem:[%s12200_s10 + $0xa6] sm:$0xff] %v7157_v10  ;;  %v6042_v53 = vadd.f32 %v5938_v18, %v12452_v50  ;;  %v6781_v60 = vrot.slane %v6650_v19, 2  ;;  %v6160_v28 = vsel %vm1661_vm2, %v6158_v11, %v6159_v59 }
 0x5bd   : > { %v12527_v30 = vpop.f32.mrf.mxu1  ;;  %v12529_v12 = vpop.f32.mrf.mxu0  ;;  %v6994_v9 = vrot.slane %v6876_v39, 4 }
 0x5be   : > { %v6161_v26 = vrot.slane %v6042_v53, 2  ;;  %v6782_v44 = vsel %vm1661_vm2, %v6780_v57, %v6781_v60  ;;  %v6878_v6 = vadd.f32 %v6781_v60, %v12454_v38  ;;  %v12880_v38 = vld [vmem:[#allocation7_spill] sm:$0xff]  ;;  %v12881_v60 = vld [vmem:[#allocation8_spill] sm:$0xff] }
 0x5bf   : > { %v6877_v29 = vadd.f32 %v6782_v44, %v12444_v52  ;;  %v5944_v48 = vpop.f32.mrf.mxu1  ;;  %v6656_v34 = vpop.f32.mrf.mxu0  ;;  %v6264_v3 = vadd.f32 %v6160_v28, %v12880_v38 }
 0x5c0   : > { %v6162_v50 = vsel %vm1661_vm2, %v6159_v59, %v6161_v26  ;;  %v6266_v36 = vadd.f32 %v6161_v26, %v11878_v23  ;;  %v6997_v47 = vrot.slane %v6878_v6, 4  ;;  %v6043_v37 = vadd.f32 %v5944_v48, %v12463_v15  ;;  %v12882_v26 = vld [vmem:[#allocation6_spill] sm:$0xff] }
 0x5c1   : > { %v6265_v55 = vadd.f32 %v6162_v50, %v12879_v20  ;;  %v6995_v16 = vrot.slane %v6877_v29, 4  ;;  %v12538_v0 = vpop.f32.mrf.mxu1  ;;  %v12540_v49 = vpop.f32.mrf.mxu0 }
 0x5c2   : > { %v7102_v14 = vadd.f32 %v6997_v47, %v6266_v36  ;;  %v6163_v35 = vrot.slane %v6043_v37, 2 }
 0x5c3   : > { %v6996_v52 = vsel %vm2498_vm3, %v6994_v9, %v6995_v16  ;;  %v6998_v58 = vsel %vm2498_vm3, %v6995_v16, %v6997_v47  ;;  %v5950_v54 = vpop.f32.mrf.mxu1  ;;  %v6661_v23 = vpop.f32.mrf.mxu0 }
 0x5c4   : > { %v7100_v5 = vadd.f32 %v6996_v52, %v6264_v3  ;;  %v7101_v13 = vadd.f32 %v6998_v58, %v6265_v55  ;;  %v7161_v41 = vadd.f32 %v12182_v21, %v7102_v14  ;;  %v6044_v40 = vadd.f32 %v5950_v54, %v12474_v43  ;;  %v12580_v55 = vld [vmem:[%s12710_s2] ss:$0 sm:$0xff] }
 0x5c5   : > { %v6783_v61 = vrot.slane %v6661_v23, 2  ;;  %v12548_v7 = vpop.f32.mrf.mxu1  ;;  %v12550_v45 = vpop.f32.mrf.mxu0 }
 0x5c6   : > { %v7159_v24 = vadd.f32 %v12182_v21, %v7100_v5  ;;  %v7160_v33 = vadd.f32 %v12182_v21, %v7101_v13  ;;  %7209 = vst [vmem:[%s12200_s10 + $0xbe] sm:$0x3] %v7161_v41  ;;  %v6164_v31 = vrot.slane %v6044_v40, 2 }
 0x5c7   : > { %v5956_v27 = vpop.f32.mrf.mxu1  ;;  %v6667_v63 = vpop.f32.mrf.mxu0  ;;  %v6879_v15 = vadd.f32 %v6783_v61, %v12465_v4 }
 0x5c8   : > { %7207 = vst [vmem:[%s12200_s10 + $0xae] sm:$0xfc] %v7159_v24  ;;  %7208 = vst [vmem:[%s12200_s10 + $0xb6] sm:$0xff] %v7160_v33  ;;  %v6045_v62 = vadd.f32 %v5956_v27, %v12484_v46  ;;  %v6784_v43 = vrot.slane %v6667_v63, 2  ;;  %v6165_v59 = vsel %vm1661_vm2, %v6163_v35, %v6164_v31 }
 0x5c9   : > { %v12559_v51 = vpop.f32.mrf.mxu1  ;;  %v12561_v57 = vpop.f32.mrf.mxu0  ;;  %v6999_v39 = vrot.slane %v6879_v15, 4 }
 0x5ca   : > { %v6166_v42 = vrot.slane %v6045_v62, 2  ;;  %v6785_v10 = vsel %vm1661_vm2, %v6783_v61, %v6784_v43  ;;  %v6881_v21 = vadd.f32 %v6784_v43, %v12486_v1  ;;  %v12883_v1 = vld [vmem:[#allocation22_spill] sm:$0xff] }
 0x5cb   : > { %v6880_v18 = vadd.f32 %v6785_v10, %v12476_v22  ;;  %v5962_v19 = vpop.f32.mrf.mxu1  ;;  %v6673_v53 = vpop.f32.mrf.mxu0  ;;  %v6267_v48 = vadd.f32 %v6165_v59, %v12883_v1 }
 0x5cc   : > { %v6167_v46 = vsel %vm1661_vm2, %v6164_v31, %v6166_v42  ;;  %v6269_v11 = vadd.f32 %v6166_v42, %v12881_v60  ;;  %v7002_v4 = vrot.slane %v6881_v21, 4  ;;  %v6046_v3 = vadd.f32 %v5962_v19, %v12495_v56 }
 0x5cd   : > { %v6268_v44 = vadd.f32 %v6167_v46, %v12882_v26  ;;  %v7000_v6 = vrot.slane %v6880_v18, 4  ;;  %v12570_v28 = vpop.f32.mrf.mxu1  ;;  %v12572_v29 = vpop.f32.mrf.mxu0  ;;  %v12886_v46 = vld [vmem:[#allocation10_spill] sm:$0xff] }
 0x5ce   : > { %v7105_v34 = vadd.f32 %v7002_v4, %v6269_v11  ;;  %v6168_v37 = vrot.slane %v6046_v3, 2 }
 0x5cf   : > { %v7001_v22 = vsel %vm2498_vm3, %v6999_v39, %v7000_v6  ;;  %v7003_v50 = vsel %vm2498_vm3, %v7000_v6, %v7002_v4  ;;  %v5968_v36 = vpop.f32.mrf.mxu1  ;;  %v6678_v47 = vpop.f32.mrf.mxu0 }
 0x5d0   : > { %v7103_v9 = vadd.f32 %v7001_v22, %v6267_v48  ;;  %v7104_v20 = vadd.f32 %v7003_v50, %v6268_v44  ;;  %v7164_v16 = vadd.f32 %v12580_v55, %v7105_v34  ;;  %v6047_v38 = vadd.f32 %v5968_v36, %v12506_v2 }
 0x5d1   : > { %v6786_v14 = vrot.slane %v6678_v47, 2  ;;  %v12585_v52 = vpop.f32.mrf.mxu1  ;;  %v12587_v58 = vpop.f32.mrf.mxu0 }
 0x5d2   : > { %v7162_v54 = vadd.f32 %v12580_v55, %v7103_v9  ;;  %v7163_v23 = vadd.f32 %v12580_v55, %v7104_v20  ;;  %7212 = vst [vmem:[%s12200_s10 + $0xce] sm:$0x3] %v7164_v16  ;;  %v6169_v5 = vrot.slane %v6047_v38, 2 }
 0x5d3   : > { %v5974_v13 = vpop.f32.mrf.mxu1  ;;  %v6684_v41 = vpop.f32.mrf.mxu0  ;;  %v6882_v56 = vadd.f32 %v6786_v14, %v12497_v32  ;;  %v12885_v32 = vld [vmem:[#allocation13_spill] sm:$0xff] }
 0x5d4   : > { %7210 = vst [vmem:[%s12200_s10 + $0xbe] sm:$0xfc] %v7162_v54  ;;  %7211 = vst [vmem:[%s12200_s10 + $0xc6] sm:$0xff] %v7163_v23  ;;  %v6048_v40 = vadd.f32 %v5974_v13, %v12516_v25  ;;  %v6787_v2 = vrot.slane %v6684_v41, 2  ;;  %v6170_v63 = vsel %vm1661_vm2, %v6168_v37, %v6169_v5  ;;  %v12884_v25 = vld [vmem:[#allocation9_spill] sm:$0xff] }
 0x5d5   : > { %v5978_v61 = vpop.f32.mrf.mxu1  ;;  %v6688_v24 = vpop.f32.mrf.mxu0  ;;  %v7004_v21 = vrot.slane %v6882_v56, 4  ;;  %v6270_v60 = vadd.f32 %v6170_v63, %v12886_v46 }
 0x5d6   : > { %v6171_v33 = vrot.slane %v6048_v40, 2  ;;  %v6788_v31 = vsel %vm1661_vm2, %v6786_v14, %v6787_v2  ;;  %v6884_v27 = vadd.f32 %v6787_v2, %v12518_v8 }
 0x5d7   : > { %v6883_v62 = vadd.f32 %v6788_v31, %v12508_v17  ;;  %v5979_v43 = vpop.f32.mrf.mxu1  ;;  %v6689_v35 = vpop.f32.mrf.mxu0 }
 0x5d8   : > { %v6172_v15 = vsel %vm1661_vm2, %v6169_v5, %v6171_v33  ;;  %v6272_v42 = vadd.f32 %v6171_v33, %v12884_v25  ;;  %v7007_v10 = vrot.slane %v6884_v27, 4  ;;  %v6049_v48 = vadd.f32 %v5979_v43, %v12527_v30  ;;  %v12889_v43 = vld [vmem:[#allocation12_spill] sm:$0xff] }
 0x5d9   : > { %v6271_v59 = vadd.f32 %v6172_v15, %v12885_v32  ;;  %v7005_v18 = vrot.slane %v6883_v62, 4  ;;  %v5983_v19 = vpop.f32.mrf.mxu1  ;;  %v6692_v53 = vpop.f32.mrf.mxu0 }
 0x5da   : > { %v7108_v8 = vadd.f32 %v7007_v10, %v6272_v42  ;;  %v6173_v14 = vrot.slane %v6049_v48, 2 }
 0x5db   : > { %v7006_v11 = vsel %vm2498_vm3, %v7004_v21, %v7005_v18  ;;  %v7008_v17 = vsel %vm2498_vm3, %v7005_v18, %v7007_v10  ;;  %v5984_v4 = vpop.f32.mrf.mxu1  ;;  %v6693_v39 = vpop.f32.mrf.mxu0 }
 0x5dc   : > { %v7106_v26 = vadd.f32 %v7006_v11, %v6270_v60  ;;  %v7107_v44 = vadd.f32 %v7008_v17, %v6271_v59  ;;  %v7167_v6 = vadd.f32 %v12580_v55, %v7108_v8  ;;  %v6050_v1 = vadd.f32 %v5984_v4, %v12538_v0 }
 0x5dd   : > { %v6789_v34 = vrot.slane %v6693_v39, 2  ;;  %v5988_v22 = vpop.f32.mrf.mxu1  ;;  %v6697_v50 = vpop.f32.mrf.mxu0 }
 0x5de   : > { %v7165_v36 = vadd.f32 %v12580_v55, %v7106_v26  ;;  %v7166_v47 = vadd.f32 %v12580_v55, %v7107_v44  ;;  %7215 = vst [vmem:[%s12200_s10 + $0xde] sm:$0x3] %v7167_v6  ;;  %v6174_v9 = vrot.slane %v6050_v1, 2  ;;  %v12890_v50 = vld [vmem:[#allocation14_spill] sm:$0xff] }
 0x5df   : > { %v5989_v20 = vpop.f32.mrf.mxu1  ;;  %v6698_v16 = vpop.f32.mrf.mxu0  ;;  %v6885_v0 = vadd.f32 %v6789_v34, %v12529_v12  ;;  %v12888_v12 = vld [vmem:[#allocation16_spill] sm:$0xff] }
 0x5e0   : > { %7213 = vst [vmem:[%s12200_s10 + $0xce] sm:$0xfc] %v7165_v36  ;;  %7214 = vst [vmem:[%s12200_s10 + $0xd6] sm:$0xff] %v7166_v47  ;;  %v6051_v38 = vadd.f32 %v5989_v20, %v12548_v7  ;;  %v6790_v3 = vrot.slane %v6698_v16, 2  ;;  %v6175_v41 = vsel %vm1661_vm2, %v6173_v14, %v6174_v9  ;;  %v12887_v7 = vld [vmem:[#allocation11_spill] sm:$0xff] }
 0x5e1   : > { %v5993_v30 = vpop.f32.mrf.mxu1  ;;  %v6702_v54 = vpop.f32.mrf.mxu0  ;;  %v7009_v33 = vrot.slane %v6885_v0, 4  ;;  %v6273_v35 = vadd.f32 %v6175_v41, %v12889_v43  ;;  %v12892_v16 = vld [vmem:[#allocation15_spill] sm:$0xff] }
 0x5e2   : > { %v6176_v23 = vrot.slane %v6051_v38, 2  ;;  %v6791_v5 = vsel %vm1661_vm2, %v6789_v34, %v6790_v3  ;;  %v6887_v13 = vadd.f32 %v6790_v3, %v12550_v45 }
 0x5e3   : > { %v6886_v40 = vadd.f32 %v6791_v5, %v12540_v49  ;;  %v5994_v2 = vpop.f32.mrf.mxu1  ;;  %v6703_v37 = vpop.f32.mrf.mxu0 }
 0x5e4   : > { %v6177_v56 = vsel %vm1661_vm2, %v6174_v9, %v6176_v23  ;;  %v6275_v61 = vadd.f32 %v6176_v23, %v12887_v7  ;;  %v7012_v24 = vrot.slane %v6887_v13, 4  ;;  %v6052_v18 = vadd.f32 %v5994_v2, %v12559_v51  ;;  %v12891_v9 = vld [vmem:[#allocation25_spill] sm:$0xff] }
 0x5e5   : > { %v6274_v31 = vadd.f32 %v6177_v56, %v12888_v12  ;;  %v7010_v27 = vrot.slane %v6886_v40, 4  ;;  %v5998_v63 = vpop.f32.mrf.mxu1  ;;  %v6706_v62 = vpop.f32.mrf.mxu0 }
 0x5e6   : > { %v7111_v45 = vadd.f32 %v7012_v24, %v6275_v61 }
 0x5e7   : > { %v7011_v15 = vsel %vm2498_vm3, %v7009_v33, %v7010_v27  ;;  %v7013_v49 = vsel %vm2498_vm3, %v7010_v27, %v7012_v24  ;;  %v5999_v25 = vpop.f32.mrf.mxu1  ;;  %v6707_v42 = vpop.f32.mrf.mxu0 }
 0x5e8   : > { %v7109_v10 = vadd.f32 %v7011_v15, %v6273_v35  ;;  %v7110_v21 = vadd.f32 %v7013_v49, %v6274_v31  ;;  %v7170_v32 = vadd.f32 %v12580_v55, %v7111_v45  ;;  %v6053_v59 = vadd.f32 %v5999_v25, %v12570_v28 }
 0x5e9   : > { %v6792_v19 = vrot.slane %v6707_v42, 2  ;;  %v6003_v53 = vpop.f32.mrf.mxu1  ;;  %v6711_v46 = vpop.f32.mrf.mxu0  ;;  %v6178_v28 = vrot.slane %v6052_v18, 2 }
 0x5ea   : > { %v7168_v60 = vadd.f32 %v12580_v55, %v7109_v10  ;;  %v7169_v8 = vadd.f32 %v12580_v55, %v7110_v21  ;;  %7218 = vst [vmem:[%s12200_s10 + $0xee] sm:$0x3] %v7170_v32  ;;  %v6179_v11 = vrot.slane %v6053_v59, 2 }
 0x5eb   : > { %v6004_v17 = vpop.f32.mrf.mxu1  ;;  %v6712_v4 = vpop.f32.mrf.mxu0  ;;  %v6888_v51 = vadd.f32 %v6792_v19, %v12561_v57 }
 0x5ec   : > { %7216 = vst [vmem:[%s12200_s10 + $0xde] sm:$0xfc] %v7168_v60  ;;  %7217 = vst [vmem:[%s12200_s10 + $0xe6] sm:$0xff] %v7169_v8  ;;  %v6054_v39 = vadd.f32 %v6004_v17, %v12585_v52  ;;  %v6793_v26 = vrot.slane %v6712_v4, 2  ;;  %v6180_v48 = vsel %vm1661_vm2, %v6178_v28, %v6179_v11 }
 0x5ed   : > { %v7014_v47 = vrot.slane %v6888_v51, 4  ;;  %v6276_v38 = vadd.f32 %v6180_v48, %v12892_v16 }
 0x5ee   : > { %v6181_v44 = vrot.slane %v6054_v39, 2  ;;  %v6794_v6 = vsel %vm1661_vm2, %v6792_v19, %v6793_v26  ;;  %v6890_v1 = vadd.f32 %v6793_v26, %v12587_v58 }
 0x5ef   : > { %v6889_v34 = vadd.f32 %v6794_v6, %v12572_v29 }
 0x5f0   : > { %v6182_v22 = vsel %vm1661_vm2, %v6179_v11, %v6181_v44  ;;  %v6278_v36 = vadd.f32 %v6181_v44, %v12890_v50  ;;  %v7017_v52 = vrot.slane %v6890_v1, 4 }
 0x5f1   : > { %v6277_v20 = vadd.f32 %v6182_v22, %v12891_v9  ;;  %v7015_v57 = vrot.slane %v6889_v34, 4 }
 0x5f2   : > { %v7114_v58 = vadd.f32 %v7017_v52, %v6278_v36 }
 0x5f3   : > { %v7016_v29 = vsel %vm2498_vm3, %v7014_v47, %v7015_v57  ;;  %v7018_v3 = vsel %vm2498_vm3, %v7015_v57, %v7017_v52 }
 0x5f4   : > { %v7112_v14 = vadd.f32 %v7016_v29, %v6276_v38  ;;  %v7113_v0 = vadd.f32 %v7018_v3, %v6277_v20  ;;  %v7173_v30 = vadd.f32 %v12580_v55, %v7114_v58 }
 0x5f6   : > { %v7171_v54 = vadd.f32 %v12580_v55, %v7112_v14  ;;  %v7172_v23 = vadd.f32 %v12580_v55, %v7113_v0  ;;  %7221 = vst [vmem:[%s12200_s10 + $0xfe] sm:$0x3] %v7173_v30 }
 0x5f8   : > { %7219 = vst [vmem:[%s12200_s10 + $0xee] sm:$0xfc] %v7171_v54  ;;  %7220 = vst [vmem:[%s12200_s10 + $0xf6] sm:$0xff] %v7172_v23 }
 0x5f9   : > { %8593 = shalt.err (!%p8590_p5)
}
 0x5fa   : > { %s8594_s6 = scalar_lea.hbm %s12652_s28, 4096  ;;  %s8598_s8 = scalar_lea.hbm %s12711_s3, 8192 }
 0x5fb   : > { %p8595_p6 = scmp.ne.s32.totalorder %s12652_s28, %s8594_s6  ;;  %p8599_p10 = scmp.lt.s32.totalorder %s12652_s28, %s12711_s3 }
 0x5fc   : > { %p8600_p11 = scmp.lt.s32.totalorder %s8598_s8, %s8594_s6 }
 0x5fd   : > { %p8596_p7 = pnand %p8595_p6, %p8722_p4 }
 0x5fe   : > { %p8601_p12 = por %p8600_p11, %p8599_p10 }
 0x5ff   : > { %p8597_p9 = pneg %p8596_p7 }
 0x601   : > { %p8602_p13 = pnand %p8601_p12, %p8597_p9 }
 0x603   : > { %8605 = shalt.err (!%p8602_p13)
}
 0x604   : > { %s8660_s18 = smov 128   ;;  %s8661_s19 = smov 8  }
 0x605   : > { %8269 = dma.vmem_to_hbm [thread:$0]  (%p8722_p4), %s12654_s23, 4096, %s12652_s28, %s12663_s15, %s8660_s18, %s8660_s18, %s8661_s19  }
 0x606 PF: > { %p8275_p0 = scmp.ge.s32.totalorder %s8656_s17, 2  ;;  %s7511_s21 = sand.u32 1, %s8636_s12  }
 0x607   : > { %s7512_s26 = scalar_lea.sflag [#allocation3], %s7511_s21 }
 0x608   : > { %p8272_p1 = pnand %p8275_p0, %p8729_p8 }
 0x60a   : > { %p8273_p2 = pneg %p8272_p1 }
 0x60c   : > { %8631 = dma.done.wait (%p8273_p2), %s7512_s26, 4096  }
 0x60d   : > { %8633 = vsyncadd (%p8273_p2), %s7512_s26, 4294963200  ;;  %s16_s17 = sadd.s32 1, %s8656_s17   ;;  %s12893_s12 = smov %s8640_s13 }
 0x60e   : > { %p13_p3 = scmp.ge.s32.totalorder %s16_s17, 4   ;;  %s12894_s13 = smov %s8644_s14 }
 0x60f   : > { %s12895_s14 = smov %s8735_s25  ;;  %s12896_s15 = smov %s8652_s16 }
 0x610   : > { %s12897_s16 = smov %s12899_s20  ;;  %15 = sbr.rel (!%p13_p3) target bundleno = 4 (0x4), region = 86 }
 0x615   :  { %7517 = vsyncpa [#allocation3], 1 }
 0x616   :  { %7519 = vsyncpa [#allocation3 + $0x1], 1 }

</bundles_post_ra>
